<compile_context>
chip_gen: v5e
topology: v5e:2x2
jax: 0.10.0
libtpu: 0.0.40
codegen_flags: <defaults>
</compile_context>

<pallas_src>
import functools

import jax
import jax.numpy as jnp
from jax.experimental import pallas as pl
from jax.experimental.pallas import tpu as pltpu

EPS = 1e-5  # BatchNorm2d default eps

_VMEM = pl.BlockSpec(memory_space=pltpu.MemorySpace.VMEM)


# ----------------------------- Pallas kernels ------------------------------

def _bn_relu(acc):
    """BatchNorm2d (training-mode batch stats, gamma=1, beta=0) + ReLU, f32.

    One-pass stats: mean and E[x^2] from a single sweep over the accumulator.
    acc: (M, Cout) f32 where M = N*Hout*Wout.
    """
    m = acc.shape[0]
    inv_m = 1.0 / m
    mean = jnp.sum(acc, axis=0, keepdims=True) * inv_m
    meansq = jnp.sum(acc * acc, axis=0, keepdims=True) * inv_m
    var = jnp.maximum(meansq - mean * mean, 0.0)   # clamp cancellation
    y = (acc - mean) * jax.lax.rsqrt(var + EPS)
    return jnp.maximum(y, 0.0)


def _conv_bn_relu_kernel(p_ref, w_ref, o_ref):
    """3x3 conv (pad=1, no bias) + BN + ReLU as ONE big-K bf16 matmul.

    p_ref: (M, 9*Cin) bf16 im2col patches; w_ref: (9*Cin, Cout) bf16;
    o_ref: (M, Cout) bf16.
    """
    acc = jnp.dot(p_ref[...], w_ref[...], preferred_element_type=jnp.float32)
    o_ref[...] = _bn_relu(acc).astype(o_ref.dtype)


def _conv_bn_relu_res_kernel(p_ref, w_ref, r_ref, o_ref):
    """Same as above, plus fused `out += residual ; out = relu(out)`."""
    acc = jnp.dot(p_ref[...], w_ref[...], preferred_element_type=jnp.float32)
    y = _bn_relu(acc) + r_ref[...].astype(jnp.float32)
    o_ref[...] = jnp.maximum(y, 0.0).astype(o_ref.dtype)


def _conv_bn_relu_head_kernel(p_ref, w_ref, pool_ref, fcw_ref, fcb_ref, o_ref):
    """Last conv block + fused head: avg-pool (as matmul) + Linear + log_softmax.

    p_ref: (M, 9*Cin) bf16; w_ref: (9*Cin, Cout) bf16;
    pool_ref: (N, M) f32 pooling matrix (1/(H*W) on each sample's rows);
    fcw_ref: (Cout, num_classes) f32; fcb_ref: (1, num_classes) f32;
    o_ref: (N, num_classes) f32.
    """
    acc = jnp.dot(p_ref[...], w_ref[...], preferred_element_type=jnp.float32)
    y = _bn_relu(acc)                                           # (M, Cout) f32
    pooled = jnp.dot(pool_ref[...], y,
                     preferred_element_type=jnp.float32)        # (N, Cout)
    logits = jnp.dot(pooled, fcw_ref[...],
                     preferred_element_type=jnp.float32) + fcb_ref[...]
    z = logits - jnp.max(logits, axis=-1, keepdims=True)
    o_ref[...] = z - jnp.log(jnp.sum(jnp.exp(z), axis=-1, keepdims=True))


# -------------------------------- wrappers ---------------------------------

def _im2col(x_nhwc, stride):
    """Plain-JAX glue (fused under jit): (M, 9*Cin) patches for 3x3, pad=1."""
    n, h, w, c = x_nhwc.shape
    ho, wo = h // stride, w // stride
    xp = jnp.pad(x_nhwc, ((0, 0), (1, 1), (1, 1), (0, 0)))
    cols = []
    for kh in range(3):
        for kw in range(3):
            p = xp[:, kh:kh + stride * (ho - 1) + 1:stride,
                   kw:kw + stride * (wo - 1) + 1:stride, :]
            cols.append(p.reshape(n * ho * wo, c))
    # concat on the last (lane) axis -> matches HWIO weight reshape (9*Cin, Cout)
    return jnp.concatenate(cols, axis=-1), ho, wo


def _prep(x_nhwc, w_hwio, stride):
    n, h, w, cin = x_nhwc.shape
    cout = w_hwio.shape[-1]
    taps, ho, wo = _im2col(x_nhwc, stride)
    taps = taps.astype(jnp.bfloat16)                       # bf16 MXU operands
    wk = w_hwio.reshape(9 * cin, cout).astype(jnp.bfloat16)
    return taps, wk, n, ho, wo, cout


def conv_bn_relu(x_nhwc, w_hwio, stride):
    taps, wk, n, ho, wo, cout = _prep(x_nhwc, w_hwio, stride)
    out2d = pl.pallas_call(
        _conv_bn_relu_kernel,
        out_shape=jax.ShapeDtypeStruct((n * ho * wo, cout), jnp.bfloat16),
        in_specs=[_VMEM, _VMEM],
        out_specs=_VMEM,
    )(taps, wk)
    return out2d.reshape(n, ho, wo, cout)


def conv_bn_relu_residual(x_nhwc, w_hwio, stride, residual_nhwc):
    taps, wk, n, ho, wo, cout = _prep(x_nhwc, w_hwio, stride)
    res2d = residual_nhwc.reshape(n * ho * wo, cout).astype(jnp.bfloat16)
    out2d = pl.pallas_call(
        _conv_bn_relu_res_kernel,
        out_shape=jax.ShapeDtypeStruct((n * ho * wo, cout), jnp.bfloat16),
        in_specs=[_VMEM, _VMEM, _VMEM],
        out_specs=_VMEM,
    )(taps, wk, res2d)
    return out2d.reshape(n, ho, wo, cout)


def conv_bn_relu_head(x_nhwc, w_hwio, stride, fc_w, fc_b):
    taps, wk, n, ho, wo, cout = _prep(x_nhwc, w_hwio, stride)
    # (N, M) pooling matrix: 1/(Ho*Wo) on each sample's own rows.
    pool = jnp.repeat(jnp.eye(n, dtype=jnp.float32), ho * wo, axis=1) / float(ho * wo)
    return pl.pallas_call(
        _conv_bn_relu_head_kernel,
        out_shape=jax.ShapeDtypeStruct((n, fc_w.shape[1]), jnp.float32),
        in_specs=[_VMEM, _VMEM, _VMEM, _VMEM, _VMEM],
        out_specs=_VMEM,
    )(taps, wk, pool, fc_w.astype(jnp.float32), fc_b.astype(jnp.float32))


# --------------------------- parameters / forward --------------------------

def init_params(key, in_channels, depth, num_classes=10):
    """Mirrors ResNet_V2.__init__ (including its self.num_filters mutation:
    layer channel widths come out as 16, 32, 128, 1024)."""
    num_res_blocks = (depth - 2) // 9
    counter = [0]

    def nxt():
        counter[0] += 1
        return jax.random.fold_in(key, counter[0])

    def conv_w(cin, cout):  # deterministic HWIO weights
        return jax.random.normal(nxt(), (3, 3, cin, cout),
                                 jnp.float32) * (9 * cin) ** -0.5

    nf = 16
    params = {'conv1': conv_w(in_channels, nf)}
    layer_ws, layer_strides = [], []
    for mult, stride in ((1, 1), (2, 2), (4, 2), (8, 2)):
        out_ch = nf * mult
        ws, ss = [conv_w(nf, out_ch)], [stride]
        nf = out_ch                         # mirrors self.num_filters = out_channels
        for _ in range(1, num_res_blocks):
            ws.append(conv_w(out_ch, out_ch))
            ss.append(1)
        layer_ws.append(ws)
        layer_strides.append(tuple(ss))
    params['layers'] = layer_ws
    # TODO(synk): the PyTorch __init__ builds nn.Linear(self.num_filters*8, num_classes)
    # (= 8192 -> 10 here) which cannot consume the nf(=1024)-dim pooled features and
    # would raise at runtime; the usable nf -> num_classes linear is instantiated instead.
    params['fc_w'] = jax.random.normal(nxt(), (nf, num_classes),
                                       jnp.float32) * nf ** -0.5
    params['fc_b'] = jnp.zeros((1, num_classes), jnp.float32)
    return params, tuple(layer_strides)


@functools.partial(jax.jit, static_argnums=(2,))
def resnet_v2_forward(x_nchw, params, layer_strides):
    x = jnp.transpose(x_nchw, (0, 2, 3, 1)).astype(jnp.float32)  # NCHW -> NHWC
    out = conv_bn_relu(x, params['conv1'], 1)            # conv1 + bn1 + relu (fused)

    # layer1 + residual: the add+ReLU is fused into the layer's last conv kernel.
    residual = out
    ws1, ss1 = params['layers'][0], layer_strides[0]
    for wgt, s in zip(ws1[:-1], ss1[:-1]):
        out = conv_bn_relu(out, wgt, s)
    out = conv_bn_relu_residual(out, ws1[-1], ss1[-1], residual)

    for li in (1, 2):                                    # layer2, layer3
        for wgt, s in zip(params['layers'][li], layer_strides[li]):
            out = conv_bn_relu(out, wgt, s)
        # TODO(synk): PyTorch's `out += residual` here mixes incompatible shapes
        # (e.g. (N,32,8,8) += (N,16,16,16)) and would raise; skipped. The
        # following relu is then a no-op (every block already ends in ReLU).

    # layer4: the head (avg-pool + fc + log_softmax) is fused into its last conv kernel.
    ws4, ss4 = params['layers'][3], layer_strides[3]
    for wgt, s in zip(ws4[:-1], ss4[:-1]):
        out = conv_bn_relu(out, wgt, s)
    return conv_bn_relu_head(out, ws4[-1], ss4[-1], params['fc_w'], params['fc_b'])


# ------------------------------ plain-JAX ref -------------------------------

def ref_forward(x_nchw, params, layer_strides):
    def cbr(x, w, s):
        y = jax.lax.conv_general_dilated(
            x, w, (s, s), ((1, 1), (1, 1)),
            dimension_numbers=('NHWC', 'HWIO', 'NHWC'))
        mu = jnp.mean(y, axis=(0, 1, 2), keepdims=True)
        var = jnp.mean((y - mu) ** 2, axis=(0, 1, 2), keepdims=True)
        return jnp.maximum((y - mu) * jax.lax.rsqrt(var + EPS), 0.0)

    x = jnp.transpose(x_nchw, (0, 2, 3, 1)).astype(jnp.float32)
    out = cbr(x, params['conv1'], 1)
    residual = out
    for w, s in zip(params['layers'][0], layer_strides[0]):
        out = cbr(out, w, s)
    out = jnp.maximum(out + residual, 0.0)
    for li in (1, 2, 3):
        for w, s in zip(params['layers'][li], layer_strides[li]):
            out = cbr(out, w, s)
    pooled = jnp.mean(out, axis=(1, 2))
    logits = pooled @ params['fc_w'] + params['fc_b']
    return jax.nn.log_softmax(logits, axis=1)


# ----------------------------------- main -----------------------------------

if __name__ == "__main__":
    key = jax.random.PRNGKey(0)
    in_channels, depth, num_classes = 4, 11, 10   # depth=11 -> 1 block per layer
    params, strides = init_params(jax.random.fold_in(key, 0),
                                  in_channels, depth, num_classes)
    x = jax.random.normal(jax.random.fold_in(key, 1),
                          (2, in_channels, 16, 16), jnp.float32)

    out = resnet_v2_forward(x, params, strides)
    out = jax.block_until_ready(out)
    assert out.shape == (2, num_classes)
    assert bool(jnp.all(jnp.isfinite(out)))

    ref = jax.block_until_ready(ref_forward(x, params, strides))
    max_diff = float(jnp.max(jnp.abs(out - ref)))
    # bf16 MXU operands / bf16 activation storage introduce ~1e-2-level error
    # vs the f32 reference.
    assert max_diff < 1e-1, f"kernel/reference mismatch: {max_diff}"

    print("KERNEL_OK")
</pallas_src>

<mosaic_0001>
module attributes {stable_mosaic.version = 11 : i64} {
  func.func @_conv_bn_relu_kernel(%arg0: memref<512x36xbf16, #tpu.memory_space<vmem>>, %arg1: memref<36x16xbf16, #tpu.memory_space<vmem>>, %arg2: memref<512x16xbf16, #tpu.memory_space<vmem>>) attributes {dimension_semantics = [], scalar_prefetch = 0 : i64, scratch_operands = 0 : i64, tpu.core_type = #tpu.core_type<tc>} {
    %c0 = arith.constant 0 : index
    %c0_0 = arith.constant 0 : index
    %0 = vector.load %arg0[%c0, %c0_0] : memref<512x36xbf16, #tpu.memory_space<vmem>>, vector<512x36xbf16>
    %c0_1 = arith.constant 0 : index
    %c0_2 = arith.constant 0 : index
    %1 = vector.load %arg1[%c0_1, %c0_2] : memref<36x16xbf16, #tpu.memory_space<vmem>>, vector<36x16xbf16>
    %cst = arith.constant dense<0.000000e+00> : vector<512x16xf32>
    %2 = tpu.matmul %0, %1, %cst {dimension_numbers = #tpu.dot_dimension_numbers<[1], [0], [0], [1], [0, 0, 1, 1], [], []>} : vector<512x36xbf16>, vector<36x16xbf16>, vector<512x16xf32> -> vector<512x16xf32>
    %cst_3 = arith.constant dense<0.000000e+00> : vector<16xf32>
    %3 = vector.multi_reduction <add>, %2, %cst_3 [0] : vector<512x16xf32> to vector<16xf32>
    %4 = vector.shape_cast %3 : vector<16xf32> to vector<1x16xf32>
    %cst_4 = arith.constant 0.001953125 : f32
    %5 = vector.broadcast %cst_4 : f32 to vector<1x16xf32>
    %6 = arith.mulf %4, %5 : vector<1x16xf32>
    %7 = arith.mulf %2, %2 : vector<512x16xf32>
    %cst_5 = arith.constant dense<0.000000e+00> : vector<16xf32>
    %8 = vector.multi_reduction <add>, %7, %cst_5 [0] : vector<512x16xf32> to vector<16xf32>
    %9 = vector.shape_cast %8 : vector<16xf32> to vector<1x16xf32>
    %cst_6 = arith.constant 0.001953125 : f32
    %10 = vector.broadcast %cst_6 : f32 to vector<1x16xf32>
    %11 = arith.mulf %9, %10 : vector<1x16xf32>
    %12 = arith.mulf %6, %6 : vector<1x16xf32>
    %13 = arith.subf %11, %12 : vector<1x16xf32>
    %cst_7 = arith.constant 0.000000e+00 : f32
    %14 = vector.broadcast %cst_7 : f32 to vector<1x16xf32>
    %15 = arith.maximumf %13, %14 : vector<1x16xf32>
    %16 = vector.broadcast %6 : vector<1x16xf32> to vector<512x16xf32>
    %17 = arith.subf %2, %16 : vector<512x16xf32>
    %cst_8 = arith.constant 9.99999974E-6 : f32
    %18 = vector.broadcast %cst_8 : f32 to vector<1x16xf32>
    %19 = arith.addf %15, %18 : vector<1x16xf32>
    %20 = math.rsqrt %19 : vector<1x16xf32>
    %21 = vector.broadcast %20 : vector<1x16xf32> to vector<512x16xf32>
    %22 = arith.mulf %17, %21 : vector<512x16xf32>
    %cst_9 = arith.constant 0.000000e+00 : f32
    %23 = vector.broadcast %cst_9 : f32 to vector<512x16xf32>
    %24 = arith.maximumf %22, %23 : vector<512x16xf32>
    %25 = arith.truncf %24 : vector<512x16xf32> to vector<512x16xbf16>
    %c0_10 = arith.constant 0 : index
    %c0_11 = arith.constant 0 : index
    %26 = vector.load %arg2[%c0_10, %c0_11] : memref<512x16xbf16, #tpu.memory_space<vmem>>, vector<512x16xbf16>
    tpu.vector_store %arg2[%c0_10, %c0_11], %25 {strides = array<i32>} : memref<512x16xbf16, #tpu.memory_space<vmem>>, vector<512x16xbf16>,
    return
  }
}

module attributes {stable_mosaic.version = 11 : i64} {
  func.func @_conv_bn_relu_res_kernel(%arg0: memref<512x144xbf16, #tpu.memory_space<vmem>>, %arg1: memref<144x16xbf16, #tpu.memory_space<vmem>>, %arg2: memref<512x16xbf16, #tpu.memory_space<vmem>>, %arg3: memref<512x16xbf16, #tpu.memory_space<vmem>>) attributes {dimension_semantics = [], scalar_prefetch = 0 : i64, scratch_operands = 0 : i64, tpu.core_type = #tpu.core_type<tc>} {
    %c0 = arith.constant 0 : index
    %c0_0 = arith.constant 0 : index
    %0 = vector.load %arg0[%c0, %c0_0] : memref<512x144xbf16, #tpu.memory_space<vmem>>, vector<512x144xbf16>
    %c0_1 = arith.constant 0 : index
    %c0_2 = arith.constant 0 : index
    %1 = vector.load %arg1[%c0_1, %c0_2] : memref<144x16xbf16, #tpu.memory_space<vmem>>, vector<144x16xbf16>
    %cst = arith.constant dense<0.000000e+00> : vector<512x16xf32>
    %2 = tpu.matmul %0, %1, %cst {dimension_numbers = #tpu.dot_dimension_numbers<[1], [0], [0], [1], [0, 0, 1, 1], [], []>} : vector<512x144xbf16>, vector<144x16xbf16>, vector<512x16xf32> -> vector<512x16xf32>
    %cst_3 = arith.constant dense<0.000000e+00> : vector<16xf32>
    %3 = vector.multi_reduction <add>, %2, %cst_3 [0] : vector<512x16xf32> to vector<16xf32>
    %4 = vector.shape_cast %3 : vector<16xf32> to vector<1x16xf32>
    %cst_4 = arith.constant 0.001953125 : f32
    %5 = vector.broadcast %cst_4 : f32 to vector<1x16xf32>
    %6 = arith.mulf %4, %5 : vector<1x16xf32>
    %7 = arith.mulf %2, %2 : vector<512x16xf32>
    %cst_5 = arith.constant dense<0.000000e+00> : vector<16xf32>
    %8 = vector.multi_reduction <add>, %7, %cst_5 [0] : vector<512x16xf32> to vector<16xf32>
    %9 = vector.shape_cast %8 : vector<16xf32> to vector<1x16xf32>
    %cst_6 = arith.constant 0.001953125 : f32
    %10 = vector.broadcast %cst_6 : f32 to vector<1x16xf32>
    %11 = arith.mulf %9, %10 : vector<1x16xf32>
    %12 = arith.mulf %6, %6 : vector<1x16xf32>
    %13 = arith.subf %11, %12 : vector<1x16xf32>
    %cst_7 = arith.constant 0.000000e+00 : f32
    %14 = vector.broadcast %cst_7 : f32 to vector<1x16xf32>
    %15 = arith.maximumf %13, %14 : vector<1x16xf32>
    %16 = vector.broadcast %6 : vector<1x16xf32> to vector<512x16xf32>
    %17 = arith.subf %2, %16 : vector<512x16xf32>
    %cst_8 = arith.constant 9.99999974E-6 : f32
    %18 = vector.broadcast %cst_8 : f32 to vector<1x16xf32>
    %19 = arith.addf %15, %18 : vector<1x16xf32>
    %20 = math.rsqrt %19 : vector<1x16xf32>
    %21 = vector.broadcast %20 : vector<1x16xf32> to vector<512x16xf32>
    %22 = arith.mulf %17, %21 : vector<512x16xf32>
    %cst_9 = arith.constant 0.000000e+00 : f32
    %23 = vector.broadcast %cst_9 : f32 to vector<512x16xf32>
    %24 = arith.maximumf %22, %23 : vector<512x16xf32>
    %c0_10 = arith.constant 0 : index
    %c0_11 = arith.constant 0 : index
    %25 = vector.load %arg2[%c0_10, %c0_11] : memref<512x16xbf16, #tpu.memory_space<vmem>>, vector<512x16xbf16>
    %26 = arith.extf %25 : vector<512x16xbf16> to vector<512x16xf32>
    %27 = arith.addf %24, %26 : vector<512x16xf32>
    %cst_12 = arith.constant 0.000000e+00 : f32
    %28 = vector.broadcast %cst_12 : f32 to vector<512x16xf32>
    %29 = arith.maximumf %27, %28 : vector<512x16xf32>
    %30 = arith.truncf %29 : vector<512x16xf32> to vector<512x16xbf16>
    %c0_13 = arith.constant 0 : index
    %c0_14 = arith.constant 0 : index
    %31 = vector.load %arg3[%c0_13, %c0_14] : memref<512x16xbf16, #tpu.memory_space<vmem>>, vector<512x16xbf16>
    tpu.vector_store %arg3[%c0_13, %c0_14], %30 {strides = array<i32>} : memref<512x16xbf16, #tpu.memory_space<vmem>>, vector<512x16xbf16>,
    return
  }
}

module attributes {stable_mosaic.version = 11 : i64} {
  func.func @_conv_bn_relu_kernel(%arg0: memref<128x144xbf16, #tpu.memory_space<vmem>>, %arg1: memref<144x32xbf16, #tpu.memory_space<vmem>>, %arg2: memref<128x32xbf16, #tpu.memory_space<vmem>>) attributes {dimension_semantics = [], scalar_prefetch = 0 : i64, scratch_operands = 0 : i64, tpu.core_type = #tpu.core_type<tc>} {
    %c0 = arith.constant 0 : index
    %c0_0 = arith.constant 0 : index
    %0 = vector.load %arg0[%c0, %c0_0] : memref<128x144xbf16, #tpu.memory_space<vmem>>, vector<128x144xbf16>
    %c0_1 = arith.constant 0 : index
    %c0_2 = arith.constant 0 : index
    %1 = vector.load %arg1[%c0_1, %c0_2] : memref<144x32xbf16, #tpu.memory_space<vmem>>, vector<144x32xbf16>
    %cst = arith.constant dense<0.000000e+00> : vector<128x32xf32>
    %2 = tpu.matmul %0, %1, %cst {dimension_numbers = #tpu.dot_dimension_numbers<[1], [0], [0], [1], [0, 0, 1, 1], [], []>} : vector<128x144xbf16>, vector<144x32xbf16>, vector<128x32xf32> -> vector<128x32xf32>
    %cst_3 = arith.constant dense<0.000000e+00> : vector<32xf32>
    %3 = vector.multi_reduction <add>, %2, %cst_3 [0] : vector<128x32xf32> to vector<32xf32>
    %4 = vector.shape_cast %3 : vector<32xf32> to vector<1x32xf32>
    %cst_4 = arith.constant 7.812500e-03 : f32
    %5 = vector.broadcast %cst_4 : f32 to vector<1x32xf32>
    %6 = arith.mulf %4, %5 : vector<1x32xf32>
    %7 = arith.mulf %2, %2 : vector<128x32xf32>
    %cst_5 = arith.constant dense<0.000000e+00> : vector<32xf32>
    %8 = vector.multi_reduction <add>, %7, %cst_5 [0] : vector<128x32xf32> to vector<32xf32>
    %9 = vector.shape_cast %8 : vector<32xf32> to vector<1x32xf32>
    %cst_6 = arith.constant 7.812500e-03 : f32
    %10 = vector.broadcast %cst_6 : f32 to vector<1x32xf32>
    %11 = arith.mulf %9, %10 : vector<1x32xf32>
    %12 = arith.mulf %6, %6 : vector<1x32xf32>
    %13 = arith.subf %11, %12 : vector<1x32xf32>
    %cst_7 = arith.constant 0.000000e+00 : f32
    %14 = vector.broadcast %cst_7 : f32 to vector<1x32xf32>
    %15 = arith.maximumf %13, %14 : vector<1x32xf32>
    %16 = vector.broadcast %6 : vector<1x32xf32> to vector<128x32xf32>
    %17 = arith.subf %2, %16 : vector<128x32xf32>
    %cst_8 = arith.constant 9.99999974E-6 : f32
    %18 = vector.broadcast %cst_8 : f32 to vector<1x32xf32>
    %19 = arith.addf %15, %18 : vector<1x32xf32>
    %20 = math.rsqrt %19 : vector<1x32xf32>
    %21 = vector.broadcast %20 : vector<1x32xf32> to vector<128x32xf32>
    %22 = arith.mulf %17, %21 : vector<128x32xf32>
    %cst_9 = arith.constant 0.000000e+00 : f32
    %23 = vector.broadcast %cst_9 : f32 to vector<128x32xf32>
    %24 = arith.maximumf %22, %23 : vector<128x32xf32>
    %25 = arith.truncf %24 : vector<128x32xf32> to vector<128x32xbf16>
    %c0_10 = arith.constant 0 : index
    %c0_11 = arith.constant 0 : index
    %26 = vector.load %arg2[%c0_10, %c0_11] : memref<128x32xbf16, #tpu.memory_space<vmem>>, vector<128x32xbf16>
    tpu.vector_store %arg2[%c0_10, %c0_11], %25 {strides = array<i32>} : memref<128x32xbf16, #tpu.memory_space<vmem>>, vector<128x32xbf16>,
    return
  }
}

module attributes {stable_mosaic.version = 11 : i64} {
  func.func @_conv_bn_relu_kernel(%arg0: memref<32x288xbf16, #tpu.memory_space<vmem>>, %arg1: memref<288x128xbf16, #tpu.memory_space<vmem>>, %arg2: memref<32x128xbf16, #tpu.memory_space<vmem>>) attributes {dimension_semantics = [], scalar_prefetch = 0 : i64, scratch_operands = 0 : i64, tpu.core_type = #tpu.core_type<tc>} {
    %c0 = arith.constant 0 : index
    %c0_0 = arith.constant 0 : index
    %0 = vector.load %arg0[%c0, %c0_0] : memref<32x288xbf16, #tpu.memory_space<vmem>>, vector<32x288xbf16>
    %c0_1 = arith.constant 0 : index
    %c0_2 = arith.constant 0 : index
    %1 = vector.load %arg1[%c0_1, %c0_2] : memref<288x128xbf16, #tpu.memory_space<vmem>>, vector<288x128xbf16>
    %cst = arith.constant dense<0.000000e+00> : vector<32x128xf32>
    %2 = tpu.matmul %0, %1, %cst {dimension_numbers = #tpu.dot_dimension_numbers<[1], [0], [0], [1], [0, 0, 1, 1], [], []>} : vector<32x288xbf16>, vector<288x128xbf16>, vector<32x128xf32> -> vector<32x128xf32>
    %cst_3 = arith.constant dense<0.000000e+00> : vector<128xf32>
    %3 = vector.multi_reduction <add>, %2, %cst_3 [0] : vector<32x128xf32> to vector<128xf32>
    %4 = vector.shape_cast %3 : vector<128xf32> to vector<1x128xf32>
    %cst_4 = arith.constant 3.125000e-02 : f32
    %5 = vector.broadcast %cst_4 : f32 to vector<1x128xf32>
    %6 = arith.mulf %4, %5 : vector<1x128xf32>
    %7 = arith.mulf %2, %2 : vector<32x128xf32>
    %cst_5 = arith.constant dense<0.000000e+00> : vector<128xf32>
    %8 = vector.multi_reduction <add>, %7, %cst_5 [0] : vector<32x128xf32> to vector<128xf32>
    %9 = vector.shape_cast %8 : vector<128xf32> to vector<1x128xf32>
    %cst_6 = arith.constant 3.125000e-02 : f32
    %10 = vector.broadcast %cst_6 : f32 to vector<1x128xf32>
    %11 = arith.mulf %9, %10 : vector<1x128xf32>
    %12 = arith.mulf %6, %6 : vector<1x128xf32>
    %13 = arith.subf %11, %12 : vector<1x128xf32>
    %cst_7 = arith.constant 0.000000e+00 : f32
    %14 = vector.broadcast %cst_7 : f32 to vector<1x128xf32>
    %15 = arith.maximumf %13, %14 : vector<1x128xf32>
    %16 = vector.broadcast %6 : vector<1x128xf32> to vector<32x128xf32>
    %17 = arith.subf %2, %16 : vector<32x128xf32>
    %cst_8 = arith.constant 9.99999974E-6 : f32
    %18 = vector.broadcast %cst_8 : f32 to vector<1x128xf32>
    %19 = arith.addf %15, %18 : vector<1x128xf32>
    %20 = math.rsqrt %19 : vector<1x128xf32>
    %21 = vector.broadcast %20 : vector<1x128xf32> to vector<32x128xf32>
    %22 = arith.mulf %17, %21 : vector<32x128xf32>
    %cst_9 = arith.constant 0.000000e+00 : f32
    %23 = vector.broadcast %cst_9 : f32 to vector<32x128xf32>
    %24 = arith.maximumf %22, %23 : vector<32x128xf32>
    %25 = arith.truncf %24 : vector<32x128xf32> to vector<32x128xbf16>
    %c0_10 = arith.constant 0 : index
    %c0_11 = arith.constant 0 : index
    %26 = vector.load %arg2[%c0_10, %c0_11] : memref<32x128xbf16, #tpu.memory_space<vmem>>, vector<32x128xbf16>
    tpu.vector_store %arg2[%c0_10, %c0_11], %25 {strides = array<i32>} : memref<32x128xbf16, #tpu.memory_space<vmem>>, vector<32x128xbf16>,
    return
  }
}

module attributes {stable_mosaic.version = 11 : i64} {
  func.func @_conv_bn_relu_head_kernel(%arg0: memref<8x1152xbf16, #tpu.memory_space<vmem>>, %arg1: memref<1152x1024xbf16, #tpu.memory_space<vmem>>, %arg2: memref<2x8xf32, #tpu.memory_space<vmem>>, %arg3: memref<1024x10xf32, #tpu.memory_space<vmem>>, %arg4: memref<1x10xf32, #tpu.memory_space<vmem>>, %arg5: memref<2x10xf32, #tpu.memory_space<vmem>>) attributes {dimension_semantics = [], scalar_prefetch = 0 : i64, scratch_operands = 0 : i64, tpu.core_type = #tpu.core_type<tc>} {
    %c0 = arith.constant 0 : index
    %c0_0 = arith.constant 0 : index
    %0 = vector.load %arg0[%c0, %c0_0] : memref<8x1152xbf16, #tpu.memory_space<vmem>>, vector<8x1152xbf16>
    %c0_1 = arith.constant 0 : index
    %c0_2 = arith.constant 0 : index
    %1 = vector.load %arg1[%c0_1, %c0_2] : memref<1152x1024xbf16, #tpu.memory_space<vmem>>, vector<1152x1024xbf16>
    %cst = arith.constant dense<0.000000e+00> : vector<8x1024xf32>
    %2 = tpu.matmul %0, %1, %cst {dimension_numbers = #tpu.dot_dimension_numbers<[1], [0], [0], [1], [0, 0, 1, 1], [], []>} : vector<8x1152xbf16>, vector<1152x1024xbf16>, vector<8x1024xf32> -> vector<8x1024xf32>
    %cst_3 = arith.constant dense<0.000000e+00> : vector<1024xf32>
    %3 = vector.multi_reduction <add>, %2, %cst_3 [0] : vector<8x1024xf32> to vector<1024xf32>
    %4 = vector.shape_cast %3 : vector<1024xf32> to vector<1x1024xf32>
    %cst_4 = arith.constant 1.250000e-01 : f32
    %5 = vector.broadcast %cst_4 : f32 to vector<1x1024xf32>
    %6 = arith.mulf %4, %5 : vector<1x1024xf32>
    %7 = arith.mulf %2, %2 : vector<8x1024xf32>
    %cst_5 = arith.constant dense<0.000000e+00> : vector<1024xf32>
    %8 = vector.multi_reduction <add>, %7, %cst_5 [0] : vector<8x1024xf32> to vector<1024xf32>
    %9 = vector.shape_cast %8 : vector<1024xf32> to vector<1x1024xf32>
    %cst_6 = arith.constant 1.250000e-01 : f32
    %10 = vector.broadcast %cst_6 : f32 to vector<1x1024xf32>
    %11 = arith.mulf %9, %10 : vector<1x1024xf32>
    %12 = arith.mulf %6, %6 : vector<1x1024xf32>
    %13 = arith.subf %11, %12 : vector<1x1024xf32>
    %cst_7 = arith.constant 0.000000e+00 : f32
    %14 = vector.broadcast %cst_7 : f32 to vector<1x1024xf32>
    %15 = arith.maximumf %13, %14 : vector<1x1024xf32>
    %16 = vector.broadcast %6 : vector<1x1024xf32> to vector<8x1024xf32>
    %17 = arith.subf %2, %16 : vector<8x1024xf32>
    %cst_8 = arith.constant 9.99999974E-6 : f32
    %18 = vector.broadcast %cst_8 : f32 to vector<1x1024xf32>
    %19 = arith.addf %15, %18 : vector<1x1024xf32>
    %20 = math.rsqrt %19 : vector<1x1024xf32>
    %21 = vector.broadcast %20 : vector<1x1024xf32> to vector<8x1024xf32>
    %22 = arith.mulf %17, %21 : vector<8x1024xf32>
    %cst_9 = arith.constant 0.000000e+00 : f32
    %23 = vector.broadcast %cst_9 : f32 to vector<8x1024xf32>
    %24 = arith.maximumf %22, %23 : vector<8x1024xf32>
    %c0_10 = arith.constant 0 : index
    %c0_11 = arith.constant 0 : index
    %25 = vector.load %arg2[%c0_10, %c0_11] : memref<2x8xf32, #tpu.memory_space<vmem>>, vector<2x8xf32>
    %cst_12 = arith.constant dense<0.000000e+00> : vector<2x1024xf32>
    %26 = tpu.matmul %25, %24, %cst_12 {dimension_numbers = #tpu.dot_dimension_numbers<[1], [0], [0], [1], [0, 0, 1, 1], [], []>} : vector<2x8xf32>, vector<8x1024xf32>, vector<2x1024xf32> -> vector<2x1024xf32>
    %c0_13 = arith.constant 0 : index
    %c0_14 = arith.constant 0 : index
    %27 = vector.load %arg3[%c0_13, %c0_14] : memref<1024x10xf32, #tpu.memory_space<vmem>>, vector<1024x10xf32>
    %cst_15 = arith.constant dense<0.000000e+00> : vector<2x10xf32>
    %28 = tpu.matmul %26, %27, %cst_15 {dimension_numbers = #tpu.dot_dimension_numbers<[1], [0], [0], [1], [0, 0, 1, 1], [], []>} : vector<2x1024xf32>, vector<1024x10xf32>, vector<2x10xf32> -> vector<2x10xf32>
    %c0_16 = arith.constant 0 : index
    %c0_17 = arith.constant 0 : index
    %29 = vector.load %arg4[%c0_16, %c0_17] : memref<1x10xf32, #tpu.memory_space<vmem>>, vector<1x10xf32>
    %30 = vector.broadcast %29 : vector<1x10xf32> to vector<2x10xf32>
    %31 = arith.addf %28, %30 : vector<2x10xf32>
    %cst_18 = arith.constant dense<0xFF800000> : vector<2xf32>
    %32 = vector.multi_reduction <maximumf>, %31, %cst_18 [1] : vector<2x10xf32> to vector<2xf32>
    %33 = vector.shape_cast %32 : vector<2xf32> to vector<2x1xf32>
    %34 = vector.broadcast %33 : vector<2x1xf32> to vector<2x10xf32>
    %35 = arith.subf %31, %34 : vector<2x10xf32>
    %36 = math.exp %35 : vector<2x10xf32>
    %cst_19 = arith.constant dense<0.000000e+00> : vector<2xf32>
    %37 = vector.multi_reduction <add>, %36, %cst_19 [1] : vector<2x10xf32> to vector<2xf32>
    %38 = vector.shape_cast %37 : vector<2xf32> to vector<2x1xf32>
    %39 = math.log %38 : vector<2x1xf32>
    %40 = vector.broadcast %39 : vector<2x1xf32> to vector<2x10xf32>
    %41 = arith.subf %35, %40 : vector<2x10xf32>
    %c0_20 = arith.constant 0 : index
    %c0_21 = arith.constant 0 : index
    %42 = vector.load %arg5[%c0_20, %c0_21] : memref<2x10xf32, #tpu.memory_space<vmem>>, vector<2x10xf32>
    tpu.vector_store %arg5[%c0_20, %c0_21], %41 {strides = array<i32>} : memref<2x10xf32, #tpu.memory_space<vmem>>, vector<2x10xf32>,
    return
  }
}

</mosaic_0001>

<bundles_post_ra>
// kernel: resnet_v2_forward.5
= control target key start
LH: loop header
LB: loop body
LE: loop exit
PB: predicated region body
PF: predicated region fallthrough
CT: control target
= control target key end

     0   :  { %vm353_vm0 = vcmask 1041408   ;;  %vm256_vm1 = vcmask 293888   ;;  %vm526_vm2 = vcmask 130048   ;;  %vm1129_vm6 = vcmask 125952   ;;  %s2465_s1 = inlined_call_operand.vmem [shape: bf16[36,16], index: 1, kind: input, shape index: {}]   ;;  %s2466_s0 = inlined_call_operand.vmem [shape: bf16[512,36], index: 0, kind: input, shape index: {}]   ;;  %s2467_s2 = inlined_call_operand.vmem [shape: bf16[512,16], index: 2, kind: output, shape index: {}]  }
   0x1   :  { %v80_v0 = vld [vmem:[%s2465_s1 + $0x10] sm:$0x3]  ;;  %v1399_v4 = vld [vmem:[%s2465_s1 + $0x8] sm:$0xff]  ;;  %v1398_v5 = vld [vmem:[%s2465_s1] sm:$0xff] }
   0x2   :  { %v250_v1 = vunpack.c.l.b16 %v80_v0  ;;  %v1366_v6 = vld [vmem:[%s2466_s0] sm:$0xff]  ;;  %v1367_v8 = vld [vmem:[%s2466_s0 + $0x8] sm:$0xff]  ;;  %v1368_v11 = vld [vmem:[%s2466_s0 + $0x10] sm:$0xff] }
   0x3   :  { %v1374_v7 = vld [vmem:[%s2466_s0 + $0x40] sm:$0xff]  ;;  %v1375_v9 = vld [vmem:[%s2466_s0 + $0x48] sm:$0xff]  ;;  %v1376_v12 = vld [vmem:[%s2466_s0 + $0x50] sm:$0xff] }
   0x4   :  { %v253_v2 = vpack.c.b16 %v250_v1, %v250_v1  ;;  %v1382_v10 = vld [vmem:[%s2466_s0 + $0x80] sm:$0xff]  ;;  %v1383_v13 = vld [vmem:[%s2466_s0 + $0x88] sm:$0xff]  ;;  %v1369_v14 = vld [vmem:[%s2466_s0 + $0x18] sm:$0xff] }
   0x5   :  { %v1377_v15 = vld [vmem:[%s2466_s0 + $0x58] sm:$0xff]  ;;  %v1384_v16 = vld [vmem:[%s2466_s0 + $0x90] sm:$0xff]  ;;  %v1390_v17 = vld [vmem:[%s2466_s0 + $0xc0] sm:$0xff] }
   0x6   :  { %v355_v3 = vsel %vm353_vm0, %v253_v2, 0  ;;  %v1370_v18 = vld [vmem:[%s2466_s0 + $0x20] sm:$0xff]  ;;  %v1385_v20 = vld [vmem:[%s2466_s0 + $0x98] sm:$0xff]  ;;  %v1391_v21 = vld [vmem:[%s2466_s0 + $0xc8] sm:$0xff] }
   0x7   :  { %362 = vmatpush.bf16.msra.mxu0 %v355_v3  ;;  %1400 = vmatpush.bf16.msra.mxu1 %v355_v3  ;;  %v1378_v19 = vld [vmem:[%s2466_s0 + $0x60] sm:$0xff]  ;;  %v1371_v22 = vld [vmem:[%s2466_s0 + $0x28] sm:$0xff]  ;;  %v1392_v25 = vld [vmem:[%s2466_s0 + $0xd0] sm:$0xff] }
   0x8   :  { %1401 = vmatpush.bf16.msra.mxu2 %v355_v3  ;;  %1402 = vmatpush.bf16.msra.mxu3 %v355_v3  ;;  %v1379_v23 = vld [vmem:[%s2466_s0 + $0x68] sm:$0xff]  ;;  %v1386_v24 = vld [vmem:[%s2466_s0 + $0xa0] sm:$0xff]  ;;  %v1372_v26 = vld [vmem:[%s2466_s0 + $0x30] sm:$0xff] }
   0x9   :  { %v1380_v27 = vld [vmem:[%s2466_s0 + $0x70] sm:$0xff]  ;;  %v1387_v28 = vld [vmem:[%s2466_s0 + $0xa8] sm:$0xff]  ;;  %v1393_v29 = vld [vmem:[%s2466_s0 + $0xd8] sm:$0xff] }
   0xa   :  { %v1373_v30 = vld [vmem:[%s2466_s0 + $0x38] sm:$0xff]  ;;  %v1388_v32 = vld [vmem:[%s2466_s0 + $0xb0] sm:$0xff]  ;;  %v1394_v33 = vld [vmem:[%s2466_s0 + $0xe0] sm:$0xff] }
   0xb   :  { %363 = vmatpush.bf16.msra.mxu0 %v1399_v4  ;;  %1403 = vmatpush.bf16.msra.mxu1 %v1399_v4  ;;  %v1381_v31 = vld [vmem:[%s2466_s0 + $0x78] sm:$0xff]  ;;  %v1395_v37 = vld [vmem:[%s2466_s0 + $0xe8] sm:$0xff]  ;;  %v1396_v42 = vld [vmem:[%s2466_s0 + $0xf0] sm:$0xff] }
   0xc   :  { %1404 = vmatpush.bf16.msra.mxu2 %v1399_v4  ;;  %1405 = vmatpush.bf16.msra.mxu3 %v1399_v4  ;;  %v1389_v36 = vld [vmem:[%s2466_s0 + $0xb8] sm:$0xff] }
   0xd   :  { %v1397_v47 = vld [vmem:[%s2466_s0 + $0xf8] sm:$0xff] }
   0xf   :  { %364 = vmatpush.bf16.msra.mxu0 %v1398_v5  ;;  %1406 = vmatpush.bf16.msra.mxu1 %v1398_v5 }
  0x10   :  { %1407 = vmatpush.bf16.msra.mxu2 %v1398_v5  ;;  %1408 = vmatpush.bf16.msra.mxu3 %v1398_v5 }
  0x12   :  { %1334 = vmatmul.msk.bf16.vlgmr.msra.gmra.mxu0 %vm256_vm1, %v1366_v6  ;;  %1342 = vmatmul.msk.bf16.vlgmr.msra.gmra.mxu1 %vm256_vm1, %v1374_v7 }
  0x13   :  { %1350 = vmatmul.msk.bf16.vlgmr.msra.gmra.mxu2 %vm256_vm1, %v1382_v10  ;;  %1358 = vmatmul.msk.bf16.vlgmr.msra.gmra.mxu3 %vm256_vm1, %v1390_v17 }
  0x22   :  { %1335 = vmatmul.msk.bf16.gmra.mxu0 %vm256_vm1, %v1367_v8  ;;  %1343 = vmatmul.msk.bf16.gmra.mxu1 %vm256_vm1, %v1375_v9 }
  0x23   :  { %1351 = vmatmul.msk.bf16.gmra.mxu2 %vm256_vm1, %v1383_v13  ;;  %1359 = vmatmul.msk.bf16.gmra.mxu3 %vm256_vm1, %v1391_v21 }
  0x32   :  { %1336 = vmatmul.msk.bf16.gmra.mxu0 %vm256_vm1, %v1368_v11  ;;  %1344 = vmatmul.msk.bf16.gmra.mxu1 %vm256_vm1, %v1376_v12 }
  0x33   :  { %1352 = vmatmul.msk.bf16.gmra.mxu2 %vm256_vm1, %v1384_v16  ;;  %1360 = vmatmul.msk.bf16.gmra.mxu3 %vm256_vm1, %v1392_v25 }
  0x42   :  { %1337 = vmatmul.msk.bf16.gmra.mxu0 %vm256_vm1, %v1369_v14  ;;  %1345 = vmatmul.msk.bf16.gmra.mxu1 %vm256_vm1, %v1377_v15 }
  0x43   :  { %1353 = vmatmul.msk.bf16.gmra.mxu2 %vm256_vm1, %v1385_v20  ;;  %1361 = vmatmul.msk.bf16.gmra.mxu3 %vm256_vm1, %v1393_v29 }
  0x52   :  { %1338 = vmatmul.msk.bf16.gmra.mxu0 %vm256_vm1, %v1370_v18  ;;  %1346 = vmatmul.msk.bf16.gmra.mxu1 %vm256_vm1, %v1378_v19 }
  0x53   :  { %1354 = vmatmul.msk.bf16.gmra.mxu2 %vm256_vm1, %v1386_v24  ;;  %1362 = vmatmul.msk.bf16.gmra.mxu3 %vm256_vm1, %v1394_v33 }
  0x62   :  { %1339 = vmatmul.msk.bf16.gmra.mxu0 %vm256_vm1, %v1371_v22  ;;  %1347 = vmatmul.msk.bf16.gmra.mxu1 %vm256_vm1, %v1379_v23 }
  0x63   :  { %1355 = vmatmul.msk.bf16.gmra.mxu2 %vm256_vm1, %v1387_v28  ;;  %1363 = vmatmul.msk.bf16.gmra.mxu3 %vm256_vm1, %v1395_v37 }
  0x72   :  { %1340 = vmatmul.msk.bf16.gmra.mxu0 %vm256_vm1, %v1372_v26  ;;  %1348 = vmatmul.msk.bf16.gmra.mxu1 %vm256_vm1, %v1380_v27 }
  0x73   :  { %1356 = vmatmul.msk.bf16.gmra.mxu2 %vm256_vm1, %v1388_v32  ;;  %1364 = vmatmul.msk.bf16.gmra.mxu3 %vm256_vm1, %v1396_v42 }
  0x82   :  { %1341 = vmatmul.msk.bf16.gmra.mxu0 %vm256_vm1, %v1373_v30  ;;  %1349 = vmatmul.msk.bf16.gmra.mxu1 %vm256_vm1, %v1381_v31 }
  0x83   :  { %1357 = vmatmul.msk.bf16.gmra.mxu2 %vm256_vm1, %v1389_v36  ;;  %1365 = vmatmul.msk.bf16.gmra.mxu3 %vm256_vm1, %v1397_v47 }
  0x8f   :  { %v1547_v34 = vpop.f32.mrf.mxu0  ;;  %v1549_v35 = vpop.f32.mrf.mxu1 }
  0x90   :  { %v661_v6 = vmul.f32 %v1547_v34, %v1547_v34  ;;  %v527_v9 = vsel %vm526_vm2, %v1547_v34, 0.0 }
  0x92   :  { %v725_v15 = vsel %vm526_vm2, %v661_v6, 0.0 }
  0x96   :  { %v1575_v45 = vpop.f32.mrf.mxu2  ;;  %v1609_v61 = vpop.f32.mrf.mxu3 }
  0x97   :  { %v1559_v38 = vpop.f32.mrf.mxu0  ;;  %v1561_v39 = vpop.f32.mrf.mxu1  ;;  %2491 = vst [vmem:[#allocation2_spill] sm:$0xff] %v1575_v45 }
  0x98   :  { %v662_v4 = vmul.f32 %v1559_v38, %v1559_v38  ;;  %v528_v7 = vsel %vm526_vm2, %v1559_v38, 0.0 }
  0x99   :  { %v529_v13 = vadd.f32 %v528_v7, %v527_v9 }
  0x9a   :  { %v726_v10 = vsel %vm526_vm2, %v662_v4, 0.0 }
  0x9b   :  { %v727_v19 = vadd.f32 %v726_v10, %v725_v15 }
  0x9e   :  { %v1587_v50 = vpop.f32.mrf.mxu2  ;;  %v1617_v1 = vpop.f32.mrf.mxu3 }
  0x9f   :  { %v1563_v40 = vpop.f32.mrf.mxu0  ;;  %v1565_v41 = vpop.f32.mrf.mxu1 }
  0xa0   :  { %v663_v8 = vmul.f32 %v1563_v40, %v1563_v40  ;;  %v530_v11 = vsel %vm526_vm2, %v1563_v40, 0.0 }
  0xa1   :  { %v531_v20 = vadd.f32 %v530_v11, %v529_v13 }
  0xa2   :  { %v728_v16 = vsel %vm526_vm2, %v663_v8, 0.0 }
  0xa3   :  { %v729_v25 = vadd.f32 %v728_v16, %v727_v19 }
  0xa6   :  { %v1593_v53 = vpop.f32.mrf.mxu2  ;;  %v1640_v14 = vpop.f32.mrf.mxu3 }
  0xa7   :  { %v1571_v43 = vpop.f32.mrf.mxu0  ;;  %v1573_v44 = vpop.f32.mrf.mxu1 }
  0xa8   :  { %v664_v12 = vmul.f32 %v1571_v43, %v1571_v43  ;;  %v532_v17 = vsel %vm526_vm2, %v1571_v43, 0.0 }
  0xa9   :  { %v533_v26 = vadd.f32 %v532_v17, %v531_v20 }
  0xaa   :  { %v730_v22 = vsel %vm526_vm2, %v664_v12, 0.0 }
  0xab   :  { %v731_v31 = vadd.f32 %v730_v22, %v729_v25 }
  0xae   :  { %v1599_v56 = vpop.f32.mrf.mxu2  ;;  %v1676_v12 = vpop.f32.mrf.mxu3 }
  0xaf   :  { %v1577_v46 = vpop.f32.mrf.mxu0  ;;  %v1583_v48 = vpop.f32.mrf.mxu1  ;;  %2492 = vst [vmem:[#allocation3_spill] sm:$0xff] %v1599_v56 }
  0xb0   :  { %v665_v18 = vmul.f32 %v1577_v46, %v1577_v46  ;;  %v534_v23 = vsel %vm526_vm2, %v1577_v46, 0.0 }
  0xb1   :  { %v535_v32 = vadd.f32 %v534_v23, %v533_v26 }
  0xb2   :  { %v732_v28 = vsel %vm526_vm2, %v665_v18, 0.0 }
  0xb3   :  { %v733_v47 = vadd.f32 %v732_v28, %v731_v31 }
  0xb6   :  { %v1605_v59 = vpop.f32.mrf.mxu2 }
  0xb7   :  { %v1585_v49 = vpop.f32.mrf.mxu0  ;;  %v1591_v52 = vpop.f32.mrf.mxu1 }
  0xb8   :  { %v666_v24 = vmul.f32 %v1585_v49, %v1585_v49  ;;  %v536_v29 = vsel %vm526_vm2, %v1585_v49, 0.0 }
  0xb9   :  { %v537_v4 = vadd.f32 %v536_v29, %v535_v32 }
  0xba   :  { %v734_v36 = vsel %vm526_vm2, %v666_v24, 0.0 }
  0xbb   :  { %v735_v9 = vadd.f32 %v734_v36, %v733_v47 }
  0xbe   :  { %v1615_v0 = vpop.f32.mrf.mxu2 }
  0xbf   :  { %v1589_v51 = vpop.f32.mrf.mxu0  ;;  %v1597_v55 = vpop.f32.mrf.mxu1  ;;  %2494 = vst [vmem:[#allocation5_spill] sm:$0xff] %v1615_v0 }
  0xc0   :  { %v667_v30 = vmul.f32 %v1589_v51, %v1589_v51  ;;  %v538_v37 = vsel %vm526_vm2, %v1589_v51, 0.0 }
  0xc1   :  { %v539_v10 = vadd.f32 %v538_v37, %v537_v4 }
  0xc2   :  { %v736_v6 = vsel %vm526_vm2, %v667_v30, 0.0 }
  0xc3   :  { %v737_v17 = vadd.f32 %v736_v6, %v735_v9 }
  0xc6   :  { %v1625_v5 = vpop.f32.mrf.mxu2 }
  0xc7   :  { %v1595_v54 = vpop.f32.mrf.mxu0  ;;  %v1603_v58 = vpop.f32.mrf.mxu1 }
  0xc8   :  { %v668_v42 = vmul.f32 %v1595_v54, %v1595_v54  ;;  %v540_v7 = vsel %vm526_vm2, %v1595_v54, 0.0 }
  0xc9   :  { %v541_v18 = vadd.f32 %v540_v7, %v539_v10 }
  0xca   :  { %v738_v13 = vsel %vm526_vm2, %v668_v42, 0.0 }
  0xcb   :  { %v739_v23 = vadd.f32 %v738_v13, %v737_v17 }
  0xce   :  { %v1662_v33 = vpop.f32.mrf.mxu2 }
  0xcf   :  { %v1601_v57 = vpop.f32.mrf.mxu0  ;;  %v1611_v62 = vpop.f32.mrf.mxu1 }
  0xd0   :  { %2493 = vst [vmem:[#allocation4_spill] sm:$0xff] %v1611_v62  ;;  %v669_v8 = vmul.f32 %v1601_v57, %v1601_v57  ;;  %v542_v15 = vsel %vm526_vm2, %v1601_v57, 0.0 }
  0xd1   :  { %v543_v24 = vadd.f32 %v542_v15, %v541_v18  ;;  %v1709_v15 = vpop.f32.mrf.mxu3 }
  0xd2   :  { %v740_v19 = vsel %vm526_vm2, %v669_v8, 0.0  ;;  %2498 = vst [vmem:[#allocation9_spill] sm:$0xff] %v1709_v15 }
  0xd3   :  { %v741_v30 = vadd.f32 %v740_v19, %v739_v23 }
  0xd6   :  { %v1695_v32 = vpop.f32.mrf.mxu2 }
  0xd7   :  { %v1607_v60 = vpop.f32.mrf.mxu0  ;;  %v1621_v3 = vpop.f32.mrf.mxu1  ;;  %2497 = vst [vmem:[#allocation8_spill] sm:$0xff] %v1695_v32 }
  0xd8   :  { %2495 = vst [vmem:[#allocation6_spill] sm:$0xff] %v1621_v3  ;;  %v670_v16 = vmul.f32 %v1607_v60, %v1607_v60  ;;  %v544_v20 = vsel %vm526_vm2, %v1607_v60, 0.0 }
  0xd9   :  { %v545_v31 = vadd.f32 %v544_v20, %v543_v24 }
  0xda   :  { %v742_v26 = vsel %vm526_vm2, %v670_v16, 0.0 }
  0xdb   :  { %v743_v47 = vadd.f32 %v742_v26, %v741_v30 }
  0xdf   :  { %v1613_v63 = vpop.f32.mrf.mxu0  ;;  %v1655_v27 = vpop.f32.mrf.mxu1 }
  0xe0   :  { %v671_v22 = vmul.f32 %v1613_v63, %v1613_v63  ;;  %v546_v28 = vsel %vm526_vm2, %v1613_v63, 0.0 }
  0xe1   :  { %v547_v4 = vadd.f32 %v546_v28, %v545_v31 }
  0xe2   :  { %v744_v36 = vsel %vm526_vm2, %v671_v22, 0.0 }
  0xe3   :  { %v745_v10 = vadd.f32 %v744_v36, %v743_v47 }
  0xe7   :  { %v1619_v2 = vpop.f32.mrf.mxu0  ;;  %v1688_v25 = vpop.f32.mrf.mxu1 }
  0xe8   :  { %2496 = vst [vmem:[#allocation7_spill] sm:$0xff] %v1688_v25  ;;  %v672_v29 = vmul.f32 %v1619_v2, %v1619_v2  ;;  %v548_v37 = vsel %vm526_vm2, %v1619_v2, 0.0 }
  0xe9   :  { %v549_v13 = vadd.f32 %v548_v37, %v547_v4  ;;  %v1724_v37 = vpop.f32.mrf.mxu2 }
  0xea   :  { %v746_v7 = vsel %vm526_vm2, %v672_v29, 0.0 }
  0xeb   :  { %v747_v19 = vadd.f32 %v746_v7, %v745_v10  ;;  %v678_v10 = vmul.f32 %v1561_v39, %v1561_v39 }
  0xef   :  { %v1648_v21 = vpop.f32.mrf.mxu0  ;;  %v1719_v28 = vpop.f32.mrf.mxu1 }
  0xf0   :  { %v673_v42 = vmul.f32 %v1648_v21, %v1648_v21  ;;  %v550_v8 = vsel %vm526_vm2, %v1648_v21, 0.0 }
  0xf1   :  { %v551_v20 = vadd.f32 %v550_v8, %v549_v13 }
  0xf2   :  { %v748_v16 = vsel %vm526_vm2, %v673_v42, 0.0  ;;  %v677_v42 = vmul.f32 %v1549_v35, %v1549_v35 }
  0xf3   :  { %v749_v24 = vadd.f32 %v748_v16, %v747_v19 }
  0xf4   :  { %v756_v19 = vsel %vm526_vm2, %v677_v42, 0.0 }
  0xf7   :  { %v1674_v11 = vpop.f32.mrf.mxu0 }
  0xf8   :  { %v674_v9 = vmul.f32 %v1674_v11, %v1674_v11  ;;  %v552_v17 = vsel %vm526_vm2, %v1674_v11, 0.0 }
  0xf9   :  { %v553_v26 = vadd.f32 %v552_v17, %v551_v20  ;;  %v560_v20 = vsel %vm526_vm2, %v1561_v39, 0.0 }
  0xfa   :  { %v750_v22 = vsel %vm526_vm2, %v674_v9, 0.0  ;;  %v558_v9 = vsel %vm526_vm2, %v1549_v35, 0.0 }
  0xfb   :  { %v751_v30 = vadd.f32 %v750_v22, %v749_v24  ;;  %v679_v22 = vmul.f32 %v1565_v41, %v1565_v41 }
  0xfd   :  { %v760_v42 = vsel %vm526_vm2, %v679_v22, 0.0 }
  0xff   :  { %v1702_v6 = vpop.f32.mrf.mxu0 }
 0x100   :  { %v675_v18 = vmul.f32 %v1702_v6, %v1702_v6  ;;  %v554_v23 = vsel %vm526_vm2, %v1702_v6, 0.0 }
 0x101   :  { %v555_v31 = vadd.f32 %v554_v23, %v553_v26  ;;  %v758_v26 = vsel %vm526_vm2, %v678_v10, 0.0 }
 0x102   :  { %v752_v29 = vsel %vm526_vm2, %v675_v18, 0.0  ;;  %v1737_v18 = vpop.f32.mrf.mxu3 }
 0x103   :  { %v753_v7 = vadd.f32 %v752_v29, %v751_v30  ;;  %v562_v29 = vsel %vm526_vm2, %v1565_v41, 0.0  ;;  %v680_v30 = vmul.f32 %v1573_v44, %v1573_v44 }
 0x107   :  { %v1722_v36 = vpop.f32.mrf.mxu0 }
 0x108   :  { %v556_v47 = vsel %vm526_vm2, %v1722_v36, 0.0  ;;  %v676_v4 = vmul.f32 %v1722_v36, %v1722_v36 }
 0x109   :  { %v557_v8 = vadd.f32 %v556_v47, %v555_v31 }
 0x10a   :  { %v754_v13 = vsel %vm526_vm2, %v676_v4, 0.0  ;;  %v1749_v4 = vpop.f32.mrf.mxu1 }
 0x10b   :  { %v559_v16 = vadd.f32 %v558_v9, %v557_v8  ;;  %v755_v17 = vadd.f32 %v754_v13, %v753_v7  ;;  %2499 = vst [vmem:[#allocation10_spill] sm:$0xff] %v1749_v4  ;;  %v564_v7 = vsel %vm526_vm2, %v1573_v44, 0.0  ;;  %v681_v8 = vmul.f32 %v1583_v48, %v1583_v48  ;;  %v1756_v13 = vpop.f32.mrf.mxu2 }
 0x10c   :  { %2500 = vst [vmem:[#allocation11_spill] sm:$0xff] %v1756_v13 }
 0x10d   :  { %v561_v23 = vadd.f32 %v560_v20, %v559_v16  ;;  %v757_v24 = vadd.f32 %v756_v19, %v755_v17  ;;  %v762_v16 = vsel %vm526_vm2, %v680_v30, 0.0  ;;  %v566_v17 = vsel %vm526_vm2, %v1583_v48, 0.0 }
 0x10e   :  { %v682_v19 = vmul.f32 %v1591_v52, %v1591_v52 }
 0x10f   :  { %v563_v31 = vadd.f32 %v562_v29, %v561_v23  ;;  %v759_v47 = vadd.f32 %v758_v26, %v757_v24  ;;  %v764_v23 = vsel %vm526_vm2, %v681_v8, 0.0  ;;  %v568_v24 = vsel %vm526_vm2, %v1591_v52, 0.0 }
 0x110   :  { %v683_v26 = vmul.f32 %v1597_v55, %v1597_v55  ;;  %v766_v30 = vsel %vm526_vm2, %v682_v19, 0.0 }
 0x111   :  { %v565_v9 = vadd.f32 %v564_v7, %v563_v31  ;;  %v761_v10 = vadd.f32 %v760_v42, %v759_v47  ;;  %v1768_v47 = vpop.f32.mrf.mxu3  ;;  %v570_v42 = vsel %vm526_vm2, %v1597_v55, 0.0  ;;  %v684_v7 = vmul.f32 %v1603_v58, %v1603_v58 }
 0x112   :  { %2501 = vst [vmem:[#allocation12_spill] sm:$0xff] %v1768_v47 }
 0x113   :  { %v567_v20 = vadd.f32 %v566_v17, %v565_v9  ;;  %v763_v22 = vadd.f32 %v762_v16, %v761_v10  ;;  %v768_v10 = vsel %vm526_vm2, %v683_v26, 0.0  ;;  %v572_v16 = vsel %vm526_vm2, %v1603_v58, 0.0 }
 0x114   :  { %v685_v17 = vmul.f32 %v1611_v62, %v1611_v62  ;;  %v770_v19 = vsel %vm526_vm2, %v684_v7, 0.0 }
 0x115   :  { %v569_v29 = vadd.f32 %v568_v24, %v567_v20  ;;  %v765_v31 = vadd.f32 %v764_v23, %v763_v22  ;;  %v1780_v23 = vpop.f32.mrf.mxu1  ;;  %v574_v24 = vsel %vm526_vm2, %v1611_v62, 0.0  ;;  %v578_v62 = vsel %vm526_vm2, %v1655_v27, 0.0 }
 0x116   :  { %2502 = vst [vmem:[#allocation13_spill] sm:$0xff] %v1780_v23 }
 0x117   :  { %v767_v9 = vadd.f32 %v766_v30, %v765_v31  ;;  %v571_v8 = vadd.f32 %v570_v42, %v569_v29  ;;  %v686_v29 = vmul.f32 %v1621_v3, %v1621_v3  ;;  %v1787_v30 = vpop.f32.mrf.mxu2  ;;  %v772_v42 = vsel %vm526_vm2, %v685_v17, 0.0 }
 0x119   :  { %v573_v20 = vadd.f32 %v572_v16, %v571_v8  ;;  %v769_v22 = vadd.f32 %v768_v10, %v767_v9  ;;  %v576_v8 = vsel %vm526_vm2, %v1621_v3, 0.0  ;;  %v687_v9 = vmul.f32 %v1655_v27, %v1655_v27 }
 0x11a   :  { %v774_v16 = vsel %vm526_vm2, %v686_v29, 0.0  ;;  %v580_v3 = vsel %vm526_vm2, %v1688_v25, 0.0 }
 0x11b   :  { %v575_v31 = vadd.f32 %v574_v24, %v573_v20  ;;  %v771_v26 = vadd.f32 %v770_v19, %v769_v22  ;;  %v688_v20 = vmul.f32 %v1688_v25, %v1688_v25  ;;  %v1799_v24 = vpop.f32.mrf.mxu3  ;;  %v776_v17 = vsel %vm526_vm2, %v687_v9, 0.0 }
 0x11c   :  { %2503 = vst [vmem:[#allocation14_spill] sm:$0xff] %v1799_v24  ;;  %v584_v25 = vsel %vm526_vm2, %v1749_v4, 0.0 }
 0x11d   :  { %v577_v10 = vadd.f32 %v576_v8, %v575_v31  ;;  %v773_v7 = vadd.f32 %v772_v42, %v771_v26  ;;  %v689_v31 = vmul.f32 %v1719_v28, %v1719_v28  ;;  %v778_v42 = vsel %vm526_vm2, %v688_v20, 0.0 }
 0x11e   :  { %v582_v8 = vsel %vm526_vm2, %v1719_v28, 0.0 }
 0x11f   :  { %v579_v22 = vadd.f32 %v578_v62, %v577_v10  ;;  %v775_v19 = vadd.f32 %v774_v16, %v773_v7  ;;  %v690_v62 = vmul.f32 %v1749_v4, %v1749_v4  ;;  %v1811_v16 = vpop.f32.mrf.mxu1  ;;  %v780_v9 = vsel %vm526_vm2, %v689_v31, 0.0 }
 0x121   :  { %v581_v26 = vadd.f32 %v580_v3, %v579_v22  ;;  %v777_v29 = vadd.f32 %v776_v17, %v775_v19  ;;  %v691_v3 = vmul.f32 %v1780_v23, %v1780_v23  ;;  %v1818_v19 = vpop.f32.mrf.mxu2  ;;  %v782_v17 = vsel %vm526_vm2, %v690_v62, 0.0 }
 0x122   :  { %v590_v62 = vsel %vm526_vm2, %v1575_v45, 0.0 }
 0x123   :  { %v583_v10 = vadd.f32 %v582_v8, %v581_v26  ;;  %v779_v7 = vadd.f32 %v778_v42, %v777_v29  ;;  %v586_v26 = vsel %vm526_vm2, %v1780_v23, 0.0  ;;  %v692_v29 = vmul.f32 %v1811_v16, %v1811_v16 }
 0x124   :  { %v693_v8 = vmul.f32 %v1575_v45, %v1575_v45  ;;  %v784_v4 = vsel %vm526_vm2, %v691_v3, 0.0  ;;  %v694_v23 = vmul.f32 %v1587_v50, %v1587_v50  ;;  %v592_v3 = vsel %vm526_vm2, %v1587_v50, 0.0 }
 0x125   :  { %v781_v22 = vadd.f32 %v780_v9, %v779_v7  ;;  %v585_v20 = vadd.f32 %v584_v25, %v583_v10  ;;  %v588_v25 = vsel %vm526_vm2, %v1811_v16, 0.0  ;;  %v1830_v9 = vpop.f32.mrf.mxu3  ;;  %v594_v45 = vsel %vm526_vm2, %v1593_v53, 0.0 }
 0x126   :  { %2504 = vst [vmem:[#allocation15_spill] sm:$0xff] %v1830_v9 }
 0x127   :  { %v783_v42 = vadd.f32 %v782_v17, %v781_v22  ;;  %v587_v31 = vadd.f32 %v586_v26, %v585_v20  ;;  %v786_v22 = vsel %vm526_vm2, %v692_v29, 0.0  ;;  %v788_v26 = vsel %vm526_vm2, %v693_v8, 0.0 }
 0x128   :  { %v696_v29 = vmul.f32 %v1599_v56, %v1599_v56 }
 0x129   :  { %v785_v10 = vadd.f32 %v784_v4, %v783_v42  ;;  %v589_v7 = vadd.f32 %v588_v25, %v587_v31  ;;  %v695_v4 = vmul.f32 %v1593_v53, %v1593_v53  ;;  %v790_v25 = vsel %vm526_vm2, %v694_v23, 0.0 }
 0x12b   :  { %v591_v20 = vadd.f32 %v590_v62, %v589_v7  ;;  %v787_v17 = vadd.f32 %v786_v22, %v785_v10  ;;  %v1847_v62 = vpop.f32.mrf.mxu2  ;;  %v792_v8 = vsel %vm526_vm2, %v695_v4, 0.0  ;;  %v596_v22 = vsel %vm526_vm2, %v1599_v56, 0.0 }
 0x12c   :  { %2505 = vst [vmem:[#allocation16_spill] sm:$0xff] %v1847_v62  ;;  %v600_v56 = vsel %vm526_vm2, %v1615_v0, 0.0 }
 0x12d   :  { %v593_v42 = vadd.f32 %v592_v3, %v591_v20  ;;  %v789_v31 = vadd.f32 %v788_v26, %v787_v17  ;;  %v697_v20 = vmul.f32 %v1605_v59, %v1605_v59  ;;  %v794_v26 = vsel %vm526_vm2, %v696_v29, 0.0 }
 0x12e   :  { %v598_v3 = vsel %vm526_vm2, %v1605_v59, 0.0 }
 0x12f   :  { %v595_v7 = vadd.f32 %v594_v45, %v593_v42  ;;  %v791_v10 = vadd.f32 %v790_v25, %v789_v31  ;;  %v698_v45 = vmul.f32 %v1615_v0, %v1615_v0  ;;  %v1859_v25 = vpop.f32.mrf.mxu3  ;;  %v796_v4 = vsel %vm526_vm2, %v697_v20, 0.0 }
 0x130   :  { %2506 = vst [vmem:[#allocation17_spill] sm:$0xff] %v1859_v25  ;;  %v701_v0 = vmul.f32 %v1695_v32, %v1695_v32 }
 0x131   :  { %v597_v17 = vadd.f32 %v596_v22, %v595_v7  ;;  %v793_v23 = vadd.f32 %v792_v8, %v791_v10  ;;  %v699_v7 = vmul.f32 %v1625_v5, %v1625_v5  ;;  %v798_v8 = vsel %vm526_vm2, %v698_v45, 0.0 }
 0x132   :  { %v602_v22 = vsel %vm526_vm2, %v1625_v5, 0.0 }
 0x133   :  { %v599_v42 = vadd.f32 %v598_v3, %v597_v17  ;;  %v795_v31 = vadd.f32 %v794_v26, %v793_v23  ;;  %v700_v17 = vmul.f32 %v1662_v33, %v1662_v33  ;;  %v800_v20 = vsel %vm526_vm2, %v699_v7, 0.0 }
 0x134   :  { %v604_v3 = vsel %vm526_vm2, %v1662_v33, 0.0 }
 0x135   :  { %v601_v10 = vadd.f32 %v600_v56, %v599_v42  ;;  %v797_v29 = vadd.f32 %v796_v4, %v795_v31  ;;  %v1876_v31 = vpop.f32.mrf.mxu2  ;;  %v802_v45 = vsel %vm526_vm2, %v700_v17, 0.0  ;;  %v606_v4 = vsel %vm526_vm2, %v1695_v32, 0.0 }
 0x136   :  { %v610_v32 = vsel %vm526_vm2, %v1756_v13, 0.0 }
 0x137   :  { %v799_v23 = vadd.f32 %v798_v8, %v797_v29  ;;  %v603_v26 = vadd.f32 %v602_v22, %v601_v10  ;;  %v702_v10 = vmul.f32 %v1724_v37, %v1724_v37  ;;  %v804_v8 = vsel %vm526_vm2, %v701_v0, 0.0 }
 0x138   :  { %v608_v22 = vsel %vm526_vm2, %v1724_v37, 0.0 }
 0x139   :  { %v605_v56 = vadd.f32 %v604_v3, %v603_v26  ;;  %v801_v42 = vadd.f32 %v800_v20, %v799_v23  ;;  %v703_v23 = vmul.f32 %v1756_v13, %v1756_v13  ;;  %v1888_v3 = vpop.f32.mrf.mxu3  ;;  %v806_v17 = vsel %vm526_vm2, %v702_v10, 0.0 }
 0x13a   :  { %2507 = vst [vmem:[#allocation18_spill] sm:$0xff] %v1888_v3  ;;  %v706_v13 = vmul.f32 %v1847_v62, %v1847_v62 }
 0x13b   :  { %v607_v29 = vadd.f32 %v606_v4, %v605_v56  ;;  %v803_v7 = vadd.f32 %v802_v45, %v801_v42  ;;  %v704_v56 = vmul.f32 %v1787_v30, %v1787_v30  ;;  %v808_v45 = vsel %vm526_vm2, %v703_v23, 0.0 }
 0x13c   :  { %v612_v4 = vsel %vm526_vm2, %v1787_v30, 0.0 }
 0x13d   :  { %v609_v26 = vadd.f32 %v608_v22, %v607_v29  ;;  %v805_v20 = vadd.f32 %v804_v8, %v803_v7  ;;  %v705_v29 = vmul.f32 %v1818_v19, %v1818_v19  ;;  %v810_v10 = vsel %vm526_vm2, %v704_v56, 0.0 }
 0x13e   :  { %v614_v22 = vsel %vm526_vm2, %v1818_v19, 0.0 }
 0x13f   :  { %v611_v42 = vadd.f32 %v610_v32, %v609_v26  ;;  %v807_v0 = vadd.f32 %v806_v17, %v805_v20  ;;  %v1905_v20 = vpop.f32.mrf.mxu2  ;;  %v812_v23 = vsel %vm526_vm2, %v705_v29, 0.0  ;;  %v616_v17 = vsel %vm526_vm2, %v1847_v62, 0.0 }
 0x140   :  { %2508 = vst [vmem:[#allocation19_spill] sm:$0xff] %v1905_v20  ;;  %v709_v29 = vmul.f32 %v1609_v61, %v1609_v61 }
 0x141   :  { %v613_v7 = vadd.f32 %v612_v4, %v611_v42  ;;  %v809_v8 = vadd.f32 %v808_v45, %v807_v0  ;;  %v707_v42 = vmul.f32 %v1876_v31, %v1876_v31  ;;  %v814_v45 = vsel %vm526_vm2, %v706_v13, 0.0 }
 0x142   :  { %v618_v4 = vsel %vm526_vm2, %v1876_v31, 0.0 }
 0x143   :  { %v811_v32 = vadd.f32 %v810_v10, %v809_v8  ;;  %v615_v26 = vadd.f32 %v614_v22, %v613_v7  ;;  %v708_v7 = vmul.f32 %v1905_v20, %v1905_v20  ;;  %v1917_v22 = vpop.f32.mrf.mxu3  ;;  %v816_v62 = vsel %vm526_vm2, %v707_v42, 0.0 }
 0x144   :  { %2509 = vst [vmem:[#allocation20_spill] sm:$0xff] %v1917_v22  ;;  %v624_v42 = vsel %vm526_vm2, %v1617_v1, 0.0 }
 0x145   :  { %v813_v0 = vadd.f32 %v812_v23, %v811_v32  ;;  %v617_v56 = vadd.f32 %v616_v17, %v615_v26  ;;  %v620_v32 = vsel %vm526_vm2, %v1905_v20, 0.0  ;;  %v622_v23 = vsel %vm526_vm2, %v1609_v61, 0.0 }
 0x146   :  { %v710_v17 = vmul.f32 %v1617_v1, %v1617_v1  ;;  %v711_v20 = vmul.f32 %v1640_v14, %v1640_v14 }
 0x147   :  { %v815_v8 = vadd.f32 %v814_v45, %v813_v0  ;;  %v619_v10 = vadd.f32 %v618_v4, %v617_v56  ;;  %v818_v0 = vsel %vm526_vm2, %v708_v7, 0.0  ;;  %v820_v4 = vsel %vm526_vm2, %v709_v29, 0.0 }
 0x148   :  { %v712_v7 = vmul.f32 %v1676_v12, %v1676_v12  ;;  %v824_v29 = vsel %vm526_vm2, %v711_v20, 0.0 }
 0x149   :  { %v817_v26 = vadd.f32 %v816_v62, %v815_v8  ;;  %v621_v13 = vadd.f32 %v620_v32, %v619_v10  ;;  %v822_v10 = vsel %vm526_vm2, %v710_v17, 0.0  ;;  %v626_v32 = vsel %vm526_vm2, %v1640_v14, 0.0 }
 0x14a   :  { %v826_v17 = vsel %vm526_vm2, %v712_v7, 0.0 }
 0x14b   :  { %v623_v56 = vadd.f32 %v622_v23, %v621_v13  ;;  %v819_v45 = vadd.f32 %v818_v0, %v817_v26  ;;  %v628_v23 = vsel %vm526_vm2, %v1676_v12, 0.0  ;;  %v713_v0 = vmul.f32 %v1709_v15, %v1709_v15 }
 0x14d   :  { %v625_v62 = vadd.f32 %v624_v42, %v623_v56  ;;  %v821_v8 = vadd.f32 %v820_v4, %v819_v45  ;;  %v1944_v4 = vpop.f32.mrf.mxu3  ;;  %v630_v42 = vsel %vm526_vm2, %v1709_v15, 0.0  ;;  %v716_v15 = vmul.f32 %v1799_v24, %v1799_v24 }
 0x14e   :  { %2510 = vst [vmem:[#allocation21_spill] sm:$0xff] %v1944_v4 }
 0x14f   :  { %v627_v13 = vadd.f32 %v626_v32, %v625_v62  ;;  %v823_v26 = vadd.f32 %v822_v10, %v821_v8  ;;  %v714_v62 = vmul.f32 %v1737_v18, %v1737_v18  ;;  %v828_v10 = vsel %vm526_vm2, %v713_v0, 0.0 }
 0x150   :  { %v632_v32 = vsel %vm526_vm2, %v1737_v18, 0.0 }
 0x151   :  { %v629_v56 = vadd.f32 %v628_v23, %v627_v13  ;;  %v825_v45 = vadd.f32 %v824_v29, %v823_v26  ;;  %v715_v13 = vmul.f32 %v1768_v47, %v1768_v47  ;;  %v830_v7 = vsel %vm526_vm2, %v714_v62, 0.0 }
 0x152   :  { %v634_v23 = vsel %vm526_vm2, %v1768_v47, 0.0  ;;  %v834_v62 = vsel %vm526_vm2, %v716_v15, 0.0  ;;  %v642_v15 = vsel %vm526_vm2, %v1888_v3, 0.0 }
 0x153   :  { %v631_v8 = vadd.f32 %v630_v42, %v629_v56  ;;  %v827_v20 = vadd.f32 %v826_v17, %v825_v45  ;;  %v832_v0 = vsel %vm526_vm2, %v715_v13, 0.0  ;;  %v636_v17 = vsel %vm526_vm2, %v1799_v24, 0.0 }
 0x154   :  { %v717_v42 = vmul.f32 %v1830_v9, %v1830_v9 }
 0x155   :  { %v633_v26 = vadd.f32 %v632_v32, %v631_v8  ;;  %v829_v29 = vadd.f32 %v828_v10, %v827_v20  ;;  %v638_v10 = vsel %vm526_vm2, %v1830_v9, 0.0  ;;  %v718_v32 = vmul.f32 %v1859_v25, %v1859_v25 }
 0x156   :  { %v836_v13 = vsel %vm526_vm2, %v717_v42, 0.0  ;;  %v644_v42 = vsel %vm526_vm2, %v1917_v22, 0.0 }
 0x157   :  { %v831_v56 = vadd.f32 %v830_v7, %v829_v29  ;;  %v635_v45 = vadd.f32 %v634_v23, %v633_v26  ;;  %v1971_v7 = vpop.f32.mrf.mxu3  ;;  %v640_v23 = vsel %vm526_vm2, %v1859_v25, 0.0 }
 0x158   :  { %2511 = vst [vmem:[#allocation22_spill] sm:$0xff] %v1971_v7 }
 0x159   :  { %v637_v8 = vadd.f32 %v636_v17, %v635_v45  ;;  %v833_v20 = vadd.f32 %v832_v0, %v831_v56  ;;  %v838_v56 = vsel %vm526_vm2, %v718_v32, 0.0  ;;  %v719_v0 = vmul.f32 %v1888_v3, %v1888_v3 }
 0x15b   :  { %v639_v29 = vadd.f32 %v638_v10, %v637_v8  ;;  %v835_v26 = vadd.f32 %v834_v62, %v833_v20  ;;  %v840_v20 = vsel %vm526_vm2, %v719_v0, 0.0  ;;  %v720_v62 = vmul.f32 %v1917_v22, %v1917_v22 }
 0x15c   :  { %v722_v0 = vmul.f32 %v1971_v7, %v1971_v7 }
 0x15d   :  { %v641_v24 = vadd.f32 %v640_v23, %v639_v29  ;;  %v837_v45 = vadd.f32 %v836_v13, %v835_v26  ;;  %v842_v32 = vsel %vm526_vm2, %v720_v62, 0.0  ;;  %v646_v13 = vsel %vm526_vm2, %v1944_v4, 0.0 }
 0x15f   :  { %v643_v17 = vadd.f32 %v642_v15, %v641_v24  ;;  %v839_v8 = vadd.f32 %v838_v56, %v837_v45  ;;  %v1986_v26 = vpop.f32.mrf.mxu3  ;;  %v721_v24 = vmul.f32 %v1944_v4, %v1944_v4  ;;  %v648_v15 = vsel %vm526_vm2, %v1971_v7, 0.0 }
 0x160   :  { %2512 = vst [vmem:[#allocation23_spill] sm:$0xff] %v1986_v26  ;;  %v723_v62 = vmul.f32 %v1986_v26, %v1986_v26 }
 0x161   :  { %v645_v10 = vadd.f32 %v644_v42, %v643_v17  ;;  %v841_v29 = vadd.f32 %v840_v20, %v839_v8  ;;  %v844_v56 = vsel %vm526_vm2, %v721_v24, 0.0  ;;  %v846_v20 = vsel %vm526_vm2, %v722_v0, 0.0 }
 0x162   :  { %v650_v42 = vsel %vm526_vm2, %v1986_v26, 0.0 }
 0x163   :  { %v843_v23 = vadd.f32 %v842_v32, %v841_v29  ;;  %v647_v45 = vadd.f32 %v646_v13, %v645_v10  ;;  %v848_v13 = vsel %vm526_vm2, %v723_v62, 0.0 }
 0x165   :  { %v845_v17 = vadd.f32 %v844_v56, %v843_v23  ;;  %v649_v8 = vadd.f32 %v648_v15, %v647_v45 }
 0x167   :  { %v847_v29 = vadd.f32 %v846_v20, %v845_v17  ;;  %v651_v10 = vadd.f32 %v650_v42, %v649_v8  ;;  %v2003_v32 = vpop.f32.mrf.mxu3 }
 0x168   :  { %2513 = vst [vmem:[#allocation24_spill] sm:$0xff] %v2003_v32  ;;  %v652_v24 = vsel %vm526_vm2, %v2003_v32, 0.0  ;;  %v724_v23 = vmul.f32 %v2003_v32, %v2003_v32 }
 0x169   :  { %v849_v45 = vadd.f32 %v848_v13, %v847_v29  ;;  %v653_v56 = vadd.f32 %v652_v24, %v651_v10 }
 0x16a   :  { %v850_v15 = vsel %vm526_vm2, %v724_v23, 0.0 }
 0x16b   :  { %v654_v0 = vrot.slane %v653_v56, 4  ;;  %v851_v7 = vadd.f32 %v850_v15, %v849_v45 }
 0x16d   :  { %v655_v4 = vadd.f32 %v654_v0, %v653_v56  ;;  %v852_v26 = vrot.slane %v851_v7, 4 }
 0x16f   :  { %v656_v17 = vrot.slane %v655_v4, 2  ;;  %v853_v8 = vadd.f32 %v852_v26, %v851_v7 }
 0x171   :  { %v657_v20 = vadd.f32 %v656_v17, %v655_v4  ;;  %v854_v42 = vrot.slane %v853_v8, 2 }
 0x173   :  { %v658_v22 = vrot.slane %v657_v20, 1  ;;  %v855_v62 = vadd.f32 %v854_v42, %v853_v8 }
 0x175   :  { %v659_v3 = vadd.f32 %v658_v22, %v657_v20  ;;  %v856_v25 = vrot.slane %v855_v62, 1 }
 0x177   :  { %v2011_v9 = vmul.f32 0.001953125, %v659_v3  ;;  %v857_v47 = vadd.f32 %v856_v25, %v855_v62 }
 0x179   :  { %v858_v32 = vmul.f32 0.001953125, %v857_v47  ;;  %v859_v29 = vmul.f32 %v2011_v9, %v2011_v9  ;;  %v862_v47 = vsub.f32 %v1547_v34, %v2011_v9  ;;  %v863_v25 = vsub.f32 %v1559_v38, %v2011_v9 }
 0x17a   :  { %v864_v22 = vsub.f32 %v1563_v40, %v2011_v9  ;;  %v865_v15 = vsub.f32 %v1571_v43, %v2011_v9  ;;  %v866_v17 = vsub.f32 %v1577_v46, %v2011_v9  ;;  %v867_v34 = vsub.f32 %v1585_v49, %v2011_v9 }
 0x17b   :  { %v860_v10 = vsub.f32 %v858_v32, %v859_v29  ;;  %v868_v40 = vsub.f32 %v1589_v51, %v2011_v9  ;;  %v869_v43 = vsub.f32 %v1595_v54, %v2011_v9  ;;  %v870_v46 = vsub.f32 %v1601_v57, %v2011_v9 }
 0x17c   :  { %v872_v51 = vsub.f32 %v1613_v63, %v2011_v9  ;;  %v873_v54 = vsub.f32 %v1619_v2, %v2011_v9  ;;  %v874_v57 = vsub.f32 %v1648_v21, %v2011_v9  ;;  %v875_v63 = vsub.f32 %v1674_v11, %v2011_v9 }
 0x17d   :  { %v861_v13 = vmax.f32 %v860_v10, 0.0  ;;  %v877_v11 = vsub.f32 %v1722_v36, %v2011_v9  ;;  %v879_v36 = vsub.f32 %v1561_v39, %v2011_v9  ;;  %v881_v39 = vsub.f32 %v1573_v44, %v2011_v9 }
 0x17e   :  { %v883_v44 = vsub.f32 %v1591_v52, %v2011_v9  ;;  %v885_v52 = vsub.f32 %v1603_v58, %v2011_v9  ;;  %v2515_v58 = vld [vmem:[#allocation6_spill] sm:$0xff] }
 0x17f   :  { %v926_v24 = vadd.f32 1e-05, %v861_v13  ;;  %v871_v13 = vsub.f32 %v1607_v60, %v2011_v9 }
 0x181   :  { %1409 = vrsqrt.f32 %v926_v24  ;;  %vm933_vm4 = vweird.f32 %v926_v24 }
 0x187   :  { %v1410_v23 = vpop.eup %1409 }
 0x188   :  { %v928_v45 = vmul.f32 %v1410_v23, %v926_v24  ;;  %vm934_vm3 = vweird.f32 %v1410_v23 }
 0x189   :  { %vm935_vm5 = vmor %vm933_vm4, %vm934_vm3 }
 0x18a   :  { %v929_v7 = vmul.f32 %v1410_v23, %v928_v45 }
 0x18c   :  { %v930_v4 = vmul.f32 0.5, %v929_v7 }
 0x18e   :  { %v931_v26 = vsub.f32 1.5, %v930_v4 }
 0x190   :  { %v932_v56 = vmul.f32 %v1410_v23, %v931_v26 }
 0x192   :  { %v2015_v3 = vsel %vm935_vm5, %v1410_v23, %v932_v56 }
 0x193   :  { %v937_v32 = vmul.f32 %v2015_v3, %v862_v47  ;;  %v938_v0 = vmul.f32 %v2015_v3, %v863_v25  ;;  %v939_v8 = vmul.f32 %v2015_v3, %v864_v22  ;;  %v940_v38 = vmul.f32 %v2015_v3, %v865_v15 }
 0x194   :  { %v941_v20 = vmul.f32 %v2015_v3, %v866_v17  ;;  %v942_v62 = vmul.f32 %v2015_v3, %v867_v34  ;;  %v943_v10 = vmul.f32 %v2015_v3, %v868_v40  ;;  %v944_v24 = vmul.f32 %v2015_v3, %v869_v43 }
 0x195   :  { %v1001_v42 = vmax.f32 %v937_v32, 0.0  ;;  %v1002_v29 = vmax.f32 %v938_v0, 0.0  ;;  %v1003_v49 = vmax.f32 %v939_v8, 0.0  ;;  %v1004_v23 = vmax.f32 %v940_v38, 0.0 }
 0x196   :  { %v945_v45 = vmul.f32 %v2015_v3, %v870_v46  ;;  %v1005_v7 = vmax.f32 %v941_v20, 0.0  ;;  %v946_v26 = vmul.f32 %v2015_v3, %v871_v13  ;;  %v1006_v56 = vmax.f32 %v942_v62, 0.0 }
 0x197   :  { %v1065_v4 = vpack.c.bf16 %v1001_v42, %v1001_v42  ;;  %v1066_v60 = vpack.c.bf16 %v1002_v29, %v1002_v29  ;;  %v947_v47 = vmul.f32 %v2015_v3, %v872_v51  ;;  %v1007_v25 = vmax.f32 %v943_v10, 0.0 }
 0x198   :  { %v1067_v22 = vpack.c.bf16 %v1003_v49, %v1003_v49  ;;  %v948_v2 = vmul.f32 %v2015_v3, %v873_v54  ;;  %v1008_v32 = vmax.f32 %v944_v24, 0.0  ;;  %v1068_v15 = vpack.c.bf16 %v1004_v23, %v1004_v23 }
 0x199   :  { %v876_v0 = vsub.f32 %v1702_v6, %v2011_v9  ;;  %v949_v21 = vmul.f32 %v2015_v3, %v874_v57  ;;  %v1009_v17 = vmax.f32 %v945_v45, 0.0  ;;  %v1069_v8 = vpack.c.bf16 %v1005_v7, %v1005_v7  ;;  %1130 = vst.msk [vmem:[%s2467_s2] sm:$0xf] %vm1129_vm6, %v1065_v4 }
 0x19a   :  { %v950_v34 = vmul.f32 %v2015_v3, %v875_v63  ;;  %v1010_v38 = vmax.f32 %v946_v26, 0.0  ;;  %v1070_v40 = vpack.c.bf16 %v1006_v56, %v1006_v56  ;;  %1131 = vst.msk [vmem:[%s2467_s2 + $0x4] sm:$0xf] %vm1129_vm6, %v1066_v60  ;;  %v878_v6 = vsub.f32 %v1549_v35, %v2011_v9 }
 0x19b   :  { %v951_v20 = vmul.f32 %v2015_v3, %v876_v0  ;;  %v1011_v42 = vmax.f32 %v947_v47, 0.0  ;;  %v1071_v43 = vpack.c.bf16 %v1007_v25, %v1007_v25  ;;  %1132 = vst.msk [vmem:[%s2467_s2 + $0x8] sm:$0xf] %vm1129_vm6, %v1067_v22  ;;  %v952_v62 = vmul.f32 %v2015_v3, %v877_v11 }
 0x19c   :  { %v1012_v29 = vmax.f32 %v948_v2, 0.0  ;;  %v1072_v46 = vpack.c.bf16 %v1008_v32, %v1008_v32  ;;  %1133 = vst.msk [vmem:[%s2467_s2 + $0xc] sm:$0xf] %vm1129_vm6, %v1068_v15  ;;  %v880_v35 = vsub.f32 %v1565_v41, %v2011_v9  ;;  %v953_v10 = vmul.f32 %v2015_v3, %v878_v6 }
 0x19d   :  { %v1013_v49 = vmax.f32 %v949_v21, 0.0  ;;  %v1073_v13 = vpack.c.bf16 %v1009_v17, %v1009_v17  ;;  %1134 = vst.msk [vmem:[%s2467_s2 + $0x10] sm:$0xf] %vm1129_vm6, %v1069_v8  ;;  %v954_v51 = vmul.f32 %v2015_v3, %v879_v36  ;;  %v1014_v24 = vmax.f32 %v950_v34, 0.0 }
 0x19e   :  { %v1074_v23 = vpack.c.bf16 %v1010_v38, %v1010_v38  ;;  %1135 = vst.msk [vmem:[%s2467_s2 + $0x14] sm:$0xf] %vm1129_vm6, %v1070_v40  ;;  %v882_v41 = vsub.f32 %v1583_v48, %v2011_v9  ;;  %v955_v54 = vmul.f32 %v2015_v3, %v880_v35  ;;  %v1015_v45 = vmax.f32 %v951_v20, 0.0  ;;  %v2516_v20 = vld [vmem:[#allocation7_spill] sm:$0xff] }
 0x19f   :  { %v1075_v7 = vpack.c.bf16 %v1011_v42, %v1011_v42  ;;  %1136 = vst.msk [vmem:[%s2467_s2 + $0x18] sm:$0xf] %vm1129_vm6, %v1071_v43  ;;  %v956_v4 = vmul.f32 %v2015_v3, %v881_v39  ;;  %v1016_v57 = vmax.f32 %v952_v62, 0.0  ;;  %v1076_v26 = vpack.c.bf16 %v1012_v29, %v1012_v29 }
 0x1a0   :  { %1137 = vst.msk [vmem:[%s2467_s2 + $0x1c] sm:$0xf] %vm1129_vm6, %v1072_v46  ;;  %v884_v48 = vsub.f32 %v1597_v55, %v2011_v9  ;;  %v957_v56 = vmul.f32 %v2015_v3, %v882_v41  ;;  %v1017_v60 = vmax.f32 %v953_v10, 0.0  ;;  %v1077_v63 = vpack.c.bf16 %v1013_v49, %v1013_v49  ;;  %v2514_v55 = vld [vmem:[#allocation4_spill] sm:$0xff]  ;;  %v2517_v10 = vld [vmem:[#allocation10_spill] sm:$0xff] }
 0x1a1   :  { %1138 = vst.msk [vmem:[%s2467_s2 + $0x20] sm:$0xf] %vm1129_vm6, %v1073_v13  ;;  %v958_v47 = vmul.f32 %v2015_v3, %v883_v44  ;;  %v1018_v25 = vmax.f32 %v954_v51, 0.0  ;;  %v1078_v22 = vpack.c.bf16 %v1014_v24, %v1014_v24  ;;  %v886_v2 = vsub.f32 %v2514_v55, %v2011_v9 }
 0x1a2   :  { %1139 = vst.msk [vmem:[%s2467_s2 + $0x24] sm:$0xf] %vm1129_vm6, %v1074_v23  ;;  %v959_v32 = vmul.f32 %v2015_v3, %v884_v48  ;;  %v1019_v15 = vmax.f32 %v955_v54, 0.0  ;;  %v1079_v0 = vpack.c.bf16 %v1015_v45, %v1015_v45  ;;  %v887_v21 = vsub.f32 %v2515_v58, %v2011_v9 }
 0x1a3   :  { %1140 = vst.msk [vmem:[%s2467_s2 + $0x28] sm:$0xf] %vm1129_vm6, %v1075_v7  ;;  %v960_v17 = vmul.f32 %v2015_v3, %v885_v52  ;;  %v1020_v8 = vmax.f32 %v956_v4, 0.0  ;;  %v1080_v11 = vpack.c.bf16 %v1016_v57, %v1016_v57  ;;  %v888_v34 = vsub.f32 %v1655_v27, %v2011_v9  ;;  %v2519_v57 = vld [vmem:[#allocation2_spill] sm:$0xff] }
 0x1a4   :  { %1141 = vst.msk [vmem:[%s2467_s2 + $0x2c] sm:$0xf] %vm1129_vm6, %v1076_v26  ;;  %v961_v38 = vmul.f32 %v2015_v3, %v886_v2  ;;  %v1021_v40 = vmax.f32 %v957_v56, 0.0  ;;  %v1081_v6 = vpack.c.bf16 %v1017_v60, %v1017_v60  ;;  %v889_v42 = vsub.f32 %v2516_v20, %v2011_v9 }
 0x1a5   :  { %1142 = vst.msk [vmem:[%s2467_s2 + $0x30] sm:$0xf] %vm1129_vm6, %v1077_v63  ;;  %v962_v43 = vmul.f32 %v2015_v3, %v887_v21  ;;  %v1022_v36 = vmax.f32 %v958_v47, 0.0  ;;  %v1082_v62 = vpack.c.bf16 %v1018_v25, %v1018_v25  ;;  %v890_v27 = vsub.f32 %v1719_v28, %v2011_v9  ;;  %v2518_v28 = vld [vmem:[#allocation13_spill] sm:$0xff] }
 0x1a6   :  { %1143 = vst.msk [vmem:[%s2467_s2 + $0x34] sm:$0xf] %vm1129_vm6, %v1078_v22  ;;  %v963_v29 = vmul.f32 %v2015_v3, %v888_v34  ;;  %v1023_v46 = vmax.f32 %v959_v32, 0.0  ;;  %v1083_v35 = vpack.c.bf16 %v1019_v15, %v1019_v15  ;;  %v891_v49 = vsub.f32 %v2517_v10, %v2011_v9 }
 0x1a7   :  { %1144 = vst.msk [vmem:[%s2467_s2 + $0x38] sm:$0xf] %vm1129_vm6, %v1079_v0  ;;  %v964_v13 = vmul.f32 %v2015_v3, %v889_v42  ;;  %v1024_v39 = vmax.f32 %v960_v17, 0.0  ;;  %v1084_v51 = vpack.c.bf16 %v1020_v8, %v1020_v8  ;;  %v892_v24 = vsub.f32 %v2518_v28, %v2011_v9  ;;  %v2523_v28 = vld [vmem:[#allocation11_spill] sm:$0xff] }
 0x1a8   :  { %1145 = vst.msk [vmem:[%s2467_s2 + $0x3c] sm:$0xf] %vm1129_vm6, %v1080_v11  ;;  %v965_v23 = vmul.f32 %v2015_v3, %v890_v27  ;;  %v1025_v41 = vmax.f32 %v961_v38, 0.0  ;;  %v1085_v54 = vpack.c.bf16 %v1021_v40, %v1021_v40  ;;  %v893_v45 = vsub.f32 %v1811_v16, %v2011_v9  ;;  %v2521_v11 = vld [vmem:[#allocation5_spill] sm:$0xff] }
 0x1a9   :  { %1146 = vst.msk [vmem:[%s2467_s2 + $0x40] sm:$0xf] %vm1129_vm6, %v1081_v6  ;;  %v966_v7 = vmul.f32 %v2015_v3, %v891_v49  ;;  %v1026_v44 = vmax.f32 %v962_v43, 0.0  ;;  %v1086_v4 = vpack.c.bf16 %v1022_v36, %v1022_v36  ;;  %v894_v26 = vsub.f32 %v2519_v57, %v2011_v9 }
 0x1aa   :  { %1147 = vst.msk [vmem:[%s2467_s2 + $0x44] sm:$0xf] %vm1129_vm6, %v1082_v62  ;;  %v967_v48 = vmul.f32 %v2015_v3, %v892_v24  ;;  %v1027_v56 = vmax.f32 %v963_v29, 0.0  ;;  %v1087_v60 = vpack.c.bf16 %v1023_v46, %v1023_v46  ;;  %v895_v16 = vsub.f32 %v1587_v50, %v2011_v9  ;;  %v2520_v50 = vld [vmem:[#allocation3_spill] sm:$0xff] }
 0x1ab   :  { %1148 = vst.msk [vmem:[%s2467_s2 + $0x48] sm:$0xf] %vm1129_vm6, %v1083_v35  ;;  %v968_v63 = vmul.f32 %v2015_v3, %v893_v45  ;;  %v1028_v52 = vmax.f32 %v964_v13, 0.0  ;;  %v1088_v47 = vpack.c.bf16 %v1024_v39, %v1024_v39  ;;  %v896_v25 = vsub.f32 %v1593_v53, %v2011_v9 }
 0x1ac   :  { %1149 = vst.msk [vmem:[%s2467_s2 + $0x4c] sm:$0xf] %vm1129_vm6, %v1084_v51  ;;  %v969_v22 = vmul.f32 %v2015_v3, %v894_v26  ;;  %v1029_v55 = vmax.f32 %v965_v23, 0.0  ;;  %v1089_v2 = vpack.c.bf16 %v1025_v41, %v1025_v41  ;;  %v897_v32 = vsub.f32 %v2520_v50, %v2011_v9 }
 0x1ad   :  { %1150 = vst.msk [vmem:[%s2467_s2 + $0x50] sm:$0xf] %vm1129_vm6, %v1085_v54  ;;  %v970_v15 = vmul.f32 %v2015_v3, %v895_v16  ;;  %v1030_v0 = vmax.f32 %v966_v7, 0.0  ;;  %v1090_v58 = vpack.c.bf16 %v1026_v44, %v1026_v44  ;;  %v898_v53 = vsub.f32 %v1605_v59, %v2011_v9 }
 0x1ae   :  { %1151 = vst.msk [vmem:[%s2467_s2 + $0x54] sm:$0xf] %vm1129_vm6, %v1086_v4  ;;  %v971_v21 = vmul.f32 %v2015_v3, %v896_v25  ;;  %v1031_v17 = vmax.f32 %v967_v48, 0.0  ;;  %v1091_v8 = vpack.c.bf16 %v1027_v56, %v1027_v56  ;;  %v899_v34 = vsub.f32 %v2521_v11, %v2011_v9 }
 0x1af   :  { %1152 = vst.msk [vmem:[%s2467_s2 + $0x58] sm:$0xf] %vm1129_vm6, %v1087_v60  ;;  %v972_v38 = vmul.f32 %v2015_v3, %v897_v32  ;;  %v1032_v40 = vmax.f32 %v968_v63, 0.0  ;;  %v1092_v6 = vpack.c.bf16 %v1028_v52, %v1028_v52  ;;  %v900_v59 = vsub.f32 %v1625_v5, %v2011_v9  ;;  %v2522_v5 = vld [vmem:[#allocation8_spill] sm:$0xff] }
 0x1b0   :  { %1153 = vst.msk [vmem:[%s2467_s2 + $0x5c] sm:$0xf] %vm1129_vm6, %v1088_v47  ;;  %v973_v20 = vmul.f32 %v2015_v3, %v898_v53  ;;  %v1033_v42 = vmax.f32 %v969_v22, 0.0  ;;  %v1093_v43 = vpack.c.bf16 %v1029_v55, %v1029_v55  ;;  %v901_v36 = vsub.f32 %v1662_v33, %v2011_v9  ;;  %v2525_v22 = vld [vmem:[#allocation19_spill] sm:$0xff] }
 0x1b1   :  { %1154 = vst.msk [vmem:[%s2467_s2 + $0x60] sm:$0xf] %vm1129_vm6, %v1089_v2  ;;  %v974_v62 = vmul.f32 %v2015_v3, %v899_v34  ;;  %v1034_v27 = vmax.f32 %v970_v15, 0.0  ;;  %v1094_v29 = vpack.c.bf16 %v1030_v0, %v1030_v0  ;;  %v902_v46 = vsub.f32 %v2522_v5, %v2011_v9  ;;  %v2527_v5 = vld [vmem:[#allocation12_spill] sm:$0xff] }
 0x1b2   :  { %1155 = vst.msk [vmem:[%s2467_s2 + $0x64] sm:$0xf] %vm1129_vm6, %v1090_v58  ;;  %v975_v35 = vmul.f32 %v2015_v3, %v900_v59  ;;  %v1035_v10 = vmax.f32 %v971_v21, 0.0  ;;  %v1095_v49 = vpack.c.bf16 %v1031_v17, %v1031_v17  ;;  %v903_v33 = vsub.f32 %v1724_v37, %v2011_v9 }
 0x1b3   :  { %1156 = vst.msk [vmem:[%s2467_s2 + $0x68] sm:$0xf] %vm1129_vm6, %v1091_v8  ;;  %v976_v13 = vmul.f32 %v2015_v3, %v901_v36  ;;  %v1036_v39 = vmax.f32 %v972_v38, 0.0  ;;  %v1096_v51 = vpack.c.bf16 %v1032_v40, %v1032_v40  ;;  %v904_v24 = vsub.f32 %v2523_v28, %v2011_v9  ;;  %v2529_v28 = vld [vmem:[#allocation15_spill] sm:$0xff] }
 0x1b4   :  { %1157 = vst.msk [vmem:[%s2467_s2 + $0x6c] sm:$0xf] %vm1129_vm6, %v1092_v6  ;;  %v977_v23 = vmul.f32 %v2015_v3, %v902_v46  ;;  %v1037_v41 = vmax.f32 %v973_v20, 0.0  ;;  %v1097_v54 = vpack.c.bf16 %v1033_v42, %v1033_v42  ;;  %v905_v37 = vsub.f32 %v1787_v30, %v2011_v9  ;;  %v2524_v30 = vld [vmem:[#allocation16_spill] sm:$0xff] }
 0x1b5   :  { %1158 = vst.msk [vmem:[%s2467_s2 + $0x70] sm:$0xf] %vm1129_vm6, %v1093_v43  ;;  %v978_v45 = vmul.f32 %v2015_v3, %v903_v33  ;;  %v1038_v7 = vmax.f32 %v974_v62, 0.0  ;;  %v1098_v44 = vpack.c.bf16 %v1034_v27, %v1034_v27  ;;  %v906_v4 = vsub.f32 %v1818_v19, %v2011_v9 }
 0x1b6   :  { %1159 = vst.msk [vmem:[%s2467_s2 + $0x74] sm:$0xf] %vm1129_vm6, %v1094_v29  ;;  %v979_v57 = vmul.f32 %v2015_v3, %v904_v24  ;;  %v1039_v26 = vmax.f32 %v975_v35, 0.0  ;;  %v1099_v48 = vpack.c.bf16 %v1035_v10, %v1035_v10  ;;  %v907_v56 = vsub.f32 %v2524_v30, %v2011_v9 }
 0x1b7   :  { %1160 = vst.msk [vmem:[%s2467_s2 + $0x78] sm:$0xf] %vm1129_vm6, %v1095_v49  ;;  %v980_v60 = vmul.f32 %v2015_v3, %v905_v37  ;;  %v1040_v16 = vmax.f32 %v976_v13, 0.0  ;;  %v1100_v63 = vpack.c.bf16 %v1036_v39, %v1036_v39  ;;  %v908_v19 = vsub.f32 %v1876_v31, %v2011_v9  ;;  %v2530_v37 = vld [vmem:[#allocation17_spill] sm:$0xff] }
 0x1b8   :  { %1161 = vst.msk [vmem:[%s2467_s2 + $0x7c] sm:$0xf] %vm1129_vm6, %v1096_v51  ;;  %v981_v52 = vmul.f32 %v2015_v3, %v906_v4  ;;  %v1041_v47 = vmax.f32 %v977_v23, 0.0  ;;  %v1101_v25 = vpack.c.bf16 %v1037_v41, %v1037_v41  ;;  %v909_v55 = vsub.f32 %v2525_v22, %v2011_v9 }
 0x1b9   :  { %1162 = vst.msk [vmem:[%s2467_s2 + $0x80] sm:$0xf] %vm1129_vm6, %v1097_v54  ;;  %v982_v2 = vmul.f32 %v2015_v3, %v907_v56  ;;  %v1042_v50 = vmax.f32 %v978_v45, 0.0  ;;  %v1102_v32 = vpack.c.bf16 %v1038_v7, %v1038_v7  ;;  %v910_v31 = vsub.f32 %v1609_v61, %v2011_v9 }
 0x1ba   :  { %1163 = vst.msk [vmem:[%s2467_s2 + $0x84] sm:$0xf] %vm1129_vm6, %v1098_v44  ;;  %v983_v15 = vmul.f32 %v2015_v3, %v908_v19  ;;  %v1043_v0 = vmax.f32 %v979_v57, 0.0  ;;  %v1103_v58 = vpack.c.bf16 %v1039_v26, %v1039_v26  ;;  %v911_v53 = vsub.f32 %v1617_v1, %v2011_v9  ;;  %v2531_v57 = vld [vmem:[#allocation18_spill] sm:$0xff] }
 0x1bb   :  { %1164 = vst.msk [vmem:[%s2467_s2 + $0x88] sm:$0xf] %vm1129_vm6, %v1099_v48  ;;  %v984_v21 = vmul.f32 %v2015_v3, %v909_v55  ;;  %v1044_v17 = vmax.f32 %v980_v60, 0.0  ;;  %v1104_v8 = vpack.c.bf16 %v1040_v16, %v1040_v16  ;;  %v912_v61 = vsub.f32 %v1640_v14, %v2011_v9  ;;  %v2526_v14 = vld [vmem:[#allocation9_spill] sm:$0xff]  ;;  %v2532_v60 = vld [vmem:[#allocation20_spill] sm:$0xff] }
 0x1bc   :  { %1165 = vst.msk [vmem:[%s2467_s2 + $0x8c] sm:$0xf] %vm1129_vm6, %v1100_v63  ;;  %v985_v11 = vmul.f32 %v2015_v3, %v910_v31  ;;  %v1045_v34 = vmax.f32 %v981_v52, 0.0  ;;  %v1105_v38 = vpack.c.bf16 %v1041_v47, %v1041_v47  ;;  %v913_v1 = vsub.f32 %v1676_v12, %v2011_v9  ;;  %v2533_v47 = vld [vmem:[#allocation21_spill] sm:$0xff] }
 0x1bd   :  { %1166 = vst.msk [vmem:[%s2467_s2 + $0x90] sm:$0xf] %vm1129_vm6, %v1101_v25  ;;  %v986_v40 = vmul.f32 %v2015_v3, %v911_v53  ;;  %v1046_v6 = vmax.f32 %v982_v2, 0.0  ;;  %v1106_v59 = vpack.c.bf16 %v1042_v50, %v1042_v50  ;;  %v914_v20 = vsub.f32 %v2526_v14, %v2011_v9  ;;  %v2534_v50 = vld [vmem:[#allocation22_spill] sm:$0xff] }
 0x1be   :  { %1167 = vst.msk [vmem:[%s2467_s2 + $0x94] sm:$0xf] %vm1129_vm6, %v1102_v32  ;;  %v987_v42 = vmul.f32 %v2015_v3, %v912_v61  ;;  %v1047_v43 = vmax.f32 %v983_v15, 0.0  ;;  %v1107_v36 = vpack.c.bf16 %v1043_v0, %v1043_v0  ;;  %v915_v12 = vsub.f32 %v1737_v18, %v2011_v9  ;;  %v2528_v18 = vld [vmem:[#allocation14_spill] sm:$0xff]  ;;  %v2536_v61 = vld [vmem:[#allocation24_spill] sm:$0xff] }
 0x1bf   :  { %1168 = vst.msk [vmem:[%s2467_s2 + $0x98] sm:$0xf] %vm1129_vm6, %v1103_v58  ;;  %v988_v62 = vmul.f32 %v2015_v3, %v913_v1  ;;  %v1048_v27 = vmax.f32 %v984_v21, 0.0  ;;  %v1108_v29 = vpack.c.bf16 %v1044_v17, %v1044_v17  ;;  %v916_v46 = vsub.f32 %v2527_v5, %v2011_v9  ;;  %v2535_v58 = vld [vmem:[#allocation23_spill] sm:$0xff] }
 0x1c0   :  { %1169 = vst.msk [vmem:[%s2467_s2 + $0x9c] sm:$0xf] %vm1129_vm6, %v1104_v8  ;;  %v989_v35 = vmul.f32 %v2015_v3, %v914_v20  ;;  %v1049_v10 = vmax.f32 %v985_v11, 0.0  ;;  %v1109_v49 = vpack.c.bf16 %v1045_v34, %v1045_v34  ;;  %v917_v33 = vsub.f32 %v2528_v18, %v2011_v9 }
 0x1c1   :  { %1170 = vst.msk [vmem:[%s2467_s2 + $0xa0] sm:$0xf] %vm1129_vm6, %v1105_v38  ;;  %v990_v13 = vmul.f32 %v2015_v3, %v915_v12  ;;  %v1050_v39 = vmax.f32 %v986_v40, 0.0  ;;  %v1110_v51 = vpack.c.bf16 %v1046_v6, %v1046_v6  ;;  %v918_v24 = vsub.f32 %v2529_v28, %v2011_v9 }
 0x1c2   :  { %1171 = vst.msk [vmem:[%s2467_s2 + $0xa4] sm:$0xf] %vm1129_vm6, %v1106_v59  ;;  %v991_v23 = vmul.f32 %v2015_v3, %v916_v46  ;;  %v1051_v41 = vmax.f32 %v987_v42, 0.0  ;;  %v1111_v54 = vpack.c.bf16 %v1047_v43, %v1047_v43  ;;  %v919_v45 = vsub.f32 %v2530_v37, %v2011_v9 }
 0x1c3   :  { %1172 = vst.msk [vmem:[%s2467_s2 + $0xa8] sm:$0xf] %vm1129_vm6, %v1107_v36  ;;  %v992_v7 = vmul.f32 %v2015_v3, %v917_v33  ;;  %v1052_v44 = vmax.f32 %v988_v62, 0.0  ;;  %v1112_v4 = vpack.c.bf16 %v1048_v27, %v1048_v27  ;;  %v920_v26 = vsub.f32 %v2531_v57, %v2011_v9 }
 0x1c4   :  { %1173 = vst.msk [vmem:[%s2467_s2 + $0xac] sm:$0xf] %vm1129_vm6, %v1108_v29  ;;  %v993_v48 = vmul.f32 %v2015_v3, %v918_v24  ;;  %v1053_v30 = vmax.f32 %v989_v35, 0.0  ;;  %v1113_v56 = vpack.c.bf16 %v1049_v10, %v1049_v10  ;;  %v921_v16 = vsub.f32 %v2532_v60, %v2011_v9 }
 0x1c5   :  { %1174 = vst.msk [vmem:[%s2467_s2 + $0xb0] sm:$0xf] %vm1129_vm6, %v1109_v49  ;;  %v994_v63 = vmul.f32 %v2015_v3, %v919_v45  ;;  %v1054_v19 = vmax.f32 %v990_v13, 0.0  ;;  %v1114_v52 = vpack.c.bf16 %v1050_v39, %v1050_v39  ;;  %v922_v25 = vsub.f32 %v2533_v47, %v2011_v9 }
 0x1c6   :  { %1175 = vst.msk [vmem:[%s2467_s2 + $0xb4] sm:$0xf] %vm1129_vm6, %v1110_v51  ;;  %v995_v22 = vmul.f32 %v2015_v3, %v920_v26  ;;  %v1055_v55 = vmax.f32 %v991_v23, 0.0  ;;  %v1115_v2 = vpack.c.bf16 %v1051_v41, %v1051_v41  ;;  %v923_v32 = vsub.f32 %v2534_v50, %v2011_v9 }
 0x1c7   :  { %1176 = vst.msk [vmem:[%s2467_s2 + $0xb8] sm:$0xf] %vm1129_vm6, %v1111_v54  ;;  %v996_v31 = vmul.f32 %v2015_v3, %v921_v16  ;;  %v1056_v15 = vmax.f32 %v992_v7, 0.0  ;;  %v1116_v0 = vpack.c.bf16 %v1052_v44, %v1052_v44  ;;  %v924_v53 = vsub.f32 %v2535_v58, %v2011_v9 }
 0x1c8   :  { %1177 = vst.msk [vmem:[%s2467_s2 + $0xbc] sm:$0xf] %vm1129_vm6, %v1112_v4  ;;  %v997_v21 = vmul.f32 %v2015_v3, %v922_v25  ;;  %v1057_v17 = vmax.f32 %v993_v48, 0.0  ;;  %v1117_v8 = vpack.c.bf16 %v1053_v30, %v1053_v30  ;;  %v925_v11 = vsub.f32 %v2536_v61, %v2011_v9 }
 0x1c9   :  { %1178 = vst.msk [vmem:[%s2467_s2 + $0xc0] sm:$0xf] %vm1129_vm6, %v1113_v56  ;;  %v998_v34 = vmul.f32 %v2015_v3, %v923_v32  ;;  %v1058_v38 = vmax.f32 %v994_v63, 0.0  ;;  %v1118_v1 = vpack.c.bf16 %v1054_v19, %v1054_v19  ;;  %v999_v40 = vmul.f32 %v2015_v3, %v924_v53 }
 0x1ca   :  { %1179 = vst.msk [vmem:[%s2467_s2 + $0xc4] sm:$0xf] %vm1129_vm6, %v1114_v52  ;;  %v1059_v6 = vmax.f32 %v995_v22, 0.0  ;;  %v1119_v59 = vpack.c.bf16 %v1055_v55, %v1055_v55  ;;  %v1000_v9 = vmul.f32 %v2015_v3, %v925_v11  ;;  %v1060_v14 = vmax.f32 %v996_v31, 0.0 }
 0x1cb   :  { %1180 = vst.msk [vmem:[%s2467_s2 + $0xc8] sm:$0xf] %vm1129_vm6, %v1115_v2  ;;  %v1120_v20 = vpack.c.bf16 %v1056_v15, %v1056_v15  ;;  %v1061_v42 = vmax.f32 %v997_v21, 0.0  ;;  %v1121_v43 = vpack.c.bf16 %v1057_v17, %v1057_v17  ;;  %v1062_v36 = vmax.f32 %v998_v34, 0.0 }
 0x1cc   :  { %1181 = vst.msk [vmem:[%s2467_s2 + $0xcc] sm:$0xf] %vm1129_vm6, %v1116_v0  ;;  %v1122_v12 = vpack.c.bf16 %v1058_v38, %v1058_v38  ;;  %v1063_v3 = vmax.f32 %v999_v40, 0.0  ;;  %v1123_v62 = vpack.c.bf16 %v1059_v6, %v1059_v6  ;;  %v1064_v27 = vmax.f32 %v1000_v9, 0.0 }
 0x1cd   :  { %1182 = vst.msk [vmem:[%s2467_s2 + $0xd0] sm:$0xf] %vm1129_vm6, %v1117_v8  ;;  %v1124_v29 = vpack.c.bf16 %v1060_v14, %v1060_v14  ;;  %v1125_v5 = vpack.c.bf16 %v1061_v42, %v1061_v42  ;;  %v1126_v46 = vpack.c.bf16 %v1062_v36, %v1062_v36 }
 0x1ce   :  { %1183 = vst.msk [vmem:[%s2467_s2 + $0xd4] sm:$0xf] %vm1129_vm6, %v1118_v1  ;;  %v1127_v35 = vpack.c.bf16 %v1063_v3, %v1063_v3  ;;  %v1128_v10 = vpack.c.bf16 %v1064_v27, %v1064_v27 }
 0x1cf   :  { %1184 = vst.msk [vmem:[%s2467_s2 + $0xd8] sm:$0xf] %vm1129_vm6, %v1119_v59 }
 0x1d0   :  { %1185 = vst.msk [vmem:[%s2467_s2 + $0xdc] sm:$0xf] %vm1129_vm6, %v1120_v20 }
 0x1d1   :  { %1186 = vst.msk [vmem:[%s2467_s2 + $0xe0] sm:$0xf] %vm1129_vm6, %v1121_v43 }
 0x1d2   :  { %1187 = vst.msk [vmem:[%s2467_s2 + $0xe4] sm:$0xf] %vm1129_vm6, %v1122_v12 }
 0x1d3   :  { %1188 = vst.msk [vmem:[%s2467_s2 + $0xe8] sm:$0xf] %vm1129_vm6, %v1123_v62 }
 0x1d4   :  { %1189 = vst.msk [vmem:[%s2467_s2 + $0xec] sm:$0xf] %vm1129_vm6, %v1124_v29 }
 0x1d5   :  { %1190 = vst.msk [vmem:[%s2467_s2 + $0xf0] sm:$0xf] %vm1129_vm6, %v1125_v5 }
 0x1d6   :  { %1191 = vst.msk [vmem:[%s2467_s2 + $0xf4] sm:$0xf] %vm1129_vm6, %v1126_v46 }
 0x1d7   :  { %1192 = vst.msk [vmem:[%s2467_s2 + $0xf8] sm:$0xf] %vm1129_vm6, %v1127_v35 }
 0x1d8   :  { %1193 = vst.msk [vmem:[%s2467_s2 + $0xfc] sm:$0xf] %vm1129_vm6, %v1128_v10 }

// kernel: resnet_v2_forward.6
= control target key start
LH: loop header
LB: loop body
LE: loop exit
PB: predicated region body
PF: predicated region fallthrough
CT: control target
= control target key end

     0   :  { %vm439_vm0 = vcmask 130048   ;;  %vm1732_vm4 = vcmask 125952   ;;  %s4452_s1 = inlined_call_operand.vmem [shape: bf16[144,16], index: 1, kind: input, shape index: {}]   ;;  %s4453_s0 = inlined_call_operand.vmem [shape: bf16[512,144], index: 0, kind: input, shape index: {}]   ;;  %s4454_s2 = inlined_call_operand.vmem [shape: bf16[512,16], index: 2, kind: input, shape index: {}]   ;;  %s4455_s3 = inlined_call_operand.vmem [shape: bf16[512,16], index: 3, kind: output, shape index: {}]  }
   0x1   :  { %v2196_v0 = vld [vmem:[%s4452_s1 + $0x38] sm:$0xff]  ;;  %v2197_v1 = vld [vmem:[%s4452_s1 + $0x40] sm:$0xff]  ;;  %v1805_v3 = vld [vmem:[%s4453_s0 + $0x8] sm:$0xf0] }
   0x2   :  { %v2125_v2 = vld [vmem:[%s4453_s0 + $0x4] sm:$0xf]  ;;  %536 = vmatpush.bf16.msra.mxu0 %v2196_v0  ;;  %712 = vmatpush.bf16.msra.mxu1 %v2197_v1  ;;  %v2195_v5 = vld [vmem:[%s4452_s1 + $0x30] sm:$0xff]  ;;  %v2194_v6 = vld [vmem:[%s4452_s1 + $0x28] sm:$0xff] }
   0x3   :  { %v1808_v4 = vor.u32 %v2125_v2, %v1805_v3  ;;  %2357 = vmatpush.bf16.msra.mxu2 %v2196_v0  ;;  %2365 = vmatpush.bf16.msra.mxu3 %v2197_v1  ;;  %v2193_v7 = vld [vmem:[%s4452_s1 + $0x20] sm:$0xff]  ;;  %v2192_v8 = vld [vmem:[%s4452_s1 + $0x18] sm:$0xff]  ;;  %v2127_v9 = vld [vmem:[%s4453_s0 + $0x14] sm:$0xf] }
   0x4   :  { %v1813_v10 = vld [vmem:[%s4453_s0 + $0x18] sm:$0xf0]  ;;  %v2191_v12 = vld [vmem:[%s4452_s1 + $0x10] sm:$0xff]  ;;  %v2190_v13 = vld [vmem:[%s4452_s1 + $0x8] sm:$0xff] }
   0x5   :  { %2093 = vmatmul.msk.bf16.vlgmr.msra.gmra.mxu1 %vm439_vm0, %v1808_v4  ;;  %v1816_v11 = vor.u32 %v2127_v9, %v1813_v10  ;;  %v2189_v14 = vld [vmem:[%s4452_s1] sm:$0xff]  ;;  %v2126_v16 = vld [vmem:[%s4453_s0 + $0x4] sm:$0xf0]  ;;  %v1821_v19 = vld [vmem:[%s4453_s0 + $0x28] sm:$0xf0] }
   0x6   :  { %537 = vmatpush.bf16.msra.mxu0 %v2195_v5  ;;  %v1803_v15 = vld [vmem:[%s4453_s0] sm:$0xf]  ;;  %v2129_v18 = vld [vmem:[%s4453_s0 + $0x24] sm:$0xf]  ;;  %v1811_v21 = vld [vmem:[%s4453_s0 + $0x10] sm:$0xf] }
   0x7   :  { %2358 = vmatpush.bf16.msra.mxu2 %v2195_v5  ;;  %v1804_v17 = vor.u32 %v2126_v16, %v1803_v15  ;;  %v1824_v20 = vor.u32 %v2129_v18, %v1821_v19  ;;  %v2128_v22 = vld [vmem:[%s4453_s0 + $0x14] sm:$0xf0]  ;;  %v2131_v24 = vld [vmem:[%s4453_s0 + $0x34] sm:$0xf]  ;;  %v1829_v25 = vld [vmem:[%s4453_s0 + $0x38] sm:$0xf0] }
   0x8   :  { %v1812_v23 = vor.u32 %v2128_v22, %v1811_v21  ;;  %v1931_v26 = vld [vmem:[%s4453_s0 + $0x100] sm:$0xf]  ;;  %v2158_v27 = vld [vmem:[%s4453_s0 + $0x104] sm:$0xf0]  ;;  %v1832_v28 = vor.u32 %v2131_v24, %v1829_v25  ;;  %v2133_v33 = vld [vmem:[%s4453_s0 + $0x44] sm:$0xf] }
   0x9   :  { %v1932_v29 = vor.u32 %v2158_v27, %v1931_v26  ;;  %v1819_v30 = vld [vmem:[%s4453_s0 + $0x20] sm:$0xf]  ;;  %v2130_v31 = vld [vmem:[%s4453_s0 + $0x24] sm:$0xf0]  ;;  %v1837_v34 = vld [vmem:[%s4453_s0 + $0x48] sm:$0xf0] }
   0xa   :  { %538 = vmatpush.bf16.msra.mxu0 %v2194_v6  ;;  %v1820_v32 = vor.u32 %v2130_v31, %v1819_v30  ;;  %v1939_v35 = vld [vmem:[%s4453_s0 + $0x110] sm:$0xf]  ;;  %v2160_v36 = vld [vmem:[%s4453_s0 + $0x114] sm:$0xf0]  ;;  %v2159_v37 = vld [vmem:[%s4453_s0 + $0x114] sm:$0xf]  ;;  %v1840_v38 = vor.u32 %v2133_v33, %v1837_v34 }
   0xb   :  { %2359 = vmatpush.bf16.msra.mxu2 %v2194_v6  ;;  %v1940_v39 = vor.u32 %v2160_v36, %v1939_v35  ;;  %v1941_v40 = vld [vmem:[%s4453_s0 + $0x118] sm:$0xf0]  ;;  %v1827_v42 = vld [vmem:[%s4453_s0 + $0x30] sm:$0xf]  ;;  %v2132_v43 = vld [vmem:[%s4453_s0 + $0x34] sm:$0xf0] }
   0xc   :  { %v1944_v41 = vor.u32 %v2159_v37, %v1941_v40  ;;  %v1828_v44 = vor.u32 %v2132_v43, %v1827_v42  ;;  %v2135_v45 = vld [vmem:[%s4453_s0 + $0x54] sm:$0xf]  ;;  %v1845_v46 = vld [vmem:[%s4453_s0 + $0x58] sm:$0xf0]  ;;  %v1947_v47 = vld [vmem:[%s4453_s0 + $0x120] sm:$0xf] }
   0xd   :  { %v2162_v48 = vld [vmem:[%s4453_s0 + $0x124] sm:$0xf0]  ;;  %v2161_v49 = vld [vmem:[%s4453_s0 + $0x124] sm:$0xf]  ;;  %v1848_v50 = vor.u32 %v2135_v45, %v1845_v46  ;;  %v1949_v52 = vld [vmem:[%s4453_s0 + $0x128] sm:$0xf0] }
   0xe   :  { %539 = vmatpush.bf16.msra.mxu0 %v2193_v7  ;;  %2110 = vmatmul.msk.bf16.vlgmr.msra.gmra.mxu3 %vm439_vm0, %v1944_v41  ;;  %v1948_v51 = vor.u32 %v2162_v48, %v1947_v47  ;;  %v1952_v53 = vor.u32 %v2161_v49, %v1949_v52  ;;  %v1835_v54 = vld [vmem:[%s4453_s0 + $0x40] sm:$0xf]  ;;  %v2134_v55 = vld [vmem:[%s4453_s0 + $0x44] sm:$0xf0]  ;;  %v2137_v57 = vld [vmem:[%s4453_s0 + $0x64] sm:$0xf] }
   0xf   :  { %2360 = vmatpush.bf16.msra.mxu2 %v2193_v7  ;;  %v1836_v56 = vor.u32 %v2134_v55, %v1835_v54  ;;  %v1853_v58 = vld [vmem:[%s4453_s0 + $0x68] sm:$0xf0]  ;;  %v1955_v59 = vld [vmem:[%s4453_s0 + $0x130] sm:$0xf]  ;;  %v2164_v60 = vld [vmem:[%s4453_s0 + $0x134] sm:$0xf0] }
  0x10   :  { %v2163_v61 = vld [vmem:[%s4453_s0 + $0x134] sm:$0xf]  ;;  %v1856_v62 = vor.u32 %v2137_v57, %v1853_v58  ;;  %v1956_v63 = vor.u32 %v2164_v60, %v1955_v59  ;;  %v1957_v0 = vld [vmem:[%s4453_s0 + $0x138] sm:$0xf0]  ;;  %v1843_v2 = vld [vmem:[%s4453_s0 + $0x50] sm:$0xf] }
  0x11   :  { %v1960_v1 = vor.u32 %v2163_v61, %v1957_v0  ;;  %v2136_v3 = vld [vmem:[%s4453_s0 + $0x54] sm:$0xf0]  ;;  %v2139_v5 = vld [vmem:[%s4453_s0 + $0x74] sm:$0xf]  ;;  %v1861_v6 = vld [vmem:[%s4453_s0 + $0x78] sm:$0xf0] }
  0x12   :  { %540 = vmatpush.bf16.msra.mxu0 %v2192_v8  ;;  %v1844_v4 = vor.u32 %v2136_v3, %v1843_v2  ;;  %v1963_v7 = vld [vmem:[%s4453_s0 + $0x140] sm:$0xf]  ;;  %v2165_v9 = vld [vmem:[%s4453_s0 + $0x144] sm:$0xf]  ;;  %v1864_v10 = vor.u32 %v2139_v5, %v1861_v6  ;;  %v2138_v15 = vld [vmem:[%s4453_s0 + $0x64] sm:$0xf0] }
  0x13   :  { %2361 = vmatpush.bf16.msra.mxu2 %v2192_v8  ;;  %v2166_v8 = vld [vmem:[%s4453_s0 + $0x144] sm:$0xf0]  ;;  %v1869_v18 = vld [vmem:[%s4453_s0 + $0x88] sm:$0xf0]  ;;  %v1971_v19 = vld [vmem:[%s4453_s0 + $0x150] sm:$0xf] }
  0x14   :  { %v2167_v21 = vld [vmem:[%s4453_s0 + $0x154] sm:$0xf]  ;;  %v1973_v24 = vld [vmem:[%s4453_s0 + $0x158] sm:$0xf0]  ;;  %v1979_v33 = vld [vmem:[%s4453_s0 + $0x160] sm:$0xf] }
  0x15   :  { %2094 = vmatmul.msk.bf16.gmra.mxu1 %vm439_vm0, %v1816_v11  ;;  %v1964_v11 = vor.u32 %v2166_v8, %v1963_v7  ;;  %v1976_v26 = vor.u32 %v2167_v21, %v1973_v24  ;;  %v2143_v31 = vld [vmem:[%s4453_s0 + $0x94] sm:$0xf]  ;;  %v2170_v34 = vld [vmem:[%s4453_s0 + $0x164] sm:$0xf0]  ;;  %v2169_v35 = vld [vmem:[%s4453_s0 + $0x164] sm:$0xf] }
  0x16   :  { %541 = vmatpush.bf16.msra.mxu0 %v2191_v12  ;;  %v1980_v37 = vor.u32 %v2170_v34, %v1979_v33  ;;  %v1867_v42 = vld [vmem:[%s4453_s0 + $0x80] sm:$0xf]  ;;  %v2142_v43 = vld [vmem:[%s4453_s0 + $0x84] sm:$0xf0]  ;;  %v2145_v46 = vld [vmem:[%s4453_s0 + $0xa4] sm:$0xf] }
  0x17   :  { %2362 = vmatpush.bf16.msra.mxu2 %v2191_v12  ;;  %v1965_v12 = vld [vmem:[%s4453_s0 + $0x148] sm:$0xf0]  ;;  %v1987_v49 = vld [vmem:[%s4453_s0 + $0x170] sm:$0xf]  ;;  %v1989_v54 = vld [vmem:[%s4453_s0 + $0x178] sm:$0xf0] }
  0x18   :  { %v1885_v47 = vld [vmem:[%s4453_s0 + $0xa8] sm:$0xf0]  ;;  %v1875_v60 = vld [vmem:[%s4453_s0 + $0x90] sm:$0xf]  ;;  %v2144_v61 = vld [vmem:[%s4453_s0 + $0x94] sm:$0xf0] }
  0x19   :  { %v1888_v52 = vor.u32 %v2145_v46, %v1885_v47  ;;  %v2147_v0 = vld [vmem:[%s4453_s0 + $0xb4] sm:$0xf]  ;;  %v1995_v3 = vld [vmem:[%s4453_s0 + $0x180] sm:$0xf]  ;;  %v2173_v5 = vld [vmem:[%s4453_s0 + $0x184] sm:$0xf] }
  0x1a   :  { %542 = vmatpush.bf16.msra.mxu0 %v2190_v13  ;;  %v1997_v8 = vld [vmem:[%s4453_s0 + $0x188] sm:$0xf0]  ;;  %v2176_v24 = vld [vmem:[%s4453_s0 + $0x194] sm:$0xf0]  ;;  %v2011_v47 = vld [vmem:[%s4453_s0 + $0x1a0] sm:$0xf] }
  0x1b   :  { %2363 = vmatpush.bf16.msra.mxu2 %v2190_v13  ;;  %v1968_v13 = vor.u32 %v2165_v9, %v1965_v12 }
  0x1e   :  { %543 = vmatpush.bf16.msra.mxu0 %v2189_v14  ;;  %2111 = vmatmul.msk.bf16.gmra.mxu3 %vm439_vm0, %v1952_v53 }
  0x1f   :  { %2364 = vmatpush.bf16.msra.mxu2 %v2189_v14  ;;  %v1851_v14 = vld [vmem:[%s4453_s0 + $0x60] sm:$0xf] }
  0x20   :  { %v1852_v16 = vor.u32 %v2138_v15, %v1851_v14  ;;  %v1883_v15 = vld [vmem:[%s4453_s0 + $0xa0] sm:$0xf] }
  0x21   :  { %544 = vmatmul.bf16.vlgmr.msra.gmra.mxu0 %v1804_v17  ;;  %v2141_v17 = vld [vmem:[%s4453_s0 + $0x84] sm:$0xf] }
  0x22   :  { %624 = vmatmul.bf16.vlgmr.msra.gmra.mxu2 %v1932_v29  ;;  %v1872_v22 = vor.u32 %v2141_v17, %v1869_v18  ;;  %v2140_v29 = vld [vmem:[%s4453_s0 + $0x74] sm:$0xf0] }
  0x25   :  { %2095 = vmatmul.msk.bf16.gmra.mxu1 %vm439_vm0, %v1824_v20  ;;  %v2168_v20 = vld [vmem:[%s4453_s0 + $0x154] sm:$0xf0] }
  0x2e   :  { %2112 = vmatmul.msk.bf16.gmra.mxu3 %vm439_vm0, %v1960_v1  ;;  %v1893_v1 = vld [vmem:[%s4453_s0 + $0xb8] sm:$0xf0] }
  0x2f   :  { %v1896_v6 = vor.u32 %v2147_v0, %v1893_v1 }
  0x31   :  { %549 = vmatmul.bf16.gmra.mxu0 %v1812_v23  ;;  %v1972_v23 = vor.u32 %v2168_v20, %v1971_v19  ;;  %v2149_v19 = vld [vmem:[%s4453_s0 + $0xc4] sm:$0xf]  ;;  %v1901_v20 = vld [vmem:[%s4453_s0 + $0xc8] sm:$0xf0] }
  0x32   :  { %629 = vmatmul.bf16.gmra.mxu2 %v1940_v39 }
  0x35   :  { %2096 = vmatmul.msk.bf16.gmra.mxu1 %vm439_vm0, %v1832_v28  ;;  %v1859_v28 = vld [vmem:[%s4453_s0 + $0x70] sm:$0xf] }
  0x36   :  { %v1860_v30 = vor.u32 %v2140_v29, %v1859_v28  ;;  %v2005_v28 = vld [vmem:[%s4453_s0 + $0x198] sm:$0xf0] }
  0x3e   :  { %2113 = vmatmul.msk.bf16.gmra.mxu3 %vm439_vm0, %v1968_v13 }
  0x41   :  { %554 = vmatmul.bf16.gmra.mxu0 %v1820_v32  ;;  %v1877_v32 = vld [vmem:[%s4453_s0 + $0x98] sm:$0xf0] }
  0x42   :  { %634 = vmatmul.bf16.gmra.mxu2 %v1948_v51  ;;  %v1880_v36 = vor.u32 %v2143_v31, %v1877_v32  ;;  %v2171_v51 = vld [vmem:[%s4453_s0 + $0x174] sm:$0xf] }
  0x45   :  { %2097 = vmatmul.msk.bf16.gmra.mxu1 %vm439_vm0, %v1840_v38  ;;  %v1981_v38 = vld [vmem:[%s4453_s0 + $0x168] sm:$0xf0] }
  0x46   :  { %v1984_v40 = vor.u32 %v2169_v35, %v1981_v38 }
  0x4e   :  { %2114 = vmatmul.msk.bf16.gmra.mxu3 %vm439_vm0, %v1976_v26  ;;  %v1904_v26 = vor.u32 %v2149_v19, %v1901_v20 }
  0x51   :  { %559 = vmatmul.bf16.gmra.mxu0 %v1828_v44  ;;  %v1868_v44 = vor.u32 %v2142_v43, %v1867_v42  ;;  %v1909_v42 = vld [vmem:[%s4453_s0 + $0xd8] sm:$0xf0] }
  0x52   :  { %639 = vmatmul.bf16.gmra.mxu2 %v1956_v63 }
  0x55   :  { %2098 = vmatmul.msk.bf16.gmra.mxu1 %vm439_vm0, %v1848_v50  ;;  %v2172_v50 = vld [vmem:[%s4453_s0 + $0x174] sm:$0xf0] }
  0x56   :  { %v1988_v53 = vor.u32 %v2172_v50, %v1987_v49  ;;  %v2178_v49 = vld [vmem:[%s4453_s0 + $0x1a4] sm:$0xf0] }
  0x5e   :  { %2115 = vmatmul.msk.bf16.gmra.mxu3 %vm439_vm0, %v1984_v40 }
  0x61   :  { %564 = vmatmul.bf16.gmra.mxu0 %v1836_v56  ;;  %v1992_v56 = vor.u32 %v2171_v51, %v1989_v54  ;;  %v2012_v51 = vor.u32 %v2178_v49, %v2011_v47  ;;  %v2029_v47 = vld [vmem:[%s4453_s0 + $0x1c8] sm:$0xf0] }
  0x62   :  { %644 = vmatmul.bf16.gmra.mxu2 %v1964_v11 }
  0x65   :  { %2099 = vmatmul.msk.bf16.gmra.mxu1 %vm439_vm0, %v1856_v62  ;;  %v1876_v62 = vor.u32 %v2144_v61, %v1875_v60 }
  0x6e   :  { %2116 = vmatmul.msk.bf16.gmra.mxu3 %vm439_vm0, %v1992_v56 }
  0x71   :  { %569 = vmatmul.bf16.gmra.mxu0 %v1844_v4  ;;  %v2174_v4 = vld [vmem:[%s4453_s0 + $0x184] sm:$0xf0] }
  0x72   :  { %649 = vmatmul.bf16.gmra.mxu2 %v1972_v23  ;;  %v1996_v7 = vor.u32 %v2174_v4, %v1995_v3  ;;  %v2003_v23 = vld [vmem:[%s4453_s0 + $0x190] sm:$0xf]  ;;  %v2153_v4 = vld [vmem:[%s4453_s0 + $0xe4] sm:$0xf] }
  0x75   :  { %2100 = vmatmul.msk.bf16.gmra.mxu1 %vm439_vm0, %v1864_v10  ;;  %v2000_v10 = vor.u32 %v2173_v5, %v1997_v8  ;;  %v1917_v5 = vld [vmem:[%s4453_s0 + $0xe8] sm:$0xf0] }
  0x7e   :  { %2117 = vmatmul.msk.bf16.gmra.mxu3 %vm439_vm0, %v2000_v10  ;;  %v2019_v10 = vld [vmem:[%s4453_s0 + $0x1b0] sm:$0xf] }
  0x81   :  { %574 = vmatmul.bf16.gmra.mxu0 %v1852_v16  ;;  %v2146_v16 = vld [vmem:[%s4453_s0 + $0xa4] sm:$0xf0] }
  0x82   :  { %v714_v25 = vpop.f32.mrf.mxu1  ;;  %654 = vmatmul.bf16.gmra.mxu2 %v1980_v37  ;;  %v1884_v17 = vor.u32 %v2146_v16, %v1883_v15  ;;  %v2148_v37 = vld [vmem:[%s4453_s0 + $0xb4] sm:$0xf0]  ;;  %v2179_v16 = vld [vmem:[%s4453_s0 + $0x1b4] sm:$0xf] }
  0x85   :  { %2101 = vmatmul.msk.bf16.gmra.mxu1 %vm439_vm0, %v1872_v22 }
  0x8a   :  { %v716_v27 = vpop.f32.mrf.mxu1 }
  0x91   :  { %579 = vmatmul.bf16.gmra.mxu0 %v1860_v30  ;;  %v799_v34 = vpop.f32.mrf.mxu3 }
  0x92   :  { %v719_v39 = vpop.f32.mrf.mxu1  ;;  %659 = vmatmul.bf16.gmra.mxu2 %v1988_v53  ;;  %v2013_v53 = vld [vmem:[%s4453_s0 + $0x1a8] sm:$0xf0] }
  0x95   :  { %2102 = vmatmul.msk.bf16.gmra.mxu1 %vm439_vm0, %v1880_v36  ;;  %v1891_v36 = vld [vmem:[%s4453_s0 + $0xb0] sm:$0xf] }
  0x9a   :  { %v721_v41 = vpop.f32.mrf.mxu1 }
  0x9e   :  { %v545_v45 = vpop.f32.mrf.mxu0 }
  0x9f   :  { %v2629_v48 = vadd.f32 %v714_v25, %v545_v45  ;;  %v2175_v25 = vld [vmem:[%s4453_s0 + $0x194] sm:$0xf]  ;;  %v801_v45 = vpop.f32.mrf.mxu3 }
  0xa0   :  { %v2008_v30 = vor.u32 %v2175_v25, %v2005_v28  ;;  %v2152_v28 = vld [vmem:[%s4453_s0 + $0xd4] sm:$0xf0] }
  0xa1   :  { %4543 = vst [vmem:[#allocation2_spill] sm:$0xff] %v2629_v48  ;;  %584 = vmatmul.bf16.gmra.mxu0 %v1868_v44 }
  0xa2   :  { %v724_v55 = vpop.f32.mrf.mxu1  ;;  %664 = vmatmul.bf16.gmra.mxu2 %v1996_v7  ;;  %2118 = vmatmul.msk.bf16.gmra.mxu3 %vm439_vm0, %v2008_v30 }
  0xa5   :  { %2103 = vmatmul.msk.bf16.gmra.mxu1 %vm439_vm0, %v1888_v52  ;;  %v2675_v12 = vpop.f32.mrf.mxu2  ;;  %v2177_v52 = vld [vmem:[%s4453_s0 + $0x1a4] sm:$0xf] }
  0xa6   :  { %v547_v57 = vpop.f32.mrf.mxu0 }
  0xa7   :  { %v2645_v58 = vadd.f32 %v716_v27, %v547_v57  ;;  %v2004_v27 = vor.u32 %v2176_v24, %v2003_v23  ;;  %v804_v60 = vpop.f32.mrf.mxu3 }
  0xa9   :  { %4544 = vst [vmem:[#allocation3_spill] sm:$0xff] %v2645_v58 }
  0xaa   :  { %v726_v59 = vpop.f32.mrf.mxu1 }
  0xad   :  { %v2691_v21 = vpop.f32.mrf.mxu2 }
  0xae   :  { %v550_v63 = vpop.f32.mrf.mxu0 }
  0xaf   :  { %v2659_v2 = vadd.f32 %v719_v39, %v550_v63  ;;  %v1892_v39 = vor.u32 %v2148_v37, %v1891_v36  ;;  %v2150_v63 = vld [vmem:[%s4453_s0 + $0xc4] sm:$0xf0]  ;;  %v806_v8 = vpop.f32.mrf.mxu3 }
  0xb1   :  { %4545 = vst [vmem:[#allocation4_spill] sm:$0xff] %v2659_v2  ;;  %589 = vmatmul.bf16.gmra.mxu0 %v1876_v62  ;;  %v1899_v62 = vld [vmem:[%s4453_s0 + $0xc0] sm:$0xf] }
  0xb2   :  { %v729_v9 = vpop.f32.mrf.mxu1  ;;  %669 = vmatmul.bf16.gmra.mxu2 %v2004_v27  ;;  %v1900_v1 = vor.u32 %v2150_v63, %v1899_v62  ;;  %v1907_v27 = vld [vmem:[%s4453_s0 + $0xd0] sm:$0xf] }
  0xb3   :  { %v1908_v30 = vor.u32 %v2152_v28, %v1907_v27  ;;  %v1923_v28 = vld [vmem:[%s4453_s0 + $0xf0] sm:$0xf] }
  0xb5   :  { %2104 = vmatmul.msk.bf16.gmra.mxu1 %vm439_vm0, %v1896_v6  ;;  %v630_v32 = vpop.f32.mrf.mxu2 }
  0xb6   :  { %v552_v11 = vpop.f32.mrf.mxu0  ;;  %v2717_v38 = vadd.f32 %v799_v34, %v630_v32  ;;  %v2155_v32 = vld [vmem:[%s4453_s0 + $0xf4] sm:$0xf]  ;;  %v1925_v34 = vld [vmem:[%s4453_s0 + $0xf8] sm:$0xf0] }
  0xb7   :  { %v2677_v13 = vadd.f32 %v721_v41, %v552_v11  ;;  %v2151_v41 = vld [vmem:[%s4453_s0 + $0xd4] sm:$0xf]  ;;  %v2180_v11 = vld [vmem:[%s4453_s0 + $0x1b4] sm:$0xf0]  ;;  %v809_v25 = vpop.f32.mrf.mxu3 }
  0xb8   :  { %v1912_v50 = vor.u32 %v2151_v41, %v1909_v42  ;;  %v2020_v15 = vor.u32 %v2180_v11, %v2019_v10  ;;  %v2182_v41 = vld [vmem:[%s4453_s0 + $0x1c4] sm:$0xf0]  ;;  %v1928_v42 = vor.u32 %v2155_v32, %v1925_v34  ;;  %v2184_v10 = vld [vmem:[%s4453_s0 + $0x1d4] sm:$0xf0] }
  0xb9   :  { %4546 = vst [vmem:[#allocation5_spill] sm:$0xff] %v2677_v13 }
  0xba   :  { %v731_v14 = vpop.f32.mrf.mxu1 }
  0xbd   :  { %v632_v43 = vpop.f32.mrf.mxu2 }
  0xbe   :  { %v555_v18 = vpop.f32.mrf.mxu0  ;;  %v2727_v46 = vadd.f32 %v801_v45, %v632_v43  ;;  %v2181_v45 = vld [vmem:[%s4453_s0 + $0x1c4] sm:$0xf] }
  0xbf   :  { %v2693_v22 = vadd.f32 %v724_v55, %v555_v18  ;;  %v2016_v55 = vor.u32 %v2177_v52, %v2013_v53  ;;  %v811_v37 = vpop.f32.mrf.mxu3 }
  0xc1   :  { %594 = vmatmul.bf16.gmra.mxu0 %v1884_v17  ;;  %2119 = vmatmul.msk.bf16.gmra.mxu3 %vm439_vm0, %v2016_v55  ;;  %v2021_v17 = vld [vmem:[%s4453_s0 + $0x1b8] sm:$0xf0] }
  0xc2   :  { %v734_v29 = vpop.f32.mrf.mxu1  ;;  %674 = vmatmul.bf16.gmra.mxu2 %v2012_v51  ;;  %v2024_v19 = vor.u32 %v2179_v16, %v2021_v17  ;;  %v2037_v16 = vld [vmem:[%s4453_s0 + $0x1d8] sm:$0xf0] }
  0xc5   :  { %2105 = vmatmul.msk.bf16.gmra.mxu1 %vm439_vm0, %v1904_v26  ;;  %v635_v57 = vpop.f32.mrf.mxu2 }
  0xc6   :  { %v557_v31 = vpop.f32.mrf.mxu0  ;;  %v2751_v0 = vadd.f32 %v804_v60, %v635_v57  ;;  %v2154_v57 = vld [vmem:[%s4453_s0 + $0xe4] sm:$0xf0] }
  0xc7   :  { %v2709_v33 = vadd.f32 %v726_v59, %v557_v31 }
  0xc9   :  { %4547 = vst [vmem:[#allocation6_spill] sm:$0xff] %v2709_v33 }
  0xca   :  { %v736_v35 = vpop.f32.mrf.mxu1 }
  0xcd   :  { %v637_v6 = vpop.f32.mrf.mxu2 }
  0xce   :  { %v560_v40 = vpop.f32.mrf.mxu0 }
  0xcf   :  { %v2725_v44 = vadd.f32 %v729_v9, %v560_v40  ;;  %v2761_v9 = vadd.f32 %v806_v8, %v637_v6  ;;  %v2027_v40 = vld [vmem:[%s4453_s0 + $0x1c0] sm:$0xf]  ;;  %v2035_v8 = vld [vmem:[%s4453_s0 + $0x1d0] sm:$0xf] }
  0xd0   :  { %v2028_v43 = vor.u32 %v2182_v41, %v2027_v40  ;;  %v2043_v41 = vld [vmem:[%s4453_s0 + $0x1e0] sm:$0xf] }
  0xd1   :  { %599 = vmatmul.bf16.gmra.mxu0 %v1892_v39  ;;  %2120 = vmatmul.msk.bf16.gmra.mxu3 %vm439_vm0, %v2024_v19 }
  0xd2   :  { %v739_v54 = vpop.f32.mrf.mxu1  ;;  %679 = vmatmul.bf16.gmra.mxu2 %v2020_v15  ;;  %v2183_v15 = vld [vmem:[%s4453_s0 + $0x1d4] sm:$0xf] }
  0xd5   :  { %2106 = vmatmul.msk.bf16.gmra.mxu1 %vm439_vm0, %v1912_v50  ;;  %v640_v23 = vpop.f32.mrf.mxu2  ;;  %v2032_v50 = vor.u32 %v2181_v45, %v2029_v47  ;;  %v2185_v45 = vld [vmem:[%s4453_s0 + $0x1e4] sm:$0xf]  ;;  %v2045_v47 = vld [vmem:[%s4453_s0 + $0x1e8] sm:$0xf0] }
  0xd6   :  { %v562_v56 = vpop.f32.mrf.mxu0 }
  0xd7   :  { %v2743_v59 = vadd.f32 %v731_v14, %v562_v56  ;;  %v1920_v14 = vor.u32 %v2153_v4, %v1917_v5  ;;  %v1915_v56 = vld [vmem:[%s4453_s0 + $0xe0] sm:$0xf] }
  0xd8   :  { %v1916_v62 = vor.u32 %v2154_v57, %v1915_v56 }
  0xd9   :  { %4548 = vst [vmem:[#allocation7_spill] sm:$0xff] %v2743_v59 }
  0xda   :  { %v741_v61 = vpop.f32.mrf.mxu1 }
  0xde   :  { %v565_v3 = vpop.f32.mrf.mxu0 }
  0xdf   :  { %v2759_v7 = vadd.f32 %v734_v29, %v565_v3  ;;  %v2785_v29 = vadd.f32 %v809_v25, %v640_v23 }
  0xe1   :  { %604 = vmatmul.bf16.gmra.mxu0 %v1900_v1  ;;  %4549 = vst [vmem:[#allocation8_spill] sm:$0xff] %v2785_v29  ;;  %2121 = vmatmul.msk.bf16.gmra.mxu3 %vm439_vm0, %v2032_v50  ;;  %v2157_v1 = vld [vmem:[%s4453_s0 + $0x104] sm:$0xf]  ;;  %v2048_v50 = vor.u32 %v2185_v45, %v2045_v47 }
  0xe2   :  { %v744_v18 = vpop.f32.mrf.mxu1  ;;  %684 = vmatmul.bf16.gmra.mxu2 %v2028_v43 }
  0xe5   :  { %2107 = vmatmul.msk.bf16.gmra.mxu1 %vm439_vm0, %v1920_v14  ;;  %v2036_v14 = vor.u32 %v2184_v10, %v2035_v8  ;;  %v2051_v8 = vld [vmem:[%s4453_s0 + $0x1f0] sm:$0xf] }
  0xe6   :  { %v567_v20 = vpop.f32.mrf.mxu0 }
  0xe7   :  { %v2777_v24 = vadd.f32 %v736_v35, %v567_v20  ;;  %v642_v35 = vpop.f32.mrf.mxu2 }
  0xe8   :  { %v2795_v39 = vadd.f32 %v811_v37, %v642_v35 }
  0xea   :  { %v746_v26 = vpop.f32.mrf.mxu1  ;;  %4551 = vst [vmem:[#allocation10_spill] sm:$0xff] %v2795_v39 }
  0xee   :  { %v570_v31 = vpop.f32.mrf.mxu0 }
  0xef   :  { %v2793_v36 = vadd.f32 %v739_v54, %v570_v31  ;;  %v645_v52 = vpop.f32.mrf.mxu2  ;;  %v814_v54 = vpop.f32.mrf.mxu3 }
  0xf0   :  { %v2819_v60 = vadd.f32 %v814_v54, %v645_v52 }
  0xf1   :  { %4550 = vst [vmem:[#allocation9_spill] sm:$0xff] %v2793_v36  ;;  %609 = vmatmul.bf16.gmra.mxu0 %v1908_v30  ;;  %v2156_v30 = vld [vmem:[%s4453_s0 + $0xf4] sm:$0xf0] }
  0xf2   :  { %v749_v49 = vpop.f32.mrf.mxu1  ;;  %4553 = vst [vmem:[#allocation12_spill] sm:$0xff] %v2819_v60  ;;  %689 = vmatmul.bf16.gmra.mxu2 %v2036_v14  ;;  %v1924_v32 = vor.u32 %v2156_v30, %v1923_v28  ;;  %v2053_v14 = vld [vmem:[%s4453_s0 + $0x1f8] sm:$0xf0] }
  0xf5   :  { %2108 = vmatmul.msk.bf16.gmra.mxu1 %vm439_vm0, %v1928_v42  ;;  %v2186_v42 = vld [vmem:[%s4453_s0 + $0x1e4] sm:$0xf0] }
  0xf6   :  { %v572_v51 = vpop.f32.mrf.mxu0  ;;  %v2044_v43 = vor.u32 %v2186_v42, %v2043_v41 }
  0xf7   :  { %v2811_v53 = vadd.f32 %v741_v61, %v572_v51  ;;  %v1933_v61 = vld [vmem:[%s4453_s0 + $0x108] sm:$0xf0]  ;;  %v647_v3 = vpop.f32.mrf.mxu2  ;;  %v816_v5 = vpop.f32.mrf.mxu3 }
  0xf8   :  { %v2829_v6 = vadd.f32 %v816_v5, %v647_v3  ;;  %v1936_v11 = vor.u32 %v2157_v1, %v1933_v61 }
  0xf9   :  { %4552 = vst [vmem:[#allocation11_spill] sm:$0xff] %v2811_v53 }
  0xfa   :  { %v751_v55 = vpop.f32.mrf.mxu1  ;;  %4554 = vst [vmem:[#allocation13_spill] sm:$0xff] %v2829_v6 }
  0xfe   :  { %v575_v63 = vpop.f32.mrf.mxu0 }
  0xff   :  { %v2827_v4 = vadd.f32 %v744_v18, %v575_v63  ;;  %v2040_v18 = vor.u32 %v2183_v15, %v2037_v16  ;;  %v650_v20 = vpop.f32.mrf.mxu2  ;;  %v819_v25 = vpop.f32.mrf.mxu3 }
 0x100   :  { %v2853_v31 = vadd.f32 %v819_v25, %v650_v20 }
 0x101   :  { %614 = vmatmul.bf16.gmra.mxu0 %v1916_v62  ;;  %2122 = vmatmul.msk.bf16.gmra.mxu3 %vm439_vm0, %v2040_v18 }
 0x102   :  { %v754_v17 = vpop.f32.mrf.mxu1  ;;  %4556 = vst [vmem:[#allocation15_spill] sm:$0xff] %v2853_v31  ;;  %694 = vmatmul.bf16.gmra.mxu2 %v2044_v43 }
 0x105   :  { %2109 = vmatmul.msk.bf16.gmra.mxu1 %vm439_vm0, %v1936_v11  ;;  %v2187_v11 = vld [vmem:[%s4453_s0 + $0x1f4] sm:$0xf] }
 0x106   :  { %v577_v19 = vpop.f32.mrf.mxu0  ;;  %v2056_v16 = vor.u32 %v2187_v11, %v2053_v14 }
 0x107   :  { %v2845_v23 = vadd.f32 %v746_v26, %v577_v19  ;;  %v652_v35 = vpop.f32.mrf.mxu2  ;;  %v821_v40 = vpop.f32.mrf.mxu3 }
 0x108   :  { %v2857_v26 = vadd.f32 %v821_v40, %v652_v35 }
 0x109   :  { %4555 = vst [vmem:[#allocation14_spill] sm:$0xff] %v2845_v23 }
 0x10a   :  { %v756_v27 = vpop.f32.mrf.mxu1  ;;  %4557 = vst [vmem:[#allocation16_spill] sm:$0xff] %v2857_v26 }
 0x10e   :  { %v580_v34 = vpop.f32.mrf.mxu0 }
 0x10f   :  { %v2855_v37 = vadd.f32 %v749_v49, %v580_v34  ;;  %v655_v52 = vpop.f32.mrf.mxu2  ;;  %v824_v56 = vpop.f32.mrf.mxu3 }
 0x110   :  { %v2874_v62 = vadd.f32 %v824_v56, %v655_v52 }
 0x111   :  { %619 = vmatmul.bf16.gmra.mxu0 %v1924_v32  ;;  %2123 = vmatmul.msk.bf16.gmra.mxu3 %vm439_vm0, %v2048_v50 }
 0x112   :  { %v759_v49 = vpop.f32.mrf.mxu1 }
 0x116   :  { %v582_v51 = vpop.f32.mrf.mxu0 }
 0x117   :  { %v2872_v54 = vadd.f32 %v751_v55, %v582_v51  ;;  %v657_v1 = vpop.f32.mrf.mxu2  ;;  %v826_v3 = vpop.f32.mrf.mxu3  ;;  %v2188_v55 = vld [vmem:[%s4453_s0 + $0x1f4] sm:$0xf0] }
 0x118   :  { %v2878_v5 = vadd.f32 %v826_v3, %v657_v1  ;;  %v2052_v10 = vor.u32 %v2188_v55, %v2051_v8 }
 0x119   :  { %4558 = vst [vmem:[#allocation17_spill] sm:$0xff] %v2872_v54 }
 0x11a   :  { %v761_v57 = vpop.f32.mrf.mxu1  ;;  %4559 = vst [vmem:[#allocation18_spill] sm:$0xff] %v2878_v5  ;;  %699 = vmatmul.bf16.gmra.mxu2 %v2052_v10 }
 0x11e   :  { %v585_v63 = vpop.f32.mrf.mxu0 }
 0x11f   :  { %v2876_v61 = vadd.f32 %v754_v17, %v585_v63  ;;  %v660_v18 = vpop.f32.mrf.mxu2  ;;  %v829_v20 = vpop.f32.mrf.mxu3 }
 0x120   :  { %v2897_v28 = vadd.f32 %v829_v20, %v660_v18  ;;  %v1009_v20 = vmul.f32 %v2645_v58, %v2645_v58 }
 0x121   :  { %2124 = vmatmul.msk.bf16.gmra.mxu3 %vm439_vm0, %v2056_v16 }
 0x122   :  { %v764_v15 = vpop.f32.mrf.mxu1  ;;  %4560 = vst [vmem:[#allocation19_spill] sm:$0xff] %v2897_v28 }
 0x126   :  { %v587_v17 = vpop.f32.mrf.mxu0 }
 0x127   :  { %v2893_v19 = vadd.f32 %v756_v27, %v587_v17  ;;  %v662_v32 = vpop.f32.mrf.mxu2  ;;  %v831_v35 = vpop.f32.mrf.mxu3 }
 0x128   :  { %v2901_v40 = vadd.f32 %v831_v35, %v662_v32  ;;  %v1008_v32 = vmul.f32 %v2629_v48, %v2629_v48  ;;  %v875_v35 = vsel %vm439_vm0, %v2645_v58, 0.0 }
 0x12a   :  { %v2895_v25 = vpop.f32.mrf.mxu1  ;;  %4562 = vst [vmem:[#allocation21_spill] sm:$0xff] %v2901_v40  ;;  %v1072_v58 = vsel %vm439_vm0, %v1008_v32, 0.0 }
 0x12e   :  { %v590_v30 = vpop.f32.mrf.mxu0 }
 0x12f   :  { %v2899_v34 = vadd.f32 %v759_v49, %v590_v30  ;;  %v665_v43 = vpop.f32.mrf.mxu2  ;;  %v834_v27 = vpop.f32.mrf.mxu3 }
 0x130   :  { %v2909_v50 = vadd.f32 %v834_v27, %v665_v43 }
 0x131   :  { %4561 = vst [vmem:[#allocation20_spill] sm:$0xff] %v2899_v34 }
 0x132   :  { %v2903_v41 = vpop.f32.mrf.mxu1  ;;  %4563 = vst [vmem:[#allocation22_spill] sm:$0xff] %v2909_v50 }
 0x136   :  { %v592_v42 = vpop.f32.mrf.mxu0 }
 0x137   :  { %v2905_v45 = vadd.f32 %v761_v57, %v592_v42  ;;  %v667_v52 = vpop.f32.mrf.mxu2  ;;  %v836_v49 = vpop.f32.mrf.mxu3  ;;  %v1010_v42 = vmul.f32 %v2659_v2, %v2659_v2 }
 0x138   :  { %v2913_v63 = vadd.f32 %v836_v49, %v667_v52  ;;  %v874_v52 = vsel %vm439_vm0, %v2629_v48, 0.0  ;;  %v1073_v49 = vsel %vm439_vm0, %v1009_v20, 0.0 }
 0x139   :  { %v1074_v20 = vadd.f32 %v1073_v49, %v1072_v58  ;;  %v1014_v58 = vmul.f32 %v2725_v44, %v2725_v44 }
 0x13a   :  { %v2907_v47 = vpop.f32.mrf.mxu1  ;;  %4564 = vst [vmem:[#allocation23_spill] sm:$0xff] %v2913_v63 }
 0x13e   :  { %v595_v51 = vpop.f32.mrf.mxu0 }
 0x13f   :  { %v2911_v56 = vadd.f32 %v764_v15, %v595_v51  ;;  %v670_v8 = vpop.f32.mrf.mxu2  ;;  %v839_v55 = vpop.f32.mrf.mxu3 }
 0x140   :  { %v2921_v10 = vadd.f32 %v839_v55, %v670_v8  ;;  %v877_v8 = vsel %vm439_vm0, %v2659_v2, 0.0  ;;  %v1011_v55 = vmul.f32 %v2677_v13, %v2677_v13 }
 0x142   :  { %v2915_v1 = vpop.f32.mrf.mxu1  ;;  %4565 = vst [vmem:[#allocation24_spill] sm:$0xff] %v2921_v10  ;;  %v1077_v2 = vsel %vm439_vm0, %v1011_v55, 0.0 }
 0x146   :  { %v2917_v3 = vpop.f32.mrf.mxu0 }
 0x147   :  { %v672_v14 = vpop.f32.mrf.mxu2  ;;  %v841_v16 = vpop.f32.mrf.mxu3 }
 0x148   :  { %v2925_v17 = vadd.f32 %v841_v16, %v672_v14  ;;  %v876_v14 = vadd.f32 %v875_v35, %v874_v52  ;;  %v1013_v35 = vmul.f32 %v2709_v33, %v2709_v33 }
 0x14a   :  { %v2919_v57 = vpop.f32.mrf.mxu1  ;;  %4566 = vst [vmem:[#allocation25_spill] sm:$0xff] %v2925_v17  ;;  %v1075_v17 = vsel %vm439_vm0, %v1010_v42, 0.0  ;;  %v878_v48 = vadd.f32 %v877_v8, %v876_v14  ;;  %v1081_v55 = vsel %vm439_vm0, %v1013_v35, 0.0  ;;  %v885_v14 = vsel %vm439_vm0, %v2725_v44, 0.0 }
 0x14b   :  { %v1076_v52 = vadd.f32 %v1075_v17, %v1074_v20 }
 0x14d   :  { %v1078_v49 = vadd.f32 %v1077_v2, %v1076_v52  ;;  %v1016_v2 = vmul.f32 %v2759_v7, %v2759_v7 }
 0x14e   :  { %v2923_v11 = vpop.f32.mrf.mxu0 }
 0x14f   :  { %v675_v43 = vpop.f32.mrf.mxu2  ;;  %v844_v27 = vpop.f32.mrf.mxu3 }
 0x150   :  { %v2941_v51 = vadd.f32 %v844_v27, %v675_v43  ;;  %v879_v43 = vsel %vm439_vm0, %v2677_v13, 0.0  ;;  %v1012_v27 = vmul.f32 %v2693_v22, %v2693_v22  ;;  %v883_v13 = vsel %vm439_vm0, %v2709_v33, 0.0 }
 0x151   :  { %v880_v32 = vadd.f32 %v879_v43, %v878_v48  ;;  %v1015_v48 = vmul.f32 %v2743_v59, %v2743_v59  ;;  %v887_v33 = vsel %vm439_vm0, %v2743_v59, 0.0  ;;  %v1018_v59 = vmul.f32 %v2793_v36, %v2793_v36 }
 0x152   :  { %v2927_v15 = vpop.f32.mrf.mxu1  ;;  %4567 = vst [vmem:[#allocation26_spill] sm:$0xff] %v2941_v51  ;;  %v881_v51 = vsel %vm439_vm0, %v2693_v22, 0.0  ;;  %v1079_v42 = vsel %vm439_vm0, %v1012_v27, 0.0  ;;  %v1083_v27 = vsel %vm439_vm0, %v1014_v58, 0.0  ;;  %v1087_v58 = vsel %vm439_vm0, %v1016_v2, 0.0 }
 0x153   :  { %v882_v8 = vadd.f32 %v881_v51, %v880_v32  ;;  %v1080_v17 = vadd.f32 %v1079_v42, %v1078_v49  ;;  %v1085_v52 = vsel %vm439_vm0, %v1015_v48, 0.0  ;;  %v889_v32 = vsel %vm439_vm0, %v2759_v7, 0.0 }
 0x155   :  { %v884_v43 = vadd.f32 %v883_v13, %v882_v8  ;;  %v1082_v51 = vadd.f32 %v1081_v55, %v1080_v17  ;;  %v1017_v13 = vmul.f32 %v2777_v24, %v2777_v24  ;;  %v891_v8 = vsel %vm439_vm0, %v2777_v24, 0.0 }
 0x156   :  { %v2929_v18 = vpop.f32.mrf.mxu0 }
 0x157   :  { %v886_v35 = vadd.f32 %v885_v14, %v884_v43  ;;  %v1084_v42 = vadd.f32 %v1083_v27, %v1082_v51  ;;  %v1089_v48 = vsel %vm439_vm0, %v1017_v13, 0.0  ;;  %v893_v43 = vsel %vm439_vm0, %v2793_v36, 0.0 }
 0x158   :  { %v897_v36 = vsel %vm439_vm0, %v2827_v4, 0.0 }
 0x159   :  { %v888_v49 = vadd.f32 %v887_v33, %v886_v35  ;;  %v1086_v55 = vadd.f32 %v1085_v52, %v1084_v42  ;;  %v1019_v33 = vmul.f32 %v2811_v53, %v2811_v53  ;;  %v1091_v35 = vsel %vm439_vm0, %v1018_v59, 0.0 }
 0x15a   :  { %v2933_v30 = vpop.f32.mrf.mxu1  ;;  %v895_v52 = vsel %vm439_vm0, %v2811_v53, 0.0  ;;  %v1022_v53 = vmul.f32 %v2855_v37, %v2855_v37 }
 0x15b   :  { %v890_v14 = vadd.f32 %v889_v32, %v888_v49  ;;  %v1088_v27 = vadd.f32 %v1087_v58, %v1086_v55  ;;  %v1020_v32 = vmul.f32 %v2827_v4, %v2827_v4  ;;  %v1093_v49 = vsel %vm439_vm0, %v1019_v33, 0.0 }
 0x15c   :  { %v1021_v58 = vmul.f32 %v2845_v23, %v2845_v23 }
 0x15d   :  { %v892_v2 = vadd.f32 %v891_v8, %v890_v14  ;;  %v1090_v42 = vadd.f32 %v1089_v48, %v1088_v27  ;;  %v1095_v59 = vsel %vm439_vm0, %v1020_v32, 0.0  ;;  %v899_v14 = vsel %vm439_vm0, %v2845_v23, 0.0 }
 0x15e   :  { %v2950_v16 = vpop.f32.mrf.mxu0  ;;  %v1097_v33 = vsel %vm439_vm0, %v1021_v58, 0.0  ;;  %v901_v27 = vsel %vm439_vm0, %v2855_v37, 0.0  ;;  %v903_v23 = vsel %vm439_vm0, %v2872_v54, 0.0 }
 0x15f   :  { %v894_v13 = vadd.f32 %v893_v43, %v892_v2  ;;  %v1092_v8 = vadd.f32 %v1091_v35, %v1090_v42  ;;  %v1023_v2 = vmul.f32 %v2872_v54, %v2872_v54  ;;  %v1026_v54 = vmul.f32 %v2899_v34, %v2899_v34 }
 0x161   :  { %v896_v55 = vadd.f32 %v895_v52, %v894_v13  ;;  %v1094_v48 = vadd.f32 %v1093_v49, %v1092_v8  ;;  %v1099_v13 = vsel %vm439_vm0, %v1022_v53, 0.0  ;;  %v1101_v8 = vsel %vm439_vm0, %v1023_v2, 0.0 }
 0x162   :  { %v2963_v10 = vpop.f32.mrf.mxu1 }
 0x163   :  { %v898_v43 = vadd.f32 %v897_v36, %v896_v55  ;;  %v1096_v35 = vadd.f32 %v1095_v59, %v1094_v48  ;;  %v1024_v36 = vmul.f32 %v2876_v61, %v2876_v61  ;;  %v905_v55 = vsel %vm439_vm0, %v2876_v61, 0.0 }
 0x164   :  { %v1025_v59 = vmul.f32 %v2893_v19, %v2893_v19 }
 0x165   :  { %v900_v52 = vadd.f32 %v899_v14, %v898_v43  ;;  %v1098_v49 = vadd.f32 %v1097_v33, %v1096_v35  ;;  %v1103_v53 = vsel %vm439_vm0, %v1024_v36, 0.0  ;;  %v907_v43 = vsel %vm439_vm0, %v2893_v19, 0.0 }
 0x166   :  { %v2975_v20 = vpop.f32.mrf.mxu0  ;;  %v1105_v2 = vsel %vm439_vm0, %v1025_v59, 0.0  ;;  %v909_v35 = vsel %vm439_vm0, %v2899_v34, 0.0  ;;  %v3054_v59 = vadd.f32 %v2903_v41, %v2923_v11 }
 0x167   :  { %v902_v58 = vadd.f32 %v901_v27, %v900_v52  ;;  %v1100_v14 = vadd.f32 %v1099_v13, %v1098_v49  ;;  %v1027_v52 = vmul.f32 %v2905_v45, %v2905_v45 }
 0x169   :  { %v904_v48 = vadd.f32 %v903_v23, %v902_v58  ;;  %v1102_v33 = vadd.f32 %v1101_v8, %v1100_v14  ;;  %v3045_v23 = vadd.f32 %v2895_v25, %v2917_v3  ;;  %v1107_v58 = vsel %vm439_vm0, %v1026_v54, 0.0 }
 0x16a   :  { %v2992_v17 = vpop.f32.mrf.mxu1  ;;  %v911_v8 = vsel %vm439_vm0, %v2905_v45, 0.0  ;;  %v1109_v25 = vsel %vm439_vm0, %v1027_v52, 0.0  ;;  %v913_v3 = vsel %vm439_vm0, %v2911_v56, 0.0 }
 0x16b   :  { %v906_v27 = vadd.f32 %v905_v55, %v904_v48  ;;  %v1104_v13 = vadd.f32 %v1103_v53, %v1102_v33  ;;  %v1028_v55 = vmul.f32 %v2911_v56, %v2911_v56  ;;  %v1029_v54 = vmul.f32 %v3045_v23, %v3045_v23 }
 0x16c   :  { %v3065_v53 = vadd.f32 %v2907_v47, %v2929_v18  ;;  %v915_v11 = vsel %vm439_vm0, %v3045_v23, 0.0  ;;  %v917_v47 = vsel %vm439_vm0, %v3054_v59, 0.0 }
 0x16d   :  { %v908_v36 = vadd.f32 %v907_v43, %v906_v27  ;;  %v1106_v14 = vadd.f32 %v1105_v2, %v1104_v13  ;;  %v1111_v41 = vsel %vm439_vm0, %v1028_v55, 0.0  ;;  %v1030_v27 = vmul.f32 %v3054_v59, %v3054_v59 }
 0x16e   :  { %v2999_v51 = vpop.f32.mrf.mxu0  ;;  %v3074_v2 = vadd.f32 %v2915_v1, %v2950_v16  ;;  %v1113_v13 = vsel %vm439_vm0, %v1029_v54, 0.0  ;;  %v1031_v18 = vmul.f32 %v3065_v53, %v3065_v53  ;;  %v919_v16 = vsel %vm439_vm0, %v3065_v53, 0.0 }
 0x16f   :  { %v910_v48 = vadd.f32 %v909_v35, %v908_v36  ;;  %v1108_v43 = vadd.f32 %v1107_v58, %v1106_v14  ;;  %v3083_v36 = vadd.f32 %v2919_v57, %v2975_v20  ;;  %v1115_v1 = vsel %vm439_vm0, %v1030_v27, 0.0 }
 0x170   :  { %v1032_v14 = vmul.f32 %v3074_v2, %v3074_v2  ;;  %v1117_v57 = vsel %vm439_vm0, %v1031_v18, 0.0  ;;  %v921_v20 = vsel %vm439_vm0, %v3074_v2, 0.0 }
 0x171   :  { %v912_v33 = vadd.f32 %v911_v8, %v910_v48  ;;  %v1110_v35 = vadd.f32 %v1109_v25, %v1108_v43  ;;  %v3092_v48 = vadd.f32 %v2927_v15, %v2999_v51  ;;  %v1033_v54 = vmul.f32 %v3083_v36, %v3083_v36 }
 0x172   :  { %v3021_v42 = vpop.f32.mrf.mxu1  ;;  %v1119_v27 = vsel %vm439_vm0, %v1032_v14, 0.0 }
 0x173   :  { %v914_v52 = vadd.f32 %v913_v3, %v912_v33  ;;  %v1112_v58 = vadd.f32 %v1111_v41, %v1110_v35  ;;  %v3102_v33 = vpop.f32.mrf.mxu2  ;;  %v3104_v41 = vpop.f32.mrf.mxu3  ;;  %v923_v35 = vsel %vm439_vm0, %v3083_v36, 0.0  ;;  %v925_v18 = vsel %vm439_vm0, %v3092_v48, 0.0 }
 0x175   :  { %v916_v8 = vadd.f32 %v915_v11, %v914_v52  ;;  %v1114_v25 = vadd.f32 %v1113_v13, %v1112_v58  ;;  %v1034_v52 = vmul.f32 %v3092_v48, %v3092_v48 }
 0x176   :  { %v612_v32 = vpop.f32.mrf.mxu0 }
 0x177   :  { %v918_v3 = vadd.f32 %v917_v47, %v916_v8  ;;  %v3100_v43 = vadd.f32 %v2933_v30, %v612_v32  ;;  %v1116_v11 = vadd.f32 %v1115_v1, %v1114_v25  ;;  %v1121_v47 = vsel %vm439_vm0, %v1033_v54, 0.0 }
 0x178   :  { %v1123_v25 = vsel %vm439_vm0, %v1034_v52, 0.0 }
 0x179   :  { %v920_v15 = vadd.f32 %v919_v16, %v918_v3  ;;  %v1118_v30 = vadd.f32 %v1117_v57, %v1116_v11  ;;  %v1035_v58 = vmul.f32 %v3100_v43, %v3100_v43 }
 0x17a   :  { %v3056_v34 = vpop.f32.mrf.mxu1 }
 0x17b   :  { %v922_v32 = vadd.f32 %v921_v20, %v920_v15  ;;  %v1120_v1 = vadd.f32 %v1119_v27, %v1118_v30  ;;  %v1125_v54 = vsel %vm439_vm0, %v1035_v58, 0.0  ;;  %v3138_v52 = vpop.f32.mrf.mxu2 }
 0x17d   :  { %v924_v16 = vadd.f32 %v923_v35, %v922_v32  ;;  %v1122_v57 = vadd.f32 %v1121_v47, %v1120_v1 }
 0x17e   :  { %v615_v49 = vpop.f32.mrf.mxu0 }
 0x17f   :  { %v3112_v13 = vadd.f32 %v2963_v10, %v615_v49  ;;  %v927_v10 = vsel %vm439_vm0, %v3100_v43, 0.0  ;;  %v926_v20 = vadd.f32 %v925_v18, %v924_v16  ;;  %v1124_v11 = vadd.f32 %v1123_v25, %v1122_v57 }
 0x181   :  { %v1036_v49 = vmul.f32 %v3112_v13, %v3112_v13  ;;  %v928_v15 = vadd.f32 %v927_v10, %v926_v20  ;;  %v1126_v32 = vadd.f32 %v1125_v54, %v1124_v11 }
 0x182   :  { %v794_v51 = vpop.f32.mrf.mxu1 }
 0x183   :  { %v1127_v27 = vsel %vm439_vm0, %v1036_v49, 0.0  ;;  %v3145_v58 = vadd.f32 %v794_v51, %v2675_v12 }
 0x185   :  { %v1040_v12 = vmul.f32 %v3145_v58, %v3145_v58 }
 0x186   :  { %v617_v55 = vpop.f32.mrf.mxu0 }
 0x187   :  { %v3120_v8 = vadd.f32 %v2992_v17, %v617_v55  ;;  %v929_v17 = vsel %vm439_vm0, %v3112_v13, 0.0 }
 0x188   :  { %v930_v47 = vadd.f32 %v929_v17, %v928_v15 }
 0x189   :  { %v1037_v55 = vmul.f32 %v3120_v8, %v3120_v8  ;;  %v931_v35 = vsel %vm439_vm0, %v3120_v8, 0.0 }
 0x18a   :  { %v796_v18 = vpop.f32.mrf.mxu1  ;;  %v932_v25 = vadd.f32 %v931_v35, %v930_v47  ;;  %v1135_v47 = vsel %vm439_vm0, %v1040_v12, 0.0 }
 0x18b   :  { %v1129_v1 = vsel %vm439_vm0, %v1037_v55, 0.0  ;;  %v3151_v49 = vadd.f32 %v796_v18, %v2691_v21  ;;  %v937_v21 = vsel %vm439_vm0, %v3145_v58, 0.0 }
 0x18d   :  { %v939_v18 = vsel %vm439_vm0, %v3151_v49, 0.0 }
 0x18e   :  { %v620_v14 = vpop.f32.mrf.mxu0 }
 0x18f   :  { %v3128_v3 = vadd.f32 %v3021_v42, %v620_v14  ;;  %v3140_v42 = vpop.f32.mrf.mxu3  ;;  %v1128_v14 = vadd.f32 %v1127_v27, %v1126_v32  ;;  %v1042_v32 = vmul.f32 %v2717_v38, %v2717_v38 }
 0x191   :  { %v1038_v30 = vmul.f32 %v3128_v3, %v3128_v3  ;;  %v933_v16 = vsel %vm439_vm0, %v3128_v3, 0.0  ;;  %v1130_v54 = vadd.f32 %v1129_v1, %v1128_v14  ;;  %v3173_v1 = vpop.f32.mrf.mxu2  ;;  %v1139_v12 = vsel %vm439_vm0, %v1042_v32, 0.0 }
 0x192   :  { %v934_v17 = vadd.f32 %v933_v16, %v932_v25 }
 0x193   :  { %v1131_v57 = vsel %vm439_vm0, %v1038_v30, 0.0 }
 0x194   :  { %v1132_v11 = vadd.f32 %v1131_v57, %v1130_v54  ;;  %v1043_v57 = vmul.f32 %v2727_v46, %v2727_v46 }
 0x196   :  { %v622_v10 = vpop.f32.mrf.mxu0 }
 0x197   :  { %v3155_v20 = vadd.f32 %v3056_v34, %v622_v10  ;;  %v1041_v34 = vmul.f32 %v3151_v49, %v3151_v49  ;;  %v3175_v16 = vpop.f32.mrf.mxu3  ;;  %v941_v10 = vsel %vm439_vm0, %v2717_v38, 0.0 }
 0x199   :  { %v935_v51 = vsel %vm439_vm0, %v3155_v20, 0.0  ;;  %v1039_v55 = vmul.f32 %v3155_v20, %v3155_v20  ;;  %v1137_v54 = vsel %vm439_vm0, %v1041_v34, 0.0  ;;  %v1045_v34 = vmul.f32 %v2761_v9, %v2761_v9 }
 0x19a   :  { %v936_v15 = vadd.f32 %v935_v51, %v934_v17 }
 0x19b   :  { %v1133_v27 = vsel %vm439_vm0, %v1039_v55, 0.0  ;;  %v943_v55 = vsel %vm439_vm0, %v2727_v46, 0.0 }
 0x19c   :  { %v938_v35 = vadd.f32 %v937_v21, %v936_v15  ;;  %v1134_v30 = vadd.f32 %v1133_v27, %v1132_v11  ;;  %v1044_v11 = vmul.f32 %v2751_v0, %v2751_v0  ;;  %v1141_v27 = vsel %vm439_vm0, %v1043_v57, 0.0 }
 0x19d   :  { %v1145_v57 = vsel %vm439_vm0, %v1045_v34, 0.0 }
 0x19e   :  { %v940_v14 = vadd.f32 %v939_v18, %v938_v35  ;;  %v1136_v25 = vadd.f32 %v1135_v47, %v1134_v30  ;;  %v945_v35 = vsel %vm439_vm0, %v2751_v0, 0.0  ;;  %v1143_v32 = vsel %vm439_vm0, %v1044_v11, 0.0 }
 0x19f   :  { %v947_v18 = vsel %vm439_vm0, %v2761_v9, 0.0 }
 0x1a0   :  { %v942_v17 = vadd.f32 %v941_v10, %v940_v14  ;;  %v1138_v51 = vadd.f32 %v1137_v54, %v1136_v25  ;;  %v1046_v14 = vmul.f32 %v2785_v29, %v2785_v29  ;;  %v949_v54 = vsel %vm439_vm0, %v2785_v29, 0.0 }
 0x1a2   :  { %v944_v15 = vadd.f32 %v943_v55, %v942_v17  ;;  %v1140_v21 = vadd.f32 %v1139_v12, %v1138_v51  ;;  %v1047_v17 = vmul.f32 %v2795_v39, %v2795_v39  ;;  %v3202_v51 = vpop.f32.mrf.mxu2  ;;  %v3204_v12 = vpop.f32.mrf.mxu3 }
 0x1a4   :  { %v946_v30 = vadd.f32 %v945_v35, %v944_v15  ;;  %v1142_v47 = vadd.f32 %v1141_v27, %v1140_v21  ;;  %v1147_v15 = vsel %vm439_vm0, %v1046_v14, 0.0  ;;  %v951_v21 = vsel %vm439_vm0, %v2795_v39, 0.0 }
 0x1a5   :  { %v1048_v27 = vmul.f32 %v2819_v60, %v2819_v60 }
 0x1a6   :  { %v948_v25 = vadd.f32 %v947_v18, %v946_v30  ;;  %v1144_v10 = vadd.f32 %v1143_v32, %v1142_v47  ;;  %v1149_v30 = vsel %vm439_vm0, %v1047_v17, 0.0  ;;  %v953_v47 = vsel %vm439_vm0, %v2819_v60, 0.0 }
 0x1a7   :  { %v1049_v32 = vmul.f32 %v2829_v6, %v2829_v6  ;;  %v1151_v14 = vsel %vm439_vm0, %v1048_v27, 0.0 }
 0x1a8   :  { %v950_v55 = vadd.f32 %v949_v54, %v948_v25  ;;  %v1146_v11 = vadd.f32 %v1145_v57, %v1144_v10  ;;  %v955_v10 = vsel %vm439_vm0, %v2829_v6, 0.0  ;;  %v1050_v57 = vmul.f32 %v2853_v31, %v2853_v31  ;;  %v3506_v6 = vld [vmem:[%s4454_s2 + $0x8] sm:$0xff]  }
 0x1a9   :  { %v1153_v17 = vsel %vm439_vm0, %v1049_v32, 0.0 }
 0x1aa   :  { %v952_v35 = vadd.f32 %v951_v21, %v950_v55  ;;  %v1148_v34 = vadd.f32 %v1147_v15, %v1146_v11  ;;  %v957_v11 = vsel %vm439_vm0, %v2853_v31, 0.0  ;;  %v1051_v15 = vmul.f32 %v2857_v26, %v2857_v26  ;;  %v4596_v31 = vld [vmem:[#allocation23_spill] sm:$0xff] }
 0x1ab   :  { %v1155_v27 = vsel %vm439_vm0, %v1050_v57, 0.0  ;;  %v1053_v57 = vmul.f32 %v2878_v5, %v2878_v5 }
 0x1ac   :  { %v954_v18 = vadd.f32 %v953_v47, %v952_v35  ;;  %v1150_v25 = vadd.f32 %v1149_v30, %v1148_v34  ;;  %v959_v34 = vsel %vm439_vm0, %v2857_v26, 0.0  ;;  %v1052_v30 = vmul.f32 %v2874_v62, %v2874_v62  ;;  %v3231_v47 = vpop.f32.mrf.mxu2 }
 0x1ad   :  { %v1054_v26 = vmul.f32 %v2897_v28, %v2897_v28 }
 0x1ae   :  { %v956_v54 = vadd.f32 %v955_v10, %v954_v18  ;;  %v1152_v55 = vadd.f32 %v1151_v14, %v1150_v25  ;;  %v3233_v18 = vpop.f32.mrf.mxu3  ;;  %v1157_v14 = vsel %vm439_vm0, %v1051_v15, 0.0  ;;  %v961_v10 = vsel %vm439_vm0, %v2874_v62, 0.0 }
 0x1af   :  { %v1161_v15 = vsel %vm439_vm0, %v1053_v57, 0.0 }
 0x1b0   :  { %v958_v21 = vadd.f32 %v957_v11, %v956_v54  ;;  %v1154_v35 = vadd.f32 %v1153_v17, %v1152_v55  ;;  %v1159_v17 = vsel %vm439_vm0, %v1052_v30, 0.0  ;;  %v963_v11 = vsel %vm439_vm0, %v2878_v5, 0.0 }
 0x1b1   :  { %v1163_v30 = vsel %vm439_vm0, %v1054_v26, 0.0 }
 0x1b2   :  { %v960_v32 = vadd.f32 %v959_v34, %v958_v21  ;;  %v1156_v25 = vadd.f32 %v1155_v27, %v1154_v35  ;;  %v965_v27 = vsel %vm439_vm0, %v2897_v28, 0.0  ;;  %v1055_v34 = vmul.f32 %v2901_v40, %v2901_v40 }
 0x1b4   :  { %v1158_v54 = vadd.f32 %v1157_v14, %v1156_v25  ;;  %v962_v55 = vadd.f32 %v961_v10, %v960_v32  ;;  %v967_v14 = vsel %vm439_vm0, %v2901_v40, 0.0  ;;  %v1056_v10 = vmul.f32 %v2909_v50, %v2909_v50 }
 0x1b5   :  { %v1165_v57 = vsel %vm439_vm0, %v1055_v34, 0.0  ;;  %v4568_v34 = vld [vmem:[#allocation24_spill] sm:$0xff] }
 0x1b6   :  { %v964_v21 = vadd.f32 %v963_v11, %v962_v55  ;;  %v1160_v35 = vadd.f32 %v1159_v17, %v1158_v54  ;;  %v969_v17 = vsel %vm439_vm0, %v2909_v50, 0.0  ;;  %v690_v11 = vpop.f32.mrf.mxu2  ;;  %v859_v28 = vpop.f32.mrf.mxu3 }
 0x1b8   :  { %v966_v25 = vadd.f32 %v965_v27, %v964_v21  ;;  %v1162_v32 = vadd.f32 %v1161_v15, %v1160_v35  ;;  %v1057_v21 = vmul.f32 %v2913_v63, %v2913_v63  ;;  %v1167_v15 = vsel %vm439_vm0, %v1056_v10, 0.0 }
 0x1b9   :  { %v971_v27 = vsel %vm439_vm0, %v2913_v63, 0.0 }
 0x1ba   :  { %v968_v55 = vadd.f32 %v967_v14, %v966_v25  ;;  %v1164_v54 = vadd.f32 %v1163_v30, %v1162_v32  ;;  %v1169_v32 = vsel %vm439_vm0, %v1057_v21, 0.0  ;;  %v973_v30 = vsel %vm439_vm0, %v4568_v34, 0.0 }
 0x1bb   :  { %v1058_v14 = vmul.f32 %v4568_v34, %v4568_v34 }
 0x1bc   :  { %v970_v35 = vadd.f32 %v969_v17, %v968_v55  ;;  %v1166_v26 = vadd.f32 %v1165_v57, %v1164_v54  ;;  %v4569_v54 = vld [vmem:[#allocation25_spill] sm:$0xff] }
 0x1bd   :  { %v1171_v55 = vsel %vm439_vm0, %v1058_v14, 0.0  ;;  %v975_v10 = vsel %vm439_vm0, %v4569_v54, 0.0  ;;  %v1059_v57 = vmul.f32 %v4569_v54, %v4569_v54 }
 0x1be   :  { %v972_v40 = vadd.f32 %v971_v27, %v970_v35  ;;  %v1168_v25 = vadd.f32 %v1167_v15, %v1166_v26  ;;  %v692_v26 = vpop.f32.mrf.mxu2  ;;  %v861_v21 = vpop.f32.mrf.mxu3  ;;  %v4570_v27 = vld [vmem:[#allocation26_spill] sm:$0xff] }
 0x1bf   :  { %v1173_v15 = vsel %vm439_vm0, %v1059_v57, 0.0  ;;  %v977_v63 = vsel %vm439_vm0, %v4570_v27, 0.0 }
 0x1c0   :  { %v974_v50 = vadd.f32 %v973_v30, %v972_v40  ;;  %v1170_v5 = vadd.f32 %v1169_v32, %v1168_v25  ;;  %v1060_v40 = vmul.f32 %v4570_v27, %v4570_v27  ;;  %v3280_v25 = vadd.f32 %v3104_v41, %v3102_v33 }
 0x1c2   :  { %v976_v17 = vadd.f32 %v975_v10, %v974_v50  ;;  %v1172_v35 = vadd.f32 %v1171_v55, %v1170_v5  ;;  %4571 = vst [vmem:[#allocation24_spill] sm:$0xff] %v3280_v25  ;;  %v1175_v14 = vsel %vm439_vm0, %v1060_v40, 0.0  ;;  %v979_v5 = vsel %vm439_vm0, %v3280_v25, 0.0 }
 0x1c3   :  { %v1061_v50 = vmul.f32 %v3280_v25, %v3280_v25  ;;  %v3289_v55 = vadd.f32 %v3140_v42, %v3138_v52 }
 0x1c4   :  { %v978_v32 = vadd.f32 %v977_v63, %v976_v17  ;;  %v1174_v30 = vadd.f32 %v1173_v15, %v1172_v35  ;;  %v3298_v17 = vadd.f32 %v3175_v16, %v3173_v1 }
 0x1c5   :  { %4572 = vst [vmem:[#allocation27_spill] sm:$0xff] %v3289_v55  ;;  %v1177_v33 = vsel %vm439_vm0, %v1061_v50, 0.0  ;;  %v981_v63 = vsel %vm439_vm0, %v3289_v55, 0.0  ;;  %v1062_v41 = vmul.f32 %v3289_v55, %v3289_v55  ;;  %v3316_v50 = vadd.f32 %v3233_v18, %v3231_v47 }
 0x1c6   :  { %v980_v10 = vadd.f32 %v979_v5, %v978_v32  ;;  %v1176_v57 = vadd.f32 %v1175_v14, %v1174_v30  ;;  %v695_v27 = vpop.f32.mrf.mxu2  ;;  %v864_v54 = vpop.f32.mrf.mxu3  ;;  %4573 = vst [vmem:[#allocation28_spill] sm:$0xff] %v3298_v17  ;;  %v983_v42 = vsel %vm439_vm0, %v3298_v17, 0.0  ;;  %v1063_v40 = vmul.f32 %v3298_v17, %v3298_v17 }
 0x1c7   :  { %v1179_v52 = vsel %vm439_vm0, %v1062_v41, 0.0  ;;  %v3307_v32 = vadd.f32 %v3204_v12, %v3202_v51  ;;  %v987_v12 = vsel %vm439_vm0, %v3316_v50, 0.0  ;;  %v1065_v41 = vmul.f32 %v3316_v50, %v3316_v50 }
 0x1c8   :  { %v982_v35 = vadd.f32 %v981_v63, %v980_v10  ;;  %v1178_v15 = vadd.f32 %v1177_v33, %v1176_v57  ;;  %v1181_v5 = vsel %vm439_vm0, %v1063_v40, 0.0  ;;  %v3330_v40 = vadd.f32 %v861_v21, %v692_v26 }
 0x1c9   :  { %4574 = vst [vmem:[#allocation29_spill] sm:$0xff] %v3307_v32  ;;  %v985_v1 = vsel %vm439_vm0, %v3307_v32, 0.0  ;;  %v1064_v16 = vmul.f32 %v3307_v32, %v3307_v32 }
 0x1ca   :  { %v984_v30 = vadd.f32 %v983_v42, %v982_v35  ;;  %v1180_v14 = vadd.f32 %v1179_v52, %v1178_v15  ;;  %v3323_v35 = vadd.f32 %v859_v28, %v690_v11  ;;  %v1185_v42 = vsel %vm439_vm0, %v1065_v41, 0.0 }
 0x1cb   :  { %v1183_v51 = vsel %vm439_vm0, %v1064_v16, 0.0  ;;  %v991_v28 = vsel %vm439_vm0, %v3330_v40, 0.0  ;;  %v1067_v11 = vmul.f32 %v3330_v40, %v3330_v40 }
 0x1cc   :  { %v986_v10 = vadd.f32 %v985_v1, %v984_v30  ;;  %v1182_v57 = vadd.f32 %v1181_v5, %v1180_v14  ;;  %4575 = vst [vmem:[#allocation30_spill] sm:$0xff] %v3323_v35  ;;  %v989_v47 = vsel %vm439_vm0, %v3323_v35, 0.0  ;;  %v1066_v18 = vmul.f32 %v3323_v35, %v3323_v35 }
 0x1ce   :  { %v697_v33 = vpop.f32.mrf.mxu2  ;;  %v866_v63 = vpop.f32.mrf.mxu3  ;;  %v1184_v15 = vadd.f32 %v1183_v51, %v1182_v57  ;;  %v988_v52 = vadd.f32 %v987_v12, %v986_v10  ;;  %v1187_v16 = vsel %vm439_vm0, %v1066_v18, 0.0  ;;  %v3337_v10 = vadd.f32 %v864_v54, %v695_v27 }
 0x1cf   :  { %v1189_v12 = vsel %vm439_vm0, %v1067_v11, 0.0  ;;  %v3344_v41 = vadd.f32 %v866_v63, %v697_v33 }
 0x1d0   :  { %v1186_v30 = vadd.f32 %v1185_v42, %v1184_v15  ;;  %v990_v14 = vadd.f32 %v989_v47, %v988_v52  ;;  %4576 = vst [vmem:[#allocation31_spill] sm:$0xff] %v3337_v10  ;;  %v993_v26 = vsel %vm439_vm0, %v3337_v10, 0.0  ;;  %v1068_v21 = vmul.f32 %v3337_v10, %v3337_v10 }
 0x1d1   :  { %4577 = vst [vmem:[#allocation32_spill] sm:$0xff] %v3344_v41  ;;  %v995_v54 = vsel %vm439_vm0, %v3344_v41, 0.0  ;;  %v1069_v27 = vmul.f32 %v3344_v41, %v3344_v41 }
 0x1d2   :  { %v1188_v57 = vadd.f32 %v1187_v16, %v1186_v30  ;;  %v992_v51 = vadd.f32 %v991_v28, %v990_v14  ;;  %v1191_v42 = vsel %vm439_vm0, %v1068_v21, 0.0 }
 0x1d3   :  { %v1193_v28 = vsel %vm439_vm0, %v1069_v27, 0.0 }
 0x1d4   :  { %v1190_v15 = vadd.f32 %v1189_v12, %v1188_v57  ;;  %v994_v52 = vadd.f32 %v993_v26, %v992_v51 }
 0x1d6   :  { %v700_v5 = vpop.f32.mrf.mxu2  ;;  %v869_v1 = vpop.f32.mrf.mxu3  ;;  %v1192_v18 = vadd.f32 %v1191_v42, %v1190_v15  ;;  %v996_v30 = vadd.f32 %v995_v54, %v994_v52 }
 0x1d7   :  { %v3351_v47 = vadd.f32 %v869_v1, %v700_v5  ;;  %v4601_v17 = vld [vmem:[#allocation31_spill] sm:$0xff] }
 0x1d8   :  { %v1194_v57 = vadd.f32 %v1193_v28, %v1192_v18 }
 0x1d9   :  { %4578 = vst [vmem:[#allocation33_spill] sm:$0xff] %v3351_v47  ;;  %v997_v33 = vsel %vm439_vm0, %v3351_v47, 0.0  ;;  %v1070_v63 = vmul.f32 %v3351_v47, %v3351_v47 }
 0x1da   :  { %v998_v51 = vadd.f32 %v997_v33, %v996_v30 }
 0x1db   :  { %v1195_v12 = vsel %vm439_vm0, %v1070_v63, 0.0 }
 0x1dc   :  { %v1196_v26 = vadd.f32 %v1195_v12, %v1194_v57 }
 0x1de   :  { %v702_v14 = vpop.f32.mrf.mxu2  ;;  %v871_v16 = vpop.f32.mrf.mxu3 }
 0x1df   :  { %v3358_v11 = vadd.f32 %v871_v16, %v702_v14 }
 0x1e0   :  { %v4603_v32 = vld [vmem:[#allocation33_spill] sm:$0xff] }
 0x1e1   :  { %4579 = vst [vmem:[#allocation34_spill] sm:$0xff] %v3358_v11  ;;  %v999_v5 = vsel %vm439_vm0, %v3358_v11, 0.0  ;;  %v1071_v1 = vmul.f32 %v3358_v11, %v3358_v11 }
 0x1e2   :  { %v1000_v21 = vadd.f32 %v999_v5, %v998_v51 }
 0x1e3   :  { %v1197_v15 = vsel %vm439_vm0, %v1071_v1, 0.0 }
 0x1e4   :  { %v1001_v52 = vrot.slane %v1000_v21, 4  ;;  %v1198_v42 = vadd.f32 %v1197_v15, %v1196_v26  ;;  %v4580_v15 = vld [vmem:[#allocation2_spill] sm:$0xff] }
 0x1e6   :  { %v1002_v54 = vadd.f32 %v1001_v52, %v1000_v21  ;;  %v1199_v27 = vrot.slane %v1198_v42, 4 }
 0x1e8   :  { %v1003_v14 = vrot.slane %v1002_v54, 2  ;;  %v1200_v16 = vadd.f32 %v1199_v27, %v1198_v42  ;;  %v4604_v25 = vld [vmem:[#allocation34_spill] sm:$0xff] }
 0x1ea   :  { %v1004_v18 = vadd.f32 %v1003_v14, %v1002_v54  ;;  %v1201_v30 = vrot.slane %v1200_v16, 2  ;;  %v4583_v54 = vld [vmem:[#allocation5_spill] sm:$0xff]  ;;  %v4590_v14 = vld [vmem:[#allocation20_spill] sm:$0xff] }
 0x1ec   :  { %v1005_v28 = vrot.slane %v1004_v18, 1  ;;  %v1202_v33 = vadd.f32 %v1201_v30, %v1200_v16  ;;  %v4584_v16 = vld [vmem:[#allocation6_spill] sm:$0xff] }
 0x1ed   :  { %v4588_v30 = vld [vmem:[#allocation14_spill] sm:$0xff] }
 0x1ee   :  { %v1006_v63 = vadd.f32 %v1005_v28, %v1004_v18  ;;  %v1203_v47 = vrot.slane %v1202_v33, 1  ;;  %v4585_v28 = vld [vmem:[#allocation7_spill] sm:$0xff] }
 0x1ef   :  { %v4593_v18 = vld [vmem:[#allocation19_spill] sm:$0xff] }
 0x1f0   :  { %v3366_v41 = vmul.f32 0.001953125, %v1006_v63  ;;  %v1204_v10 = vadd.f32 %v1203_v47, %v1202_v33  ;;  %v4589_v63 = vld [vmem:[#allocation17_spill] sm:$0xff] }
 0x1f1   :  { %v4597_v33 = vld [vmem:[#allocation25_spill] sm:$0xff] }
 0x1f2   :  { %v1205_v11 = vmul.f32 0.001953125, %v1204_v10  ;;  %v1206_v57 = vmul.f32 %v3366_v41, %v3366_v41  ;;  %v4581_v10 = vld [vmem:[#allocation3_spill] sm:$0xff]  ;;  %v4610_v55 = vsub.f32 %v4584_v16, %v3366_v41 }
 0x1f3   :  { %4600 = vst [vmem:[#allocation3_spill] sm:$0xff] %v3506_v6  ;;  %v4606_v39 = vsub.f32 %v4581_v10, %v3366_v41 }
 0x1f4   :  { %v1207_v51 = vsub.f32 %v1205_v11, %v1206_v57  ;;  %v4582_v11 = vld [vmem:[#allocation4_spill] sm:$0xff] }
 0x1f5   :  { %v4591_v57 = vld [vmem:[#allocation16_spill] sm:$0xff]  ;;  %v4607_v47 = vsub.f32 %v4582_v11, %v3366_v41 }
 0x1f6   :  { %v1208_v12 = vmax.f32 %v1207_v51, 0.0  ;;  %v4586_v51 = vld [vmem:[#allocation9_spill] sm:$0xff] }
 0x1f8   :  { %v3370_v5 = vadd.f32 1e-05, %v1208_v12 }
 0x1fa   :  { %2366 = vrsqrt.f32 %v3370_v5  ;;  %vm1280_vm2 = vweird.f32 %v3370_v5 }
 0x200   :  { %v3373_v1 = vpop.eup %2366 }
 0x201   :  { %v1275_v26 = vmul.f32 %v3373_v1, %v3370_v5  ;;  %vm1281_vm1 = vweird.f32 %v3373_v1  ;;  %v4605_v5 = vsub.f32 %v4580_v15, %v3366_v41  ;;  %v4608_v15 = vsub.f32 %v4583_v54, %v3366_v41 }
 0x202   :  { %vm1282_vm3 = vmor %vm1280_vm2, %vm1281_vm1 }
 0x203   :  { %v1276_v21 = vmul.f32 %v3373_v1, %v1275_v26  ;;  %v4587_v26 = vld [vmem:[#allocation11_spill] sm:$0xff] }
 0x205   :  { %v1277_v42 = vmul.f32 0.5, %v1276_v21  ;;  %v4594_v21 = vld [vmem:[#allocation21_spill] sm:$0xff] }
 0x207   :  { %v1278_v27 = vsub.f32 1.5, %v1277_v42  ;;  %v4595_v42 = vld [vmem:[#allocation22_spill] sm:$0xff] }
 0x209   :  { %v1279_v52 = vmul.f32 %v3373_v1, %v1278_v27  ;;  %v3492_v27 = vld [vmem:[%s4454_s2] sm:$0xff]  }
 0x20a   :  { %4599 = vst [vmem:[#allocation2_spill] sm:$0xff] %v3492_v27 }
 0x20b   :  { %v3501_v60 = vsel %vm1282_vm3, %v3373_v1, %v1279_v52  ;;  %v4602_v1 = vld [vmem:[#allocation32_spill] sm:$0xff] }
 0x20c   :  { %v3527_v35 = vmul.f32 %v3501_v60, %v4605_v5  ;;  %v3533_v12 = vmul.f32 %v3501_v60, %v4606_v39  ;;  %v3541_v29 = vmul.f32 %v3501_v60, %v4607_v47  ;;  %v3547_v5 = vmul.f32 %v3501_v60, %v4608_v15 }
 0x20d   :  { %v4609_v39 = vsub.f32 %v2693_v22, %v3366_v41  ;;  %v3559_v11 = vmul.f32 %v3501_v60, %v4610_v55  ;;  %v4611_v47 = vsub.f32 %v2725_v44, %v3366_v41  ;;  %v4612_v15 = vsub.f32 %v4585_v28, %v3366_v41 }
 0x20e   :  { %v4614_v55 = vsub.f32 %v2777_v24, %v3366_v41 }
 0x20f   :  { %v3553_v10 = vmul.f32 %v3501_v60, %v4609_v39  ;;  %v3565_v54 = vmul.f32 %v3501_v60, %v4611_v47  ;;  %v3571_v22 = vmul.f32 %v3501_v60, %v4612_v15  ;;  %v4613_v39 = vsub.f32 %v2759_v7, %v3366_v41 }
 0x210   :  { %v3583_v44 = vmul.f32 %v3501_v60, %v4614_v55  ;;  %v4615_v47 = vsub.f32 %v4586_v51, %v3366_v41  ;;  %v4616_v15 = vsub.f32 %v4587_v26, %v3366_v41  ;;  %v4618_v55 = vsub.f32 %v4588_v30, %v3366_v41 }
 0x211   :  { %v3577_v16 = vmul.f32 %v3501_v60, %v4613_v39  ;;  %v4617_v39 = vsub.f32 %v2827_v4, %v3366_v41 }
 0x212   :  { %v3589_v28 = vmul.f32 %v3501_v60, %v4615_v47  ;;  %v3595_v7 = vmul.f32 %v3501_v60, %v4616_v15  ;;  %v3607_v51 = vmul.f32 %v3501_v60, %v4618_v55  ;;  %v4619_v47 = vsub.f32 %v2855_v37, %v3366_v41 }
 0x213   :  { %v3601_v24 = vmul.f32 %v3501_v60, %v4617_v39  ;;  %v4620_v15 = vsub.f32 %v4589_v63, %v3366_v41  ;;  %v4621_v39 = vsub.f32 %v2876_v61, %v3366_v41  ;;  %v4622_v55 = vsub.f32 %v2893_v19, %v3366_v41 }
 0x214   :  { %v3613_v26 = vmul.f32 %v3501_v60, %v4619_v47  ;;  %v4623_v47 = vsub.f32 %v4590_v14, %v3366_v41 }
 0x215   :  { %v3619_v4 = vmul.f32 %v3501_v60, %v4620_v15  ;;  %v3625_v30 = vmul.f32 %v3501_v60, %v4621_v39  ;;  %v3631_v37 = vmul.f32 %v3501_v60, %v4622_v55  ;;  %v4624_v15 = vsub.f32 %v2905_v45, %v3366_v41 }
 0x216   :  { %v3637_v63 = vmul.f32 %v3501_v60, %v4623_v47  ;;  %v4625_v39 = vsub.f32 %v2911_v56, %v3366_v41  ;;  %v4626_v55 = vsub.f32 %v3045_v23, %v3366_v41  ;;  %v4627_v47 = vsub.f32 %v3054_v59, %v3366_v41 }
 0x217   :  { %v3643_v61 = vmul.f32 %v3501_v60, %v4624_v15  ;;  %v4628_v15 = vsub.f32 %v3065_v53, %v3366_v41 }
 0x218   :  { %v3649_v19 = vmul.f32 %v3501_v60, %v4625_v39  ;;  %v3655_v14 = vmul.f32 %v3501_v60, %v4626_v55  ;;  %v3661_v45 = vmul.f32 %v3501_v60, %v4627_v47  ;;  %v4629_v39 = vsub.f32 %v3074_v2, %v3366_v41 }
 0x219   :  { %v3667_v56 = vmul.f32 %v3501_v60, %v4628_v15  ;;  %v4630_v55 = vsub.f32 %v3083_v36, %v3366_v41  ;;  %v4631_v47 = vsub.f32 %v3092_v48, %v3366_v41  ;;  %v4632_v15 = vsub.f32 %v3100_v43, %v3366_v41 }
 0x21a   :  { %v3673_v23 = vmul.f32 %v3501_v60, %v4629_v39  ;;  %v4633_v39 = vsub.f32 %v3112_v13, %v3366_v41 }
 0x21b   :  { %v3679_v59 = vmul.f32 %v3501_v60, %v4630_v55  ;;  %v3685_v53 = vmul.f32 %v3501_v60, %v4631_v47  ;;  %v3691_v2 = vmul.f32 %v3501_v60, %v4632_v15  ;;  %v4634_v55 = vsub.f32 %v3120_v8, %v3366_v41 }
 0x21c   :  { %v3697_v36 = vmul.f32 %v3501_v60, %v4633_v39  ;;  %v4635_v47 = vsub.f32 %v3128_v3, %v3366_v41  ;;  %v4637_v15 = vsub.f32 %v3155_v20, %v3366_v41  ;;  %v4638_v39 = vsub.f32 %v3145_v58, %v3366_v41 }
 0x21d   :  { %v3703_v48 = vmul.f32 %v3501_v60, %v4634_v55  ;;  %v4639_v55 = vsub.f32 %v3151_v49, %v3366_v41 }
 0x21e   :  { %v3709_v43 = vmul.f32 %v3501_v60, %v4635_v47  ;;  %v3715_v13 = vmul.f32 %v3501_v60, %v4637_v15  ;;  %v3721_v8 = vmul.f32 %v3501_v60, %v4638_v39  ;;  %v4640_v47 = vsub.f32 %v2717_v38, %v3366_v41 }
 0x21f   :  { %v3727_v3 = vmul.f32 %v3501_v60, %v4639_v55  ;;  %v4641_v15 = vsub.f32 %v2727_v46, %v3366_v41  ;;  %v4642_v39 = vsub.f32 %v2751_v0, %v3366_v41  ;;  %v4643_v55 = vsub.f32 %v2761_v9, %v3366_v41 }
 0x220   :  { %4636 = vst [vmem:[#allocation4_spill] sm:$0xff] %v3709_v43  ;;  %v3733_v20 = vmul.f32 %v3501_v60, %v4640_v47  ;;  %v4645_v47 = vld [vmem:[#allocation8_spill] sm:$0xff] }
 0x221   :  { %v3739_v58 = vmul.f32 %v3501_v60, %v4641_v15  ;;  %v3745_v49 = vmul.f32 %v3501_v60, %v4642_v39  ;;  %v3751_v38 = vmul.f32 %v3501_v60, %v4643_v55  ;;  %v4646_v52 = vsub.f32 %v4645_v47, %v3366_v41  ;;  %v4648_v15 = vld [vmem:[#allocation10_spill] sm:$0xff]  ;;  %v4650_v39 = vld [vmem:[#allocation12_spill] sm:$0xff]  ;;  %v4653_v55 = vld [vmem:[#allocation13_spill] sm:$0xff] }
 0x222   :  { %v4649_v27 = vsub.f32 %v4648_v15, %v3366_v41  ;;  %v4651_v6 = vsub.f32 %v4650_v39, %v3366_v41 }
 0x223   :  { %4644 = vst [vmem:[#allocation5_spill] sm:$0xff] %v3751_v38  ;;  %v3757_v46 = vmul.f32 %v3501_v60, %v4646_v52  ;;  %v4654_v38 = vsub.f32 %v4653_v55, %v3366_v41  ;;  %v4656_v52 = vld [vmem:[#allocation15_spill] sm:$0xff] }
 0x224   :  { %v3763_v0 = vmul.f32 %v3501_v60, %v4649_v27  ;;  %v3769_v9 = vmul.f32 %v3501_v60, %v4651_v6  ;;  %v4659_v27 = vsub.f32 %v4591_v57, %v3366_v41  ;;  %v4661_v6 = vsub.f32 %v2874_v62, %v3366_v41 }
 0x225   :  { %4647 = vst [vmem:[#allocation6_spill] sm:$0xff] %v3757_v46  ;;  %v3775_v47 = vmul.f32 %v3501_v60, %v4654_v38  ;;  %v4657_v46 = vsub.f32 %v4656_v52, %v3366_v41  ;;  %v4663_v38 = vld [vmem:[#allocation18_spill] sm:$0xff] }
 0x226   :  { %4652 = vst [vmem:[#allocation7_spill] sm:$0xff] %v3769_v9  ;;  %v3787_v39 = vmul.f32 %v3501_v60, %v4659_v27  ;;  %v3793_v55 = vmul.f32 %v3501_v60, %v4661_v6  ;;  %v4668_v27 = vsub.f32 %v4594_v21, %v3366_v41  ;;  %v4670_v6 = vsub.f32 %v4595_v42, %v3366_v41 }
 0x227   :  { %4655 = vst [vmem:[#allocation9_spill] sm:$0xff] %v3775_v47  ;;  %v3781_v15 = vmul.f32 %v3501_v60, %v4657_v46  ;;  %v4664_v47 = vsub.f32 %v4663_v38, %v3366_v41  ;;  %v4666_v46 = vsub.f32 %v4593_v18, %v3366_v41 }
 0x228   :  { %4660 = vst [vmem:[#allocation14_spill] sm:$0xff] %v3787_v39  ;;  %v3811_v62 = vmul.f32 %v3501_v60, %v4668_v27  ;;  %v3817_v38 = vmul.f32 %v3501_v60, %v4670_v6  ;;  %v4676_v27 = vsub.f32 %v4597_v33, %v3366_v41  ;;  %v4678_v6 = vld [vmem:[#allocation26_spill] sm:$0xff]  ;;  %v4719_v39 = vmax.f32 %v3533_v12, 0.0  ;;  %v2330_v12 = vld [vmem:[%s4454_s2 + $0x28] sm:$0xff]  }
 0x229   :  { %4658 = vst [vmem:[#allocation11_spill] sm:$0xff] %v3781_v15  ;;  %v3799_v52 = vmul.f32 %v3501_v60, %v4664_v47  ;;  %v3805_v57 = vmul.f32 %v3501_v60, %v4666_v46  ;;  %v4672_v47 = vsub.f32 %v4596_v31, %v3366_v41  ;;  %v4674_v46 = vsub.f32 %v4568_v34, %v3366_v41 }
 0x22a   :  { %4662 = vst [vmem:[#allocation17_spill] sm:$0xff] %v3793_v55  ;;  %v3835_v42 = vmul.f32 %v3501_v60, %v4676_v27  ;;  %v4687_v27 = vld [vmem:[#allocation28_spill] sm:$0xff]  ;;  %v4715_v55 = vld [vmem:[#allocation3_spill] sm:$0xff] }
 0x22b   :  { %4665 = vst [vmem:[#allocation20_spill] sm:$0xff] %v3799_v52  ;;  %v3823_v18 = vmul.f32 %v3501_v60, %v4672_v47  ;;  %v3829_v21 = vmul.f32 %v3501_v60, %v4674_v46  ;;  %v4681_v47 = vld [vmem:[#allocation24_spill] sm:$0xff]  ;;  %v4684_v46 = vld [vmem:[#allocation27_spill] sm:$0xff]  ;;  %v2328_v52 = vld [vmem:[%s4454_s2 + $0x18] sm:$0xff]  }
 0x22c   :  { %4667 = vst [vmem:[#allocation16_spill] sm:$0xff] %v3805_v57  ;;  %v4729_v57 = vmax.f32 %v3565_v54, 0.0  ;;  %v4732_v54 = vmax.f32 %v3583_v44, 0.0 }
 0x22d   :  { %4669 = vst [vmem:[#allocation19_spill] sm:$0xff] %v3811_v62 }
 0x22e   :  { %4671 = vst [vmem:[#allocation21_spill] sm:$0xff] %v3817_v38  ;;  %v4679_v38 = vsub.f32 %v4678_v6, %v3366_v41 }
 0x22f   :  { %4673 = vst [vmem:[#allocation22_spill] sm:$0xff] %v3823_v18  ;;  %v4682_v18 = vsub.f32 %v4681_v47, %v3366_v41 }
 0x230   :  { %4675 = vst [vmem:[#allocation23_spill] sm:$0xff] %v3829_v21  ;;  %v3841_v31 = vmul.f32 %v3501_v60, %v4679_v38  ;;  %v4685_v21 = vsub.f32 %v4684_v46, %v3366_v41  ;;  %v4690_v38 = vld [vmem:[#allocation29_spill] sm:$0xff] }
 0x231   :  { %4677 = vst [vmem:[#allocation25_spill] sm:$0xff] %v3835_v42  ;;  %v3847_v34 = vmul.f32 %v3501_v60, %v4682_v18  ;;  %v4688_v42 = vsub.f32 %v4687_v27, %v3366_v41  ;;  %v4693_v18 = vsub.f32 %v3316_v50, %v3366_v41 }
 0x232   :  { %4680 = vst [vmem:[#allocation31_spill] sm:$0xff] %v3841_v31  ;;  %v3853_v33 = vmul.f32 %v3501_v60, %v4685_v21  ;;  %v4691_v31 = vsub.f32 %v4690_v38, %v3366_v41  ;;  %v4694_v21 = vld [vmem:[#allocation30_spill] sm:$0xff] }
 0x233   :  { %4683 = vst [vmem:[#allocation32_spill] sm:$0xff] %v3847_v34  ;;  %v3859_v6 = vmul.f32 %v3501_v60, %v4688_v42  ;;  %v3871_v46 = vmul.f32 %v3501_v60, %v4693_v18  ;;  %v4697_v42 = vsub.f32 %v3330_v40, %v3366_v41  ;;  %v4701_v18 = vsub.f32 %v4602_v1, %v3366_v41  ;;  %v4707_v1 = vld [vmem:[#allocation5_spill] sm:$0xff] }
 0x234   :  { %4686 = vst [vmem:[#allocation33_spill] sm:$0xff] %v3853_v33  ;;  %v3865_v47 = vmul.f32 %v3501_v60, %v4691_v31  ;;  %v4695_v33 = vsub.f32 %v4694_v21, %v3366_v41  ;;  %v4699_v31 = vsub.f32 %v4601_v17, %v3366_v41  ;;  %v2212_v34 = vunpack.c.l.bf16 %v2328_v52 }
 0x235   :  { %4689 = vst [vmem:[#allocation34_spill] sm:$0xff] %v3859_v6  ;;  %v3883_v38 = vmul.f32 %v3501_v60, %v4697_v42  ;;  %v3895_v21 = vmul.f32 %v3501_v60, %v4701_v18  ;;  %v4705_v42 = vsub.f32 %v4604_v25, %v3366_v41  ;;  %v2213_v6 = vunpack.c.h.bf16 %v2328_v52 }
 0x236   :  { %4692 = vst [vmem:[#allocation8_spill] sm:$0xff] %v3865_v47  ;;  %v3877_v27 = vmul.f32 %v3501_v60, %v4695_v33  ;;  %v3889_v50 = vmul.f32 %v3501_v60, %v4699_v31  ;;  %v4703_v33 = vsub.f32 %v4603_v32, %v3366_v41  ;;  %v1348_v31 = vmax.f32 %v3527_v35, 0.0  ;;  %v4711_v9 = vld [vmem:[#allocation22_spill] sm:$0xff] }
 0x237   :  { %4698 = vst [vmem:[#allocation12_spill] sm:$0xff] %v3883_v38  ;;  %v3907_v17 = vmul.f32 %v3501_v60, %v4705_v42  ;;  %v2205_v32 = vunpack.c.h.bf16 %v4715_v55  ;;  %v4717_v35 = vld [vmem:[#allocation2_spill] sm:$0xff]  ;;  %v4728_v42 = vmax.f32 %v3559_v11, 0.0 }
 0x238   :  { %4696 = vst [vmem:[#allocation10_spill] sm:$0xff] %v3877_v27  ;;  %v3901_v40 = vmul.f32 %v3501_v60, %v4703_v33  ;;  %v4718_v33 = vunpack.c.l.bf16 %v4717_v35  ;;  %v4720_v43 = vunpack.c.h.bf16 %v4717_v35  ;;  %v1546_v35 = vadd.f32 %v2212_v34, %v4729_v57  ;;  %v2333_v47 = vld [vmem:[%s4454_s2 + $0x40] sm:$0xff]  }
 0x239   :  { %4700 = vst [vmem:[#allocation13_spill] sm:$0xff] %v3889_v50  ;;  %v4708_v50 = vld [vmem:[#allocation6_spill] sm:$0xff]  ;;  %v2232_v44 = vunpack.c.l.bf16 %v2333_v47 }
 0x23a   :  { %4702 = vst [vmem:[#allocation15_spill] sm:$0xff] %v3895_v21  ;;  %v1540_v41 = vadd.f32 %v4718_v33, %v1348_v31  ;;  %v2329_v21 = vld [vmem:[%s4454_s2 + $0x20] sm:$0xff]   ;;  %v1541_v25 = vadd.f32 %v4720_v43, %v4719_v39  ;;  %v4721_v31 = vmax.f32 %v3541_v29, 0.0  ;;  %v4722_v33 = vunpack.c.l.bf16 %v4715_v55  ;;  %v2331_v29 = vld [vmem:[%s4454_s2 + $0x30] sm:$0xff]  }
 0x23b   :  { %4704 = vst [vmem:[#allocation18_spill] sm:$0xff] %v3901_v40  ;;  %v2327_v40 = vld [vmem:[%s4454_s2 + $0x10] sm:$0xff]   ;;  %v4724_v43 = vmax.f32 %v3547_v5, 0.0  ;;  %v2216_v60 = vunpack.c.l.bf16 %v2329_v21  ;;  %v4726_v55 = vmax.f32 %v3553_v10, 0.0  ;;  %v2225_v11 = vunpack.c.h.bf16 %v2331_v29 }
 0x23c   :  { %4706 = vst [vmem:[#allocation26_spill] sm:$0xff] %v3907_v17  ;;  %v2208_v62 = vunpack.c.l.bf16 %v2327_v40  ;;  %v2209_v15 = vunpack.c.h.bf16 %v2327_v40  ;;  %v1542_v18 = vadd.f32 %v4722_v33, %v4721_v31  ;;  %v1604_v33 = vmax.f32 %v1540_v41, 0.0 }
 0x23d   :  { %v1543_v39 = vadd.f32 %v2205_v32, %v4724_v43  ;;  %v2217_v40 = vunpack.c.h.bf16 %v2329_v21  ;;  %v1605_v27 = vmax.f32 %v1541_v25, 0.0  ;;  %v2220_v32 = vunpack.c.l.bf16 %v2330_v12  ;;  %v2332_v43 = vld [vmem:[%s4454_s2 + $0x38] sm:$0xff]  }
 0x23e   :  { %v1544_v31 = vadd.f32 %v2208_v62, %v4726_v55  ;;  %v1545_v38 = vadd.f32 %v2209_v15, %v4728_v42  ;;  %v1606_v10 = vmax.f32 %v1542_v18, 0.0  ;;  %v2221_v62 = vunpack.c.h.bf16 %v2330_v12 }
 0x23f   :  { %v2224_v41 = vunpack.c.l.bf16 %v2331_v29  ;;  %v4730_v55 = vmax.f32 %v3571_v22, 0.0  ;;  %v1607_v52 = vmax.f32 %v1543_v39, 0.0  ;;  %v4731_v15 = vmax.f32 %v3577_v16, 0.0  ;;  %v2334_v16 = vld [vmem:[%s4454_s2 + $0x48] sm:$0xff]  }
 0x240   :  { %v1608_v42 = vmax.f32 %v1544_v31, 0.0  ;;  %v1668_v5 = vpack.c.bf16 %v1604_v33, %v1604_v33  ;;  %v2228_v17 = vunpack.c.l.bf16 %v2332_v43  ;;  %v1549_v57 = vadd.f32 %v2217_v40, %v4732_v54 }
 0x241   :  { %v1547_v21 = vadd.f32 %v2213_v6, %v4730_v55  ;;  %v1548_v25 = vadd.f32 %v2216_v60, %v4731_v15  ;;  %v1609_v34 = vmax.f32 %v1545_v38, 0.0  ;;  %v1669_v18 = vpack.c.bf16 %v1605_v27, %v1605_v27 }
 0x242   :  { %v2229_v12 = vunpack.c.h.bf16 %v2332_v43  ;;  %v4733_v22 = vmax.f32 %v3589_v28, 0.0  ;;  %v1610_v39 = vmax.f32 %v1546_v35, 0.0  ;;  %v1670_v29 = vpack.c.bf16 %v1606_v10, %v1606_v10  ;;  %1733 = vst.msk [vmem:[%s4455_s3] sm:$0xf] %vm1732_vm4, %v1668_v5 }
 0x243   :  { %v4734_v60 = vmax.f32 %v3595_v7, 0.0  ;;  %v1611_v33 = vmax.f32 %v1547_v21, 0.0  ;;  %v1671_v55 = vpack.c.bf16 %v1607_v52, %v1607_v52  ;;  %v4735_v38 = vmax.f32 %v3601_v24, 0.0  ;;  %v2335_v7 = vld [vmem:[%s4454_s2 + $0x50] sm:$0xff]   ;;  %1734 = vst.msk [vmem:[%s4455_s3 + $0x4] sm:$0xf] %vm1732_vm4, %v1669_v18 }
 0x244   :  { %v1550_v6 = vadd.f32 %v2220_v32, %v4733_v22  ;;  %v1612_v40 = vmax.f32 %v1548_v25, 0.0  ;;  %v1672_v43 = vpack.c.bf16 %v1608_v42, %v1608_v42  ;;  %v2233_v28 = vunpack.c.h.bf16 %v2333_v47  ;;  %1735 = vst.msk [vmem:[%s4455_s3 + $0x8] sm:$0xf] %vm1732_vm4, %v1670_v29  ;;  %v2336_v21 = vld [vmem:[%s4454_s2 + $0x58] sm:$0xff]   ;;  %v2337_v18 = vld [vmem:[%s4454_s2 + $0x60] sm:$0xff]  }
 0x245   :  { %v1551_v31 = vadd.f32 %v2221_v62, %v4734_v60  ;;  %v1552_v27 = vadd.f32 %v2224_v41, %v4735_v38  ;;  %v4736_v35 = vmax.f32 %v3607_v51, 0.0  ;;  %v1613_v32 = vmax.f32 %v1549_v57, 0.0  ;;  %1736 = vst.msk [vmem:[%s4455_s3 + $0xc] sm:$0xf] %vm1732_vm4, %v1671_v55 }
 0x246   :  { %v1673_v10 = vpack.c.bf16 %v1609_v34, %v1609_v34  ;;  %v2236_v24 = vunpack.c.l.bf16 %v2334_v16  ;;  %v4737_v62 = vmax.f32 %v3613_v26, 0.0  ;;  %v1614_v5 = vmax.f32 %v1550_v6, 0.0  ;;  %1737 = vst.msk [vmem:[%s4455_s3 + $0x10] sm:$0xf] %vm1732_vm4, %v1672_v43 }
 0x247   :  { %v1553_v52 = vadd.f32 %v2225_v11, %v4736_v35  ;;  %v1674_v47 = vpack.c.bf16 %v1610_v39, %v1610_v39  ;;  %v2237_v51 = vunpack.c.h.bf16 %v2334_v16  ;;  %v4738_v11 = vmax.f32 %v3619_v4, 0.0  ;;  %v2339_v35 = vld [vmem:[%s4454_s2 + $0x70] sm:$0xff]  }
 0x248   :  { %v1554_v41 = vadd.f32 %v2228_v17, %v4737_v62  ;;  %v1615_v25 = vmax.f32 %v1551_v31, 0.0  ;;  %v1675_v42 = vpack.c.bf16 %v1611_v33, %v1611_v33  ;;  %v2240_v26 = vunpack.c.l.bf16 %v2335_v7  ;;  %1738 = vst.msk [vmem:[%s4455_s3 + $0x14] sm:$0xf] %vm1732_vm4, %v1673_v10  ;;  %v2338_v33 = vld [vmem:[%s4454_s2 + $0x68] sm:$0xff]  }
 0x249   :  { %v1555_v15 = vadd.f32 %v2229_v12, %v4738_v11  ;;  %v4739_v17 = vmax.f32 %v3625_v30, 0.0  ;;  %v1616_v57 = vmax.f32 %v1552_v27, 0.0  ;;  %v1676_v34 = vpack.c.bf16 %v1612_v40, %v1612_v40  ;;  %1739 = vst.msk [vmem:[%s4455_s3 + $0x18] sm:$0xf] %vm1732_vm4, %v1674_v47 }
 0x24a   :  { %v2241_v4 = vunpack.c.h.bf16 %v2335_v7  ;;  %v4740_v12 = vmax.f32 %v3631_v37, 0.0  ;;  %v1617_v6 = vmax.f32 %v1553_v52, 0.0  ;;  %v1677_v39 = vpack.c.bf16 %v1613_v32, %v1613_v32  ;;  %1740 = vst.msk [vmem:[%s4455_s3 + $0x1c] sm:$0xf] %vm1732_vm4, %v1675_v42 }
 0x24b   :  { %v1556_v54 = vadd.f32 %v2232_v44, %v4739_v17  ;;  %v2244_v30 = vunpack.c.l.bf16 %v2336_v21  ;;  %v4741_v29 = vmax.f32 %v3637_v63, 0.0  ;;  %v1618_v60 = vmax.f32 %v1554_v41, 0.0  ;;  %1741 = vst.msk [vmem:[%s4455_s3 + $0x20] sm:$0xf] %vm1732_vm4, %v1676_v34 }
 0x24c   :  { %v1557_v22 = vadd.f32 %v2233_v28, %v4740_v12  ;;  %v1678_v31 = vpack.c.bf16 %v1614_v5, %v1614_v5  ;;  %v2245_v37 = vunpack.c.h.bf16 %v2336_v21  ;;  %v4742_v55 = vmax.f32 %v3643_v61, 0.0  ;;  %1742 = vst.msk [vmem:[%s4455_s3 + $0x24] sm:$0xf] %vm1732_vm4, %v1677_v39 }
 0x24d   :  { %v1558_v16 = vadd.f32 %v2236_v24, %v4741_v29  ;;  %v1619_v38 = vmax.f32 %v1555_v15, 0.0  ;;  %v1679_v27 = vpack.c.bf16 %v1615_v25, %v1615_v25  ;;  %v2248_v63 = vunpack.c.l.bf16 %v2337_v18  ;;  %v2342_v29 = vld [vmem:[%s4454_s2 + $0x88] sm:$0xff]  }
 0x24e   :  { %v1559_v44 = vadd.f32 %v2237_v51, %v4742_v55  ;;  %v4743_v40 = vmax.f32 %v3649_v19, 0.0  ;;  %v1620_v28 = vmax.f32 %v1556_v54, 0.0  ;;  %v1680_v7 = vpack.c.bf16 %v1616_v57, %v1616_v57  ;;  %1743 = vst.msk [vmem:[%s4455_s3 + $0x28] sm:$0xf] %vm1732_vm4, %v1678_v31  ;;  %v2340_v51 = vld [vmem:[%s4454_s2 + $0x78] sm:$0xff]   ;;  %v2341_v57 = vld [vmem:[%s4454_s2 + $0x80] sm:$0xff]  }
 0x24f   :  { %v2249_v61 = vunpack.c.h.bf16 %v2337_v18  ;;  %v4744_v52 = vmax.f32 %v3655_v14, 0.0  ;;  %v1621_v10 = vmax.f32 %v1557_v22, 0.0  ;;  %v1681_v24 = vpack.c.bf16 %v1617_v6, %v1617_v6  ;;  %1744 = vst.msk [vmem:[%s4455_s3 + $0x2c] sm:$0xf] %vm1732_vm4, %v1679_v27  ;;  %v2343_v27 = vld [vmem:[%s4454_s2 + $0x90] sm:$0xff]  }
 0x250   :  { %v1560_v43 = vadd.f32 %v2240_v26, %v4743_v40  ;;  %v2252_v19 = vunpack.c.l.bf16 %v2338_v33  ;;  %v4745_v62 = vmax.f32 %v3661_v45, 0.0  ;;  %v1622_v5 = vmax.f32 %v1558_v16, 0.0  ;;  %1745 = vst.msk [vmem:[%s4455_s3 + $0x30] sm:$0xf] %vm1732_vm4, %v1680_v7  ;;  %v4753_v7 = vld [vmem:[#allocation4_spill] sm:$0xff] }
 0x251   :  { %v1561_v32 = vadd.f32 %v2241_v4, %v4744_v52  ;;  %v1682_v47 = vpack.c.bf16 %v1618_v60, %v1618_v60  ;;  %v2253_v14 = vunpack.c.h.bf16 %v2338_v33  ;;  %v4746_v21 = vmax.f32 %v3667_v56, 0.0  ;;  %1746 = vst.msk [vmem:[%s4455_s3 + $0x34] sm:$0xf] %vm1732_vm4, %v1681_v24 }
 0x252   :  { %v1562_v41 = vadd.f32 %v2244_v30, %v4745_v62  ;;  %v1623_v15 = vmax.f32 %v1559_v44, 0.0  ;;  %v1683_v25 = vpack.c.bf16 %v1619_v38, %v1619_v38  ;;  %v2256_v45 = vunpack.c.l.bf16 %v2339_v35 }
 0x253   :  { %v1563_v11 = vadd.f32 %v2245_v37, %v4746_v21  ;;  %v4747_v42 = vmax.f32 %v3673_v23, 0.0  ;;  %v1624_v17 = vmax.f32 %v1560_v43, 0.0  ;;  %v1684_v54 = vpack.c.bf16 %v1620_v28, %v1620_v28  ;;  %1747 = vst.msk [vmem:[%s4455_s3 + $0x38] sm:$0xf] %vm1732_vm4, %v1682_v47 }
 0x254   :  { %v2257_v56 = vunpack.c.h.bf16 %v2339_v35  ;;  %v4748_v34 = vmax.f32 %v3679_v59, 0.0  ;;  %v1625_v18 = vmax.f32 %v1561_v32, 0.0  ;;  %v1685_v12 = vpack.c.bf16 %v1621_v10, %v1621_v10  ;;  %1748 = vst.msk [vmem:[%s4455_s3 + $0x3c] sm:$0xf] %vm1732_vm4, %v1683_v25  ;;  %v2344_v10 = vld [vmem:[%s4454_s2 + $0x98] sm:$0xff]  }
 0x255   :  { %v1564_v26 = vadd.f32 %v2248_v63, %v4747_v42  ;;  %v2260_v23 = vunpack.c.l.bf16 %v2340_v51  ;;  %v4749_v22 = vmax.f32 %v3685_v53, 0.0  ;;  %v1626_v39 = vmax.f32 %v1562_v41, 0.0  ;;  %1749 = vst.msk [vmem:[%s4455_s3 + $0x40] sm:$0xf] %vm1732_vm4, %v1684_v54 }
 0x256   :  { %v1565_v4 = vadd.f32 %v2249_v61, %v4748_v34  ;;  %v1686_v30 = vpack.c.bf16 %v1622_v5, %v1622_v5  ;;  %v2261_v59 = vunpack.c.h.bf16 %v2340_v51  ;;  %v4750_v16 = vmax.f32 %v3691_v2, 0.0  ;;  %1750 = vst.msk [vmem:[%s4455_s3 + $0x44] sm:$0xf] %vm1732_vm4, %v1685_v12 }
 0x257   :  { %v1566_v6 = vadd.f32 %v2252_v19, %v4749_v22  ;;  %v1627_v31 = vmax.f32 %v1563_v11, 0.0  ;;  %v1687_v37 = vpack.c.bf16 %v1623_v15, %v1623_v15  ;;  %v2264_v53 = vunpack.c.l.bf16 %v2341_v57  ;;  %v2345_v11 = vld [vmem:[%s4454_s2 + $0xa0] sm:$0xff]  }
 0x258   :  { %v1567_v60 = vadd.f32 %v2253_v14, %v4750_v16  ;;  %v4751_v33 = vmax.f32 %v3697_v36, 0.0  ;;  %v1628_v44 = vmax.f32 %v1564_v26, 0.0  ;;  %v1688_v38 = vpack.c.bf16 %v1624_v17, %v1624_v17  ;;  %1751 = vst.msk [vmem:[%s4455_s3 + $0x48] sm:$0xf] %vm1732_vm4, %v1686_v30  ;;  %v2347_v30 = vld [vmem:[%s4454_s2 + $0xb0] sm:$0xff]  }
 0x259   :  { %v2265_v2 = vunpack.c.h.bf16 %v2341_v57  ;;  %v4752_v63 = vmax.f32 %v3703_v48, 0.0  ;;  %v1629_v43 = vmax.f32 %v1565_v4, 0.0  ;;  %v1689_v28 = vpack.c.bf16 %v1625_v18, %v1625_v18  ;;  %1752 = vst.msk [vmem:[%s4455_s3 + $0x4c] sm:$0xf] %vm1732_vm4, %v1687_v37  ;;  %v2346_v57 = vld [vmem:[%s4454_s2 + $0xa8] sm:$0xff]  }
 0x25a   :  { %v1568_v55 = vadd.f32 %v2256_v45, %v4751_v33  ;;  %v2268_v36 = vunpack.c.l.bf16 %v2342_v29  ;;  %v4754_v61 = vmax.f32 %v4753_v7, 0.0  ;;  %v1630_v52 = vmax.f32 %v1566_v6, 0.0  ;;  %1753 = vst.msk [vmem:[%s4455_s3 + $0x50] sm:$0xf] %vm1732_vm4, %v1688_v38  ;;  %v2349_v7 = vld [vmem:[%s4454_s2 + $0xc0] sm:$0xff]  }
 0x25b   :  { %v1569_v40 = vadd.f32 %v2257_v56, %v4752_v63  ;;  %v1690_v32 = vpack.c.bf16 %v1626_v39, %v1626_v39  ;;  %v2269_v48 = vunpack.c.h.bf16 %v2342_v29  ;;  %v4755_v24 = vmax.f32 %v3715_v13, 0.0  ;;  %1754 = vst.msk [vmem:[%s4455_s3 + $0x54] sm:$0xf] %vm1732_vm4, %v1689_v28  ;;  %v4764_v63 = vld [vmem:[#allocation7_spill] sm:$0xff] }
 0x25c   :  { %v1570_v35 = vadd.f32 %v2260_v23, %v4754_v61  ;;  %v1631_v62 = vmax.f32 %v1567_v60, 0.0  ;;  %v1691_v41 = vpack.c.bf16 %v1627_v31, %v1627_v31  ;;  %v2272_v5 = vunpack.c.l.bf16 %v2343_v27  ;;  %v4766_v61 = vld [vmem:[#allocation9_spill] sm:$0xff] }
 0x25d   :  { %v1571_v19 = vadd.f32 %v2261_v59, %v4755_v24  ;;  %v4756_v47 = vmax.f32 %v3721_v8, 0.0  ;;  %v1632_v51 = vmax.f32 %v1568_v55, 0.0  ;;  %v1692_v21 = vpack.c.bf16 %v1628_v44, %v1628_v44  ;;  %1755 = vst.msk [vmem:[%s4455_s3 + $0x58] sm:$0xf] %vm1732_vm4, %v1690_v32  ;;  %v2348_v55 = vld [vmem:[%s4454_s2 + $0xb8] sm:$0xff]   ;;  %v4768_v24 = vld [vmem:[#allocation11_spill] sm:$0xff] }
 0x25e   :  { %v2273_v13 = vunpack.c.h.bf16 %v2343_v27  ;;  %v4757_v15 = vmax.f32 %v3727_v3, 0.0  ;;  %v1633_v45 = vmax.f32 %v1569_v40, 0.0  ;;  %v1693_v42 = vpack.c.bf16 %v1629_v43, %v1629_v43  ;;  %1756 = vst.msk [vmem:[%s4455_s3 + $0x5c] sm:$0xf] %vm1732_vm4, %v1691_v41 }
 0x25f   :  { %v1572_v14 = vadd.f32 %v2264_v53, %v4756_v47  ;;  %v2276_v8 = vunpack.c.l.bf16 %v2344_v10  ;;  %v4758_v26 = vmax.f32 %v3733_v20, 0.0  ;;  %v1634_v54 = vmax.f32 %v1570_v35, 0.0  ;;  %1757 = vst.msk [vmem:[%s4455_s3 + $0x60] sm:$0xf] %vm1732_vm4, %v1692_v21 }
 0x260   :  { %v1573_v25 = vadd.f32 %v2265_v2, %v4757_v15  ;;  %v1694_v56 = vpack.c.bf16 %v1630_v52, %v1630_v52  ;;  %v2277_v3 = vunpack.c.h.bf16 %v2344_v10  ;;  %v4759_v34 = vmax.f32 %v3739_v58, 0.0  ;;  %1758 = vst.msk [vmem:[%s4455_s3 + $0x64] sm:$0xf] %vm1732_vm4, %v1693_v42 }
 0x261   :  { %v1574_v17 = vadd.f32 %v2268_v36, %v4758_v26  ;;  %v1635_v18 = vmax.f32 %v1571_v19, 0.0  ;;  %v1695_v12 = vpack.c.bf16 %v1631_v62, %v1631_v62  ;;  %v2280_v20 = vunpack.c.l.bf16 %v2345_v11 }
 0x262   :  { %v1575_v4 = vadd.f32 %v2269_v48, %v4759_v34  ;;  %v4760_v23 = vmax.f32 %v3745_v49, 0.0  ;;  %v1636_v6 = vmax.f32 %v1572_v14, 0.0  ;;  %v1696_v39 = vpack.c.bf16 %v1632_v51, %v1632_v51  ;;  %1759 = vst.msk [vmem:[%s4455_s3 + $0x68] sm:$0xf] %vm1732_vm4, %v1694_v56  ;;  %v2350_v14 = vld [vmem:[%s4454_s2 + $0xc8] sm:$0xff]   ;;  %v4770_v51 = vld [vmem:[#allocation14_spill] sm:$0xff] }
 0x263   :  { %v2281_v58 = vunpack.c.h.bf16 %v2345_v11  ;;  %v4761_v59 = vmax.f32 %v4707_v1, 0.0  ;;  %v1637_v16 = vmax.f32 %v1573_v25, 0.0  ;;  %v1697_v60 = vpack.c.bf16 %v1633_v45, %v1633_v45  ;;  %1760 = vst.msk [vmem:[%s4455_s3 + $0x6c] sm:$0xf] %vm1732_vm4, %v1695_v12  ;;  %v4772_v45 = vld [vmem:[#allocation17_spill] sm:$0xff]  ;;  %v2351_v56 = vld [vmem:[%s4454_s2 + $0xd0] sm:$0xff]  }
 0x264   :  { %v1576_v22 = vadd.f32 %v2272_v5, %v4760_v23  ;;  %v2284_v49 = vunpack.c.l.bf16 %v2346_v57  ;;  %v4762_v31 = vmax.f32 %v4708_v50, 0.0  ;;  %v1638_v53 = vmax.f32 %v1574_v17, 0.0  ;;  %1761 = vst.msk [vmem:[%s4455_s3 + $0x70] sm:$0xf] %vm1732_vm4, %v1696_v39 }
 0x265   :  { %v1577_v29 = vadd.f32 %v2273_v13, %v4761_v59  ;;  %v1698_v33 = vpack.c.bf16 %v1634_v54, %v1634_v54  ;;  %v2285_v1 = vunpack.c.h.bf16 %v2346_v57  ;;  %v4763_v44 = vmax.f32 %v3763_v0, 0.0  ;;  %1762 = vst.msk [vmem:[%s4455_s3 + $0x74] sm:$0xf] %vm1732_vm4, %v1697_v60  ;;  %v4778_v59 = vld [vmem:[#allocation19_spill] sm:$0xff] }
 0x266   :  { %v1578_v37 = vadd.f32 %v2276_v8, %v4762_v31  ;;  %v1639_v2 = vmax.f32 %v1575_v4, 0.0  ;;  %v1699_v27 = vpack.c.bf16 %v1635_v18, %v1635_v18  ;;  %v2288_v50 = vunpack.c.l.bf16 %v2347_v30 }
 0x267   :  { %v1579_v38 = vadd.f32 %v2277_v3, %v4763_v44  ;;  %v4765_v40 = vmax.f32 %v4764_v63, 0.0  ;;  %v1640_v28 = vmax.f32 %v1576_v22, 0.0  ;;  %v1700_v36 = vpack.c.bf16 %v1636_v6, %v1636_v6  ;;  %1763 = vst.msk [vmem:[%s4455_s3 + $0x78] sm:$0xf] %vm1732_vm4, %v1698_v33  ;;  %v4774_v3 = vld [vmem:[#allocation20_spill] sm:$0xff] }
 0x268   :  { %v2289_v0 = vunpack.c.h.bf16 %v2347_v30  ;;  %v4767_v35 = vmax.f32 %v4766_v61, 0.0  ;;  %v1641_v32 = vmax.f32 %v1577_v29, 0.0  ;;  %v1701_v48 = vpack.c.bf16 %v1637_v16, %v1637_v16  ;;  %1764 = vst.msk [vmem:[%s4455_s3 + $0x7c] sm:$0xf] %vm1732_vm4, %v1699_v27  ;;  %v2352_v30 = vld [vmem:[%s4454_s2 + $0xd8] sm:$0xff]   ;;  %v2354_v61 = vld [vmem:[%s4454_s2 + $0xe8] sm:$0xff]  }
 0x269   :  { %v1580_v43 = vadd.f32 %v2280_v20, %v4765_v40  ;;  %v2292_v10 = vunpack.c.l.bf16 %v2348_v55  ;;  %v4769_v19 = vmax.f32 %v4768_v24, 0.0  ;;  %v1642_v41 = vmax.f32 %v1578_v37, 0.0  ;;  %1765 = vst.msk [vmem:[%s4455_s3 + $0x80] sm:$0xf] %vm1732_vm4, %v1700_v36  ;;  %v4776_v20 = vld [vmem:[#allocation16_spill] sm:$0xff]  ;;  %v4780_v37 = vld [vmem:[#allocation21_spill] sm:$0xff] }
 0x26a   :  { %v1581_v52 = vadd.f32 %v2281_v58, %v4767_v35  ;;  %v1702_v5 = vpack.c.bf16 %v1638_v53, %v1638_v53  ;;  %v2293_v47 = vunpack.c.h.bf16 %v2348_v55  ;;  %v4771_v21 = vmax.f32 %v4770_v51, 0.0  ;;  %1766 = vst.msk [vmem:[%s4455_s3 + $0x84] sm:$0xf] %vm1732_vm4, %v1701_v48  ;;  %v4785_v35 = vld [vmem:[#allocation25_spill] sm:$0xff]  ;;  %v2355_v51 = vld [vmem:[%s4454_s2 + $0xf0] sm:$0xff]  }
 0x26b   :  { %v1582_v62 = vadd.f32 %v2284_v49, %v4769_v19  ;;  %v1643_v11 = vmax.f32 %v1579_v38, 0.0  ;;  %v1703_v15 = vpack.c.bf16 %v1639_v2, %v1639_v2  ;;  %v2296_v25 = vunpack.c.l.bf16 %v2349_v7  ;;  %v2353_v38 = vld [vmem:[%s4454_s2 + $0xe0] sm:$0xff]   ;;  %v4787_v19 = vld [vmem:[#allocation31_spill] sm:$0xff] }
 0x26c   :  { %v1583_v13 = vadd.f32 %v2285_v1, %v4771_v21  ;;  %v4773_v42 = vmax.f32 %v4772_v45, 0.0  ;;  %v1644_v26 = vmax.f32 %v1580_v43, 0.0  ;;  %v1704_v17 = vpack.c.bf16 %v1640_v28, %v1640_v28  ;;  %1767 = vst.msk [vmem:[%s4455_s3 + $0x88] sm:$0xf] %vm1732_vm4, %v1702_v5  ;;  %v4783_v43 = vld [vmem:[#allocation23_spill] sm:$0xff]  ;;  %v4789_v21 = vld [vmem:[#allocation32_spill] sm:$0xff] }
 0x26d   :  { %v2297_v54 = vunpack.c.h.bf16 %v2349_v7  ;;  %v4775_v57 = vmax.f32 %v4774_v3, 0.0  ;;  %v1645_v4 = vmax.f32 %v1581_v52, 0.0  ;;  %v1705_v18 = vpack.c.bf16 %v1641_v32, %v1641_v32  ;;  %1768 = vst.msk [vmem:[%s4455_s3 + $0x8c] sm:$0xf] %vm1732_vm4, %v1703_v15  ;;  %v2356_v3 = vld [vmem:[%s4454_s2 + $0xf8] sm:$0xff]  }
 0x26e   :  { %v1584_v8 = vadd.f32 %v2288_v50, %v4773_v42  ;;  %v2300_v12 = vunpack.c.l.bf16 %v2350_v14  ;;  %v4777_v23 = vmax.f32 %v4776_v20, 0.0  ;;  %v1646_v6 = vmax.f32 %v1582_v62, 0.0  ;;  %1769 = vst.msk [vmem:[%s4455_s3 + $0x90] sm:$0xf] %vm1732_vm4, %v1704_v17  ;;  %v4791_v42 = vld [vmem:[#allocation33_spill] sm:$0xff] }
 0x26f   :  { %v1585_v34 = vadd.f32 %v2289_v0, %v4775_v57  ;;  %v1706_v39 = vpack.c.bf16 %v1642_v41, %v1642_v41  ;;  %v2301_v58 = vunpack.c.h.bf16 %v2350_v14  ;;  %v4779_v29 = vmax.f32 %v4778_v59, 0.0  ;;  %1770 = vst.msk [vmem:[%s4455_s3 + $0x94] sm:$0xf] %vm1732_vm4, %v1705_v18  ;;  %v4793_v57 = vld [vmem:[#allocation34_spill] sm:$0xff] }
 0x270   :  { %v1586_v22 = vadd.f32 %v2292_v10, %v4777_v23  ;;  %v1647_v60 = vmax.f32 %v1583_v13, 0.0  ;;  %v1707_v49 = vpack.c.bf16 %v1643_v11, %v1643_v11  ;;  %v2304_v31 = vunpack.c.l.bf16 %v2351_v56  ;;  %v4795_v23 = vld [vmem:[#allocation8_spill] sm:$0xff] }
 0x271   :  { %v1587_v16 = vadd.f32 %v2293_v47, %v4779_v29  ;;  %v4781_v53 = vmax.f32 %v4780_v37, 0.0  ;;  %v1648_v1 = vmax.f32 %v1584_v8, 0.0  ;;  %v1708_v55 = vpack.c.bf16 %v1644_v26, %v1644_v26  ;;  %1771 = vst.msk [vmem:[%s4455_s3 + $0x98] sm:$0xf] %vm1732_vm4, %v1706_v39 }
 0x272   :  { %v2305_v44 = vunpack.c.h.bf16 %v2351_v56  ;;  %v4782_v2 = vmax.f32 %v4711_v9, 0.0  ;;  %v1649_v50 = vmax.f32 %v1585_v34, 0.0  ;;  %v1709_v63 = vpack.c.bf16 %v1645_v4, %v1645_v4  ;;  %1772 = vst.msk [vmem:[%s4455_s3 + $0x9c] sm:$0xf] %vm1732_vm4, %v1707_v49 }
 0x273   :  { %v1588_v33 = vadd.f32 %v2296_v25, %v4781_v53  ;;  %v2308_v40 = vunpack.c.l.bf16 %v2352_v30  ;;  %v4784_v28 = vmax.f32 %v4783_v43, 0.0  ;;  %v1650_v0 = vmax.f32 %v1586_v22, 0.0  ;;  %1773 = vst.msk [vmem:[%s4455_s3 + $0xa0] sm:$0xf] %vm1732_vm4, %v1708_v55  ;;  %v4800_v55 = vld [vmem:[#allocation12_spill] sm:$0xff] }
 0x274   :  { %v1589_v27 = vadd.f32 %v2297_v54, %v4782_v2  ;;  %v1710_v7 = vpack.c.bf16 %v1646_v6, %v1646_v6  ;;  %v2309_v9 = vunpack.c.h.bf16 %v2352_v30  ;;  %v4786_v52 = vmax.f32 %v4785_v35, 0.0  ;;  %1774 = vst.msk [vmem:[%s4455_s3 + $0xa4] sm:$0xf] %vm1732_vm4, %v1709_v63  ;;  %v4806_v35 = vld [vmem:[#allocation18_spill] sm:$0xff] }
 0x275   :  { %v1590_v36 = vadd.f32 %v2300_v12, %v4784_v28  ;;  %v1651_v48 = vmax.f32 %v1587_v16, 0.0  ;;  %v1711_v10 = vpack.c.bf16 %v1647_v60, %v1647_v60  ;;  %v2312_v24 = vunpack.c.l.bf16 %v2353_v38 }
 0x276   :  { %v1591_v32 = vadd.f32 %v2301_v58, %v4786_v52  ;;  %v4788_v62 = vmax.f32 %v4787_v19, 0.0  ;;  %v1652_v5 = vmax.f32 %v1588_v33, 0.0  ;;  %v1712_v47 = vpack.c.bf16 %v1648_v1, %v1648_v1  ;;  %1775 = vst.msk [vmem:[%s4455_s3 + $0xa8] sm:$0xf] %vm1732_vm4, %v1710_v7 }
 0x277   :  { %v2313_v14 = vunpack.c.h.bf16 %v2353_v38  ;;  %v4790_v13 = vmax.f32 %v4789_v21, 0.0  ;;  %v1653_v15 = vmax.f32 %v1589_v27, 0.0  ;;  %v1713_v25 = vpack.c.bf16 %v1649_v50, %v1649_v50  ;;  %1776 = vst.msk [vmem:[%s4455_s3 + $0xac] sm:$0xf] %vm1732_vm4, %v1711_v10  ;;  %v4802_v50 = vld [vmem:[#allocation13_spill] sm:$0xff] }
 0x278   :  { %v1592_v41 = vadd.f32 %v2304_v31, %v4788_v62  ;;  %v2316_v45 = vunpack.c.l.bf16 %v2354_v61  ;;  %v4792_v8 = vmax.f32 %v4791_v42, 0.0  ;;  %v1654_v17 = vmax.f32 %v1590_v36, 0.0  ;;  %1777 = vst.msk [vmem:[%s4455_s3 + $0xb0] sm:$0xf] %vm1732_vm4, %v1712_v47  ;;  %v4798_v31 = vld [vmem:[#allocation10_spill] sm:$0xff]  ;;  %v4804_v36 = vld [vmem:[#allocation15_spill] sm:$0xff] }
 0x279   :  { %v1593_v11 = vadd.f32 %v2305_v44, %v4790_v13  ;;  %v1714_v54 = vpack.c.bf16 %v1650_v0, %v1650_v0  ;;  %v2317_v56 = vunpack.c.h.bf16 %v2354_v61  ;;  %v4794_v34 = vmax.f32 %v4793_v57, 0.0  ;;  %1778 = vst.msk [vmem:[%s4455_s3 + $0xb4] sm:$0xf] %vm1732_vm4, %v1713_v25 }
 0x27a   :  { %v1594_v26 = vadd.f32 %v2308_v40, %v4792_v8  ;;  %v1655_v18 = vmax.f32 %v1591_v32, 0.0  ;;  %v1715_v12 = vpack.c.bf16 %v1651_v48, %v1651_v48  ;;  %v2320_v20 = vunpack.c.l.bf16 %v2355_v51 }
 0x27b   :  { %v1595_v4 = vadd.f32 %v2309_v9, %v4794_v34  ;;  %v4796_v22 = vmax.f32 %v4795_v23, 0.0  ;;  %v1656_v39 = vmax.f32 %v1592_v41, 0.0  ;;  %v1716_v58 = vpack.c.bf16 %v1652_v5, %v1652_v5  ;;  %1779 = vst.msk [vmem:[%s4455_s3 + $0xb8] sm:$0xf] %vm1732_vm4, %v1714_v54 }
 0x27c   :  { %v2321_v30 = vunpack.c.h.bf16 %v2355_v51  ;;  %v4797_v59 = vmax.f32 %v3871_v46, 0.0  ;;  %v1657_v16 = vmax.f32 %v1593_v11, 0.0  ;;  %v1717_v60 = vpack.c.bf16 %v1653_v15, %v1653_v15  ;;  %1780 = vst.msk [vmem:[%s4455_s3 + $0xbc] sm:$0xf] %vm1732_vm4, %v1715_v12 }
 0x27d   :  { %v1596_v6 = vadd.f32 %v2312_v24, %v4796_v22  ;;  %v2324_v49 = vunpack.c.l.bf16 %v2356_v3  ;;  %v4799_v37 = vmax.f32 %v4798_v31, 0.0  ;;  %v1658_v33 = vmax.f32 %v1594_v26, 0.0  ;;  %1781 = vst.msk [vmem:[%s4455_s3 + $0xc0] sm:$0xf] %vm1732_vm4, %v1716_v58  ;;  %v4808_v24 = vld [vmem:[#allocation26_spill] sm:$0xff] }
 0x27e   :  { %v1597_v29 = vadd.f32 %v2313_v14, %v4797_v59  ;;  %v1718_v1 = vpack.c.bf16 %v1654_v17, %v1654_v17  ;;  %v2325_v46 = vunpack.c.h.bf16 %v2356_v3  ;;  %v4801_v44 = vmax.f32 %v4800_v55, 0.0  ;;  %1782 = vst.msk [vmem:[%s4455_s3 + $0xc4] sm:$0xf] %vm1732_vm4, %v1717_v60 }
 0x27f   :  { %v1598_v53 = vadd.f32 %v2316_v45, %v4799_v37  ;;  %v1659_v2 = vmax.f32 %v1595_v4, 0.0  ;;  %v1719_v27 = vpack.c.bf16 %v1655_v18, %v1655_v18  ;;  %v4803_v63 = vmax.f32 %v4802_v50, 0.0 }
 0x280   :  { %v1599_v38 = vadd.f32 %v2317_v56, %v4801_v44  ;;  %v1660_v43 = vmax.f32 %v1596_v6, 0.0  ;;  %v1720_v28 = vpack.c.bf16 %v1656_v39, %v1656_v39  ;;  %v4805_v0 = vmax.f32 %v4804_v36, 0.0  ;;  %1783 = vst.msk [vmem:[%s4455_s3 + $0xc8] sm:$0xf] %vm1732_vm4, %v1718_v1 }
 0x281   :  { %v1600_v40 = vadd.f32 %v2320_v20, %v4803_v63  ;;  %v1661_v9 = vmax.f32 %v1597_v29, 0.0  ;;  %v1721_v61 = vpack.c.bf16 %v1657_v16, %v1657_v16  ;;  %v4807_v52 = vmax.f32 %v4806_v35, 0.0  ;;  %1784 = vst.msk [vmem:[%s4455_s3 + $0xcc] sm:$0xf] %vm1732_vm4, %v1719_v27 }
 0x282   :  { %v1601_v7 = vadd.f32 %v2321_v30, %v4805_v0  ;;  %v1662_v48 = vmax.f32 %v1598_v53, 0.0  ;;  %v1722_v10 = vpack.c.bf16 %v1658_v33, %v1658_v33  ;;  %v4809_v19 = vmax.f32 %v4808_v24, 0.0  ;;  %1785 = vst.msk [vmem:[%s4455_s3 + $0xd0] sm:$0xf] %vm1732_vm4, %v1720_v28 }
 0x283   :  { %v1602_v32 = vadd.f32 %v2324_v49, %v4807_v52  ;;  %v1663_v41 = vmax.f32 %v1599_v38, 0.0  ;;  %v1723_v5 = vpack.c.bf16 %v1659_v2, %v1659_v2  ;;  %v1664_v47 = vmax.f32 %v1600_v40, 0.0  ;;  %1786 = vst.msk [vmem:[%s4455_s3 + $0xd4] sm:$0xf] %vm1732_vm4, %v1721_v61 }
 0x284   :  { %v1603_v62 = vadd.f32 %v2325_v46, %v4809_v19  ;;  %v1724_v14 = vpack.c.bf16 %v1660_v43, %v1660_v43  ;;  %v1665_v51 = vmax.f32 %v1601_v7, 0.0  ;;  %v1725_v21 = vpack.c.bf16 %v1661_v9, %v1661_v9  ;;  %1787 = vst.msk [vmem:[%s4455_s3 + $0xd8] sm:$0xf] %vm1732_vm4, %v1722_v10 }
 0x285   :  { %v1666_v13 = vmax.f32 %v1602_v32, 0.0  ;;  %v1726_v11 = vpack.c.bf16 %v1662_v48, %v1662_v48  ;;  %v1727_v25 = vpack.c.bf16 %v1663_v41, %v1663_v41  ;;  %1788 = vst.msk [vmem:[%s4455_s3 + $0xdc] sm:$0xf] %vm1732_vm4, %v1723_v5  ;;  %v1728_v45 = vpack.c.bf16 %v1664_v47, %v1664_v47 }
 0x286   :  { %v1667_v15 = vmax.f32 %v1603_v62, 0.0  ;;  %1789 = vst.msk [vmem:[%s4455_s3 + $0xe0] sm:$0xf] %vm1732_vm4, %v1724_v14  ;;  %v1729_v42 = vpack.c.bf16 %v1665_v51, %v1665_v51 }
 0x287   :  { %1790 = vst.msk [vmem:[%s4455_s3 + $0xe4] sm:$0xf] %vm1732_vm4, %v1725_v21  ;;  %v1730_v8 = vpack.c.bf16 %v1666_v13, %v1666_v13 }
 0x288   :  { %1791 = vst.msk [vmem:[%s4455_s3 + $0xe8] sm:$0xf] %vm1732_vm4, %v1726_v11  ;;  %v1731_v26 = vpack.c.bf16 %v1667_v15, %v1667_v15 }
 0x289   :  { %1792 = vst.msk [vmem:[%s4455_s3 + $0xec] sm:$0xf] %vm1732_vm4, %v1727_v25 }
 0x28a   :  { %1793 = vst.msk [vmem:[%s4455_s3 + $0xf0] sm:$0xf] %vm1732_vm4, %v1728_v45 }
 0x28b   :  { %1794 = vst.msk [vmem:[%s4455_s3 + $0xf4] sm:$0xf] %vm1732_vm4, %v1729_v42 }
 0x28c   :  { %1795 = vst.msk [vmem:[%s4455_s3 + $0xf8] sm:$0xf] %vm1732_vm4, %v1730_v8 }
 0x28d   :  { %1796 = vst.msk [vmem:[%s4455_s3 + $0xfc] sm:$0xf] %vm1732_vm4, %v1731_v26 }

// kernel: resnet_v2_forward.7
= control target key start
LH: loop header
LB: loop body
LE: loop exit
PB: predicated region body
PF: predicated region fallthrough
CT: control target
= control target key end

     0   :  { %vm172_vm0 = vcmask 130048   ;;  %vm295_vm1 = vcmask 261120   ;;  %vm466_vm5 = vcmask 257024   ;;  %s1004_s1 = inlined_call_operand.vmem [shape: bf16[144,32], index: 1, kind: input, shape index: {}]   ;;  %s1005_s0 = inlined_call_operand.vmem [shape: bf16[128,144], index: 0, kind: input, shape index: {}]   ;;  %s1006_s2 = inlined_call_operand.vmem [shape: bf16[128,32], index: 2, kind: output, shape index: {}]  }
   0x1   :  { %v618_v0 = vld [vmem:[%s1004_s1 + $0x38] sm:$0xff]  ;;  %v619_v1 = vld [vmem:[%s1004_s1 + $0x40] sm:$0xff]  ;;  %v491_v3 = vld [vmem:[%s1005_s0 + $0x8] sm:$0xf0] }
   0x2   :  { %v595_v2 = vld [vmem:[%s1005_s0 + $0x4] sm:$0xf]  ;;  %197 = vmatpush.bf16.msra.mxu0 %v618_v0  ;;  %253 = vmatpush.bf16.msra.mxu1 %v619_v1  ;;  %v617_v5 = vld [vmem:[%s1004_s1 + $0x30] sm:$0xff]  ;;  %v616_v6 = vld [vmem:[%s1004_s1 + $0x28] sm:$0xff] }
   0x3   :  { %v494_v4 = vor.u32 %v595_v2, %v491_v3  ;;  %620 = vmatpush.bf16.msra.mxu2 %v618_v0  ;;  %628 = vmatpush.bf16.msra.mxu3 %v619_v1  ;;  %v615_v7 = vld [vmem:[%s1004_s1 + $0x20] sm:$0xff]  ;;  %v614_v8 = vld [vmem:[%s1004_s1 + $0x18] sm:$0xff]  ;;  %v597_v9 = vld [vmem:[%s1005_s0 + $0x14] sm:$0xf] }
   0x4   :  { %v499_v10 = vld [vmem:[%s1005_s0 + $0x18] sm:$0xf0]  ;;  %v605_v11 = vld [vmem:[%s1005_s0 + $0x54] sm:$0xf]  ;;  %v612_v16 = vld [vmem:[%s1004_s1 + $0x8] sm:$0xff] }
   0x5   :  { %587 = vmatmul.msk.bf16.vlgmr.msra.gmra.mxu1 %vm172_vm0, %v494_v4  ;;  %v502_v12 = vor.u32 %v597_v9, %v499_v10  ;;  %v531_v13 = vld [vmem:[%s1005_s0 + $0x58] sm:$0xf0]  ;;  %v613_v14 = vld [vmem:[%s1004_s1 + $0x10] sm:$0xff]  ;;  %v611_v17 = vld [vmem:[%s1004_s1] sm:$0xff] }
   0x6   :  { %198 = vmatpush.bf16.msra.mxu0 %v617_v5  ;;  %v534_v15 = vor.u32 %v605_v11, %v531_v13  ;;  %v489_v18 = vld [vmem:[%s1005_s0] sm:$0xf]  ;;  %v596_v19 = vld [vmem:[%s1005_s0 + $0x4] sm:$0xf0]  ;;  %v599_v24 = vld [vmem:[%s1005_s0 + $0x24] sm:$0xf] }
   0x7   :  { %621 = vmatpush.bf16.msra.mxu2 %v617_v5  ;;  %v521_v20 = vld [vmem:[%s1005_s0 + $0x40] sm:$0xf]  ;;  %v604_v21 = vld [vmem:[%s1005_s0 + $0x44] sm:$0xf0]  ;;  %v490_v22 = vor.u32 %v596_v19, %v489_v18  ;;  %v507_v25 = vld [vmem:[%s1005_s0 + $0x28] sm:$0xf0] }
   0x8   :  { %592 = vmatmul.msk.bf16.vlgmr.msra.gmra.mxu3 %vm172_vm0, %v534_v15  ;;  %v522_v23 = vor.u32 %v604_v21, %v521_v20  ;;  %v607_v26 = vld [vmem:[%s1005_s0 + $0x64] sm:$0xf]  ;;  %v510_v27 = vor.u32 %v599_v24, %v507_v25  ;;  %v539_v28 = vld [vmem:[%s1005_s0 + $0x68] sm:$0xf0]  ;;  %v497_v30 = vld [vmem:[%s1005_s0 + $0x10] sm:$0xf] }
   0x9   :  { %v542_v29 = vor.u32 %v607_v26, %v539_v28  ;;  %v598_v31 = vld [vmem:[%s1005_s0 + $0x14] sm:$0xf0]  ;;  %v529_v32 = vld [vmem:[%s1005_s0 + $0x50] sm:$0xf]  ;;  %v601_v36 = vld [vmem:[%s1005_s0 + $0x34] sm:$0xf] }
   0xa   :  { %199 = vmatpush.bf16.msra.mxu0 %v616_v6  ;;  %v606_v33 = vld [vmem:[%s1005_s0 + $0x54] sm:$0xf0]  ;;  %v498_v34 = vor.u32 %v598_v31, %v497_v30  ;;  %v515_v37 = vld [vmem:[%s1005_s0 + $0x38] sm:$0xf0]  ;;  %v609_v38 = vld [vmem:[%s1005_s0 + $0x74] sm:$0xf] }
   0xb   :  { %622 = vmatpush.bf16.msra.mxu2 %v616_v6  ;;  %v530_v35 = vor.u32 %v606_v33, %v529_v32  ;;  %v518_v39 = vor.u32 %v601_v36, %v515_v37  ;;  %v547_v40 = vld [vmem:[%s1005_s0 + $0x78] sm:$0xf0]  ;;  %v505_v42 = vld [vmem:[%s1005_s0 + $0x20] sm:$0xf]  ;;  %v600_v43 = vld [vmem:[%s1005_s0 + $0x24] sm:$0xf0] }
   0xc   :  { %v550_v41 = vor.u32 %v609_v38, %v547_v40  ;;  %v537_v44 = vld [vmem:[%s1005_s0 + $0x60] sm:$0xf]  ;;  %v608_v45 = vld [vmem:[%s1005_s0 + $0x64] sm:$0xf0]  ;;  %v506_v46 = vor.u32 %v600_v43, %v505_v42  ;;  %v603_v48 = vld [vmem:[%s1005_s0 + $0x44] sm:$0xf] }
   0xd   :  { %v538_v47 = vor.u32 %v608_v45, %v537_v44  ;;  %v523_v49 = vld [vmem:[%s1005_s0 + $0x48] sm:$0xf0]  ;;  %v513_v51 = vld [vmem:[%s1005_s0 + $0x30] sm:$0xf]  ;;  %v602_v52 = vld [vmem:[%s1005_s0 + $0x34] sm:$0xf0] }
   0xe   :  { %200 = vmatpush.bf16.msra.mxu0 %v615_v7  ;;  %v526_v50 = vor.u32 %v603_v48, %v523_v49  ;;  %v545_v53 = vld [vmem:[%s1005_s0 + $0x70] sm:$0xf]  ;;  %v610_v54 = vld [vmem:[%s1005_s0 + $0x74] sm:$0xf0]  ;;  %v514_v55 = vor.u32 %v602_v52, %v513_v51 }
   0xf   :  { %623 = vmatpush.bf16.msra.mxu2 %v615_v7  ;;  %v546_v56 = vor.u32 %v610_v54, %v545_v53 }
  0x12   :  { %201 = vmatpush.bf16.msra.mxu0 %v614_v8 }
  0x13   :  { %624 = vmatpush.bf16.msra.mxu2 %v614_v8 }
  0x15   :  { %588 = vmatmul.msk.bf16.gmra.mxu1 %vm172_vm0, %v502_v12 }
  0x16   :  { %202 = vmatpush.bf16.msra.mxu0 %v613_v14 }
  0x17   :  { %625 = vmatpush.bf16.msra.mxu2 %v613_v14 }
  0x18   :  { %593 = vmatmul.msk.bf16.gmra.mxu3 %vm172_vm0, %v542_v29 }
  0x1a   :  { %203 = vmatpush.bf16.msra.mxu0 %v612_v16 }
  0x1b   :  { %626 = vmatpush.bf16.msra.mxu2 %v612_v16 }
  0x1e   :  { %204 = vmatpush.bf16.msra.mxu0 %v611_v17 }
  0x1f   :  { %627 = vmatpush.bf16.msra.mxu2 %v611_v17 }
  0x21   :  { %205 = vmatmul.bf16.vlgmr.msra.gmra.mxu0 %v490_v22 }
  0x22   :  { %225 = vmatmul.bf16.vlgmr.msra.gmra.mxu2 %v522_v23 }
  0x25   :  { %589 = vmatmul.msk.bf16.gmra.mxu1 %vm172_vm0, %v510_v27 }
  0x28   :  { %594 = vmatmul.msk.bf16.gmra.mxu3 %vm172_vm0, %v550_v41 }
  0x31   :  { %210 = vmatmul.bf16.gmra.mxu0 %v498_v34 }
  0x32   :  { %230 = vmatmul.bf16.gmra.mxu2 %v530_v35 }
  0x35   :  { %590 = vmatmul.msk.bf16.gmra.mxu1 %vm172_vm0, %v518_v39 }
  0x41   :  { %215 = vmatmul.bf16.gmra.mxu0 %v506_v46 }
  0x42   :  { %235 = vmatmul.bf16.gmra.mxu2 %v538_v47 }
  0x45   :  { %591 = vmatmul.msk.bf16.gmra.mxu1 %vm172_vm0, %v526_v50 }
  0x51   :  { %220 = vmatmul.bf16.gmra.mxu0 %v514_v55 }
  0x52   :  { %240 = vmatmul.bf16.gmra.mxu2 %v546_v56 }
  0x82   :  { %v255_v57 = vpop.f32.mrf.mxu1 }
  0x8a   :  { %v257_v58 = vpop.f32.mrf.mxu1 }
  0x8b   :  { %v777_v3 = vpop.f32.mrf.mxu3 }
  0x92   :  { %v260_v59 = vpop.f32.mrf.mxu1 }
  0x93   :  { %v779_v8 = vpop.f32.mrf.mxu3 }
  0x9a   :  { %v262_v60 = vpop.f32.mrf.mxu1 }
  0x9b   :  { %v783_v12 = vpop.f32.mrf.mxu3 }
  0x9e   :  { %v206_v61 = vpop.f32.mrf.mxu0 }
  0x9f   :  { %v789_v15 = vadd.f32 %v255_v57, %v206_v61 }
  0xa1   :  { %v334_v20 = vmul.f32 %v789_v15, %v789_v15  ;;  %v296_v26 = vsel %vm295_vm1, %v789_v15, 0.0 }
  0xa2   :  { %v265_v62 = vpop.f32.mrf.mxu1 }
  0xa3   :  { %v287_v25 = vpop.f32.mrf.mxu3  ;;  %v350_v32 = vsel %vm295_vm1, %v334_v20, 0.0 }
  0xa5   :  { %v226_v63 = vpop.f32.mrf.mxu2 }
  0xa6   :  { %v208_v0 = vpop.f32.mrf.mxu0 }
  0xa7   :  { %v785_v13 = vadd.f32 %v257_v58, %v208_v0 }
  0xa9   :  { %v335_v18 = vmul.f32 %v785_v13, %v785_v13  ;;  %v297_v22 = vsel %vm295_vm1, %v785_v13, 0.0 }
  0xaa   :  { %v267_v1 = vpop.f32.mrf.mxu1  ;;  %v298_v33 = vadd.f32 %v297_v22, %v296_v26 }
  0xab   :  { %v351_v27 = vsel %vm295_vm1, %v335_v18, 0.0  ;;  %v290_v55 = vpop.f32.mrf.mxu3 }
  0xac   :  { %v352_v39 = vadd.f32 %v351_v27, %v350_v32 }
  0xad   :  { %v228_v2 = vpop.f32.mrf.mxu2 }
  0xae   :  { %v211_v4 = vpop.f32.mrf.mxu0 }
  0xaf   :  { %v791_v17 = vadd.f32 %v260_v59, %v211_v4 }
  0xb1   :  { %v336_v23 = vmul.f32 %v791_v17, %v791_v17  ;;  %v299_v28 = vsel %vm295_vm1, %v791_v17, 0.0 }
  0xb2   :  { %v270_v6 = vpop.f32.mrf.mxu1  ;;  %v300_v40 = vadd.f32 %v299_v28, %v298_v33 }
  0xb3   :  { %v353_v35 = vsel %vm295_vm1, %v336_v23, 0.0 }
  0xb4   :  { %v354_v44 = vadd.f32 %v353_v35, %v352_v39 }
  0xb5   :  { %v231_v5 = vpop.f32.mrf.mxu2 }
  0xb6   :  { %v213_v7 = vpop.f32.mrf.mxu0 }
  0xb7   :  { %v795_v19 = vadd.f32 %v262_v60, %v213_v7 }
  0xb9   :  { %v337_v29 = vmul.f32 %v795_v19, %v795_v19  ;;  %v301_v36 = vsel %vm295_vm1, %v795_v19, 0.0 }
  0xba   :  { %v272_v11 = vpop.f32.mrf.mxu1  ;;  %v302_v45 = vadd.f32 %v301_v36, %v300_v40 }
  0xbb   :  { %v355_v41 = vsel %vm295_vm1, %v337_v29, 0.0 }
  0xbc   :  { %v356_v49 = vadd.f32 %v355_v41, %v354_v44 }
  0xbd   :  { %v781_v9 = vpop.f32.mrf.mxu2 }
  0xbe   :  { %v216_v10 = vpop.f32.mrf.mxu0 }
  0xbf   :  { %v803_v24 = vadd.f32 %v265_v62, %v216_v10 }
  0xc1   :  { %v338_v37 = vmul.f32 %v803_v24, %v803_v24  ;;  %v303_v42 = vsel %vm295_vm1, %v803_v24, 0.0 }
  0xc2   :  { %v275_v21 = vpop.f32.mrf.mxu1  ;;  %v304_v50 = vadd.f32 %v303_v42, %v302_v45 }
  0xc3   :  { %v357_v46 = vsel %vm295_vm1, %v338_v37, 0.0  ;;  %v832_v52 = vadd.f32 %v275_v21, %v226_v63  ;;  %v843_v63 = vadd.f32 %v777_v3, %v231_v5 }
  0xc4   :  { %v358_v56 = vadd.f32 %v357_v46, %v356_v49 }
  0xc5   :  { %v787_v14 = vpop.f32.mrf.mxu2  ;;  %v342_v4 = vmul.f32 %v832_v52, %v832_v52  ;;  %v344_v21 = vmul.f32 %v843_v63, %v843_v63  ;;  %v315_v27 = vsel %vm295_vm1, %v843_v63, 0.0 }
  0xc6   :  { %v218_v16 = vpop.f32.mrf.mxu0  ;;  %v865_v23 = vadd.f32 %v783_v12, %v787_v14  ;;  %v292_v12 = vpop.f32.mrf.mxu3 }
  0xc7   :  { %v812_v30 = vadd.f32 %v267_v1, %v218_v16  ;;  %v311_v16 = vsel %vm295_vm1, %v832_v52, 0.0  ;;  %v365_v22 = vsel %vm295_vm1, %v342_v4, 0.0  ;;  %v369_v14 = vsel %vm295_vm1, %v344_v21, 0.0 }
  0xc8   :  { %v346_v37 = vmul.f32 %v865_v23, %v865_v23 }
  0xc9   :  { %v339_v43 = vmul.f32 %v812_v30, %v812_v30  ;;  %v305_v47 = vsel %vm295_vm1, %v812_v30, 0.0 }
  0xca   :  { %v277_v51 = vpop.f32.mrf.mxu1  ;;  %v306_v57 = vadd.f32 %v305_v47, %v304_v50  ;;  %v373_v46 = vsel %vm295_vm1, %v346_v37, 0.0 }
  0xcb   :  { %v359_v53 = vsel %vm295_vm1, %v339_v43, 0.0  ;;  %v837_v60 = vadd.f32 %v277_v51, %v228_v2 }
  0xcc   :  { %v360_v0 = vadd.f32 %v359_v53, %v358_v56 }
  0xcd   :  { %v238_v31 = vpop.f32.mrf.mxu2  ;;  %v343_v3 = vmul.f32 %v837_v60, %v837_v60 }
  0xce   :  { %v221_v34 = vpop.f32.mrf.mxu0  ;;  %v874_v32 = vadd.f32 %v287_v25, %v238_v31  ;;  %v319_v25 = vsel %vm295_vm1, %v865_v23, 0.0 }
  0xcf   :  { %v820_v38 = vadd.f32 %v270_v6, %v221_v34  ;;  %v367_v29 = vsel %vm295_vm1, %v343_v3, 0.0 }
  0xd0   :  { %v347_v31 = vmul.f32 %v874_v32, %v874_v32  ;;  %v321_v47 = vsel %vm295_vm1, %v874_v32, 0.0 }
  0xd1   :  { %v340_v48 = vmul.f32 %v820_v38, %v820_v38  ;;  %v307_v54 = vsel %vm295_vm1, %v820_v38, 0.0 }
  0xd2   :  { %v308_v1 = vadd.f32 %v307_v54, %v306_v57  ;;  %v375_v51 = vsel %vm295_vm1, %v347_v31, 0.0 }
  0xd3   :  { %v361_v61 = vsel %vm295_vm1, %v340_v48, 0.0 }
  0xd4   :  { %v362_v2 = vadd.f32 %v361_v61, %v360_v0 }
  0xd5   :  { %v241_v59 = vpop.f32.mrf.mxu2 }
  0xd6   :  { %v223_v58 = vpop.f32.mrf.mxu0  ;;  %v881_v39 = vadd.f32 %v290_v55, %v241_v59 }
  0xd7   :  { %v840_v62 = vadd.f32 %v272_v11, %v223_v58  ;;  %v853_v11 = vadd.f32 %v779_v8, %v781_v9  ;;  %v313_v8 = vsel %vm295_vm1, %v837_v60, 0.0 }
  0xd8   :  { %v348_v48 = vmul.f32 %v881_v39, %v881_v39  ;;  %v323_v53 = vsel %vm295_vm1, %v881_v39, 0.0 }
  0xd9   :  { %v309_v6 = vsel %vm295_vm1, %v840_v62, 0.0  ;;  %v341_v7 = vmul.f32 %v840_v62, %v840_v62  ;;  %v345_v28 = vmul.f32 %v853_v11, %v853_v11  ;;  %v317_v36 = vsel %vm295_vm1, %v853_v11, 0.0 }
  0xda   :  { %v310_v10 = vadd.f32 %v309_v6, %v308_v1  ;;  %v377_v57 = vsel %vm295_vm1, %v348_v48, 0.0 }
  0xdb   :  { %v363_v5 = vsel %vm295_vm1, %v341_v7, 0.0  ;;  %v371_v42 = vsel %vm295_vm1, %v345_v28, 0.0 }
  0xdc   :  { %v312_v18 = vadd.f32 %v311_v16, %v310_v10  ;;  %v364_v20 = vadd.f32 %v363_v5, %v362_v2 }
  0xdd   :  { %v243_v35 = vpop.f32.mrf.mxu2 }
  0xde   :  { %v314_v9 = vadd.f32 %v313_v8, %v312_v18  ;;  %v366_v26 = vadd.f32 %v365_v22, %v364_v20  ;;  %v888_v43 = vadd.f32 %v292_v12, %v243_v35 }
  0xe0   :  { %v316_v33 = vadd.f32 %v315_v27, %v314_v9  ;;  %v368_v34 = vadd.f32 %v367_v29, %v366_v26  ;;  %v349_v54 = vmul.f32 %v888_v43, %v888_v43  ;;  %v325_v58 = vsel %vm295_vm1, %v888_v43, 0.0 }
  0xe2   :  { %v370_v40 = vadd.f32 %v369_v14, %v368_v34  ;;  %v318_v41 = vadd.f32 %v317_v36, %v316_v33  ;;  %v379_v0 = vsel %vm295_vm1, %v349_v54, 0.0 }
  0xe4   :  { %v320_v44 = vadd.f32 %v319_v25, %v318_v41  ;;  %v372_v45 = vadd.f32 %v371_v42, %v370_v40 }
  0xe6   :  { %v322_v49 = vadd.f32 %v321_v47, %v320_v44  ;;  %v374_v50 = vadd.f32 %v373_v46, %v372_v45 }
  0xe8   :  { %v324_v55 = vadd.f32 %v323_v53, %v322_v49  ;;  %v376_v56 = vadd.f32 %v375_v51, %v374_v50 }
  0xea   :  { %v378_v59 = vadd.f32 %v377_v57, %v376_v56  ;;  %v326_v61 = vadd.f32 %v325_v58, %v324_v55 }
  0xec   :  { %v327_v1 = vrot.slane %v326_v61, 4  ;;  %v380_v4 = vadd.f32 %v379_v0, %v378_v59 }
  0xee   :  { %v328_v6 = vadd.f32 %v327_v1, %v326_v61  ;;  %v381_v7 = vrot.slane %v380_v4, 4 }
  0xf0   :  { %v329_v2 = vrot.slane %v328_v6, 2  ;;  %v382_v10 = vadd.f32 %v381_v7, %v380_v4 }
  0xf2   :  { %v330_v16 = vadd.f32 %v329_v2, %v328_v6  ;;  %v383_v3 = vrot.slane %v382_v10, 2 }
  0xf4   :  { %v331_v5 = vrot.slane %v330_v16, 1  ;;  %v384_v18 = vadd.f32 %v383_v3, %v382_v10 }
  0xf6   :  { %v332_v20 = vadd.f32 %v331_v5, %v330_v16  ;;  %v385_v21 = vrot.slane %v384_v18, 1 }
  0xf8   :  { %v904_v22 = vmul.f32 0.0078125, %v332_v20  ;;  %v386_v8 = vadd.f32 %v385_v21, %v384_v18 }
  0xfa   :  { %v387_v9 = vmul.f32 0.0078125, %v386_v8  ;;  %v388_v26 = vmul.f32 %v904_v22, %v904_v22  ;;  %v391_v37 = vsub.f32 %v789_v15, %v904_v22  ;;  %v392_v40 = vsub.f32 %v785_v13, %v904_v22 }
  0xfb   :  { %v393_v41 = vsub.f32 %v791_v17, %v904_v22  ;;  %v394_v42 = vsub.f32 %v795_v19, %v904_v22  ;;  %v395_v31 = vsub.f32 %v803_v24, %v904_v22  ;;  %v396_v15 = vsub.f32 %v812_v30, %v904_v22 }
  0xfc   :  { %v389_v27 = vsub.f32 %v387_v9, %v388_v26  ;;  %v397_v13 = vsub.f32 %v820_v38, %v904_v22  ;;  %v398_v17 = vsub.f32 %v840_v62, %v904_v22  ;;  %v399_v19 = vsub.f32 %v832_v52, %v904_v22 }
  0xfd   :  { %v400_v54 = vsub.f32 %v837_v60, %v904_v22  ;;  %v401_v30 = vsub.f32 %v843_v63, %v904_v22  ;;  %v402_v56 = vsub.f32 %v853_v11, %v904_v22  ;;  %v403_v62 = vsub.f32 %v865_v23, %v904_v22 }
  0xfe   :  { %v390_v28 = vmax.f32 %v389_v27, 0.0  ;;  %v404_v63 = vsub.f32 %v874_v32, %v904_v22  ;;  %v405_v11 = vsub.f32 %v881_v39, %v904_v22  ;;  %v406_v3 = vsub.f32 %v888_v43, %v904_v22 }
 0x100   :  { %v407_v29 = vadd.f32 1e-05, %v390_v28 }
 0x102   :  { %629 = vrsqrt.f32 %v407_v29  ;;  %vm414_vm3 = vweird.f32 %v407_v29 }
 0x108   :  { %v630_v33 = vpop.eup %629 }
 0x109   :  { %v409_v34 = vmul.f32 %v630_v33, %v407_v29  ;;  %vm415_vm2 = vweird.f32 %v630_v33 }
 0x10a   :  { %vm416_vm4 = vmor %vm414_vm3, %vm415_vm2 }
 0x10b   :  { %v410_v35 = vmul.f32 %v630_v33, %v409_v34 }
 0x10d   :  { %v411_v12 = vmul.f32 0.5, %v410_v35 }
 0x10f   :  { %v412_v14 = vsub.f32 1.5, %v411_v12 }
 0x111   :  { %v413_v36 = vmul.f32 %v630_v33, %v412_v14 }
 0x113   :  { %v417_v25 = vsel %vm416_vm4, %v630_v33, %v413_v36 }
 0x114   :  { %v418_v44 = vmul.f32 %v417_v25, %v391_v37  ;;  %v419_v45 = vmul.f32 %v417_v25, %v392_v40  ;;  %v420_v46 = vmul.f32 %v417_v25, %v393_v41  ;;  %v421_v47 = vmul.f32 %v417_v25, %v394_v42 }
 0x115   :  { %v422_v48 = vmul.f32 %v417_v25, %v395_v31  ;;  %v423_v49 = vmul.f32 %v417_v25, %v396_v15  ;;  %v424_v50 = vmul.f32 %v417_v25, %v397_v13  ;;  %v425_v55 = vmul.f32 %v417_v25, %v398_v17 }
 0x116   :  { %v434_v24 = vmax.f32 %v418_v44, 0.0  ;;  %v435_v51 = vmax.f32 %v419_v45, 0.0  ;;  %v436_v53 = vmax.f32 %v420_v46, 0.0  ;;  %v437_v38 = vmax.f32 %v421_v47, 0.0 }
 0x117   :  { %v426_v52 = vmul.f32 %v417_v25, %v399_v19  ;;  %v438_v57 = vmax.f32 %v422_v48, 0.0  ;;  %v427_v58 = vmul.f32 %v417_v25, %v400_v54  ;;  %v428_v59 = vmul.f32 %v417_v25, %v401_v30 }
 0x118   :  { %v439_v61 = vmax.f32 %v423_v49, 0.0  ;;  %v440_v0 = vmax.f32 %v424_v50, 0.0  ;;  %v450_v1 = vpack.c.bf16 %v434_v24, %v434_v24  ;;  %v451_v60 = vpack.c.bf16 %v435_v51, %v435_v51 }
 0x119   :  { %v452_v4 = vpack.c.bf16 %v436_v53, %v436_v53  ;;  %v429_v6 = vmul.f32 %v417_v25, %v402_v56  ;;  %v441_v7 = vmax.f32 %v425_v55, 0.0  ;;  %v453_v2 = vpack.c.bf16 %v437_v38, %v437_v38 }
 0x11a   :  { %v430_v23 = vmul.f32 %v417_v25, %v403_v62  ;;  %v442_v10 = vmax.f32 %v426_v52, 0.0  ;;  %v454_v16 = vpack.c.bf16 %v438_v57, %v438_v57  ;;  %467 = vst.msk [vmem:[%s1006_s2] sm:$0xf] %vm466_vm5, %v450_v1  ;;  %v431_v5 = vmul.f32 %v417_v25, %v404_v63 }
 0x11b   :  { %v443_v18 = vmax.f32 %v427_v58, 0.0  ;;  %v455_v32 = vpack.c.bf16 %v439_v61, %v439_v61  ;;  %468 = vst.msk [vmem:[%s1006_s2 + $0x4] sm:$0xf] %vm466_vm5, %v451_v60  ;;  %v432_v39 = vmul.f32 %v417_v25, %v405_v11  ;;  %v444_v20 = vmax.f32 %v428_v59, 0.0 }
 0x11c   :  { %v456_v21 = vpack.c.bf16 %v440_v0, %v440_v0  ;;  %469 = vst.msk [vmem:[%s1006_s2 + $0x8] sm:$0xf] %vm466_vm5, %v452_v4  ;;  %v433_v8 = vmul.f32 %v417_v25, %v406_v3  ;;  %v445_v9 = vmax.f32 %v429_v6, 0.0  ;;  %v457_v26 = vpack.c.bf16 %v441_v7, %v441_v7 }
 0x11d   :  { %470 = vst.msk [vmem:[%s1006_s2 + $0xc] sm:$0xf] %vm466_vm5, %v453_v2  ;;  %v446_v43 = vmax.f32 %v430_v23, 0.0  ;;  %v458_v22 = vpack.c.bf16 %v442_v10, %v442_v10  ;;  %v447_v27 = vmax.f32 %v431_v5, 0.0  ;;  %v459_v28 = vpack.c.bf16 %v443_v18, %v443_v18 }
 0x11e   :  { %471 = vst.msk [vmem:[%s1006_s2 + $0x10] sm:$0xf] %vm466_vm5, %v454_v16  ;;  %v448_v29 = vmax.f32 %v432_v39, 0.0  ;;  %v460_v33 = vpack.c.bf16 %v444_v20, %v444_v20  ;;  %v449_v34 = vmax.f32 %v433_v8, 0.0  ;;  %v461_v35 = vpack.c.bf16 %v445_v9, %v445_v9 }
 0x11f   :  { %472 = vst.msk [vmem:[%s1006_s2 + $0x14] sm:$0xf] %vm466_vm5, %v455_v32  ;;  %v462_v12 = vpack.c.bf16 %v446_v43, %v446_v43  ;;  %v463_v14 = vpack.c.bf16 %v447_v27, %v447_v27 }
 0x120   :  { %473 = vst.msk [vmem:[%s1006_s2 + $0x18] sm:$0xf] %vm466_vm5, %v456_v21  ;;  %v464_v36 = vpack.c.bf16 %v448_v29, %v448_v29  ;;  %v465_v37 = vpack.c.bf16 %v449_v34, %v449_v34 }
 0x121   :  { %474 = vst.msk [vmem:[%s1006_s2 + $0x1c] sm:$0xf] %vm466_vm5, %v457_v26 }
 0x122   :  { %475 = vst.msk [vmem:[%s1006_s2 + $0x20] sm:$0xf] %vm466_vm5, %v458_v22 }
 0x123   :  { %476 = vst.msk [vmem:[%s1006_s2 + $0x24] sm:$0xf] %vm466_vm5, %v459_v28 }
 0x124   :  { %477 = vst.msk [vmem:[%s1006_s2 + $0x28] sm:$0xf] %vm466_vm5, %v460_v33 }
 0x125   :  { %478 = vst.msk [vmem:[%s1006_s2 + $0x2c] sm:$0xf] %vm466_vm5, %v461_v35 }
 0x126   :  { %479 = vst.msk [vmem:[%s1006_s2 + $0x30] sm:$0xf] %vm466_vm5, %v462_v12 }
 0x127   :  { %480 = vst.msk [vmem:[%s1006_s2 + $0x34] sm:$0xf] %vm466_vm5, %v463_v14 }
 0x128   :  { %481 = vst.msk [vmem:[%s1006_s2 + $0x38] sm:$0xf] %vm466_vm5, %v464_v36 }
 0x129   :  { %482 = vst.msk [vmem:[%s1006_s2 + $0x3c] sm:$0xf] %vm466_vm5, %v465_v37 }

// kernel: resnet_v2_forward.8
= control target key start
LH: loop header
LB: loop body
LE: loop exit
PB: predicated region body
PF: predicated region fallthrough
CT: control target
= control target key end

     0   :  { %vm194_vm0 = vcmask 261120   ;;  %s576_s1 = inlined_call_operand.vmem [shape: bf16[288,128], index: 1, kind: input, shape index: {}]   ;;  %s577_s0 = inlined_call_operand.vmem [shape: bf16[32,288], index: 0, kind: input, shape index: {}]   ;;  %s578_s2 = inlined_call_operand.vmem [shape: bf16[32,128], index: 2, kind: output, shape index: {}]  }
   0x1   :  { %v431_v0 = vld [vmem:[%s576_s1 + $0x38] sm:$0xff]  ;;  %v430_v2 = vld [vmem:[%s576_s1 + $0x30] sm:$0xff]  ;;  %v441_v4 = vld [vmem:[%s576_s1 + $0x88] sm:$0xff] }
   0x2   :  { %v439_v1 = vld [vmem:[%s576_s1 + $0x78] sm:$0xff]  ;;  %201 = vmatpush.bf16.msra.mxu0 %v431_v0  ;;  %v438_v3 = vld [vmem:[%s576_s1 + $0x70] sm:$0xff]  ;;  %453 = vmatpush.bf16.msra.mxu3 %v431_v0  ;;  %v440_v5 = vld [vmem:[%s576_s1 + $0x80] sm:$0xff] }
   0x3   :  { %220 = vmatpush.bf16.msra.mxu1 %v439_v1  ;;  %245 = vmatpush.bf16.msra.mxu2 %v441_v4  ;;  %v330_v6 = vld [vmem:[%s577_s0 + $0x8] sm:$0xf]  ;;  %v420_v7 = vld [vmem:[%s577_s0 + $0x10] sm:$0xf0]  ;;  %v428_v11 = vld [vmem:[%s576_s1 + $0x20] sm:$0xff] }
   0x4   :  { %v429_v8 = vld [vmem:[%s576_s1 + $0x28] sm:$0xff]  ;;  %v331_v10 = vor.u32 %v420_v7, %v330_v6  ;;  %v436_v12 = vld [vmem:[%s576_s1 + $0x60] sm:$0xff]  ;;  %v427_v13 = vld [vmem:[%s576_s1 + $0x18] sm:$0xff] }
   0x5   :  { %v437_v9 = vld [vmem:[%s576_s1 + $0x68] sm:$0xff]  ;;  %v435_v14 = vld [vmem:[%s576_s1 + $0x58] sm:$0xff]  ;;  %v426_v15 = vld [vmem:[%s576_s1 + $0x10] sm:$0xff] }
   0x6   :  { %202 = vmatpush.bf16.msra.mxu0 %v430_v2  ;;  %454 = vmatpush.bf16.msra.mxu3 %v430_v2  ;;  %v434_v16 = vld [vmem:[%s576_s1 + $0x50] sm:$0xff]  ;;  %v342_v17 = vld [vmem:[%s577_s0 + $0x20] sm:$0xf]  ;;  %v423_v18 = vld [vmem:[%s577_s0 + $0x28] sm:$0xf0] }
   0x7   :  { %221 = vmatpush.bf16.msra.mxu1 %v438_v3  ;;  %246 = vmatpush.bf16.msra.mxu2 %v440_v5  ;;  %v425_v19 = vld [vmem:[%s576_s1 + $0x8] sm:$0xff]  ;;  %v343_v21 = vor.u32 %v423_v18, %v342_v17  ;;  %v424_v22 = vld [vmem:[%s576_s1] sm:$0xff]  ;;  %v324_v27 = vld [vmem:[%s577_s0 + $0xc] sm:$0xf0] }
   0x8   :  { %v433_v20 = vld [vmem:[%s576_s1 + $0x48] sm:$0xff]  ;;  %v432_v23 = vld [vmem:[%s576_s1 + $0x40] sm:$0xff]  ;;  %v334_v28 = vld [vmem:[%s577_s0 + $0x18] sm:$0xf] }
   0x9   :  { %v322_v24 = vld [vmem:[%s577_s0] sm:$0xf]  ;;  %v419_v25 = vld [vmem:[%s577_s0 + $0x8] sm:$0xf0]  ;;  %v418_v26 = vld [vmem:[%s577_s0 + $0x4] sm:$0xf] }
   0xa   :  { %203 = vmatpush.bf16.msra.mxu0 %v429_v8  ;;  %455 = vmatpush.bf16.msra.mxu3 %v429_v8  ;;  %v422_v29 = vld [vmem:[%s577_s0 + $0x20] sm:$0xf0]  ;;  %v323_v30 = vor.u32 %v419_v25, %v322_v24  ;;  %v327_v31 = vor.u32 %v418_v26, %v324_v27  ;;  %v421_v33 = vld [vmem:[%s577_s0 + $0x1c] sm:$0xf]  ;;  %v336_v34 = vld [vmem:[%s577_s0 + $0x24] sm:$0xf0] }
   0xb   :  { %222 = vmatpush.bf16.msra.mxu1 %v437_v9  ;;  %416 = vmatmul.msk.bf16.vlgmr.msra.gmra.mxu2 %vm194_vm0, %v331_v10  ;;  %v335_v32 = vor.u32 %v422_v29, %v334_v28  ;;  %v339_v35 = vor.u32 %v421_v33, %v336_v34 }
   0xe   :  { %204 = vmatpush.bf16.msra.mxu0 %v428_v11  ;;  %456 = vmatpush.bf16.msra.mxu3 %v428_v11 }
   0xf   :  { %223 = vmatpush.bf16.msra.mxu1 %v436_v12 }
  0x12   :  { %205 = vmatpush.bf16.msra.mxu0 %v427_v13  ;;  %457 = vmatpush.bf16.msra.mxu3 %v427_v13 }
  0x13   :  { %224 = vmatpush.bf16.msra.mxu1 %v435_v14 }
  0x16   :  { %206 = vmatpush.bf16.msra.mxu0 %v426_v15  ;;  %458 = vmatpush.bf16.msra.mxu3 %v426_v15 }
  0x17   :  { %225 = vmatpush.bf16.msra.mxu1 %v434_v16 }
  0x1a   :  { %207 = vmatpush.bf16.msra.mxu0 %v425_v19  ;;  %459 = vmatpush.bf16.msra.mxu3 %v425_v19 }
  0x1b   :  { %226 = vmatpush.bf16.msra.mxu1 %v433_v20  ;;  %417 = vmatmul.msk.bf16.gmra.mxu2 %vm194_vm0, %v343_v21 }
  0x1e   :  { %208 = vmatpush.bf16.msra.mxu0 %v424_v22  ;;  %460 = vmatpush.bf16.msra.mxu3 %v424_v22 }
  0x1f   :  { %227 = vmatpush.bf16.msra.mxu1 %v432_v23 }
  0x21   :  { %209 = vmatmul.bf16.vlgmr.msra.gmra.mxu0 %v323_v30  ;;  %214 = vmatmul.bf16.vlgmr.msra.gmra.mxu3 %v335_v32 }
  0x22   :  { %228 = vmatmul.bf16.vlgmr.msra.gmra.mxu1 %v327_v31 }
  0x32   :  { %233 = vmatmul.bf16.gmra.mxu1 %v339_v35 }
  0x8e   :  { %v248_v36 = vpop.f32.mrf.mxu2 }
  0x96   :  { %v250_v39 = vpop.f32.mrf.mxu2 }
  0x9e   :  { %v210_v38 = vpop.f32.mrf.mxu0  ;;  %v253_v44 = vpop.f32.mrf.mxu2 }
  0x9f   :  { %v229_v37 = vpop.f32.mrf.mxu1 }
  0xa0   :  { %v230_v46 = vadd.f32 %v229_v37, %v210_v38 }
  0xa2   :  { %v249_v49 = vadd.f32 %v248_v36, %v230_v46 }
  0xa4   :  { %v215_v42 = vpop.f32.mrf.mxu3  ;;  %v268_v54 = vmul.f32 %v249_v49, %v249_v49 }
  0xa6   :  { %v212_v41 = vpop.f32.mrf.mxu0  ;;  %v255_v58 = vpop.f32.mrf.mxu2 }
  0xa7   :  { %v231_v40 = vpop.f32.mrf.mxu1 }
  0xa8   :  { %v232_v43 = vadd.f32 %v231_v40, %v212_v41 }
  0xaa   :  { %v251_v48 = vadd.f32 %v250_v39, %v232_v43 }
  0xac   :  { %v269_v51 = vmul.f32 %v251_v48, %v251_v48  ;;  %v217_v52 = vpop.f32.mrf.mxu3  ;;  %v258_v55 = vadd.f32 %v251_v48, %v249_v49 }
  0xae   :  { %v272_v59 = vadd.f32 %v269_v51, %v268_v54 }
  0xaf   :  { %v234_v45 = vpop.f32.mrf.mxu1 }
  0xb0   :  { %v235_v47 = vadd.f32 %v234_v45, %v215_v42 }
  0xb2   :  { %v254_v50 = vadd.f32 %v253_v44, %v235_v47 }
  0xb4   :  { %v270_v56 = vmul.f32 %v254_v50, %v254_v50  ;;  %v259_v60 = vadd.f32 %v258_v55, %v254_v50 }
  0xb6   :  { %v273_v62 = vadd.f32 %v272_v59, %v270_v56 }
  0xb7   :  { %v236_v53 = vpop.f32.mrf.mxu1 }
  0xb8   :  { %v237_v57 = vadd.f32 %v236_v53, %v217_v52 }
  0xba   :  { %v256_v61 = vadd.f32 %v255_v58, %v237_v57 }
  0xbc   :  { %v260_v63 = vadd.f32 %v259_v60, %v256_v61  ;;  %v271_v0 = vmul.f32 %v256_v61, %v256_v61 }
  0xbe   :  { %v261_v1 = vrot.slane %v260_v63, 4  ;;  %v274_v2 = vadd.f32 %v273_v62, %v271_v0 }
  0xc0   :  { %v262_v3 = vadd.f32 %v261_v1, %v260_v63  ;;  %v275_v4 = vrot.slane %v274_v2, 4 }
  0xc2   :  { %v263_v5 = vrot.slane %v262_v3, 2  ;;  %v276_v6 = vadd.f32 %v275_v4, %v274_v2 }
  0xc4   :  { %v264_v7 = vadd.f32 %v263_v5, %v262_v3  ;;  %v277_v8 = vrot.slane %v276_v6, 2 }
  0xc6   :  { %v265_v9 = vrot.slane %v264_v7, 1  ;;  %v278_v10 = vadd.f32 %v277_v8, %v276_v6 }
  0xc8   :  { %v266_v11 = vadd.f32 %v265_v9, %v264_v7  ;;  %v279_v12 = vrot.slane %v278_v10, 1 }
  0xca   :  { %v267_v13 = vmul.f32 0.03125, %v266_v11  ;;  %v280_v14 = vadd.f32 %v279_v12, %v278_v10 }
  0xcc   :  { %v281_v15 = vmul.f32 0.03125, %v280_v14  ;;  %v282_v16 = vmul.f32 %v267_v13, %v267_v13  ;;  %v285_v26 = vsub.f32 %v249_v49, %v267_v13  ;;  %v286_v27 = vsub.f32 %v251_v48, %v267_v13 }
  0xcd   :  { %v287_v28 = vsub.f32 %v254_v50, %v267_v13  ;;  %v288_v29 = vsub.f32 %v256_v61, %v267_v13 }
  0xce   :  { %v283_v17 = vsub.f32 %v281_v15, %v282_v16 }
  0xd0   :  { %v284_v18 = vmax.f32 %v283_v17, 0.0 }
  0xd2   :  { %v289_v19 = vadd.f32 1e-05, %v284_v18 }
  0xd4   :  { %461 = vrsqrt.f32 %v289_v19  ;;  %vm296_vm2 = vweird.f32 %v289_v19 }
  0xda   :  { %v462_v20 = vpop.eup %461 }
  0xdb   :  { %v291_v21 = vmul.f32 %v462_v20, %v289_v19  ;;  %vm297_vm1 = vweird.f32 %v462_v20 }
  0xdc   :  { %vm298_vm3 = vmor %vm296_vm2, %vm297_vm1 }
  0xdd   :  { %v292_v22 = vmul.f32 %v462_v20, %v291_v21 }
  0xdf   :  { %v293_v23 = vmul.f32 0.5, %v292_v22 }
  0xe1   :  { %v294_v24 = vsub.f32 1.5, %v293_v23 }
  0xe3   :  { %v295_v25 = vmul.f32 %v462_v20, %v294_v24 }
  0xe5   :  { %v299_v30 = vsel %vm298_vm3, %v462_v20, %v295_v25 }
  0xe6   :  { %v300_v31 = vmul.f32 %v299_v30, %v285_v26  ;;  %v301_v32 = vmul.f32 %v299_v30, %v286_v27  ;;  %v302_v33 = vmul.f32 %v299_v30, %v287_v28  ;;  %v303_v34 = vmul.f32 %v299_v30, %v288_v29 }
  0xe8   :  { %v304_v35 = vmax.f32 %v300_v31, 0.0  ;;  %v305_v36 = vmax.f32 %v301_v32, 0.0  ;;  %v306_v37 = vmax.f32 %v302_v33, 0.0  ;;  %v307_v38 = vmax.f32 %v303_v34, 0.0 }
  0xea   :  { %v445_v39 = vpack.c.bf16 %v305_v36, %v304_v35  ;;  %v450_v40 = vpack.c.bf16 %v307_v38, %v306_v37 }
  0xec   :  { %446 = vst [vmem:[%s578_s2] sm:$0xff] %v445_v39  }
  0xed   :  { %452 = vst [vmem:[%s578_s2 + $0x8] sm:$0xff] %v450_v40  }

// kernel: resnet_v2_forward.9
= control target key start
LH: loop header
LB: loop body
LE: loop exit
PB: predicated region body
PF: predicated region fallthrough
CT: control target
= control target key end

     0   :  { %s12419_s0 = inlined_call_operand.vmem [shape: bf16[8,1152], index: 0, kind: input, shape index: {}]   ;;  %s12420_s1 = inlined_call_operand.vmem [shape: bf16[1152,1024], index: 1, kind: input, shape index: {}]   ;;  %s12421_s2 = inlined_call_operand.vmem [shape: f32[2,8], index: 2, kind: input, shape index: {}]   ;;  %s12422_s3 = inlined_call_operand.vmem [shape: f32[1024,10], index: 3, kind: input, shape index: {}]   ;;  %s12423_s4 = inlined_call_operand.vmem [shape: f32[1,10], index: 4, kind: input, shape index: {}]   ;;  %s12424_s5 = inlined_call_operand.hbm [shape: f32[2,10], index: 5, kind: output, shape index: {}]  }
   0x1   :  { %v5419_v0 = vld [vmem:[%s12420_s1 + $0x1c0] sm:$0xf] }
   0x2   :  { %v7565_v1 = vld [vmem:[%s12420_s1 + $0x1dc] sm:$0xf0] }
   0x3   :  { %v5675_v2 = vld [vmem:[%s12420_s1 + $0x3c0] sm:$0xf]  ;;  %v5420_v3 = vor.u32 %v7565_v1, %v5419_v0 }
   0x4   :  { %v7629_v4 = vld [vmem:[%s12420_s1 + $0x3dc] sm:$0xf0] }
   0x5   :  { %v5931_v5 = vld [vmem:[%s12420_s1 + $0x5c0] sm:$0xf]  ;;  %v5676_v7 = vor.u32 %v7629_v4, %v5675_v2  ;;  %3514 = vmatpush.bf16.msra.mxu0 %v5420_v3 }
   0x6   :  { %v7693_v6 = vld [vmem:[%s12420_s1 + $0x5dc] sm:$0xf0] }
   0x7   :  { %v5932_v8 = vor.u32 %v7693_v6, %v5931_v5  ;;  %v6187_v9 = vld [vmem:[%s12420_s1 + $0x7c0] sm:$0xf]  ;;  %3527 = vmatpush.bf16.msra.mxu1 %v5676_v7 }
   0x8   :  { %v7757_v10 = vld [vmem:[%s12420_s1 + $0x7dc] sm:$0xf0] }
   0x9   :  { %v5387_v11 = vld [vmem:[%s12420_s1 + $0x180] sm:$0xf]  ;;  %v6188_v12 = vor.u32 %v7757_v10, %v6187_v9  ;;  %3540 = vmatpush.bf16.msra.mxu2 %v5932_v8 }
   0xa   :  { %v7557_v13 = vld [vmem:[%s12420_s1 + $0x19c] sm:$0xf0] }
   0xb   :  { %v5643_v14 = vld [vmem:[%s12420_s1 + $0x380] sm:$0xf]  ;;  %v5388_v16 = vor.u32 %v7557_v13, %v5387_v11  ;;  %3553 = vmatpush.bf16.msra.mxu3 %v6188_v12 }
   0xc   :  { %v7621_v15 = vld [vmem:[%s12420_s1 + $0x39c] sm:$0xf0] }
   0xd   :  { %v5644_v17 = vor.u32 %v7621_v15, %v5643_v14  ;;  %v5899_v18 = vld [vmem:[%s12420_s1 + $0x580] sm:$0xf]  ;;  %3515 = vmatpush.bf16.msra.mxu0 %v5388_v16 }
   0xe   :  { %v7685_v19 = vld [vmem:[%s12420_s1 + $0x59c] sm:$0xf0] }
   0xf   :  { %v6155_v20 = vld [vmem:[%s12420_s1 + $0x780] sm:$0xf]  ;;  %v5900_v21 = vor.u32 %v7685_v19, %v5899_v18  ;;  %3528 = vmatpush.bf16.msra.mxu1 %v5644_v17 }
  0x10   :  { %v7749_v22 = vld [vmem:[%s12420_s1 + $0x79c] sm:$0xf0] }
  0x11   :  { %v5355_v23 = vld [vmem:[%s12420_s1 + $0x140] sm:$0xf]  ;;  %v6156_v25 = vor.u32 %v7749_v22, %v6155_v20  ;;  %3541 = vmatpush.bf16.msra.mxu2 %v5900_v21 }
  0x12   :  { %v7549_v24 = vld [vmem:[%s12420_s1 + $0x15c] sm:$0xf0] }
  0x13   :  { %v5611_v26 = vld [vmem:[%s12420_s1 + $0x340] sm:$0xf]  ;;  %v5356_v29 = vor.u32 %v7549_v24, %v5355_v23  ;;  %3554 = vmatpush.bf16.msra.mxu3 %v6156_v25 }
  0x14   :  { %v7613_v27 = vld [vmem:[%s12420_s1 + $0x35c] sm:$0xf0] }
  0x15   :  { %v5867_v28 = vld [vmem:[%s12420_s1 + $0x540] sm:$0xf]  ;;  %v5612_v33 = vor.u32 %v7613_v27, %v5611_v26  ;;  %3516 = vmatpush.bf16.msra.mxu0 %v5356_v29 }
  0x16   :  { %v7677_v30 = vld [vmem:[%s12420_s1 + $0x55c] sm:$0xf0] }
  0x17   :  { %v6123_v31 = vld [vmem:[%s12420_s1 + $0x740] sm:$0xf]  ;;  %v5868_v34 = vor.u32 %v7677_v30, %v5867_v28  ;;  %3529 = vmatpush.bf16.msra.mxu1 %v5612_v33 }
  0x18   :  { %v7741_v32 = vld [vmem:[%s12420_s1 + $0x75c] sm:$0xf0] }
  0x19   :  { %v5323_v35 = vld [vmem:[%s12420_s1 + $0x100] sm:$0xf]  ;;  %v6124_v38 = vor.u32 %v7741_v32, %v6123_v31  ;;  %3542 = vmatpush.bf16.msra.mxu2 %v5868_v34 }
  0x1a   :  { %v7541_v36 = vld [vmem:[%s12420_s1 + $0x11c] sm:$0xf0] }
  0x1b   :  { %v5579_v37 = vld [vmem:[%s12420_s1 + $0x300] sm:$0xf]  ;;  %v5324_v44 = vor.u32 %v7541_v36, %v5323_v35  ;;  %3555 = vmatpush.bf16.msra.mxu3 %v6124_v38 }
  0x1c   :  { %v7605_v39 = vld [vmem:[%s12420_s1 + $0x31c] sm:$0xf0] }
  0x1d   :  { %v5835_v40 = vld [vmem:[%s12420_s1 + $0x500] sm:$0xf]  ;;  %v5580_v45 = vor.u32 %v7605_v39, %v5579_v37  ;;  %3517 = vmatpush.bf16.msra.mxu0 %v5324_v44 }
  0x1e   :  { %v7669_v41 = vld [vmem:[%s12420_s1 + $0x51c] sm:$0xf0] }
  0x1f   :  { %v6091_v42 = vld [vmem:[%s12420_s1 + $0x700] sm:$0xf]  ;;  %v5836_v46 = vor.u32 %v7669_v41, %v5835_v40  ;;  %3530 = vmatpush.bf16.msra.mxu1 %v5580_v45 }
  0x20   :  { %v7733_v43 = vld [vmem:[%s12420_s1 + $0x71c] sm:$0xf0] }
  0x21   :  { %v5291_v47 = vld [vmem:[%s12420_s1 + $0xc0] sm:$0xf]  ;;  %v6092_v50 = vor.u32 %v7733_v43, %v6091_v42  ;;  %3543 = vmatpush.bf16.msra.mxu2 %v5836_v46 }
  0x22   :  { %v7533_v48 = vld [vmem:[%s12420_s1 + $0xdc] sm:$0xf0] }
  0x23   :  { %v5547_v49 = vld [vmem:[%s12420_s1 + $0x2c0] sm:$0xf]  ;;  %v5292_v56 = vor.u32 %v7533_v48, %v5291_v47  ;;  %3556 = vmatpush.bf16.msra.mxu3 %v6092_v50 }
  0x24   :  { %v7597_v51 = vld [vmem:[%s12420_s1 + $0x2dc] sm:$0xf0] }
  0x25   :  { %v5803_v52 = vld [vmem:[%s12420_s1 + $0x4c0] sm:$0xf]  ;;  %v5548_v57 = vor.u32 %v7597_v51, %v5547_v49  ;;  %3518 = vmatpush.bf16.msra.mxu0 %v5292_v56 }
  0x26   :  { %v7661_v53 = vld [vmem:[%s12420_s1 + $0x4dc] sm:$0xf0] }
  0x27   :  { %v6059_v54 = vld [vmem:[%s12420_s1 + $0x6c0] sm:$0xf]  ;;  %v5804_v58 = vor.u32 %v7661_v53, %v5803_v52  ;;  %3531 = vmatpush.bf16.msra.mxu1 %v5548_v57 }
  0x28   :  { %v7725_v55 = vld [vmem:[%s12420_s1 + $0x6dc] sm:$0xf0] }
  0x29   :  { %v5259_v59 = vld [vmem:[%s12420_s1 + $0x80] sm:$0xf]  ;;  %v6060_v62 = vor.u32 %v7725_v55, %v6059_v54  ;;  %3544 = vmatpush.bf16.msra.mxu2 %v5804_v58  ;;  %v22_v58 = vld [vmem:[%s12419_s0 + $0x8] sm:$0xff] }
  0x2a   :  { %v7525_v60 = vld [vmem:[%s12420_s1 + $0x9c] sm:$0xf0] }
  0x2b   :  { %v5515_v61 = vld [vmem:[%s12420_s1 + $0x280] sm:$0xf]  ;;  %v5260_v4 = vor.u32 %v7525_v60, %v5259_v59  ;;  %3557 = vmatpush.bf16.msra.mxu3 %v6060_v62 }
  0x2c   :  { %v7589_v63 = vld [vmem:[%s12420_s1 + $0x29c] sm:$0xf0] }
  0x2d   :  { %v5771_v0 = vld [vmem:[%s12420_s1 + $0x480] sm:$0xf]  ;;  %v5516_v5 = vor.u32 %v7589_v63, %v5515_v61  ;;  %3519 = vmatpush.bf16.msra.mxu0 %v5260_v4  ;;  %v609_v63 = vunpack.c.l.b16 %v22_v58 }
  0x2e   :  { %v7653_v1 = vld [vmem:[%s12420_s1 + $0x49c] sm:$0xf0] }
  0x2f   :  { %v6027_v2 = vld [vmem:[%s12420_s1 + $0x680] sm:$0xf]  ;;  %v5772_v6 = vor.u32 %v7653_v1, %v5771_v0  ;;  %3532 = vmatpush.bf16.msra.mxu1 %v5516_v5  ;;  %v610_v0 = vunpack.c.h.b16 %v22_v58  ;;  %v8427_v4 = vpack.c.b16 %v609_v63, %v609_v63 }
  0x30   :  { %v7717_v3 = vld [vmem:[%s12420_s1 + $0x69c] sm:$0xf0] }
  0x31   :  { %v5227_v7 = vld [vmem:[%s12420_s1 + $0x40] sm:$0xf]  ;;  %v6028_v10 = vor.u32 %v7717_v3, %v6027_v2  ;;  %3545 = vmatpush.bf16.msra.mxu2 %v5772_v6  ;;  %v8432_v6 = vpack.c.b16 %v610_v0, %v610_v0 }
  0x32   :  { %v7517_v8 = vld [vmem:[%s12420_s1 + $0x5c] sm:$0xf0] }
  0x33   :  { %v5483_v9 = vld [vmem:[%s12420_s1 + $0x240] sm:$0xf]  ;;  %v5228_v16 = vor.u32 %v7517_v8, %v5227_v7  ;;  %3558 = vmatpush.bf16.msra.mxu3 %v6028_v10 }
  0x34   :  { %v7581_v11 = vld [vmem:[%s12420_s1 + $0x25c] sm:$0xf0] }
  0x35   :  { %v5739_v12 = vld [vmem:[%s12420_s1 + $0x440] sm:$0xf]  ;;  %v5484_v19 = vor.u32 %v7581_v11, %v5483_v9  ;;  %3520 = vmatpush.bf16.msra.mxu0 %v5228_v16 }
  0x36   :  { %v7645_v13 = vld [vmem:[%s12420_s1 + $0x45c] sm:$0xf0] }
  0x37   :  { %v5995_v14 = vld [vmem:[%s12420_s1 + $0x640] sm:$0xf]  ;;  %v5740_v20 = vor.u32 %v7645_v13, %v5739_v12  ;;  %3533 = vmatpush.bf16.msra.mxu1 %v5484_v19 }
  0x38   :  { %v7709_v15 = vld [vmem:[%s12420_s1 + $0x65c] sm:$0xf0] }
  0x39   :  { %v5195_v17 = vld [vmem:[%s12420_s1] sm:$0xf]  ;;  %v5996_v24 = vor.u32 %v7709_v15, %v5995_v14  ;;  %3546 = vmatpush.bf16.msra.mxu2 %v5740_v20 }
  0x3a   :  { %v7509_v18 = vld [vmem:[%s12420_s1 + $0x1c] sm:$0xf0] }
  0x3b   :  { %v5451_v21 = vld [vmem:[%s12420_s1 + $0x200] sm:$0xf]  ;;  %v5196_v31 = vor.u32 %v7509_v18, %v5195_v17  ;;  %3559 = vmatpush.bf16.msra.mxu3 %v5996_v24 }
  0x3c   :  { %v7573_v22 = vld [vmem:[%s12420_s1 + $0x21c] sm:$0xf0] }
  0x3d   :  { %v5707_v23 = vld [vmem:[%s12420_s1 + $0x400] sm:$0xf]  ;;  %v5452_v35 = vor.u32 %v7573_v22, %v5451_v21  ;;  %3521 = vmatpush.bf16.msra.mxu0 %v5196_v31 }
  0x3e   :  { %v7637_v25 = vld [vmem:[%s12420_s1 + $0x41c] sm:$0xf0] }
  0x3f   :  { %v5963_v26 = vld [vmem:[%s12420_s1 + $0x600] sm:$0xf]  ;;  %v5708_v36 = vor.u32 %v7637_v25, %v5707_v23  ;;  %3534 = vmatpush.bf16.msra.mxu1 %v5452_v35 }
  0x40   :  { %v7701_v27 = vld [vmem:[%s12420_s1 + $0x61c] sm:$0xf0] }
  0x41   :  { %v6443_v28 = vld [vmem:[%s12420_s1 + $0x9c0] sm:$0xf]  ;;  %v5964_v39 = vor.u32 %v7701_v27, %v5963_v26  ;;  %3547 = vmatpush.bf16.msra.mxu2 %v5708_v36 }
  0x42   :  { %v7821_v29 = vld [vmem:[%s12420_s1 + $0x9dc] sm:$0xf0] }
  0x43   :  { %v6699_v30 = vld [vmem:[%s12420_s1 + $0xbc0] sm:$0xf]  ;;  %v6444_v40 = vor.u32 %v7821_v29, %v6443_v28  ;;  %3560 = vmatpush.bf16.msra.mxu3 %v5964_v39 }
  0x44   :  { %v7885_v32 = vld [vmem:[%s12420_s1 + $0xbdc] sm:$0xf0]  ;;  %3548 = vmatmul.bf16.vlgmr.msra.gmra.mxu2 %v8427_v4 }
  0x45   :  { %v6955_v33 = vld [vmem:[%s12420_s1 + $0xdc0] sm:$0xf]  ;;  %v6700_v41 = vor.u32 %v7885_v32, %v6699_v30  ;;  %3566 = vmatpush.bf16.msrb.mxu0 %v6444_v40 }
  0x46   :  { %v7949_v34 = vld [vmem:[%s12420_s1 + $0xddc] sm:$0xf0]  ;;  %3561 = vmatmul.bf16.vlgmr.msra.gmra.mxu3 %v8432_v6 }
  0x47   :  { %v7211_v37 = vld [vmem:[%s12420_s1 + $0xfc0] sm:$0xf]  ;;  %v6956_v42 = vor.u32 %v7949_v34, %v6955_v33  ;;  %3579 = vmatpush.bf16.msrb.mxu1 %v6700_v41 }
  0x48   :  { %v8013_v38 = vld [vmem:[%s12420_s1 + $0xfdc] sm:$0xf0] }
  0x49   :  { %v6411_v43 = vld [vmem:[%s12420_s1 + $0x980] sm:$0xf]  ;;  %v7212_v46 = vor.u32 %v8013_v38, %v7211_v37  ;;  %3592 = vmatpush.bf16.msrb.mxu2 %v6956_v42 }
  0x4a   :  { %v7813_v44 = vld [vmem:[%s12420_s1 + $0x99c] sm:$0xf0] }
  0x4b   :  { %v6667_v45 = vld [vmem:[%s12420_s1 + $0xb80] sm:$0xf]  ;;  %v6412_v52 = vor.u32 %v7813_v44, %v6411_v43  ;;  %3605 = vmatpush.bf16.msrb.mxu3 %v7212_v46 }
  0x4c   :  { %v7877_v47 = vld [vmem:[%s12420_s1 + $0xb9c] sm:$0xf0] }
  0x4d   :  { %v6923_v48 = vld [vmem:[%s12420_s1 + $0xd80] sm:$0xf]  ;;  %v6668_v54 = vor.u32 %v7877_v47, %v6667_v45  ;;  %3567 = vmatpush.bf16.msrb.mxu0 %v6412_v52 }
  0x4e   :  { %v7941_v49 = vld [vmem:[%s12420_s1 + $0xd9c] sm:$0xf0] }
  0x4f   :  { %v7179_v50 = vld [vmem:[%s12420_s1 + $0xf80] sm:$0xf]  ;;  %v6924_v55 = vor.u32 %v7941_v49, %v6923_v48  ;;  %3580 = vmatpush.bf16.msrb.mxu1 %v6668_v54 }
  0x50   :  { %v8005_v51 = vld [vmem:[%s12420_s1 + $0xf9c] sm:$0xf0] }
  0x51   :  { %v6379_v53 = vld [vmem:[%s12420_s1 + $0x940] sm:$0xf]  ;;  %v7180_v59 = vor.u32 %v8005_v51, %v7179_v50  ;;  %3593 = vmatpush.bf16.msrb.mxu2 %v6924_v55 }
  0x52   :  { %v7805_v56 = vld [vmem:[%s12420_s1 + $0x95c] sm:$0xf0] }
  0x53   :  { %v6635_v57 = vld [vmem:[%s12420_s1 + $0xb40] sm:$0xf]  ;;  %v6380_v3 = vor.u32 %v7805_v56, %v6379_v53  ;;  %3606 = vmatpush.bf16.msrb.mxu3 %v7180_v59 }
  0x54   :  { %v7869_v60 = vld [vmem:[%s12420_s1 + $0xb5c] sm:$0xf0] }
  0x55   :  { %v6891_v61 = vld [vmem:[%s12420_s1 + $0xd40] sm:$0xf]  ;;  %v6636_v7 = vor.u32 %v7869_v60, %v6635_v57  ;;  %3568 = vmatpush.bf16.msrb.mxu0 %v6380_v3  ;;  %v24_v3 = vld [vmem:[%s12419_s0 + $0x18] sm:$0xff] }
  0x56   :  { %v7933_v62 = vld [vmem:[%s12420_s1 + $0xd5c] sm:$0xf0] }
  0x57   :  { %v7147_v1 = vld [vmem:[%s12420_s1 + $0xf40] sm:$0xf]  ;;  %v6892_v8 = vor.u32 %v7933_v62, %v6891_v61  ;;  %3581 = vmatpush.bf16.msrb.mxu1 %v6636_v7 }
  0x58   :  { %v7997_v2 = vld [vmem:[%s12420_s1 + $0xf5c] sm:$0xf0] }
  0x59   :  { %v21_v5 = vld [vmem:[%s12419_s0] sm:$0xff]  ;;  %v7148_v14 = vor.u32 %v7997_v2, %v7147_v1  ;;  %3594 = vmatpush.bf16.msrb.mxu2 %v6892_v8 }
  0x5a   :  { %v6347_v9 = vld [vmem:[%s12420_s1 + $0x900] sm:$0xf]  ;;  %v607_v12 = vunpack.c.l.b16 %v21_v5  ;;  %v608_v13 = vunpack.c.h.b16 %v21_v5 }
  0x5b   :  { %v7797_v10 = vld [vmem:[%s12420_s1 + $0x91c] sm:$0xf0]  ;;  %3607 = vmatpush.bf16.msrb.mxu3 %v7148_v14  ;;  %v5421_v14 = vld [vmem:[%s12420_s1 + $0x1e0] sm:$0xf0] }
  0x5c   :  { %v6603_v11 = vld [vmem:[%s12420_s1 + $0xb00] sm:$0xf]  ;;  %v8459_v20 = vpack.c.b16 %v607_v12, %v607_v12  ;;  %v8462_v21 = vpack.c.b16 %v608_v13, %v608_v13  ;;  %v6348_v22 = vor.u32 %v7797_v10, %v6347_v9  ;;  %v23_v9 = vld [vmem:[%s12419_s0 + $0x10] sm:$0xff]  ;;  %v7561_v12 = vld [vmem:[%s12420_s1 + $0x1c4] sm:$0xf] }
  0x5d   :  { %v7861_v15 = vld [vmem:[%s12420_s1 + $0xb1c] sm:$0xf0] }
  0x5e   :  { %v6859_v16 = vld [vmem:[%s12420_s1 + $0xd00] sm:$0xf]  ;;  %v6604_v23 = vor.u32 %v7861_v15, %v6603_v11  ;;  %3522 = vmatmul.bf16.vlgmr.msra.gmra.mxu0 %v8459_v20  ;;  %3535 = vmatmul.bf16.vlgmr.msra.gmra.mxu1 %v8462_v21  ;;  %v7625_v15 = vld [vmem:[%s12420_s1 + $0x3c4] sm:$0xf] }
  0x5f   :  { %v7925_v17 = vld [vmem:[%s12420_s1 + $0xd1c] sm:$0xf0]  ;;  %3569 = vmatpush.bf16.msrb.mxu0 %v6348_v22  ;;  %v7689_v22 = vld [vmem:[%s12420_s1 + $0x5c4] sm:$0xf] }
  0x60   :  { %v7115_v18 = vld [vmem:[%s12420_s1 + $0xf00] sm:$0xf]  ;;  %v6860_v24 = vor.u32 %v7925_v17, %v6859_v16  ;;  %3582 = vmatpush.bf16.msrb.mxu1 %v6604_v23  ;;  %v5677_v16 = vld [vmem:[%s12420_s1 + $0x3e0] sm:$0xf0]  ;;  %v613_v17 = vunpack.c.l.b16 %v24_v3 }
  0x61   :  { %v7989_v19 = vld [vmem:[%s12420_s1 + $0xf1c] sm:$0xf0]  ;;  %v5933_v23 = vld [vmem:[%s12420_s1 + $0x5e0] sm:$0xf0] }
  0x62   :  { %v6315_v25 = vld [vmem:[%s12420_s1 + $0x8c0] sm:$0xf]  ;;  %v7116_v28 = vor.u32 %v7989_v19, %v7115_v18  ;;  %3595 = vmatpush.bf16.msrb.mxu2 %v6860_v24  ;;  %v611_v24 = vunpack.c.l.b16 %v23_v9 }
  0x63   :  { %v7789_v26 = vld [vmem:[%s12420_s1 + $0x8dc] sm:$0xf0] }
  0x64   :  { %v6571_v27 = vld [vmem:[%s12420_s1 + $0xac0] sm:$0xf]  ;;  %v6316_v34 = vor.u32 %v7789_v26, %v6315_v25  ;;  %3608 = vmatpush.bf16.msrb.mxu3 %v7116_v28  ;;  %v614_v25 = vunpack.c.h.b16 %v24_v3  ;;  %v612_v28 = vunpack.c.h.b16 %v23_v9  ;;  %v5837_v3 = vld [vmem:[%s12420_s1 + $0x520] sm:$0xf0] }
  0x65   :  { %v7853_v29 = vld [vmem:[%s12420_s1 + $0xadc] sm:$0xf0] }
  0x66   :  { %v6827_v30 = vld [vmem:[%s12420_s1 + $0xcc0] sm:$0xf]  ;;  %v6572_v35 = vor.u32 %v7853_v29, %v6571_v27  ;;  %3570 = vmatpush.bf16.msrb.mxu0 %v6316_v34  ;;  %v5424_v29 = vor.u32 %v7561_v12, %v5421_v14  ;;  %v5936_v34 = vor.u32 %v7689_v22, %v5933_v23  ;;  %v7593_v14 = vld [vmem:[%s12420_s1 + $0x2c4] sm:$0xf] }
  0x67   :  { %v7917_v31 = vld [vmem:[%s12420_s1 + $0xcdc] sm:$0xf0] }
  0x68   :  { %v7083_v32 = vld [vmem:[%s12420_s1 + $0xec0] sm:$0xf]  ;;  %v6828_v36 = vor.u32 %v7917_v31, %v6827_v30  ;;  %3583 = vmatpush.bf16.msrb.mxu1 %v6572_v35  ;;  %v5680_v30 = vor.u32 %v7625_v15, %v5677_v16  ;;  %v5389_v35 = vld [vmem:[%s12420_s1 + $0x1a0] sm:$0xf0] }
  0x69   :  { %v7981_v33 = vld [vmem:[%s12420_s1 + $0xedc] sm:$0xf0]  ;;  %v5549_v15 = vld [vmem:[%s12420_s1 + $0x2e0] sm:$0xf0] }
  0x6a   :  { %v6283_v37 = vld [vmem:[%s12420_s1 + $0x880] sm:$0xf]  ;;  %v7084_v40 = vor.u32 %v7981_v33, %v7083_v32  ;;  %3596 = vmatpush.bf16.msrb.mxu2 %v6828_v36  ;;  %v7553_v33 = vld [vmem:[%s12420_s1 + $0x184] sm:$0xf]  ;;  %v5552_v22 = vor.u32 %v7593_v14, %v5549_v15 }
  0x6b   :  { %v7781_v38 = vld [vmem:[%s12420_s1 + $0x89c] sm:$0xf0]  ;;  %v7617_v36 = vld [vmem:[%s12420_s1 + $0x384] sm:$0xf] }
  0x6c   :  { %v6539_v39 = vld [vmem:[%s12420_s1 + $0xa80] sm:$0xf]  ;;  %v6284_v46 = vor.u32 %v7781_v38, %v6283_v37  ;;  %3609 = vmatpush.bf16.msrb.mxu3 %v7084_v40  ;;  %v5645_v37 = vld [vmem:[%s12420_s1 + $0x3a0] sm:$0xf0]  ;;  %v8610_v38 = vpack.c.b16 %v613_v17, %v613_v17 }
  0x6d   :  { %v7845_v41 = vld [vmem:[%s12420_s1 + $0xa9c] sm:$0xf0]  ;;  %v5901_v40 = vld [vmem:[%s12420_s1 + $0x5a0] sm:$0xf0] }
  0x6e   :  { %v6795_v42 = vld [vmem:[%s12420_s1 + $0xc80] sm:$0xf]  ;;  %v6540_v47 = vor.u32 %v7845_v41, %v6539_v39  ;;  %3571 = vmatpush.bf16.msrb.mxu0 %v6284_v46  ;;  %v7681_v39 = vld [vmem:[%s12420_s1 + $0x584] sm:$0xf]  ;;  %v8618_v41 = vpack.c.b16 %v611_v24, %v611_v24  ;;  %v5648_v46 = vor.u32 %v7617_v36, %v5645_v37 }
  0x6f   :  { %v7909_v43 = vld [vmem:[%s12420_s1 + $0xc9c] sm:$0xf0]  ;;  %v7657_v16 = vld [vmem:[%s12420_s1 + $0x4c4] sm:$0xf] }
  0x70   :  { %v7051_v44 = vld [vmem:[%s12420_s1 + $0xe80] sm:$0xf]  ;;  %v6796_v48 = vor.u32 %v7909_v43, %v6795_v42  ;;  %3584 = vmatpush.bf16.msrb.mxu1 %v6540_v47  ;;  %v8620_v42 = vpack.c.b16 %v614_v25, %v614_v25  ;;  %v5805_v17 = vld [vmem:[%s12420_s1 + $0x4e0] sm:$0xf0] }
  0x71   :  { %v7973_v45 = vld [vmem:[%s12420_s1 + $0xe9c] sm:$0xf0]  ;;  %v7521_v25 = vld [vmem:[%s12420_s1 + $0x84] sm:$0xf] }
  0x72   :  { %v6251_v49 = vld [vmem:[%s12420_s1 + $0x840] sm:$0xf]  ;;  %v7052_v52 = vor.u32 %v7973_v45, %v7051_v44  ;;  %3597 = vmatpush.bf16.msrb.mxu2 %v6796_v48  ;;  %v8622_v44 = vpack.c.b16 %v612_v28, %v612_v28  ;;  %v5392_v45 = vor.u32 %v7553_v33, %v5389_v35  ;;  %v7585_v28 = vld [vmem:[%s12420_s1 + $0x284] sm:$0xf] }
  0x73   :  { %v7773_v50 = vld [vmem:[%s12420_s1 + $0x85c] sm:$0xf0]  ;;  %v7513_v37 = vld [vmem:[%s12420_s1 + $0x44] sm:$0xf] }
  0x74   :  { %v6507_v51 = vld [vmem:[%s12420_s1 + $0xa40] sm:$0xf]  ;;  %v6252_v59 = vor.u32 %v7773_v50, %v6251_v49  ;;  %3610 = vmatpush.bf16.msrb.mxu3 %v7052_v52  ;;  %v7545_v49 = vld [vmem:[%s12420_s1 + $0x144] sm:$0xf]  ;;  %v5904_v50 = vor.u32 %v7681_v39, %v5901_v40 }
  0x75   :  { %v7837_v53 = vld [vmem:[%s12420_s1 + $0xa5c] sm:$0xf0]  ;;  %v7609_v52 = vld [vmem:[%s12420_s1 + $0x344] sm:$0xf] }
  0x76   :  { %v6763_v54 = vld [vmem:[%s12420_s1 + $0xc40] sm:$0xf]  ;;  %v6508_v63 = vor.u32 %v7837_v53, %v6507_v51  ;;  %3572 = vmatpush.bf16.msrb.mxu0 %v6252_v59  ;;  %v5357_v51 = vld [vmem:[%s12420_s1 + $0x160] sm:$0xf0] }
  0x77   :  { %v7901_v55 = vld [vmem:[%s12420_s1 + $0xc5c] sm:$0xf0]  ;;  %v5613_v53 = vld [vmem:[%s12420_s1 + $0x360] sm:$0xf0] }
  0x78   :  { %v7019_v56 = vld [vmem:[%s12420_s1 + $0xe40] sm:$0xf]  ;;  %v6764_v0 = vor.u32 %v7901_v55, %v6763_v54  ;;  %3585 = vmatpush.bf16.msrb.mxu1 %v6508_v63  ;;  %v7673_v54 = vld [vmem:[%s12420_s1 + $0x544] sm:$0xf] }
  0x79   :  { %v7965_v57 = vld [vmem:[%s12420_s1 + $0xe5c] sm:$0xf0]  ;;  %v5869_v55 = vld [vmem:[%s12420_s1 + $0x560] sm:$0xf0] }
  0x7a   :  { %v6219_v58 = vld [vmem:[%s12420_s1 + $0x800] sm:$0xf]  ;;  %v7020_v5 = vor.u32 %v7965_v57, %v7019_v56  ;;  %3598 = vmatpush.bf16.msrb.mxu2 %v6764_v0  ;;  %v5360_v57 = vor.u32 %v7545_v49, %v5357_v51  ;;  %v5325_v63 = vld [vmem:[%s12420_s1 + $0x120] sm:$0xf0] }
  0x7b   :  { %v7765_v60 = vld [vmem:[%s12420_s1 + $0x81c] sm:$0xf0]  ;;  %v7601_v0 = vld [vmem:[%s12420_s1 + $0x304] sm:$0xf] }
  0x7c   :  { %v6475_v61 = vld [vmem:[%s12420_s1 + $0xa00] sm:$0xf]  ;;  %v6220_v13 = vor.u32 %v7765_v60, %v6219_v58  ;;  %3611 = vmatpush.bf16.msrb.mxu3 %v7020_v5  ;;  %v5616_v58 = vor.u32 %v7609_v52, %v5613_v53  ;;  %v5229_v40 = vld [vmem:[%s12420_s1 + $0x60] sm:$0xf0] }
  0x7d   :  { %v7829_v62 = vld [vmem:[%s12420_s1 + $0xa1c] sm:$0xf0] }
  0x7e   :  { %v6731_v1 = vld [vmem:[%s12420_s1 + $0xc00] sm:$0xf]  ;;  %v6476_v18 = vor.u32 %v7829_v62, %v6475_v61  ;;  %3573 = vmatpush.bf16.msrb.mxu0 %v6220_v13  ;;  %v7537_v61 = vld [vmem:[%s12420_s1 + $0x104] sm:$0xf]  ;;  %v5872_v62 = vor.u32 %v7673_v54, %v5869_v55 }
  0x7f   :  { %v7893_v2 = vld [vmem:[%s12420_s1 + $0xc1c] sm:$0xf0]  ;;  %v5293_v13 = vld [vmem:[%s12420_s1 + $0xe0] sm:$0xf0] }
  0x80   :  { %v6987_v7 = vld [vmem:[%s12420_s1 + $0xe00] sm:$0xf]  ;;  %v6732_v19 = vor.u32 %v7893_v2, %v6731_v1  ;;  %3586 = vmatpush.bf16.msrb.mxu1 %v6476_v18  ;;  %v5581_v1 = vld [vmem:[%s12420_s1 + $0x320] sm:$0xf0] }
  0x81   :  { %v7957_v8 = vld [vmem:[%s12420_s1 + $0xe1c] sm:$0xf0]  ;;  %3574 = vmatmul.bf16.vlgmr.msrb.gmra.mxu0 %v8618_v41  ;;  %v7665_v2 = vld [vmem:[%s12420_s1 + $0x504] sm:$0xf] }
  0x82   :  { %v7467_v10 = vld [vmem:[%s12420_s1 + $0x11c0] sm:$0xf]  ;;  %v6988_v26 = vor.u32 %v7957_v8, %v6987_v7  ;;  %3599 = vmatpush.bf16.msrb.mxu2 %v6732_v19  ;;  %v5328_v7 = vor.u32 %v7537_v61, %v5325_v63  ;;  %v5584_v8 = vor.u32 %v7601_v0, %v5581_v1  ;;  %v5840_v12 = vor.u32 %v7665_v2, %v5837_v3 }
  0x83   :  { %v8077_v11 = vld [vmem:[%s12420_s1 + $0x11dc] sm:$0xf0]  ;;  %3587 = vmatmul.bf16.vlgmr.msrb.gmra.mxu1 %v8622_v44 }
  0x84   :  { %v7468_v27 = vor.u32 %v8077_v11, %v7467_v10  ;;  %v7435_v31 = vld [vmem:[%s12420_s1 + $0x1180] sm:$0xf]  ;;  %3612 = vmatpush.bf16.msrb.mxu3 %v6988_v26  ;;  %3631 = vmatpush.bf16.msra.mxu1 %v5424_v29  ;;  %v7529_v11 = vld [vmem:[%s12420_s1 + $0xc4] sm:$0xf]  ;;  %v5808_v26 = vor.u32 %v7657_v16, %v5805_v17 }
  0x85   :  { %v8069_v32 = vld [vmem:[%s12420_s1 + $0x119c] sm:$0xf0]  ;;  %3600 = vmatmul.bf16.vlgmr.msrb.gmra.mxu2 %v8610_v38  ;;  %v5296_v19 = vor.u32 %v7529_v11, %v5293_v13  ;;  %v5517_v29 = vld [vmem:[%s12420_s1 + $0x2a0] sm:$0xf0] }
  0x86   :  { %3618 = vmatpush.bf16.msra.mxu0 %v7468_v27  ;;  %v7436_v43 = vor.u32 %v8069_v32, %v7435_v31  ;;  %3644 = vmatpush.bf16.msra.mxu2 %v5680_v30  ;;  %v7403_v47 = vld [vmem:[%s12420_s1 + $0x1140] sm:$0xf]  ;;  %v5261_v27 = vld [vmem:[%s12420_s1 + $0xa0] sm:$0xf0] }
  0x87   :  { %v8061_v48 = vld [vmem:[%s12420_s1 + $0x115c] sm:$0xf0]  ;;  %3613 = vmatmul.bf16.vlgmr.msrb.gmra.mxu3 %v8620_v42  ;;  %v7649_v30 = vld [vmem:[%s12420_s1 + $0x484] sm:$0xf]  ;;  %v5264_v33 = vor.u32 %v7521_v25, %v5261_v27 }
  0x88   :  { %3657 = vmatpush.bf16.msra.mxu3 %v5936_v34  ;;  %v7404_v56 = vor.u32 %v8061_v48, %v7403_v47  ;;  %3632 = vmatpush.bf16.msra.mxu1 %v5392_v45  ;;  %v7371_v59 = vld [vmem:[%s12420_s1 + $0x1100] sm:$0xf]  ;;  %v5773_v31 = vld [vmem:[%s12420_s1 + $0x4a0] sm:$0xf0]  ;;  %v5520_v34 = vor.u32 %v7585_v28, %v5517_v29 }
  0x89   :  { %v8053_v60 = vld [vmem:[%s12420_s1 + $0x111c] sm:$0xf0]  ;;  %v5776_v39 = vor.u32 %v7649_v30, %v5773_v31  ;;  %v5485_v45 = vld [vmem:[%s12420_s1 + $0x260] sm:$0xf0] }
  0x8a   :  { %3619 = vmatpush.bf16.msra.mxu0 %v7436_v43  ;;  %3645 = vmatpush.bf16.msra.mxu2 %v5648_v46  ;;  %v7372_v5 = vor.u32 %v8053_v60, %v7371_v59  ;;  %v7339_v9 = vld [vmem:[%s12420_s1 + $0x10c0] sm:$0xf]  ;;  %v7577_v43 = vld [vmem:[%s12420_s1 + $0x244] sm:$0xf] }
  0x8b   :  { %v8045_v10 = vld [vmem:[%s12420_s1 + $0x10dc] sm:$0xf0]  ;;  %v7641_v46 = vld [vmem:[%s12420_s1 + $0x444] sm:$0xf] }
  0x8c   :  { %3658 = vmatpush.bf16.msra.mxu3 %v5904_v50  ;;  %3633 = vmatpush.bf16.msra.mxu1 %v5360_v57  ;;  %v7340_v18 = vor.u32 %v8045_v10, %v7339_v9  ;;  %v7307_v23 = vld [vmem:[%s12420_s1 + $0x1080] sm:$0xf]  ;;  %v5741_v47 = vld [vmem:[%s12420_s1 + $0x460] sm:$0xf0] }
  0x8d   :  { %v8037_v24 = vld [vmem:[%s12420_s1 + $0x109c] sm:$0xf0] }
  0x8e   :  { %3620 = vmatpush.bf16.msra.mxu0 %v7404_v56  ;;  %3646 = vmatpush.bf16.msra.mxu2 %v5616_v58  ;;  %v7308_v32 = vor.u32 %v8037_v24, %v7307_v23  ;;  %v7275_v35 = vld [vmem:[%s12420_s1 + $0x1040] sm:$0xf] }
  0x8f   :  { %v8029_v36 = vld [vmem:[%s12420_s1 + $0x105c] sm:$0xf0] }
  0x90   :  { %3659 = vmatpush.bf16.msra.mxu3 %v5872_v62  ;;  %3634 = vmatpush.bf16.msra.mxu1 %v5328_v7 }
  0x92   :  { %3621 = vmatpush.bf16.msra.mxu0 %v7372_v5  ;;  %3647 = vmatpush.bf16.msra.mxu2 %v5584_v8 }
  0x94   :  { %3660 = vmatpush.bf16.msra.mxu3 %v5840_v12  ;;  %3635 = vmatpush.bf16.msra.mxu1 %v5296_v19 }
  0x96   :  { %3622 = vmatpush.bf16.msra.mxu0 %v7340_v18  ;;  %3648 = vmatpush.bf16.msra.mxu2 %v5552_v22 }
  0x98   :  { %3661 = vmatpush.bf16.msra.mxu3 %v5808_v26 }
  0x99   :  { %10 = vsyncpa [#allocation3], 0  ;;  %v7276_v48 = vor.u32 %v8029_v36, %v7275_v35  ;;  %v7243_v49 = vld [vmem:[%s12420_s1 + $0x1000] sm:$0xf]  ;;  %v7505_v51 = vld [vmem:[%s12420_s1 + $0x4] sm:$0xf]  ;;  %3636 = vmatpush.bf16.msra.mxu1 %v5264_v33  ;;  %v5232_v52 = vor.u32 %v7513_v37, %v5229_v40  ;;  %v5488_v53 = vor.u32 %v7577_v43, %v5485_v45  ;;  %v5744_v57 = vor.u32 %v7641_v46, %v5741_v47 }
  0x9a   :  { %3623 = vmatpush.bf16.msra.mxu0 %v7308_v32  ;;  %v8021_v50 = vld [vmem:[%s12420_s1 + $0x101c] sm:$0xf0]  ;;  %3649 = vmatpush.bf16.msra.mxu2 %v5520_v34  ;;  %v5197_v54 = vld [vmem:[%s12420_s1 + $0x20] sm:$0xf0]  ;;  %s5184_s15 = sshll.u32 %s12424_s5, 4  ;;  %s5185_s15 = int_to_ptr.hbm [resolvable:$true] %s5184_s15 }
  0x9b   :  { %v7569_v55 = vld [vmem:[%s12420_s1 + $0x204] sm:$0xf]  ;;  %v25_v56 = vld [vmem:[%s12419_s0 + $0x20] sm:$0xf]  ;;  %v7244_v0 = vor.u32 %v8021_v50, %v7243_v49  ;;  %v5200_v7 = vor.u32 %v7505_v51, %v5197_v54 }
  0x9c   :  { %3662 = vmatpush.bf16.msra.mxu3 %v5776_v39  ;;  %v5453_v58 = vld [vmem:[%s12420_s1 + $0x220] sm:$0xf0]  ;;  %v615_v5 = vunpack.c.l.b16 %v25_v56 }
  0x9d   :  { %v7633_v59 = vld [vmem:[%s12420_s1 + $0x404] sm:$0xf]  ;;  %3637 = vmatpush.bf16.msra.mxu1 %v5232_v52  ;;  %v5456_v8 = vor.u32 %v7569_v55, %v5453_v58 }
  0x9e   :  { %v5709_v60 = vld [vmem:[%s12420_s1 + $0x420] sm:$0xf0]  ;;  %3624 = vmatpush.bf16.msra.mxu0 %v7276_v48  ;;  %3650 = vmatpush.bf16.msra.mxu2 %v5488_v53  ;;  %v8808_v19 = vpack.c.b16 %v615_v5, %v615_v5 }
  0x9f   :  { %v7753_v61 = vld [vmem:[%s12420_s1 + $0x7c4] sm:$0xf]  ;;  %v5712_v11 = vor.u32 %v7633_v59, %v5709_v60 }
  0xa0   :  { %v6189_v62 = vld [vmem:[%s12420_s1 + $0x7e0] sm:$0xf0]  ;;  %3663 = vmatpush.bf16.msra.mxu3 %v5744_v57 }
  0xa1   :  { %v7817_v63 = vld [vmem:[%s12420_s1 + $0x9c4] sm:$0xf]  ;;  %v6192_v12 = vor.u32 %v7753_v61, %v6189_v62  ;;  %3638 = vmatpush.bf16.msra.mxu1 %v5200_v7 }
  0xa2   :  { %v6445_v1 = vld [vmem:[%s12420_s1 + $0x9e0] sm:$0xf0]  ;;  %3625 = vmatpush.bf16.msra.mxu0 %v7244_v0  ;;  %3651 = vmatpush.bf16.msra.mxu2 %v5456_v8 }
  0xa3   :  { %v7881_v2 = vld [vmem:[%s12420_s1 + $0xbc4] sm:$0xf]  ;;  %v6448_v13 = vor.u32 %v7817_v63, %v6445_v1 }
  0xa4   :  { %v6701_v3 = vld [vmem:[%s12420_s1 + $0xbe0] sm:$0xf0]  ;;  %3664 = vmatpush.bf16.msra.mxu3 %v5712_v11  ;;  %3639 = vmatmul.bf16.vlgmr.msra.gmra.mxu1 %v8459_v20 }
  0xa5   :  { %v7945_v9 = vld [vmem:[%s12420_s1 + $0xdc4] sm:$0xf]  ;;  %v6704_v14 = vor.u32 %v7881_v2, %v6701_v3  ;;  %3683 = vmatpush.bf16.msrb.mxu1 %v6448_v13  ;;  %3626 = vmatmul.bf16.vlgmr.msra.gmra.mxu0 %v8808_v19 }
  0xa6   :  { %v6957_v10 = vld [vmem:[%s12420_s1 + $0xde0] sm:$0xf0]  ;;  %3670 = vmatpush.bf16.msrb.mxu0 %v6192_v12  ;;  %3652 = vmatmul.bf16.vlgmr.msra.gmra.mxu2 %v8462_v21 }
  0xa7   :  { %v7745_v15 = vld [vmem:[%s12420_s1 + $0x784] sm:$0xf]  ;;  %v6960_v18 = vor.u32 %v7945_v9, %v6957_v10  ;;  %3696 = vmatpush.bf16.msrb.mxu2 %v6704_v14  ;;  %3665 = vmatmul.bf16.vlgmr.msra.gmra.mxu3 %v8427_v4 }
  0xa8   :  { %v6157_v16 = vld [vmem:[%s12420_s1 + $0x7a0] sm:$0xf0] }
  0xa9   :  { %v7809_v17 = vld [vmem:[%s12420_s1 + $0x984] sm:$0xf]  ;;  %v6160_v27 = vor.u32 %v7745_v15, %v6157_v16  ;;  %3709 = vmatpush.bf16.msrb.mxu3 %v6960_v18 }
  0xaa   :  { %v6413_v22 = vld [vmem:[%s12420_s1 + $0x9a0] sm:$0xf0] }
  0xab   :  { %v7873_v23 = vld [vmem:[%s12420_s1 + $0xb84] sm:$0xf]  ;;  %v6416_v28 = vor.u32 %v7809_v17, %v6413_v22  ;;  %3671 = vmatpush.bf16.msrb.mxu0 %v6160_v27 }
  0xac   :  { %v6669_v24 = vld [vmem:[%s12420_s1 + $0xba0] sm:$0xf0] }
  0xad   :  { %v7937_v25 = vld [vmem:[%s12420_s1 + $0xd84] sm:$0xf]  ;;  %v6672_v29 = vor.u32 %v7873_v23, %v6669_v24  ;;  %3684 = vmatpush.bf16.msrb.mxu1 %v6416_v28 }
  0xae   :  { %v6925_v26 = vld [vmem:[%s12420_s1 + $0xda0] sm:$0xf0] }
  0xaf   :  { %v7737_v30 = vld [vmem:[%s12420_s1 + $0x744] sm:$0xf]  ;;  %v6928_v33 = vor.u32 %v7937_v25, %v6925_v26  ;;  %3697 = vmatpush.bf16.msrb.mxu2 %v6672_v29 }
  0xb0   :  { %v6125_v31 = vld [vmem:[%s12420_s1 + $0x760] sm:$0xf0] }
  0xb1   :  { %v7801_v32 = vld [vmem:[%s12420_s1 + $0x944] sm:$0xf]  ;;  %v6128_v40 = vor.u32 %v7737_v30, %v6125_v31  ;;  %3710 = vmatpush.bf16.msrb.mxu3 %v6928_v33 }
  0xb2   :  { %v6381_v34 = vld [vmem:[%s12420_s1 + $0x960] sm:$0xf0] }
  0xb3   :  { %v7865_v35 = vld [vmem:[%s12420_s1 + $0xb44] sm:$0xf]  ;;  %v6384_v43 = vor.u32 %v7801_v32, %v6381_v34  ;;  %3672 = vmatpush.bf16.msrb.mxu0 %v6128_v40 }
  0xb4   :  { %v6637_v36 = vld [vmem:[%s12420_s1 + $0xb60] sm:$0xf0] }
  0xb5   :  { %v7929_v37 = vld [vmem:[%s12420_s1 + $0xd44] sm:$0xf]  ;;  %v6640_v45 = vor.u32 %v7865_v35, %v6637_v36  ;;  %3685 = vmatpush.bf16.msrb.mxu1 %v6384_v43 }
  0xb6   :  { %v6893_v39 = vld [vmem:[%s12420_s1 + $0xd60] sm:$0xf0] }
  0xb7   :  { %v7729_v46 = vld [vmem:[%s12420_s1 + $0x704] sm:$0xf]  ;;  %v6896_v49 = vor.u32 %v7929_v37, %v6893_v39  ;;  %3698 = vmatpush.bf16.msrb.mxu2 %v6640_v45 }
  0xb8   :  { %v6093_v47 = vld [vmem:[%s12420_s1 + $0x720] sm:$0xf0] }
  0xb9   :  { %v7793_v48 = vld [vmem:[%s12420_s1 + $0x904] sm:$0xf]  ;;  %v6096_v55 = vor.u32 %v7729_v46, %v6093_v47  ;;  %3711 = vmatpush.bf16.msrb.mxu3 %v6896_v49 }
  0xba   :  { %v6349_v50 = vld [vmem:[%s12420_s1 + $0x920] sm:$0xf0] }
  0xbb   :  { %v7857_v51 = vld [vmem:[%s12420_s1 + $0xb04] sm:$0xf]  ;;  %v6352_v56 = vor.u32 %v7793_v48, %v6349_v50  ;;  %3673 = vmatpush.bf16.msrb.mxu0 %v6096_v55 }
  0xbc   :  { %v6605_v52 = vld [vmem:[%s12420_s1 + $0xb20] sm:$0xf0] }
  0xbd   :  { %v7921_v53 = vld [vmem:[%s12420_s1 + $0xd04] sm:$0xf]  ;;  %v6608_v57 = vor.u32 %v7857_v51, %v6605_v52  ;;  %3686 = vmatpush.bf16.msrb.mxu1 %v6352_v56 }
  0xbe   :  { %v6861_v54 = vld [vmem:[%s12420_s1 + $0xd20] sm:$0xf0] }
  0xbf   :  { %v7721_v58 = vld [vmem:[%s12420_s1 + $0x6c4] sm:$0xf]  ;;  %v6864_v61 = vor.u32 %v7921_v53, %v6861_v54  ;;  %3699 = vmatpush.bf16.msrb.mxu2 %v6608_v57  ;;  %v5427_v53 = vld [vmem:[%s12420_s1 + $0x1c8] sm:$0xf] }
  0xc0   :  { %v6061_v59 = vld [vmem:[%s12420_s1 + $0x6e0] sm:$0xf0]  ;;  %v7566_v54 = vld [vmem:[%s12420_s1 + $0x1e4] sm:$0xf0] }
  0xc1   :  { %v7785_v60 = vld [vmem:[%s12420_s1 + $0x8c4] sm:$0xf]  ;;  %v6064_v3 = vor.u32 %v7721_v58, %v6061_v59  ;;  %3712 = vmatpush.bf16.msrb.mxu3 %v6864_v61  ;;  %v5683_v57 = vld [vmem:[%s12420_s1 + $0x3c8] sm:$0xf] }
  0xc2   :  { %v6317_v62 = vld [vmem:[%s12420_s1 + $0x8e0] sm:$0xf0]  ;;  %v7630_v58 = vld [vmem:[%s12420_s1 + $0x3e4] sm:$0xf0] }
  0xc3   :  { %v7849_v63 = vld [vmem:[%s12420_s1 + $0xac4] sm:$0xf]  ;;  %v6320_v5 = vor.u32 %v7785_v60, %v6317_v62  ;;  %3674 = vmatpush.bf16.msrb.mxu0 %v6064_v3  ;;  %v5428_v62 = vor.u32 %v7566_v54, %v5427_v53 }
  0xc4   :  { %v6573_v0 = vld [vmem:[%s12420_s1 + $0xae0] sm:$0xf0] }
  0xc5   :  { %v7913_v1 = vld [vmem:[%s12420_s1 + $0xcc4] sm:$0xf]  ;;  %v6576_v7 = vor.u32 %v7849_v63, %v6573_v0  ;;  %3687 = vmatpush.bf16.msrb.mxu1 %v6320_v5  ;;  %v5395_v5 = vld [vmem:[%s12420_s1 + $0x188] sm:$0xf] }
  0xc6   :  { %v6829_v2 = vld [vmem:[%s12420_s1 + $0xce0] sm:$0xf0] }
  0xc7   :  { %v7713_v8 = vld [vmem:[%s12420_s1 + $0x684] sm:$0xf]  ;;  %v6832_v11 = vor.u32 %v7913_v1, %v6829_v2  ;;  %3700 = vmatpush.bf16.msrb.mxu2 %v6576_v7  ;;  %v5684_v2 = vor.u32 %v7630_v58, %v5683_v57  ;;  %v7558_v7 = vld [vmem:[%s12420_s1 + $0x1a4] sm:$0xf0] }
  0xc8   :  { %v6029_v9 = vld [vmem:[%s12420_s1 + $0x6a0] sm:$0xf0] }
  0xc9   :  { %v7777_v10 = vld [vmem:[%s12420_s1 + $0x884] sm:$0xf]  ;;  %v6032_v17 = vor.u32 %v7713_v8, %v6029_v9  ;;  %3713 = vmatpush.bf16.msrb.mxu3 %v6832_v11  ;;  %v5651_v8 = vld [vmem:[%s12420_s1 + $0x388] sm:$0xf] }
  0xca   :  { %v6285_v12 = vld [vmem:[%s12420_s1 + $0x8a0] sm:$0xf0]  ;;  %v7622_v9 = vld [vmem:[%s12420_s1 + $0x3a4] sm:$0xf0] }
  0xcb   :  { %v7841_v13 = vld [vmem:[%s12420_s1 + $0xa84] sm:$0xf]  ;;  %v6288_v18 = vor.u32 %v7777_v10, %v6285_v12  ;;  %3675 = vmatpush.bf16.msrb.mxu0 %v6032_v17  ;;  %v5396_v12 = vor.u32 %v7558_v7, %v5395_v5 }
  0xcc   :  { %v6541_v14 = vld [vmem:[%s12420_s1 + $0xaa0] sm:$0xf0] }
  0xcd   :  { %v7905_v15 = vld [vmem:[%s12420_s1 + $0xc84] sm:$0xf]  ;;  %v6544_v22 = vor.u32 %v7841_v13, %v6541_v14  ;;  %3688 = vmatpush.bf16.msrb.mxu1 %v6288_v18  ;;  %v5363_v18 = vld [vmem:[%s12420_s1 + $0x148] sm:$0xf] }
  0xce   :  { %v6797_v16 = vld [vmem:[%s12420_s1 + $0xca0] sm:$0xf0] }
  0xcf   :  { %v7705_v23 = vld [vmem:[%s12420_s1 + $0x644] sm:$0xf]  ;;  %v6800_v26 = vor.u32 %v7905_v15, %v6797_v16  ;;  %3701 = vmatpush.bf16.msrb.mxu2 %v6544_v22  ;;  %v5652_v16 = vor.u32 %v7622_v9, %v5651_v8  ;;  %v7550_v22 = vld [vmem:[%s12420_s1 + $0x164] sm:$0xf0] }
  0xd0   :  { %v5997_v24 = vld [vmem:[%s12420_s1 + $0x660] sm:$0xf0] }
  0xd1   :  { %v7769_v25 = vld [vmem:[%s12420_s1 + $0x844] sm:$0xf]  ;;  %v6000_v32 = vor.u32 %v7705_v23, %v5997_v24  ;;  %3714 = vmatpush.bf16.msrb.mxu3 %v6800_v26  ;;  %v5619_v23 = vld [vmem:[%s12420_s1 + $0x348] sm:$0xf] }
  0xd2   :  { %v6253_v27 = vld [vmem:[%s12420_s1 + $0x860] sm:$0xf0]  ;;  %v7614_v24 = vld [vmem:[%s12420_s1 + $0x364] sm:$0xf0] }
  0xd3   :  { %v7833_v28 = vld [vmem:[%s12420_s1 + $0xa44] sm:$0xf]  ;;  %v6256_v35 = vor.u32 %v7769_v25, %v6253_v27  ;;  %3676 = vmatpush.bf16.msrb.mxu0 %v6000_v32  ;;  %v5364_v27 = vor.u32 %v7550_v22, %v5363_v18 }
  0xd4   :  { %v6509_v29 = vld [vmem:[%s12420_s1 + $0xa60] sm:$0xf0] }
  0xd5   :  { %v7897_v30 = vld [vmem:[%s12420_s1 + $0xc44] sm:$0xf]  ;;  %v6512_v36 = vor.u32 %v7833_v28, %v6509_v29  ;;  %3689 = vmatpush.bf16.msrb.mxu1 %v6256_v35  ;;  %v5587_v35 = vld [vmem:[%s12420_s1 + $0x308] sm:$0xf] }
  0xd6   :  { %v6765_v31 = vld [vmem:[%s12420_s1 + $0xc60] sm:$0xf0] }
  0xd7   :  { %v7697_v33 = vld [vmem:[%s12420_s1 + $0x604] sm:$0xf]  ;;  %v6768_v43 = vor.u32 %v7897_v30, %v6765_v31  ;;  %3702 = vmatpush.bf16.msrb.mxu2 %v6512_v36  ;;  %v5620_v31 = vor.u32 %v7614_v24, %v5619_v23  ;;  %v7606_v36 = vld [vmem:[%s12420_s1 + $0x324] sm:$0xf0] }
  0xd8   :  { %v5965_v34 = vld [vmem:[%s12420_s1 + $0x620] sm:$0xf0] }
  0xd9   :  { %v7761_v37 = vld [vmem:[%s12420_s1 + $0x804] sm:$0xf]  ;;  %v5968_v51 = vor.u32 %v7697_v33, %v5965_v34  ;;  %3715 = vmatpush.bf16.msrb.mxu3 %v6768_v43  ;;  %v5331_v33 = vld [vmem:[%s12420_s1 + $0x108] sm:$0xf] }
  0xda   :  { %v6221_v39 = vld [vmem:[%s12420_s1 + $0x820] sm:$0xf0]  ;;  %v7542_v34 = vld [vmem:[%s12420_s1 + $0x124] sm:$0xf0] }
  0xdb   :  { %v7825_v40 = vld [vmem:[%s12420_s1 + $0xa04] sm:$0xf]  ;;  %v6224_v55 = vor.u32 %v7761_v37, %v6221_v39  ;;  %3677 = vmatpush.bf16.msrb.mxu0 %v5968_v51  ;;  %v5555_v51 = vld [vmem:[%s12420_s1 + $0x2c8] sm:$0xf] }
  0xdc   :  { %v6477_v45 = vld [vmem:[%s12420_s1 + $0xa20] sm:$0xf0] }
  0xdd   :  { %v7889_v46 = vld [vmem:[%s12420_s1 + $0xc04] sm:$0xf]  ;;  %v6480_v56 = vor.u32 %v7825_v40, %v6477_v45  ;;  %3690 = vmatpush.bf16.msrb.mxu1 %v6224_v55  ;;  %v5332_v40 = vor.u32 %v7542_v34, %v5331_v33  ;;  %v7758_v34 = vld [vmem:[%s12420_s1 + $0x7e4] sm:$0xf0] }
  0xde   :  { %v6733_v47 = vld [vmem:[%s12420_s1 + $0xc20] sm:$0xf0]  ;;  %3678 = vmatmul.bf16.vlgmr.msrb.gmra.mxu0 %v8432_v6 }
  0xdf   :  { %v8009_v48 = vld [vmem:[%s12420_s1 + $0xfc4] sm:$0xf]  ;;  %v6736_v59 = vor.u32 %v7889_v46, %v6733_v47  ;;  %3703 = vmatpush.bf16.msrb.mxu2 %v6480_v56  ;;  %v5588_v47 = vor.u32 %v7606_v36, %v5587_v35  ;;  %v6451_v35 = vld [vmem:[%s12420_s1 + $0x9c8] sm:$0xf] }
  0xe0   :  { %v7213_v49 = vld [vmem:[%s12420_s1 + $0xfe0] sm:$0xf0]  ;;  %3691 = vmatmul.bf16.vlgmr.msrb.gmra.mxu1 %v8618_v41  ;;  %v7822_v36 = vld [vmem:[%s12420_s1 + $0x9e4] sm:$0xf0] }
  0xe1   :  { %v8073_v50 = vld [vmem:[%s12420_s1 + $0x11c4] sm:$0xf]  ;;  %v7216_v60 = vor.u32 %v8009_v48, %v7213_v49  ;;  %3716 = vmatpush.bf16.msrb.mxu3 %v6736_v59  ;;  %v5299_v49 = vld [vmem:[%s12420_s1 + $0xc8] sm:$0xf] }
  0xe2   :  { %v7469_v52 = vld [vmem:[%s12420_s1 + $0x11e0] sm:$0xf0]  ;;  %3704 = vmatmul.bf16.vlgmr.msrb.gmra.mxu2 %v8622_v44 }
  0xe3   :  { %v7472_v61 = vor.u32 %v8073_v50, %v7469_v52  ;;  %v8001_v63 = vld [vmem:[%s12420_s1 + $0xf84] sm:$0xf]  ;;  %3722 = vmatpush.bf16.msra.mxu0 %v7216_v60  ;;  %3748 = vmatpush.bf16.msra.mxu2 %v5428_v62  ;;  %v7534_v50 = vld [vmem:[%s12420_s1 + $0xe4] sm:$0xf0] }
  0xe4   :  { %v7181_v0 = vld [vmem:[%s12420_s1 + $0xfa0] sm:$0xf0]  ;;  %3717 = vmatmul.bf16.vlgmr.msrb.gmra.mxu3 %v8610_v38  ;;  %v7598_v52 = vld [vmem:[%s12420_s1 + $0x2e4] sm:$0xf0]  ;;  %v5300_v55 = vor.u32 %v7534_v50, %v5299_v49 }
  0xe5   :  { %v8065_v1 = vld [vmem:[%s12420_s1 + $0x1184] sm:$0xf]  ;;  %v7184_v10 = vor.u32 %v8001_v63, %v7181_v0  ;;  %3735 = vmatpush.bf16.msra.mxu1 %v7472_v61  ;;  %3761 = vmatpush.bf16.msra.mxu3 %v5684_v2  ;;  %v5556_v59 = vor.u32 %v7598_v52, %v5555_v51  ;;  %v5267_v61 = vld [vmem:[%s12420_s1 + $0x88] sm:$0xf] }
  0xe6   :  { %v7437_v3 = vld [vmem:[%s12420_s1 + $0x11a0] sm:$0xf0]  ;;  %v7526_v62 = vld [vmem:[%s12420_s1 + $0xa4] sm:$0xf0] }
  0xe7   :  { %v7440_v11 = vor.u32 %v8065_v1, %v7437_v3  ;;  %v7993_v13 = vld [vmem:[%s12420_s1 + $0xf44] sm:$0xf]  ;;  %3723 = vmatpush.bf16.msra.mxu0 %v7184_v10  ;;  %3749 = vmatpush.bf16.msra.mxu2 %v5396_v12  ;;  %v5523_v63 = vld [vmem:[%s12420_s1 + $0x288] sm:$0xf]  ;;  %v5268_v3 = vor.u32 %v7526_v62, %v5267_v61 }
  0xe8   :  { %v7149_v14 = vld [vmem:[%s12420_s1 + $0xf60] sm:$0xf0]  ;;  %v7590_v0 = vld [vmem:[%s12420_s1 + $0x2a4] sm:$0xf0] }
  0xe9   :  { %v8057_v15 = vld [vmem:[%s12420_s1 + $0x1144] sm:$0xf]  ;;  %v7152_v25 = vor.u32 %v7993_v13, %v7149_v14  ;;  %3736 = vmatpush.bf16.msra.mxu1 %v7440_v11  ;;  %3762 = vmatpush.bf16.msra.mxu3 %v5652_v16  ;;  %v5524_v9 = vor.u32 %v7590_v0, %v5523_v63  ;;  %v5235_v11 = vld [vmem:[%s12420_s1 + $0x48] sm:$0xf] }
  0xea   :  { %v7405_v17 = vld [vmem:[%s12420_s1 + $0x1160] sm:$0xf0]  ;;  %v7518_v12 = vld [vmem:[%s12420_s1 + $0x64] sm:$0xf0] }
  0xeb   :  { %v7408_v26 = vor.u32 %v8057_v15, %v7405_v17  ;;  %v7985_v28 = vld [vmem:[%s12420_s1 + $0xf04] sm:$0xf]  ;;  %3724 = vmatpush.bf16.msra.mxu0 %v7152_v25  ;;  %3750 = vmatpush.bf16.msra.mxu2 %v5364_v27  ;;  %v5491_v13 = vld [vmem:[%s12420_s1 + $0x248] sm:$0xf]  ;;  %v5236_v22 = vor.u32 %v7518_v12, %v5235_v11 }
  0xec   :  { %v7117_v29 = vld [vmem:[%s12420_s1 + $0xf20] sm:$0xf0]  ;;  %v7582_v14 = vld [vmem:[%s12420_s1 + $0x264] sm:$0xf0] }
  0xed   :  { %v8049_v30 = vld [vmem:[%s12420_s1 + $0x1104] sm:$0xf]  ;;  %v7120_v37 = vor.u32 %v7985_v28, %v7117_v29  ;;  %3737 = vmatpush.bf16.msra.mxu1 %v7408_v26  ;;  %3763 = vmatpush.bf16.msra.mxu3 %v5620_v31  ;;  %v5203_v25 = vld [vmem:[%s12420_s1 + $0x8] sm:$0xf]  ;;  %v5492_v26 = vor.u32 %v7582_v14, %v5491_v13 }
  0xee   :  { %v7373_v32 = vld [vmem:[%s12420_s1 + $0x1120] sm:$0xf0]  ;;  %v7510_v27 = vld [vmem:[%s12420_s1 + $0x24] sm:$0xf0] }
  0xef   :  { %v7376_v39 = vor.u32 %v8049_v30, %v7373_v32  ;;  %v7977_v43 = vld [vmem:[%s12420_s1 + $0xec4] sm:$0xf]  ;;  %3725 = vmatpush.bf16.msra.mxu0 %v7120_v37  ;;  %3751 = vmatpush.bf16.msra.mxu2 %v5332_v40  ;;  %v5459_v28 = vld [vmem:[%s12420_s1 + $0x208] sm:$0xf] }
  0xf0   :  { %v7085_v45 = vld [vmem:[%s12420_s1 + $0xee0] sm:$0xf0]  ;;  %v7574_v29 = vld [vmem:[%s12420_s1 + $0x224] sm:$0xf0] }
  0xf1   :  { %v8041_v46 = vld [vmem:[%s12420_s1 + $0x10c4] sm:$0xf]  ;;  %v7088_v53 = vor.u32 %v7977_v43, %v7085_v45  ;;  %3738 = vmatpush.bf16.msra.mxu1 %v7376_v39  ;;  %3764 = vmatpush.bf16.msra.mxu3 %v5588_v47  ;;  %v5939_v30 = vld [vmem:[%s12420_s1 + $0x5c8] sm:$0xf]  ;;  %v5204_v39 = vor.u32 %v7510_v27, %v5203_v25  ;;  %v5460_v45 = vor.u32 %v7574_v29, %v5459_v28 }
  0xf2   :  { %v7341_v48 = vld [vmem:[%s12420_s1 + $0x10e0] sm:$0xf0]  ;;  %v7694_v31 = vld [vmem:[%s12420_s1 + $0x5e4] sm:$0xf0] }
  0xf3   :  { %v7344_v54 = vor.u32 %v8041_v46, %v7341_v48  ;;  %v7969_v56 = vld [vmem:[%s12420_s1 + $0xe84] sm:$0xf]  ;;  %3726 = vmatpush.bf16.msra.mxu0 %v7088_v53  ;;  %3752 = vmatpush.bf16.msra.mxu2 %v5300_v55  ;;  %v6195_v32 = vld [vmem:[%s12420_s1 + $0x7c8] sm:$0xf]  ;;  %v5940_v46 = vor.u32 %v7694_v31, %v5939_v30  ;;  %v6452_v48 = vor.u32 %v7822_v36, %v6451_v35 }
  0xf4   :  { %v7053_v57 = vld [vmem:[%s12420_s1 + $0xea0] sm:$0xf0]  ;;  %v6707_v40 = vld [vmem:[%s12420_s1 + $0xbc8] sm:$0xf]  ;;  %v6196_v47 = vor.u32 %v7758_v34, %v6195_v32 }
  0xf5   :  { %v8033_v58 = vld [vmem:[%s12420_s1 + $0x1084] sm:$0xf]  ;;  %v7056_v1 = vor.u32 %v7969_v56, %v7053_v57  ;;  %3739 = vmatpush.bf16.msra.mxu1 %v7344_v54  ;;  %3765 = vmatpush.bf16.msra.mxu3 %v5556_v59  ;;  %v7886_v43 = vld [vmem:[%s12420_s1 + $0xbe4] sm:$0xf0] }
  0xf6   :  { %v7309_v60 = vld [vmem:[%s12420_s1 + $0x10a0] sm:$0xf0]  ;;  %v5907_v49 = vld [vmem:[%s12420_s1 + $0x588] sm:$0xf]  ;;  %v6708_v52 = vor.u32 %v7886_v43, %v6707_v40 }
  0xf7   :  { %v7312_v2 = vor.u32 %v8033_v58, %v7309_v60  ;;  %v7961_v5 = vld [vmem:[%s12420_s1 + $0xe44] sm:$0xf]  ;;  %3727 = vmatpush.bf16.msra.mxu0 %v7056_v1  ;;  %3753 = vmatpush.bf16.msra.mxu2 %v5268_v3  ;;  %v7686_v50 = vld [vmem:[%s12420_s1 + $0x5a4] sm:$0xf0] }
  0xf8   :  { %v7021_v7 = vld [vmem:[%s12420_s1 + $0xe60] sm:$0xf0]  ;;  %v6163_v51 = vld [vmem:[%s12420_s1 + $0x788] sm:$0xf]  ;;  %v5908_v58 = vor.u32 %v7686_v50, %v5907_v49 }
  0xf9   :  { %v8025_v8 = vld [vmem:[%s12420_s1 + $0x1044] sm:$0xf]  ;;  %v7024_v15 = vor.u32 %v7961_v5, %v7021_v7  ;;  %3740 = vmatpush.bf16.msra.mxu1 %v7312_v2  ;;  %3766 = vmatpush.bf16.msra.mxu3 %v5524_v9  ;;  %v7750_v53 = vld [vmem:[%s12420_s1 + $0x7a4] sm:$0xf0] }
  0xfa   :  { %v7277_v10 = vld [vmem:[%s12420_s1 + $0x1060] sm:$0xf0]  ;;  %v6419_v54 = vld [vmem:[%s12420_s1 + $0x988] sm:$0xf]  ;;  %v6164_v59 = vor.u32 %v7750_v53, %v6163_v51  ;;  %v3523_v51 = vpop.f32.mrf.mxu0  ;;  %v3536_v53 = vpop.f32.mrf.mxu1 }
  0xfb   :  { %v7953_v16 = vld [vmem:[%s12420_s1 + $0xe04] sm:$0xf]  ;;  %v7280_v18 = vor.u32 %v8025_v8, %v7277_v10  ;;  %3728 = vmatpush.bf16.msra.mxu0 %v7024_v15  ;;  %3754 = vmatpush.bf16.msra.mxu2 %v5236_v22  ;;  %v7814_v55 = vld [vmem:[%s12420_s1 + $0x9a4] sm:$0xf0] }
  0xfc   :  { %v6989_v17 = vld [vmem:[%s12420_s1 + $0xe20] sm:$0xf0]  ;;  %v6675_v56 = vld [vmem:[%s12420_s1 + $0xb88] sm:$0xf]  ;;  %v6420_v60 = vor.u32 %v7814_v55, %v6419_v54 }
  0xfd   :  { %v8017_v23 = vld [vmem:[%s12420_s1 + $0x1004] sm:$0xf]  ;;  %v6992_v33 = vor.u32 %v7953_v16, %v6989_v17  ;;  %3741 = vmatpush.bf16.msra.mxu1 %v7280_v18  ;;  %3767 = vmatpush.bf16.msra.mxu3 %v5492_v26  ;;  %v7878_v57 = vld [vmem:[%s12420_s1 + $0xba4] sm:$0xf0] }
  0xfe   :  { %v7245_v24 = vld [vmem:[%s12420_s1 + $0x1020] sm:$0xf0]  ;;  %v5875_v61 = vld [vmem:[%s12420_s1 + $0x548] sm:$0xf]  ;;  %v6676_v0 = vor.u32 %v7878_v57, %v6675_v56 }
  0xff   :  { %v7248_v37 = vor.u32 %v8017_v23, %v7245_v24  ;;  %3729 = vmatpush.bf16.msra.mxu0 %v6992_v33  ;;  %3755 = vmatpush.bf16.msra.mxu2 %v5204_v39  ;;  %v7678_v62 = vld [vmem:[%s12420_s1 + $0x564] sm:$0xf0] }
 0x100   :  { %v6131_v63 = vld [vmem:[%s12420_s1 + $0x748] sm:$0xf]  ;;  %v5876_v8 = vor.u32 %v7678_v62, %v5875_v61 }
 0x101   :  { %3742 = vmatpush.bf16.msra.mxu1 %v7248_v37  ;;  %3768 = vmatpush.bf16.msra.mxu3 %v5460_v45  ;;  %v7742_v1 = vld [vmem:[%s12420_s1 + $0x764] sm:$0xf0] }
 0x102   :  { %3730 = vmatmul.bf16.vlgmr.msra.gmra.mxu0 %v8620_v42  ;;  %v6387_v2 = vld [vmem:[%s12420_s1 + $0x948] sm:$0xf]  ;;  %3756 = vmatmul.bf16.vlgmr.msra.gmra.mxu2 %v8459_v20  ;;  %v6132_v9 = vor.u32 %v7742_v1, %v6131_v63  ;;  %v3562_v1 = vpop.f32.mrf.mxu3 }
 0x103   :  { %3774 = vmatpush.bf16.msrb.mxu0 %v5940_v46  ;;  %3800 = vmatpush.bf16.msrb.mxu2 %v6452_v48  ;;  %v7806_v3 = vld [vmem:[%s12420_s1 + $0x964] sm:$0xf0] }
 0x104   :  { %3743 = vmatmul.bf16.vlgmr.msra.gmra.mxu1 %v8808_v19  ;;  %v6643_v5 = vld [vmem:[%s12420_s1 + $0xb48] sm:$0xf]  ;;  %3769 = vmatmul.bf16.vlgmr.msra.gmra.mxu3 %v8462_v21  ;;  %v6388_v10 = vor.u32 %v7806_v3, %v6387_v2 }
 0x105   :  { %3787 = vmatpush.bf16.msrb.mxu1 %v6196_v47  ;;  %3813 = vmatpush.bf16.msrb.mxu3 %v6708_v52  ;;  %v7870_v7 = vld [vmem:[%s12420_s1 + $0xb64] sm:$0xf0] }
 0x106   :  { %v5843_v11 = vld [vmem:[%s12420_s1 + $0x508] sm:$0xf]  ;;  %v6644_v14 = vor.u32 %v7870_v7, %v6643_v5 }
 0x107   :  { %3775 = vmatpush.bf16.msrb.mxu0 %v5908_v58  ;;  %3801 = vmatpush.bf16.msrb.mxu2 %v6420_v60  ;;  %v7670_v12 = vld [vmem:[%s12420_s1 + $0x524] sm:$0xf0]  ;;  %v3549_v60 = vpop.f32.mrf.mxu2 }
 0x108   :  { %v6099_v13 = vld [vmem:[%s12420_s1 + $0x708] sm:$0xf]  ;;  %v5844_v23 = vor.u32 %v7670_v12, %v5843_v11 }
 0x109   :  { %3788 = vmatpush.bf16.msrb.mxu1 %v6164_v59  ;;  %3814 = vmatpush.bf16.msrb.mxu3 %v6676_v0  ;;  %v7734_v15 = vld [vmem:[%s12420_s1 + $0x724] sm:$0xf0]  ;;  %v3537_v59 = vadd.f32 %v3536_v53, %v3523_v51  ;;  %v7554_v53 = vld [vmem:[%s12420_s1 + $0x18c] sm:$0xf] }
 0x10a   :  { %v6355_v16 = vld [vmem:[%s12420_s1 + $0x908] sm:$0xf]  ;;  %v6100_v24 = vor.u32 %v7734_v15, %v6099_v13 }
 0x10b   :  { %v7798_v17 = vld [vmem:[%s12420_s1 + $0x924] sm:$0xf0]  ;;  %3776 = vmatpush.bf16.msrb.mxu0 %v5876_v8  ;;  %3802 = vmatpush.bf16.msrb.mxu2 %v6388_v10  ;;  %v3550_v5 = vadd.f32 %v3549_v60, %v3537_v59 }
 0x10c   :  { %v6611_v18 = vld [vmem:[%s12420_s1 + $0xb08] sm:$0xf]  ;;  %v6356_v25 = vor.u32 %v7798_v17, %v6355_v16 }
 0x10d   :  { %v7862_v22 = vld [vmem:[%s12420_s1 + $0xb24] sm:$0xf0]  ;;  %3789 = vmatpush.bf16.msrb.mxu1 %v6132_v9  ;;  %3815 = vmatpush.bf16.msrb.mxu3 %v6644_v14  ;;  %v9356_v15 = vadd.f32 %v3562_v1, %v3550_v5  ;;  %v7546_v1 = vld [vmem:[%s12420_s1 + $0x14c] sm:$0xf] }
 0x10e   :  { %v5811_v26 = vld [vmem:[%s12420_s1 + $0x4c8] sm:$0xf]  ;;  %v6612_v29 = vor.u32 %v7862_v22, %v6611_v18 }
 0x10f   :  { %v7662_v27 = vld [vmem:[%s12420_s1 + $0x4e4] sm:$0xf0]  ;;  %3777 = vmatpush.bf16.msrb.mxu0 %v5844_v23  ;;  %3803 = vmatpush.bf16.msrb.mxu2 %v6356_v25 }
 0x110   :  { %v6067_v28 = vld [vmem:[%s12420_s1 + $0x6c8] sm:$0xf]  ;;  %v5812_v35 = vor.u32 %v7662_v27, %v5811_v26  ;;  %v3525_v26 = vpop.f32.mrf.mxu0 }
 0x111   :  { %v7726_v30 = vld [vmem:[%s12420_s1 + $0x6e4] sm:$0xf0]  ;;  %3790 = vmatpush.bf16.msrb.mxu1 %v6100_v24  ;;  %3816 = vmatpush.bf16.msrb.mxu3 %v6612_v29 }
 0x112   :  { %v6323_v31 = vld [vmem:[%s12420_s1 + $0x8c8] sm:$0xf]  ;;  %v6068_v36 = vor.u32 %v7726_v30, %v6067_v28 }
 0x113   :  { %v7790_v32 = vld [vmem:[%s12420_s1 + $0x8e4] sm:$0xf0]  ;;  %3778 = vmatpush.bf16.msrb.mxu0 %v5812_v35  ;;  %v5429_v35 = vld [vmem:[%s12420_s1 + $0x1e8] sm:$0xf0] }
 0x114   :  { %v6579_v33 = vld [vmem:[%s12420_s1 + $0xac8] sm:$0xf]  ;;  %v6324_v37 = vor.u32 %v7790_v32, %v6323_v31  ;;  %v3538_v31 = vpop.f32.mrf.mxu1 }
 0x115   :  { %v7854_v34 = vld [vmem:[%s12420_s1 + $0xae4] sm:$0xf0]  ;;  %3791 = vmatpush.bf16.msrb.mxu1 %v6068_v36  ;;  %v3551_v36 = vpop.f32.mrf.mxu2 }
 0x116   :  { %v5779_v39 = vld [vmem:[%s12420_s1 + $0x488] sm:$0xf]  ;;  %v6580_v45 = vor.u32 %v7854_v34, %v6579_v33  ;;  %3804 = vmatpush.bf16.msrb.mxu2 %v6324_v37  ;;  %v7562_v34 = vld [vmem:[%s12420_s1 + $0x1cc] sm:$0xf] }
 0x117   :  { %v7654_v40 = vld [vmem:[%s12420_s1 + $0x4a4] sm:$0xf0] }
 0x118   :  { %v6035_v43 = vld [vmem:[%s12420_s1 + $0x688] sm:$0xf]  ;;  %v5780_v52 = vor.u32 %v7654_v40, %v5779_v39  ;;  %3817 = vmatpush.bf16.msrb.mxu3 %v6580_v45  ;;  %v3564_v40 = vpop.f32.mrf.mxu3 }
 0x119   :  { %v7718_v46 = vld [vmem:[%s12420_s1 + $0x6a4] sm:$0xf0] }
 0x11a   :  { %v6291_v47 = vld [vmem:[%s12420_s1 + $0x888] sm:$0xf]  ;;  %v6036_v54 = vor.u32 %v7718_v46, %v6035_v43  ;;  %3779 = vmatpush.bf16.msrb.mxu0 %v5780_v52 }
 0x11b   :  { %v7782_v48 = vld [vmem:[%s12420_s1 + $0x8a4] sm:$0xf0] }
 0x11c   :  { %v6547_v49 = vld [vmem:[%s12420_s1 + $0xa88] sm:$0xf]  ;;  %v6292_v55 = vor.u32 %v7782_v48, %v6291_v47  ;;  %3792 = vmatpush.bf16.msrb.mxu1 %v6036_v54  ;;  %v5397_v54 = vld [vmem:[%s12420_s1 + $0x1a8] sm:$0xf0] }
 0x11d   :  { %v7846_v50 = vld [vmem:[%s12420_s1 + $0xaa4] sm:$0xf0] }
 0x11e   :  { %v5747_v56 = vld [vmem:[%s12420_s1 + $0x448] sm:$0xf]  ;;  %v6548_v61 = vor.u32 %v7846_v50, %v6547_v49  ;;  %3805 = vmatpush.bf16.msrb.mxu2 %v6292_v55  ;;  %v5432_v49 = vor.u32 %v7562_v34, %v5429_v35  ;;  %v7530_v34 = vld [vmem:[%s12420_s1 + $0xcc] sm:$0xf] }
 0x11f   :  { %v7646_v57 = vld [vmem:[%s12420_s1 + $0x464] sm:$0xf0] }
 0x120   :  { %v6003_v58 = vld [vmem:[%s12420_s1 + $0x648] sm:$0xf]  ;;  %v5748_v7 = vor.u32 %v7646_v57, %v5747_v56  ;;  %3818 = vmatpush.bf16.msrb.mxu3 %v6548_v61  ;;  %v5400_v61 = vor.u32 %v7554_v53, %v5397_v54  ;;  %v7522_v53 = vld [vmem:[%s12420_s1 + $0x8c] sm:$0xf] }
 0x121   :  { %v7710_v62 = vld [vmem:[%s12420_s1 + $0x664] sm:$0xf0]  ;;  %v5269_v54 = vld [vmem:[%s12420_s1 + $0xa8] sm:$0xf0] }
 0x122   :  { %v6259_v63 = vld [vmem:[%s12420_s1 + $0x848] sm:$0xf]  ;;  %v6004_v10 = vor.u32 %v7710_v62, %v6003_v58  ;;  %3780 = vmatpush.bf16.msrb.mxu0 %v5748_v7 }
 0x123   :  { %v7774_v0 = vld [vmem:[%s12420_s1 + $0x864] sm:$0xf0] }
 0x124   :  { %v6515_v2 = vld [vmem:[%s12420_s1 + $0xa48] sm:$0xf]  ;;  %v6260_v11 = vor.u32 %v7774_v0, %v6259_v63  ;;  %3793 = vmatpush.bf16.msrb.mxu1 %v6004_v10 }
 0x125   :  { %v7838_v3 = vld [vmem:[%s12420_s1 + $0xa64] sm:$0xf0] }
 0x126   :  { %v5715_v8 = vld [vmem:[%s12420_s1 + $0x408] sm:$0xf]  ;;  %v6516_v16 = vor.u32 %v7838_v3, %v6515_v2  ;;  %3806 = vmatpush.bf16.msrb.mxu2 %v6260_v11  ;;  %v5365_v2 = vld [vmem:[%s12420_s1 + $0x168] sm:$0xf0] }
 0x127   :  { %v7638_v9 = vld [vmem:[%s12420_s1 + $0x424] sm:$0xf0]  ;;  %v5368_v11 = vor.u32 %v7546_v1, %v5365_v2 }
 0x128   :  { %v5971_v12 = vld [vmem:[%s12420_s1 + $0x608] sm:$0xf]  ;;  %v5716_v27 = vor.u32 %v7638_v9, %v5715_v8  ;;  %3819 = vmatpush.bf16.msrb.mxu3 %v6516_v16  ;;  %v7538_v16 = vld [vmem:[%s12420_s1 + $0x10c] sm:$0xf] }
 0x129   :  { %v7702_v13 = vld [vmem:[%s12420_s1 + $0x624] sm:$0xf0] }
 0x12a   :  { %v6227_v14 = vld [vmem:[%s12420_s1 + $0x808] sm:$0xf]  ;;  %v5972_v32 = vor.u32 %v7702_v13, %v5971_v12  ;;  %3781 = vmatpush.bf16.msrb.mxu0 %v5716_v27 }
 0x12b   :  { %v7766_v17 = vld [vmem:[%s12420_s1 + $0x824] sm:$0xf0] }
 0x12c   :  { %v6483_v18 = vld [vmem:[%s12420_s1 + $0xa08] sm:$0xf]  ;;  %v6228_v33 = vor.u32 %v7766_v17, %v6227_v14  ;;  %3794 = vmatpush.bf16.msrb.mxu1 %v5972_v32  ;;  %v5333_v17 = vld [vmem:[%s12420_s1 + $0x128] sm:$0xf0] }
 0x12d   :  { %v7830_v22 = vld [vmem:[%s12420_s1 + $0xa24] sm:$0xf0]  ;;  %3782 = vmatmul.bf16.vlgmr.msrb.gmra.mxu0 %v8427_v4 }
 0x12e   :  { %v6963_v23 = vld [vmem:[%s12420_s1 + $0xdc8] sm:$0xf]  ;;  %v6484_v37 = vor.u32 %v7830_v22, %v6483_v18  ;;  %3807 = vmatpush.bf16.msrb.mxu2 %v6228_v33  ;;  %v3575_v22 = vpop.f32.mrf.mxu0 }
 0x12f   :  { %v7950_v24 = vld [vmem:[%s12420_s1 + $0xde4] sm:$0xf0]  ;;  %3795 = vmatmul.bf16.vlgmr.msrb.gmra.mxu1 %v8432_v6 }
 0x130   :  { %v7219_v25 = vld [vmem:[%s12420_s1 + $0xfc8] sm:$0xf]  ;;  %v6964_v39 = vor.u32 %v7950_v24, %v6963_v23  ;;  %3820 = vmatpush.bf16.msrb.mxu3 %v6484_v37 }
 0x131   :  { %v8014_v28 = vld [vmem:[%s12420_s1 + $0xfe4] sm:$0xf0]  ;;  %3808 = vmatmul.bf16.vlgmr.msrb.gmra.mxu2 %v8618_v41 }
 0x132   :  { %v7475_v29 = vld [vmem:[%s12420_s1 + $0x11c8] sm:$0xf]  ;;  %v7220_v43 = vor.u32 %v8014_v28, %v7219_v25  ;;  %3826 = vmatpush.bf16.msra.mxu0 %v6964_v39  ;;  %v3576_v28 = vadd.f32 %v3575_v22, %v9356_v15  ;;  %v5301_v15 = vld [vmem:[%s12420_s1 + $0xe8] sm:$0xf0] }
 0x133   :  { %v8078_v30 = vld [vmem:[%s12420_s1 + $0x11e4] sm:$0xf0]  ;;  %3821 = vmatmul.bf16.vlgmr.msrb.gmra.mxu3 %v8622_v44 }
 0x134   :  { %v7476_v45 = vor.u32 %v8078_v30, %v7475_v29  ;;  %v6931_v46 = vld [vmem:[%s12420_s1 + $0xd88] sm:$0xf]  ;;  %3839 = vmatpush.bf16.msra.mxu1 %v7220_v43  ;;  %3865 = vmatpush.bf16.msra.mxu3 %v5432_v49  ;;  %v3588_v29 = vpop.f32.mrf.mxu1  ;;  %v5336_v30 = vor.u32 %v7538_v16, %v5333_v17 }
 0x135   :  { %v7942_v47 = vld [vmem:[%s12420_s1 + $0xda4] sm:$0xf0]  ;;  %v3589_v35 = vadd.f32 %v3588_v29, %v3576_v28  ;;  %v7690_v28 = vld [vmem:[%s12420_s1 + $0x5cc] sm:$0xf] }
 0x136   :  { %v7187_v48 = vld [vmem:[%s12420_s1 + $0xf88] sm:$0xf]  ;;  %v6932_v55 = vor.u32 %v7942_v47, %v6931_v46  ;;  %3852 = vmatpush.bf16.msra.mxu2 %v7476_v45  ;;  %v3601_v46 = vpop.f32.mrf.mxu2  ;;  %v5304_v47 = vor.u32 %v7530_v34, %v5301_v15  ;;  %v7818_v15 = vld [vmem:[%s12420_s1 + $0x9cc] sm:$0xf] }
 0x137   :  { %v8006_v50 = vld [vmem:[%s12420_s1 + $0xfa4] sm:$0xf0] }
 0x138   :  { %v7443_v51 = vld [vmem:[%s12420_s1 + $0x1188] sm:$0xf]  ;;  %v7188_v56 = vor.u32 %v8006_v50, %v7187_v48  ;;  %3827 = vmatpush.bf16.msra.mxu0 %v6932_v55  ;;  %3866 = vmatpush.bf16.msra.mxu3 %v5400_v61 }
 0x139   :  { %v8070_v52 = vld [vmem:[%s12420_s1 + $0x11a4] sm:$0xf0] }
 0x13a   :  { %v7444_v57 = vor.u32 %v8070_v52, %v7443_v51  ;;  %v6899_v58 = vld [vmem:[%s12420_s1 + $0xd48] sm:$0xf]  ;;  %3840 = vmatpush.bf16.msra.mxu1 %v7188_v56  ;;  %v3602_v51 = vadd.f32 %v3601_v46, %v3589_v35  ;;  %v3614_v52 = vpop.f32.mrf.mxu3  ;;  %v6453_v35 = vld [vmem:[%s12420_s1 + $0x9e8] sm:$0xf0] }
 0x13b   :  { %v7934_v59 = vld [vmem:[%s12420_s1 + $0xd64] sm:$0xf0]  ;;  %v7682_v46 = vld [vmem:[%s12420_s1 + $0x58c] sm:$0xf] }
 0x13c   :  { %v7155_v60 = vld [vmem:[%s12420_s1 + $0xf48] sm:$0xf]  ;;  %v6900_v3 = vor.u32 %v7934_v59, %v6899_v58  ;;  %3853 = vmatpush.bf16.msra.mxu2 %v7444_v57  ;;  %3867 = vmatpush.bf16.msra.mxu3 %v5368_v11  ;;  %v9516_v56 = vadd.f32 %v3614_v52, %v3602_v51  ;;  %v3577_v57 = vpop.f32.mrf.mxu0  ;;  %v7810_v51 = vld [vmem:[%s12420_s1 + $0x98c] sm:$0xf] }
 0x13d   :  { %v7998_v62 = vld [vmem:[%s12420_s1 + $0xf64] sm:$0xf0]  ;;  %v6421_v52 = vld [vmem:[%s12420_s1 + $0x9a8] sm:$0xf0] }
 0x13e   :  { %v7411_v63 = vld [vmem:[%s12420_s1 + $0x1148] sm:$0xf]  ;;  %v7156_v5 = vor.u32 %v7998_v62, %v7155_v60  ;;  %3828 = vmatpush.bf16.msra.mxu0 %v6900_v3  ;;  %v3603_v17 = vpop.f32.mrf.mxu2  ;;  %v7610_v57 = vld [vmem:[%s12420_s1 + $0x34c] sm:$0xf] }
 0x13f   :  { %v8062_v0 = vld [vmem:[%s12420_s1 + $0x1164] sm:$0xf0]  ;;  %v6357_v17 = vld [vmem:[%s12420_s1 + $0x928] sm:$0xf0] }
 0x140   :  { %v7412_v7 = vor.u32 %v8062_v0, %v7411_v63  ;;  %v6867_v8 = vld [vmem:[%s12420_s1 + $0xd08] sm:$0xf]  ;;  %3841 = vmatpush.bf16.msra.mxu1 %v7156_v5  ;;  %3868 = vmatpush.bf16.msra.mxu3 %v5336_v30  ;;  %v3590_v63 = vpop.f32.mrf.mxu1  ;;  %v5272_v0 = vor.u32 %v7522_v53, %v5269_v54  ;;  %v7514_v5 = vld [vmem:[%s12420_s1 + $0x4c] sm:$0xf] }
 0x141   :  { %v7926_v9 = vld [vmem:[%s12420_s1 + $0xd24] sm:$0xf0]  ;;  %v5941_v30 = vld [vmem:[%s12420_s1 + $0x5e8] sm:$0xf0] }
 0x142   :  { %v7123_v10 = vld [vmem:[%s12420_s1 + $0xf08] sm:$0xf]  ;;  %v6868_v18 = vor.u32 %v7926_v9, %v6867_v8  ;;  %3854 = vmatpush.bf16.msra.mxu2 %v7412_v7  ;;  %v5237_v7 = vld [vmem:[%s12420_s1 + $0x68] sm:$0xf0] }
 0x143   :  { %v7990_v12 = vld [vmem:[%s12420_s1 + $0xf24] sm:$0xf0]  ;;  %v6133_v63 = vld [vmem:[%s12420_s1 + $0x768] sm:$0xf0] }
 0x144   :  { %v7379_v13 = vld [vmem:[%s12420_s1 + $0x1108] sm:$0xf]  ;;  %v7124_v23 = vor.u32 %v7990_v12, %v7123_v10  ;;  %3829 = vmatpush.bf16.msra.mxu0 %v6868_v18  ;;  %3869 = vmatpush.bf16.msra.mxu3 %v5304_v47  ;;  %v5240_v18 = vor.u32 %v7514_v5, %v5237_v7  ;;  %v6456_v47 = vor.u32 %v7818_v15, %v6453_v35  ;;  %v7602_v7 = vld [vmem:[%s12420_s1 + $0x30c] sm:$0xf] }
 0x145   :  { %v8054_v14 = vld [vmem:[%s12420_s1 + $0x1124] sm:$0xf0] }
 0x146   :  { %v7380_v24 = vor.u32 %v8054_v14, %v7379_v13  ;;  %v6835_v25 = vld [vmem:[%s12420_s1 + $0xcc8] sm:$0xf]  ;;  %3842 = vmatpush.bf16.msra.mxu1 %v7124_v23  ;;  %v7506_v23 = vld [vmem:[%s12420_s1 + $0xc] sm:$0xf] }
 0x147   :  { %v7918_v26 = vld [vmem:[%s12420_s1 + $0xce4] sm:$0xf0] }
 0x148   :  { %v7091_v27 = vld [vmem:[%s12420_s1 + $0xec8] sm:$0xf]  ;;  %v6836_v36 = vor.u32 %v7918_v26, %v6835_v25  ;;  %3855 = vmatpush.bf16.msra.mxu2 %v7380_v24  ;;  %3870 = vmatpush.bf16.msra.mxu3 %v5272_v0  ;;  %v5205_v24 = vld [vmem:[%s12420_s1 + $0x28] sm:$0xf0]  ;;  %v3616_v25 = vpop.f32.mrf.mxu3 }
 0x149   :  { %v7982_v31 = vld [vmem:[%s12420_s1 + $0xee4] sm:$0xf0]  ;;  %v7626_v26 = vld [vmem:[%s12420_s1 + $0x3cc] sm:$0xf] }
 0x14a   :  { %v7347_v32 = vld [vmem:[%s12420_s1 + $0x10c8] sm:$0xf]  ;;  %v7092_v37 = vor.u32 %v7982_v31, %v7091_v27  ;;  %3830 = vmatpush.bf16.msra.mxu0 %v6836_v36  ;;  %v5685_v27 = vld [vmem:[%s12420_s1 + $0x3e8] sm:$0xf0]  ;;  %v5208_v36 = vor.u32 %v7506_v23, %v5205_v24 }
 0x14b   :  { %v8046_v33 = vld [vmem:[%s12420_s1 + $0x10e4] sm:$0xf0]  ;;  %v7754_v31 = vld [vmem:[%s12420_s1 + $0x7cc] sm:$0xf] }
 0x14c   :  { %v7348_v39 = vor.u32 %v8046_v33, %v7347_v32  ;;  %v6803_v40 = vld [vmem:[%s12420_s1 + $0xc88] sm:$0xf]  ;;  %3843 = vmatpush.bf16.msra.mxu1 %v7092_v37  ;;  %v6197_v32 = vld [vmem:[%s12420_s1 + $0x7e8] sm:$0xf0]  ;;  %3871 = vmatpush.bf16.msra.mxu3 %v5240_v18  ;;  %v5688_v37 = vor.u32 %v7626_v26, %v5685_v27 }
 0x14d   :  { %v7910_v43 = vld [vmem:[%s12420_s1 + $0xca4] sm:$0xf0]  ;;  %v7802_v0 = vld [vmem:[%s12420_s1 + $0x94c] sm:$0xf] }
 0x14e   :  { %v7059_v45 = vld [vmem:[%s12420_s1 + $0xe88] sm:$0xf]  ;;  %v6804_v55 = vor.u32 %v7910_v43, %v6803_v40  ;;  %3856 = vmatpush.bf16.msra.mxu2 %v7348_v39  ;;  %v5944_v39 = vor.u32 %v7690_v28, %v5941_v30  ;;  %v6200_v40 = vor.u32 %v7754_v31, %v6197_v32  ;;  %v7618_v43 = vld [vmem:[%s12420_s1 + $0x38c] sm:$0xf]  ;;  %v3640_v28 = vpop.f32.mrf.mxu1 }
 0x14f   :  { %v7974_v48 = vld [vmem:[%s12420_s1 + $0xea4] sm:$0xf0]  ;;  %v7594_v25 = vld [vmem:[%s12420_s1 + $0x2cc] sm:$0xf] }
 0x150   :  { %v7315_v49 = vld [vmem:[%s12420_s1 + $0x1088] sm:$0xf]  ;;  %v7060_v58 = vor.u32 %v7974_v48, %v7059_v45  ;;  %3831 = vmatpush.bf16.msra.mxu0 %v6804_v55  ;;  %v5653_v45 = vld [vmem:[%s12420_s1 + $0x3a8] sm:$0xf0]  ;;  %3872 = vmatpush.bf16.msra.mxu3 %v5208_v36 }
 0x151   :  { %v8038_v50 = vld [vmem:[%s12420_s1 + $0x10a4] sm:$0xf0]  ;;  %v5909_v48 = vld [vmem:[%s12420_s1 + $0x5a8] sm:$0xf0]  ;;  %v5656_v53 = vor.u32 %v7618_v43, %v5653_v45 }
 0x152   :  { %v7316_v59 = vor.u32 %v8038_v50, %v7315_v49  ;;  %v6771_v60 = vld [vmem:[%s12420_s1 + $0xc48] sm:$0xf]  ;;  %3844 = vmatpush.bf16.msra.mxu1 %v7060_v58  ;;  %v7746_v49 = vld [vmem:[%s12420_s1 + $0x78c] sm:$0xf]  ;;  %v5912_v54 = vor.u32 %v7682_v46, %v5909_v48  ;;  %v3666_v48 = vpop.f32.mrf.mxu3 }
 0x153   :  { %v7902_v61 = vld [vmem:[%s12420_s1 + $0xc64] sm:$0xf0]  ;;  %v6165_v50 = vld [vmem:[%s12420_s1 + $0x7a8] sm:$0xf0]  ;;  %3873 = vmatmul.bf16.vlgmr.msra.gmra.mxu3 %v8459_v20 }
 0x154   :  { %v7027_v62 = vld [vmem:[%s12420_s1 + $0xe48] sm:$0xf]  ;;  %v6772_v8 = vor.u32 %v7902_v61, %v6771_v60  ;;  %3857 = vmatpush.bf16.msra.mxu2 %v7316_v59  ;;  %v6168_v55 = vor.u32 %v7746_v49, %v6165_v50  ;;  %v5621_v58 = vld [vmem:[%s12420_s1 + $0x368] sm:$0xf0]  ;;  %3917 = vmatpush.bf16.msrb.mxu3 %v6456_v47  ;;  %v6424_v60 = vor.u32 %v7810_v51, %v6421_v52  ;;  %v3653_v47 = vpop.f32.mrf.mxu2 }
 0x155   :  { %v7966_v1 = vld [vmem:[%s12420_s1 + $0xe64] sm:$0xf0]  ;;  %v7674_v59 = vld [vmem:[%s12420_s1 + $0x54c] sm:$0xf]  ;;  %v3654_v51 = vadd.f32 %v3653_v47, %v3640_v28 }
 0x156   :  { %v7283_v2 = vld [vmem:[%s12420_s1 + $0x1048] sm:$0xf]  ;;  %v7028_v11 = vor.u32 %v7966_v1, %v7027_v62  ;;  %3832 = vmatpush.bf16.msra.mxu0 %v6772_v8  ;;  %v5877_v61 = vld [vmem:[%s12420_s1 + $0x568] sm:$0xf0] }
 0x157   :  { %v8030_v3 = vld [vmem:[%s12420_s1 + $0x1064] sm:$0xf0]  ;;  %v7738_v62 = vld [vmem:[%s12420_s1 + $0x74c] sm:$0xf] }
 0x158   :  { %v6739_v9 = vld [vmem:[%s12420_s1 + $0xc08] sm:$0xf]  ;;  %v7284_v12 = vor.u32 %v8030_v3, %v7283_v2  ;;  %3845 = vmatpush.bf16.msra.mxu1 %v7028_v11  ;;  %v6389_v1 = vld [vmem:[%s12420_s1 + $0x968] sm:$0xf0]  ;;  %v5624_v2 = vor.u32 %v7610_v57, %v5621_v58  ;;  %v5880_v3 = vor.u32 %v7674_v59, %v5877_v61  ;;  %v6136_v5 = vor.u32 %v7738_v62, %v6133_v63  ;;  %v3642_v61 = vpop.f32.mrf.mxu1 }
 0x159   :  { %v7894_v10 = vld [vmem:[%s12420_s1 + $0xc24] sm:$0xf0]  ;;  %v5589_v8 = vld [vmem:[%s12420_s1 + $0x328] sm:$0xf0]  ;;  %3918 = vmatpush.bf16.msrb.mxu3 %v6424_v60  ;;  %v9726_v60 = vadd.f32 %v3666_v48, %v3654_v51 }
 0x15a   :  { %v6995_v13 = vld [vmem:[%s12420_s1 + $0xe08] sm:$0xf]  ;;  %v6740_v29 = vor.u32 %v7894_v10, %v6739_v9  ;;  %3858 = vmatpush.bf16.msra.mxu2 %v7284_v12  ;;  %v7666_v9 = vld [vmem:[%s12420_s1 + $0x50c] sm:$0xf]  ;;  %v6392_v10 = vor.u32 %v7802_v0, %v6389_v1 }
 0x15b   :  { %v7958_v14 = vld [vmem:[%s12420_s1 + $0xe24] sm:$0xf0]  ;;  %v5845_v11 = vld [vmem:[%s12420_s1 + $0x528] sm:$0xf0] }
 0x15c   :  { %v7251_v16 = vld [vmem:[%s12420_s1 + $0x1008] sm:$0xf]  ;;  %v6996_v33 = vor.u32 %v7958_v14, %v6995_v13  ;;  %3833 = vmatpush.bf16.msra.mxu0 %v6740_v29  ;;  %v7730_v12 = vld [vmem:[%s12420_s1 + $0x70c] sm:$0xf]  ;;  %v3627_v14 = vpop.f32.mrf.mxu0  ;;  %v5848_v23 = vor.u32 %v7666_v9, %v5845_v11 }
 0x15d   :  { %v8022_v22 = vld [vmem:[%s12420_s1 + $0x1024] sm:$0xf0]  ;;  %v6101_v13 = vld [vmem:[%s12420_s1 + $0x728] sm:$0xf0]  ;;  %v9667_v18 = vadd.f32 %v3627_v14, %v9516_v56  ;;  %3919 = vmatpush.bf16.msrb.mxu3 %v6392_v10 }
 0x15e   :  { %v7252_v34 = vor.u32 %v8022_v22, %v7251_v16  ;;  %3846 = vmatpush.bf16.msra.mxu1 %v6996_v33  ;;  %v7794_v16 = vld [vmem:[%s12420_s1 + $0x90c] sm:$0xf]  ;;  %v5592_v22 = vor.u32 %v7602_v7, %v5589_v8  ;;  %v6104_v24 = vor.u32 %v7730_v12, %v6101_v13 }
 0x15f   :  { %3834 = vmatmul.bf16.vlgmr.msra.gmra.mxu0 %v8610_v38  ;;  %v5557_v26 = vld [vmem:[%s12420_s1 + $0x2e8] sm:$0xf0]  ;;  %v6360_v56 = vor.u32 %v7794_v16, %v6357_v17 }
 0x160   :  { %3859 = vmatpush.bf16.msra.mxu2 %v7252_v34  ;;  %3878 = vmatpush.bf16.msrb.mxu0 %v5688_v37  ;;  %v7658_v27 = vld [vmem:[%s12420_s1 + $0x4cc] sm:$0xf]  ;;  %v5560_v34 = vor.u32 %v7594_v25, %v5557_v26 }
 0x161   :  { %3847 = vmatmul.bf16.vlgmr.msra.gmra.mxu1 %v8620_v42  ;;  %v5813_v29 = vld [vmem:[%s12420_s1 + $0x4e8] sm:$0xf0]  ;;  %3920 = vmatpush.bf16.msrb.mxu3 %v6360_v56 }
 0x162   :  { %3891 = vmatpush.bf16.msrb.mxu1 %v5944_v39  ;;  %v7722_v30 = vld [vmem:[%s12420_s1 + $0x6cc] sm:$0xf]  ;;  %v5816_v15 = vor.u32 %v7658_v27, %v5813_v29 }
 0x163   :  { %3860 = vmatmul.bf16.vlgmr.msra.gmra.mxu2 %v8808_v19  ;;  %v6069_v31 = vld [vmem:[%s12420_s1 + $0x6e8] sm:$0xf0] }
 0x164   :  { %3904 = vmatpush.bf16.msrb.mxu2 %v6200_v40  ;;  %3879 = vmatpush.bf16.msrb.mxu0 %v5656_v53  ;;  %v7786_v32 = vld [vmem:[%s12420_s1 + $0x8cc] sm:$0xf]  ;;  %v6072_v35 = vor.u32 %v7722_v30, %v6069_v31  ;;  %v3629_v52 = vpop.f32.mrf.mxu0 }
 0x165   :  { %v6325_v33 = vld [vmem:[%s12420_s1 + $0x8e8] sm:$0xf0] }
 0x166   :  { %3892 = vmatpush.bf16.msrb.mxu1 %v5912_v54  ;;  %v7586_v36 = vld [vmem:[%s12420_s1 + $0x28c] sm:$0xf]  ;;  %v6328_v40 = vor.u32 %v7786_v32, %v6325_v33 }
 0x167   :  { %v5525_v37 = vld [vmem:[%s12420_s1 + $0x2a8] sm:$0xf0] }
 0x168   :  { %3905 = vmatpush.bf16.msrb.mxu2 %v6168_v55  ;;  %3880 = vmatpush.bf16.msrb.mxu0 %v5624_v2  ;;  %v7650_v39 = vld [vmem:[%s12420_s1 + $0x48c] sm:$0xf]  ;;  %v5528_v53 = vor.u32 %v7586_v36, %v5525_v37 }
 0x169   :  { %v5781_v43 = vld [vmem:[%s12420_s1 + $0x4a8] sm:$0xf0]  ;;  %3921 = vmatpush.bf16.msrb.mxu3 %v6328_v40 }
 0x16a   :  { %3893 = vmatpush.bf16.msrb.mxu1 %v5880_v3  ;;  %v7714_v45 = vld [vmem:[%s12420_s1 + $0x68c] sm:$0xf]  ;;  %v5784_v54 = vor.u32 %v7650_v39, %v5781_v43 }
 0x16b   :  { %v6037_v46 = vld [vmem:[%s12420_s1 + $0x6a8] sm:$0xf0] }
 0x16c   :  { %3906 = vmatpush.bf16.msrb.mxu2 %v6136_v5  ;;  %3881 = vmatpush.bf16.msrb.mxu0 %v5592_v22  ;;  %v7778_v49 = vld [vmem:[%s12420_s1 + $0x88c] sm:$0xf]  ;;  %v6040_v55 = vor.u32 %v7714_v45, %v6037_v46 }
 0x16d   :  { %v6293_v50 = vld [vmem:[%s12420_s1 + $0x8a8] sm:$0xf0] }
 0x16e   :  { %3894 = vmatpush.bf16.msrb.mxu1 %v5848_v23  ;;  %v7578_v57 = vld [vmem:[%s12420_s1 + $0x24c] sm:$0xf]  ;;  %v6296_v62 = vor.u32 %v7778_v49, %v6293_v50  ;;  %v3655_v23 = vpop.f32.mrf.mxu2 }
 0x16f   :  { %v5493_v58 = vld [vmem:[%s12420_s1 + $0x268] sm:$0xf0] }
 0x170   :  { %3907 = vmatpush.bf16.msrb.mxu2 %v6104_v24  ;;  %3882 = vmatpush.bf16.msrb.mxu0 %v5560_v34  ;;  %v7642_v59 = vld [vmem:[%s12420_s1 + $0x44c] sm:$0xf]  ;;  %v5496_v5 = vor.u32 %v7578_v57, %v5493_v58  ;;  %v3668_v24 = vpop.f32.mrf.mxu3 }
 0x171   :  { %v5749_v63 = vld [vmem:[%s12420_s1 + $0x468] sm:$0xf0]  ;;  %3922 = vmatpush.bf16.msrb.mxu3 %v6296_v62 }
 0x172   :  { %3895 = vmatpush.bf16.msrb.mxu1 %v5816_v15  ;;  %v7706_v0 = vld [vmem:[%s12420_s1 + $0x64c] sm:$0xf]  ;;  %v5752_v9 = vor.u32 %v7642_v59, %v5749_v63 }
 0x173   :  { %v6005_v1 = vld [vmem:[%s12420_s1 + $0x668] sm:$0xf0] }
 0x174   :  { %3908 = vmatpush.bf16.msrb.mxu2 %v6072_v35  ;;  %v7770_v2 = vld [vmem:[%s12420_s1 + $0x84c] sm:$0xf]  ;;  %3883 = vmatpush.bf16.msrb.mxu0 %v5528_v53  ;;  %v6008_v10 = vor.u32 %v7706_v0, %v6005_v1 }
 0x175   :  { %v6261_v3 = vld [vmem:[%s12420_s1 + $0x868] sm:$0xf0] }
 0x176   :  { %v7570_v7 = vld [vmem:[%s12420_s1 + $0x20c] sm:$0xf]  ;;  %3896 = vmatpush.bf16.msrb.mxu1 %v5784_v54  ;;  %v6264_v14 = vor.u32 %v7770_v2, %v6261_v3 }
 0x177   :  { %v5461_v8 = vld [vmem:[%s12420_s1 + $0x228] sm:$0xf0] }
 0x178   :  { %3909 = vmatpush.bf16.msrb.mxu2 %v6040_v55  ;;  %v7634_v11 = vld [vmem:[%s12420_s1 + $0x40c] sm:$0xf]  ;;  %3884 = vmatpush.bf16.msrb.mxu0 %v5496_v5  ;;  %v5464_v28 = vor.u32 %v7570_v7, %v5461_v8 }
 0x179   :  { %v5717_v12 = vld [vmem:[%s12420_s1 + $0x428] sm:$0xf0]  ;;  %3923 = vmatpush.bf16.msrb.mxu3 %v6264_v14 }
 0x17a   :  { %v7698_v13 = vld [vmem:[%s12420_s1 + $0x60c] sm:$0xf]  ;;  %3897 = vmatpush.bf16.msrb.mxu1 %v5752_v9  ;;  %v5720_v31 = vor.u32 %v7634_v11, %v5717_v12 }
 0x17b   :  { %v5973_v16 = vld [vmem:[%s12420_s1 + $0x628] sm:$0xf0] }
 0x17c   :  { %v7762_v17 = vld [vmem:[%s12420_s1 + $0x80c] sm:$0xf]  ;;  %3910 = vmatpush.bf16.msrb.mxu2 %v6008_v10  ;;  %v5976_v32 = vor.u32 %v7698_v13, %v5973_v16  ;;  %3885 = vmatpush.bf16.msrb.mxu0 %v5464_v28  ;;  %v3692_v28 = vpop.f32.mrf.mxu1 }
 0x17d   :  { %v6229_v22 = vld [vmem:[%s12420_s1 + $0x828] sm:$0xf0] }
 0x17e   :  { %v7882_v25 = vld [vmem:[%s12420_s1 + $0xbcc] sm:$0xf]  ;;  %v6232_v15 = vor.u32 %v7762_v17, %v6229_v22  ;;  %3898 = vmatpush.bf16.msrb.mxu1 %v5720_v31  ;;  %v3679_v17 = vpop.f32.mrf.mxu0 }
 0x17f   :  { %v6709_v26 = vld [vmem:[%s12420_s1 + $0xbe8] sm:$0xf0]  ;;  %3886 = vmatmul.bf16.vlgmr.msrb.gmra.mxu0 %v8462_v21 }
 0x180   :  { %v7946_v27 = vld [vmem:[%s12420_s1 + $0xdcc] sm:$0xf]  ;;  %v6712_v35 = vor.u32 %v7882_v25, %v6709_v26  ;;  %3911 = vmatpush.bf16.msrb.mxu2 %v5976_v32  ;;  %3924 = vmatpush.bf16.msrb.mxu3 %v6232_v15 }
 0x181   :  { %v6965_v56 = vld [vmem:[%s12420_s1 + $0xde8] sm:$0xf0]  ;;  %3899 = vmatmul.bf16.vlgmr.msrb.gmra.mxu1 %v8427_v4 }
 0x182   :  { %v8010_v29 = vld [vmem:[%s12420_s1 + $0xfcc] sm:$0xf]  ;;  %v6968_v36 = vor.u32 %v7946_v27, %v6965_v56  ;;  %3930 = vmatpush.bf16.msra.mxu0 %v6712_v35  ;;  %v3680_v27 = vadd.f32 %v3679_v17, %v9726_v60 }
 0x183   :  { %v7221_v30 = vld [vmem:[%s12420_s1 + $0xfe8] sm:$0xf0]  ;;  %3912 = vmatmul.bf16.vlgmr.msrb.gmra.mxu2 %v8432_v6  ;;  %3925 = vmatmul.bf16.vlgmr.msrb.gmra.mxu3 %v8618_v41 }
 0x184   :  { %v8074_v33 = vld [vmem:[%s12420_s1 + $0x11cc] sm:$0xf]  ;;  %v7224_v37 = vor.u32 %v8010_v29, %v7221_v30  ;;  %3943 = vmatpush.bf16.msra.mxu1 %v6968_v36 }
 0x185   :  { %v7477_v34 = vld [vmem:[%s12420_s1 + $0x11e8] sm:$0xf0] }
 0x186   :  { %v7874_v39 = vld [vmem:[%s12420_s1 + $0xb8c] sm:$0xf]  ;;  %v7480_v45 = vor.u32 %v8074_v33, %v7477_v34  ;;  %3956 = vmatpush.bf16.msra.mxu2 %v7224_v37  ;;  %v3693_v33 = vadd.f32 %v3692_v28, %v3680_v27  ;;  %v7567_v27 = vld [vmem:[%s12420_s1 + $0x1ec] sm:$0xf0] }
 0x187   :  { %v6677_v40 = vld [vmem:[%s12420_s1 + $0xba8] sm:$0xf0]  ;;  %v5691_v28 = vld [vmem:[%s12420_s1 + $0x3d0] sm:$0xf] }
 0x188   :  { %v7938_v43 = vld [vmem:[%s12420_s1 + $0xd8c] sm:$0xf]  ;;  %v6680_v51 = vor.u32 %v7874_v39, %v6677_v40  ;;  %3969 = vmatpush.bf16.msra.mxu3 %v7480_v45  ;;  %v3705_v40 = vpop.f32.mrf.mxu2 }
 0x189   :  { %v6933_v46 = vld [vmem:[%s12420_s1 + $0xda8] sm:$0xf0] }
 0x18a   :  { %v8002_v47 = vld [vmem:[%s12420_s1 + $0xf8c] sm:$0xf]  ;;  %v6936_v52 = vor.u32 %v7938_v43, %v6933_v46  ;;  %3931 = vmatpush.bf16.msra.mxu0 %v6680_v51 }
 0x18b   :  { %v7189_v48 = vld [vmem:[%s12420_s1 + $0xfa8] sm:$0xf0] }
 0x18c   :  { %v8066_v49 = vld [vmem:[%s12420_s1 + $0x118c] sm:$0xf]  ;;  %v7192_v53 = vor.u32 %v8002_v47, %v7189_v48  ;;  %3944 = vmatpush.bf16.msra.mxu1 %v6936_v52  ;;  %v3706_v48 = vadd.f32 %v3705_v40, %v3693_v33  ;;  %v6203_v33 = vld [vmem:[%s12420_s1 + $0x7d0] sm:$0xf] }
 0x18d   :  { %v7445_v50 = vld [vmem:[%s12420_s1 + $0x11a8] sm:$0xf0]  ;;  %v7559_v40 = vld [vmem:[%s12420_s1 + $0x1ac] sm:$0xf0] }
 0x18e   :  { %v7866_v54 = vld [vmem:[%s12420_s1 + $0xb4c] sm:$0xf]  ;;  %v7448_v58 = vor.u32 %v8066_v49, %v7445_v50  ;;  %3957 = vmatpush.bf16.msra.mxu2 %v7192_v53  ;;  %v3718_v49 = vpop.f32.mrf.mxu3 }
 0x18f   :  { %v6645_v55 = vld [vmem:[%s12420_s1 + $0xb68] sm:$0xf0]  ;;  %v9916_v53 = vadd.f32 %v3718_v49, %v3706_v48  ;;  %v7687_v48 = vld [vmem:[%s12420_s1 + $0x5ac] sm:$0xf0] }
 0x190   :  { %v7930_v57 = vld [vmem:[%s12420_s1 + $0xd4c] sm:$0xf]  ;;  %v6648_v1 = vor.u32 %v7866_v54, %v6645_v55  ;;  %3970 = vmatpush.bf16.msra.mxu3 %v7448_v58  ;;  %v3681_v54 = vpop.f32.mrf.mxu0  ;;  %v6171_v49 = vld [vmem:[%s12420_s1 + $0x790] sm:$0xf] }
 0x191   :  { %v6901_v59 = vld [vmem:[%s12420_s1 + $0xd68] sm:$0xf0] }
 0x192   :  { %v7994_v61 = vld [vmem:[%s12420_s1 + $0xf4c] sm:$0xf]  ;;  %v6904_v2 = vor.u32 %v7930_v57, %v6901_v59  ;;  %3932 = vmatpush.bf16.msra.mxu0 %v6648_v1 }
 0x193   :  { %v7157_v62 = vld [vmem:[%s12420_s1 + $0xf68] sm:$0xf0] }
 0x194   :  { %v8058_v63 = vld [vmem:[%s12420_s1 + $0x114c] sm:$0xf]  ;;  %v7160_v3 = vor.u32 %v7994_v61, %v7157_v62  ;;  %3945 = vmatpush.bf16.msra.mxu1 %v6904_v2  ;;  %v3694_v62 = vpop.f32.mrf.mxu1 }
 0x195   :  { %v7413_v0 = vld [vmem:[%s12420_s1 + $0x1168] sm:$0xf0]  ;;  %v5883_v62 = vld [vmem:[%s12420_s1 + $0x550] sm:$0xf] }
 0x196   :  { %v7858_v5 = vld [vmem:[%s12420_s1 + $0xb0c] sm:$0xf]  ;;  %v7416_v9 = vor.u32 %v8058_v63, %v7413_v0  ;;  %3958 = vmatpush.bf16.msra.mxu2 %v7160_v3 }
 0x197   :  { %v6613_v7 = vld [vmem:[%s12420_s1 + $0xb28] sm:$0xf0] }
 0x198   :  { %v7922_v8 = vld [vmem:[%s12420_s1 + $0xd0c] sm:$0xf]  ;;  %v6616_v16 = vor.u32 %v7858_v5, %v6613_v7  ;;  %3971 = vmatpush.bf16.msra.mxu3 %v7416_v9 }
 0x199   :  { %v6869_v10 = vld [vmem:[%s12420_s1 + $0xd28] sm:$0xf0] }
 0x19a   :  { %v7986_v11 = vld [vmem:[%s12420_s1 + $0xf0c] sm:$0xf]  ;;  %v6872_v22 = vor.u32 %v7922_v8, %v6869_v10  ;;  %3933 = vmatpush.bf16.msra.mxu0 %v6616_v16  ;;  %v3707_v16 = vpop.f32.mrf.mxu2 }
 0x19b   :  { %v7125_v12 = vld [vmem:[%s12420_s1 + $0xf28] sm:$0xf0]  ;;  %v6107_v16 = vld [vmem:[%s12420_s1 + $0x710] sm:$0xf] }
 0x19c   :  { %v8050_v13 = vld [vmem:[%s12420_s1 + $0x110c] sm:$0xf]  ;;  %v7128_v23 = vor.u32 %v7986_v11, %v7125_v12  ;;  %3946 = vmatpush.bf16.msra.mxu1 %v6872_v22 }
 0x19d   :  { %v7381_v14 = vld [vmem:[%s12420_s1 + $0x1128] sm:$0xf0] }
 0x19e   :  { %v7850_v24 = vld [vmem:[%s12420_s1 + $0xacc] sm:$0xf]  ;;  %v7384_v56 = vor.u32 %v8050_v13, %v7381_v14  ;;  %3959 = vmatpush.bf16.msra.mxu2 %v7128_v23 }
 0x19f   :  { %v6581_v25 = vld [vmem:[%s12420_s1 + $0xae8] sm:$0xf0] }
 0x1a0   :  { %v7914_v26 = vld [vmem:[%s12420_s1 + $0xccc] sm:$0xf]  ;;  %v6584_v34 = vor.u32 %v7850_v24, %v6581_v25  ;;  %3972 = vmatpush.bf16.msra.mxu3 %v7384_v56  ;;  %v3720_v25 = vpop.f32.mrf.mxu3 }
 0x1a1   :  { %v6837_v29 = vld [vmem:[%s12420_s1 + $0xce8] sm:$0xf0] }
 0x1a2   :  { %v7978_v30 = vld [vmem:[%s12420_s1 + $0xecc] sm:$0xf]  ;;  %v6840_v15 = vor.u32 %v7914_v26, %v6837_v29  ;;  %3934 = vmatpush.bf16.msra.mxu0 %v6584_v34  ;;  %v5435_v26 = vld [vmem:[%s12420_s1 + $0x1d0] sm:$0xf] }
 0x1a3   :  { %v7093_v31 = vld [vmem:[%s12420_s1 + $0xee8] sm:$0xf0]  ;;  %v7631_v29 = vld [vmem:[%s12420_s1 + $0x3ec] sm:$0xf0] }
 0x1a4   :  { %v8042_v32 = vld [vmem:[%s12420_s1 + $0x10cc] sm:$0xf]  ;;  %v7096_v35 = vor.u32 %v7978_v30, %v7093_v31  ;;  %3947 = vmatpush.bf16.msra.mxu1 %v6840_v15  ;;  %v5947_v30 = vld [vmem:[%s12420_s1 + $0x5d0] sm:$0xf] }
 0x1a5   :  { %v7349_v60 = vld [vmem:[%s12420_s1 + $0x10e8] sm:$0xf0]  ;;  %v7695_v31 = vld [vmem:[%s12420_s1 + $0x5ec] sm:$0xf0] }
 0x1a6   :  { %v7842_v36 = vld [vmem:[%s12420_s1 + $0xa8c] sm:$0xf]  ;;  %v7352_v43 = vor.u32 %v8042_v32, %v7349_v60  ;;  %3960 = vmatpush.bf16.msra.mxu2 %v7096_v35  ;;  %v7759_v34 = vld [vmem:[%s12420_s1 + $0x7ec] sm:$0xf0]  ;;  %v5436_v35 = vor.u32 %v7567_v27, %v5435_v26 }
 0x1a7   :  { %v6549_v37 = vld [vmem:[%s12420_s1 + $0xaa8] sm:$0xf0]  ;;  %v5307_v27 = vld [vmem:[%s12420_s1 + $0xd0] sm:$0xf] }
 0x1a8   :  { %v7906_v39 = vld [vmem:[%s12420_s1 + $0xc8c] sm:$0xf]  ;;  %v6552_v52 = vor.u32 %v7842_v36, %v6549_v37  ;;  %3973 = vmatpush.bf16.msra.mxu3 %v7352_v43  ;;  %v5692_v36 = vor.u32 %v7631_v29, %v5691_v28  ;;  %v5948_v37 = vor.u32 %v7695_v31, %v5947_v30  ;;  %v5659_v43 = vld [vmem:[%s12420_s1 + $0x390] sm:$0xf] }
 0x1a9   :  { %v6805_v45 = vld [vmem:[%s12420_s1 + $0xca8] sm:$0xf0]  ;;  %v7535_v28 = vld [vmem:[%s12420_s1 + $0xec] sm:$0xf0] }
 0x1aa   :  { %v7970_v46 = vld [vmem:[%s12420_s1 + $0xe8c] sm:$0xf]  ;;  %v6808_v55 = vor.u32 %v7906_v39, %v6805_v45  ;;  %3935 = vmatpush.bf16.msra.mxu0 %v6552_v52  ;;  %v5403_v39 = vld [vmem:[%s12420_s1 + $0x190] sm:$0xf]  ;;  %v6204_v45 = vor.u32 %v7759_v34, %v6203_v33  ;;  %v5308_v34 = vor.u32 %v7535_v28, %v5307_v27 }
 0x1ab   :  { %v7061_v47 = vld [vmem:[%s12420_s1 + $0xea8] sm:$0xf0]  ;;  %v7599_v30 = vld [vmem:[%s12420_s1 + $0x2ec] sm:$0xf0] }
 0x1ac   :  { %v8034_v50 = vld [vmem:[%s12420_s1 + $0x108c] sm:$0xf]  ;;  %v7064_v57 = vor.u32 %v7970_v46, %v7061_v47  ;;  %3948 = vmatpush.bf16.msra.mxu1 %v6808_v55  ;;  %v7623_v46 = vld [vmem:[%s12420_s1 + $0x3ac] sm:$0xf0] }
 0x1ad   :  { %v7317_v51 = vld [vmem:[%s12420_s1 + $0x10a8] sm:$0xf0]  ;;  %v5915_v47 = vld [vmem:[%s12420_s1 + $0x590] sm:$0xf]  ;;  %v5660_v52 = vor.u32 %v7623_v46, %v5659_v43 }
 0x1ae   :  { %v7834_v58 = vld [vmem:[%s12420_s1 + $0xa4c] sm:$0xf]  ;;  %v7320_v63 = vor.u32 %v8034_v50, %v7317_v51  ;;  %3961 = vmatpush.bf16.msra.mxu2 %v7064_v57  ;;  %v7751_v50 = vld [vmem:[%s12420_s1 + $0x7ac] sm:$0xf0]  ;;  %v5404_v51 = vor.u32 %v7559_v40, %v5403_v39  ;;  %v5916_v54 = vor.u32 %v7687_v48, %v5915_v47  ;;  %v3757_v47 = vpop.f32.mrf.mxu2 }
 0x1af   :  { %v6517_v59 = vld [vmem:[%s12420_s1 + $0xa68] sm:$0xf0]  ;;  %v5371_v55 = vld [vmem:[%s12420_s1 + $0x150] sm:$0xf] }
 0x1b0   :  { %v7898_v61 = vld [vmem:[%s12420_s1 + $0xc4c] sm:$0xf]  ;;  %v6520_v7 = vor.u32 %v7834_v58, %v6517_v59  ;;  %3974 = vmatpush.bf16.msra.mxu3 %v7320_v63  ;;  %v7551_v57 = vld [vmem:[%s12420_s1 + $0x16c] sm:$0xf0]  ;;  %v6172_v59 = vor.u32 %v7751_v50, %v6171_v49  ;;  %v3770_v50 = vpop.f32.mrf.mxu3 }
 0x1b1   :  { %v6773_v0 = vld [vmem:[%s12420_s1 + $0xc68] sm:$0xf0]  ;;  %v5627_v58 = vld [vmem:[%s12420_s1 + $0x350] sm:$0xf] }
 0x1b2   :  { %v7962_v1 = vld [vmem:[%s12420_s1 + $0xe4c] sm:$0xf]  ;;  %v6776_v10 = vor.u32 %v7898_v61, %v6773_v0  ;;  %3936 = vmatpush.bf16.msra.mxu0 %v6520_v7  ;;  %v7615_v61 = vld [vmem:[%s12420_s1 + $0x36c] sm:$0xf0] }
 0x1b3   :  { %v7029_v2 = vld [vmem:[%s12420_s1 + $0xe68] sm:$0xf0]  ;;  %v7679_v63 = vld [vmem:[%s12420_s1 + $0x56c] sm:$0xf0] }
 0x1b4   :  { %v8026_v3 = vld [vmem:[%s12420_s1 + $0x104c] sm:$0xf]  ;;  %v7032_v11 = vor.u32 %v7962_v1, %v7029_v2  ;;  %3949 = vmatpush.bf16.msra.mxu1 %v6776_v10  ;;  %v6139_v0 = vld [vmem:[%s12420_s1 + $0x750] sm:$0xf]  ;;  %v5372_v2 = vor.u32 %v7551_v57, %v5371_v55 }
 0x1b5   :  { %v7285_v5 = vld [vmem:[%s12420_s1 + $0x1068] sm:$0xf0]  ;;  %v7743_v1 = vld [vmem:[%s12420_s1 + $0x76c] sm:$0xf0] }
 0x1b6   :  { %v7826_v8 = vld [vmem:[%s12420_s1 + $0xa0c] sm:$0xf]  ;;  %v7288_v17 = vor.u32 %v8026_v3, %v7285_v5  ;;  %3962 = vmatpush.bf16.msra.mxu2 %v7032_v11  ;;  %v5628_v3 = vor.u32 %v7615_v61, %v5627_v58  ;;  %v5884_v5 = vor.u32 %v7679_v63, %v5883_v62  ;;  %v5339_v7 = vld [vmem:[%s12420_s1 + $0x110] sm:$0xf]  ;;  %v6140_v10 = vor.u32 %v7743_v1, %v6139_v0 }
 0x1b7   :  { %v6485_v9 = vld [vmem:[%s12420_s1 + $0xa28] sm:$0xf0]  ;;  %v7607_v11 = vld [vmem:[%s12420_s1 + $0x32c] sm:$0xf0] }
 0x1b8   :  { %v7890_v12 = vld [vmem:[%s12420_s1 + $0xc0c] sm:$0xf]  ;;  %v6488_v56 = vor.u32 %v7826_v8, %v6485_v9  ;;  %3975 = vmatpush.bf16.msra.mxu3 %v7288_v17  ;;  %v7543_v8 = vld [vmem:[%s12420_s1 + $0x12c] sm:$0xf0]  ;;  %v3772_v28 = vpop.f32.mrf.mxu3 }
 0x1b9   :  { %v6741_v13 = vld [vmem:[%s12420_s1 + $0xc28] sm:$0xf0]  ;;  %v5595_v9 = vld [vmem:[%s12420_s1 + $0x310] sm:$0xf] }
 0x1ba   :  { %v7954_v14 = vld [vmem:[%s12420_s1 + $0xe0c] sm:$0xf]  ;;  %v6744_v32 = vor.u32 %v7890_v12, %v6741_v13  ;;  %3937 = vmatpush.bf16.msra.mxu0 %v6488_v56  ;;  %v5851_v12 = vld [vmem:[%s12420_s1 + $0x510] sm:$0xf]  ;;  %v5596_v25 = vor.u32 %v7607_v11, %v5595_v9 }
 0x1bb   :  { %v6997_v22 = vld [vmem:[%s12420_s1 + $0xe28] sm:$0xf0]  ;;  %v7671_v13 = vld [vmem:[%s12420_s1 + $0x52c] sm:$0xf0] }
 0x1bc   :  { %v8018_v23 = vld [vmem:[%s12420_s1 + $0x100c] sm:$0xf]  ;;  %v7000_v60 = vor.u32 %v7954_v14, %v6997_v22  ;;  %3950 = vmatpush.bf16.msra.mxu1 %v6744_v32  ;;  %v3731_v14 = vpop.f32.mrf.mxu0  ;;  %v7735_v17 = vld [vmem:[%s12420_s1 + $0x72c] sm:$0xf0]  ;;  %v5852_v26 = vor.u32 %v7671_v13, %v5851_v12 }
 0x1bd   :  { %v7253_v24 = vld [vmem:[%s12420_s1 + $0x1028] sm:$0xf0]  ;;  %3938 = vmatmul.bf16.vlgmr.msra.gmra.mxu0 %v8622_v44  ;;  %v3732_v22 = vadd.f32 %v3731_v14, %v9916_v53  ;;  %v5563_v56 = vld [vmem:[%s12420_s1 + $0x2d0] sm:$0xf]  ;;  %v6108_v53 = vor.u32 %v7735_v17, %v6107_v16 }
 0x1be   :  { %v7256_v15 = vor.u32 %v8018_v23, %v7253_v24  ;;  %3963 = vmatpush.bf16.msra.mxu2 %v7000_v60  ;;  %3982 = vmatpush.bf16.msrb.mxu0 %v5436_v35  ;;  %v5340_v23 = vor.u32 %v7543_v8, %v5339_v7  ;;  %v3744_v24 = vpop.f32.mrf.mxu1  ;;  %v5819_v31 = vld [vmem:[%s12420_s1 + $0x4d0] sm:$0xf] }
 0x1bf   :  { %3951 = vmatmul.bf16.vlgmr.msra.gmra.mxu1 %v8610_v38  ;;  %v10076_v29 = vadd.f32 %v3744_v24, %v3732_v22  ;;  %v7663_v32 = vld [vmem:[%s12420_s1 + $0x4ec] sm:$0xf0]  ;;  %v3759_v24 = vpop.f32.mrf.mxu2 }
 0x1c0   :  { %3976 = vmatpush.bf16.msra.mxu3 %v7256_v15  ;;  %3995 = vmatpush.bf16.msrb.mxu1 %v5692_v36  ;;  %v6075_v60 = vld [vmem:[%s12420_s1 + $0x6d0] sm:$0xf]  ;;  %v5564_v15 = vor.u32 %v7599_v30, %v5563_v56  ;;  %v5820_v35 = vor.u32 %v7663_v32, %v5819_v31 }
 0x1c1   :  { %3964 = vmatmul.bf16.vlgmr.msra.gmra.mxu2 %v8620_v42  ;;  %v7727_v33 = vld [vmem:[%s12420_s1 + $0x6ec] sm:$0xf0] }
 0x1c2   :  { %4008 = vmatpush.bf16.msrb.mxu2 %v5948_v37  ;;  %3983 = vmatpush.bf16.msrb.mxu0 %v5404_v51  ;;  %v5275_v36 = vld [vmem:[%s12420_s1 + $0x90] sm:$0xf]  ;;  %v6076_v40 = vor.u32 %v7727_v33, %v6075_v60 }
 0x1c3   :  { %3977 = vmatmul.bf16.vlgmr.msra.gmra.mxu3 %v8808_v19  ;;  %v7527_v37 = vld [vmem:[%s12420_s1 + $0xac] sm:$0xf0] }
 0x1c4   :  { %4021 = vmatpush.bf16.msrb.mxu3 %v6204_v45  ;;  %3996 = vmatpush.bf16.msrb.mxu1 %v5660_v52  ;;  %v5531_v39 = vld [vmem:[%s12420_s1 + $0x290] sm:$0xf]  ;;  %v3733_v51 = vpop.f32.mrf.mxu0  ;;  %v5276_v52 = vor.u32 %v7527_v37, %v5275_v36 }
 0x1c5   :  { %v7591_v43 = vld [vmem:[%s12420_s1 + $0x2ac] sm:$0xf0] }
 0x1c6   :  { %4009 = vmatpush.bf16.msrb.mxu2 %v5916_v54  ;;  %3984 = vmatpush.bf16.msrb.mxu0 %v5372_v2  ;;  %v5787_v45 = vld [vmem:[%s12420_s1 + $0x490] sm:$0xf]  ;;  %v10117_v54 = vadd.f32 %v3770_v50, %v3757_v47  ;;  %v3746_v55 = vpop.f32.mrf.mxu1  ;;  %v5532_v57 = vor.u32 %v7591_v43, %v5531_v39 }
 0x1c7   :  { %v7655_v46 = vld [vmem:[%s12420_s1 + $0x4ac] sm:$0xf0] }
 0x1c8   :  { %4022 = vmatpush.bf16.msrb.mxu3 %v6172_v59  ;;  %3997 = vmatpush.bf16.msrb.mxu1 %v5628_v3  ;;  %v6043_v48 = vld [vmem:[%s12420_s1 + $0x690] sm:$0xf]  ;;  %v5788_v58 = vor.u32 %v7655_v46, %v5787_v45 }
 0x1c9   :  { %v7719_v49 = vld [vmem:[%s12420_s1 + $0x6ac] sm:$0xf0] }
 0x1ca   :  { %4010 = vmatpush.bf16.msrb.mxu2 %v5884_v5  ;;  %3985 = vmatpush.bf16.msrb.mxu0 %v5340_v23  ;;  %v5243_v59 = vld [vmem:[%s12420_s1 + $0x50] sm:$0xf]  ;;  %v6044_v63 = vor.u32 %v7719_v49, %v6043_v48 }
 0x1cb   :  { %v7519_v61 = vld [vmem:[%s12420_s1 + $0x6c] sm:$0xf0] }
 0x1cc   :  { %4023 = vmatpush.bf16.msrb.mxu3 %v6140_v10  ;;  %3998 = vmatpush.bf16.msrb.mxu1 %v5596_v25  ;;  %v5499_v62 = vld [vmem:[%s12420_s1 + $0x250] sm:$0xf]  ;;  %v5244_v7 = vor.u32 %v7519_v61, %v5243_v59 }
 0x1cd   :  { %v7583_v0 = vld [vmem:[%s12420_s1 + $0x26c] sm:$0xf0] }
 0x1ce   :  { %4011 = vmatpush.bf16.msrb.mxu2 %v5852_v26  ;;  %3986 = vmatpush.bf16.msrb.mxu0 %v5308_v34  ;;  %v5755_v1 = vld [vmem:[%s12420_s1 + $0x450] sm:$0xf]  ;;  %v5500_v10 = vor.u32 %v7583_v0, %v5499_v62 }
 0x1cf   :  { %v7647_v2 = vld [vmem:[%s12420_s1 + $0x46c] sm:$0xf0] }
 0x1d0   :  { %4024 = vmatpush.bf16.msrb.mxu3 %v6108_v53  ;;  %3999 = vmatpush.bf16.msrb.mxu1 %v5564_v15  ;;  %v6011_v3 = vld [vmem:[%s12420_s1 + $0x650] sm:$0xf]  ;;  %v5756_v11 = vor.u32 %v7647_v2, %v5755_v1 }
 0x1d1   :  { %v7711_v5 = vld [vmem:[%s12420_s1 + $0x66c] sm:$0xf0] }
 0x1d2   :  { %4012 = vmatpush.bf16.msrb.mxu2 %v5820_v35  ;;  %3987 = vmatpush.bf16.msrb.mxu0 %v5276_v52  ;;  %v5211_v8 = vld [vmem:[%s12420_s1 + $0x10] sm:$0xf]  ;;  %v6012_v16 = vor.u32 %v7711_v5, %v6011_v3 }
 0x1d3   :  { %v7511_v9 = vld [vmem:[%s12420_s1 + $0x2c] sm:$0xf0] }
 0x1d4   :  { %4025 = vmatpush.bf16.msrb.mxu3 %v6076_v40  ;;  %4000 = vmatpush.bf16.msrb.mxu1 %v5532_v57  ;;  %v5467_v12 = vld [vmem:[%s12420_s1 + $0x210] sm:$0xf]  ;;  %v5212_v56 = vor.u32 %v7511_v9, %v5211_v8 }
 0x1d5   :  { %v7575_v13 = vld [vmem:[%s12420_s1 + $0x22c] sm:$0xf0] }
 0x1d6   :  { %4013 = vmatpush.bf16.msrb.mxu2 %v5788_v58  ;;  %v5723_v14 = vld [vmem:[%s12420_s1 + $0x410] sm:$0xf]  ;;  %3988 = vmatpush.bf16.msrb.mxu0 %v5244_v7  ;;  %v5468_v32 = vor.u32 %v7575_v13, %v5467_v12 }
 0x1d7   :  { %v7639_v17 = vld [vmem:[%s12420_s1 + $0x42c] sm:$0xf0] }
 0x1d8   :  { %4026 = vmatpush.bf16.msrb.mxu3 %v6044_v63  ;;  %v5979_v22 = vld [vmem:[%s12420_s1 + $0x610] sm:$0xf]  ;;  %4001 = vmatpush.bf16.msrb.mxu1 %v5500_v10  ;;  %v5724_v60 = vor.u32 %v7639_v17, %v5723_v14 }
 0x1d9   :  { %v7703_v23 = vld [vmem:[%s12420_s1 + $0x62c] sm:$0xf0] }
 0x1da   :  { %v6459_v25 = vld [vmem:[%s12420_s1 + $0x9d0] sm:$0xf]  ;;  %4014 = vmatpush.bf16.msrb.mxu2 %v5756_v11  ;;  %v5980_v15 = vor.u32 %v7703_v23, %v5979_v22  ;;  %3989 = vmatpush.bf16.msrb.mxu0 %v5212_v56  ;;  %v3783_v23 = vpop.f32.mrf.mxu0 }
 0x1db   :  { %v7823_v26 = vld [vmem:[%s12420_s1 + $0x9ec] sm:$0xf0]  ;;  %v3784_v56 = vadd.f32 %v3783_v23, %v10117_v54 }
 0x1dc   :  { %v6715_v27 = vld [vmem:[%s12420_s1 + $0xbd0] sm:$0xf]  ;;  %4027 = vmatpush.bf16.msrb.mxu3 %v6012_v16  ;;  %v6460_v35 = vor.u32 %v7823_v26, %v6459_v25  ;;  %4002 = vmatpush.bf16.msrb.mxu1 %v5468_v32 }
 0x1dd   :  { %v7887_v53 = vld [vmem:[%s12420_s1 + $0xbec] sm:$0xf0]  ;;  %3990 = vmatmul.bf16.vlgmr.msrb.gmra.mxu0 %v8459_v20 }
 0x1de   :  { %v6971_v30 = vld [vmem:[%s12420_s1 + $0xdd0] sm:$0xf]  ;;  %v6716_v36 = vor.u32 %v7887_v53, %v6715_v27  ;;  %4015 = vmatpush.bf16.msrb.mxu2 %v5724_v60  ;;  %4034 = vmatpush.bf16.msra.mxu0 %v6460_v35  ;;  %v3796_v53 = vpop.f32.mrf.mxu1 }
 0x1df   :  { %v7951_v31 = vld [vmem:[%s12420_s1 + $0xdec] sm:$0xf0]  ;;  %4003 = vmatmul.bf16.vlgmr.msrb.gmra.mxu1 %v8462_v21 }
 0x1e0   :  { %v7227_v33 = vld [vmem:[%s12420_s1 + $0xfd0] sm:$0xf]  ;;  %v6972_v37 = vor.u32 %v7951_v31, %v6971_v30  ;;  %4028 = vmatpush.bf16.msrb.mxu3 %v5980_v15  ;;  %4047 = vmatpush.bf16.msra.mxu1 %v6716_v36 }
 0x1e1   :  { %v8015_v34 = vld [vmem:[%s12420_s1 + $0xfec] sm:$0xf0]  ;;  %4016 = vmatmul.bf16.vlgmr.msrb.gmra.mxu2 %v8427_v4 }
 0x1e2   :  { %v6427_v39 = vld [vmem:[%s12420_s1 + $0x990] sm:$0xf]  ;;  %v7228_v45 = vor.u32 %v8015_v34, %v7227_v33  ;;  %4060 = vmatpush.bf16.msra.mxu2 %v6972_v37  ;;  %v3797_v34 = vadd.f32 %v3796_v53, %v3784_v56 }
 0x1e3   :  { %v7815_v40 = vld [vmem:[%s12420_s1 + $0x9ac] sm:$0xf0]  ;;  %4029 = vmatmul.bf16.vlgmr.msrb.gmra.mxu3 %v8432_v6 }
 0x1e4   :  { %v6683_v43 = vld [vmem:[%s12420_s1 + $0xb90] sm:$0xf]  ;;  %v6428_v51 = vor.u32 %v7815_v40, %v6427_v39  ;;  %4073 = vmatpush.bf16.msra.mxu3 %v7228_v45 }
 0x1e5   :  { %v7879_v46 = vld [vmem:[%s12420_s1 + $0xbac] sm:$0xf0] }
 0x1e6   :  { %v6939_v47 = vld [vmem:[%s12420_s1 + $0xd90] sm:$0xf]  ;;  %v6684_v52 = vor.u32 %v7879_v46, %v6683_v43  ;;  %4035 = vmatpush.bf16.msra.mxu0 %v6428_v51  ;;  %v3809_v43 = vpop.f32.mrf.mxu2 }
 0x1e7   :  { %v7943_v48 = vld [vmem:[%s12420_s1 + $0xdac] sm:$0xf0] }
 0x1e8   :  { %v7195_v49 = vld [vmem:[%s12420_s1 + $0xf90] sm:$0xf]  ;;  %v6940_v55 = vor.u32 %v7943_v48, %v6939_v47  ;;  %4048 = vmatpush.bf16.msra.mxu1 %v6684_v52 }
 0x1e9   :  { %v8007_v50 = vld [vmem:[%s12420_s1 + $0xfac] sm:$0xf0] }
 0x1ea   :  { %v6395_v57 = vld [vmem:[%s12420_s1 + $0x950] sm:$0xf]  ;;  %v7196_v61 = vor.u32 %v8007_v50, %v7195_v49  ;;  %4061 = vmatpush.bf16.msra.mxu2 %v6940_v55  ;;  %v3810_v49 = vadd.f32 %v3809_v43, %v3797_v34  ;;  %v3822_v50 = vpop.f32.mrf.mxu3 }
 0x1eb   :  { %v7807_v58 = vld [vmem:[%s12420_s1 + $0x96c] sm:$0xf0] }
 0x1ec   :  { %v6651_v59 = vld [vmem:[%s12420_s1 + $0xb50] sm:$0xf]  ;;  %v6396_v3 = vor.u32 %v7807_v58, %v6395_v57  ;;  %4074 = vmatpush.bf16.msra.mxu3 %v7196_v61  ;;  %v10316_v57 = vadd.f32 %v3822_v50, %v3810_v49  ;;  %v3785_v58 = vpop.f32.mrf.mxu0  ;;  %v7619_v49 = vld [vmem:[%s12420_s1 + $0x394] sm:$0xf] }
 0x1ed   :  { %v7871_v62 = vld [vmem:[%s12420_s1 + $0xb6c] sm:$0xf0]  ;;  %v5661_v50 = vld [vmem:[%s12420_s1 + $0x3b0] sm:$0xf0] }
 0x1ee   :  { %v6907_v63 = vld [vmem:[%s12420_s1 + $0xd50] sm:$0xf]  ;;  %v6652_v5 = vor.u32 %v7871_v62, %v6651_v59  ;;  %4036 = vmatpush.bf16.msra.mxu0 %v6396_v3  ;;  %v3811_v23 = vpop.f32.mrf.mxu2 }
 0x1ef   :  { %v7935_v0 = vld [vmem:[%s12420_s1 + $0xd6c] sm:$0xf0] }
 0x1f0   :  { %v7163_v1 = vld [vmem:[%s12420_s1 + $0xf50] sm:$0xf]  ;;  %v6908_v7 = vor.u32 %v7935_v0, %v6907_v63  ;;  %4049 = vmatpush.bf16.msra.mxu1 %v6652_v5 }
 0x1f1   :  { %v7999_v2 = vld [vmem:[%s12420_s1 + $0xf6c] sm:$0xf0] }
 0x1f2   :  { %v6363_v8 = vld [vmem:[%s12420_s1 + $0x910] sm:$0xf]  ;;  %v7164_v11 = vor.u32 %v7999_v2, %v7163_v1  ;;  %4062 = vmatpush.bf16.msra.mxu2 %v6908_v7  ;;  %v3798_v1 = vpop.f32.mrf.mxu1 }
 0x1f3   :  { %v7799_v9 = vld [vmem:[%s12420_s1 + $0x92c] sm:$0xf0]  ;;  %v5373_v1 = vld [vmem:[%s12420_s1 + $0x170] sm:$0xf0] }
 0x1f4   :  { %v6619_v10 = vld [vmem:[%s12420_s1 + $0xb10] sm:$0xf]  ;;  %v6364_v22 = vor.u32 %v7799_v9, %v6363_v8  ;;  %4075 = vmatpush.bf16.msra.mxu3 %v7164_v11  ;;  %v10460_v23 = vpop.f32.mrf.mxu0 }
 0x1f5   :  { %v7863_v12 = vld [vmem:[%s12420_s1 + $0xb2c] sm:$0xf0] }
 0x1f6   :  { %v6875_v13 = vld [vmem:[%s12420_s1 + $0xd10] sm:$0xf]  ;;  %v6620_v24 = vor.u32 %v7863_v12, %v6619_v10  ;;  %4037 = vmatpush.bf16.msra.mxu0 %v6364_v22 }
 0x1f7   :  { %v7927_v14 = vld [vmem:[%s12420_s1 + $0xd2c] sm:$0xf0] }
 0x1f8   :  { %v7131_v16 = vld [vmem:[%s12420_s1 + $0xf10] sm:$0xf]  ;;  %v6876_v25 = vor.u32 %v7927_v14, %v6875_v13  ;;  %4050 = vmatpush.bf16.msra.mxu1 %v6620_v24 }
 0x1f9   :  { %v7991_v17 = vld [vmem:[%s12420_s1 + $0xf2c] sm:$0xf0] }
 0x1fa   :  { %v6331_v26 = vld [vmem:[%s12420_s1 + $0x8d0] sm:$0xf]  ;;  %v7132_v30 = vor.u32 %v7991_v17, %v7131_v16  ;;  %4063 = vmatpush.bf16.msra.mxu2 %v6876_v25 }
 0x1fb   :  { %v7791_v27 = vld [vmem:[%s12420_s1 + $0x8ec] sm:$0xf0] }
 0x1fc   :  { %v6587_v28 = vld [vmem:[%s12420_s1 + $0xad0] sm:$0xf]  ;;  %v6332_v15 = vor.u32 %v7791_v27, %v6331_v26  ;;  %4076 = vmatpush.bf16.msra.mxu3 %v7132_v30  ;;  %v7563_v30 = vld [vmem:[%s12420_s1 + $0x1d4] sm:$0xf] }
 0x1fd   :  { %v7855_v31 = vld [vmem:[%s12420_s1 + $0xaec] sm:$0xf0] }
 0x1fe   :  { %v6843_v32 = vld [vmem:[%s12420_s1 + $0xcd0] sm:$0xf]  ;;  %v6588_v35 = vor.u32 %v7855_v31, %v6587_v28  ;;  %4038 = vmatpush.bf16.msra.mxu0 %v6332_v15  ;;  %v3824_v28 = vpop.f32.mrf.mxu3  ;;  %v7691_v15 = vld [vmem:[%s12420_s1 + $0x5d4] sm:$0xf] }
 0x1ff   :  { %v7919_v60 = vld [vmem:[%s12420_s1 + $0xcec] sm:$0xf0] }
 0x200   :  { %v7099_v33 = vld [vmem:[%s12420_s1 + $0xed0] sm:$0xf]  ;;  %v6844_v36 = vor.u32 %v7919_v60, %v6843_v32  ;;  %4051 = vmatpush.bf16.msra.mxu1 %v6588_v35  ;;  %v5437_v32 = vld [vmem:[%s12420_s1 + $0x1f0] sm:$0xf0] }
 0x201   :  { %v7983_v54 = vld [vmem:[%s12420_s1 + $0xeec] sm:$0xf0]  ;;  %v7627_v60 = vld [vmem:[%s12420_s1 + $0x3d4] sm:$0xf] }
 0x202   :  { %v6299_v37 = vld [vmem:[%s12420_s1 + $0x890] sm:$0xf]  ;;  %v7100_v45 = vor.u32 %v7983_v54, %v7099_v33  ;;  %4064 = vmatpush.bf16.msra.mxu2 %v6844_v36  ;;  %v5693_v33 = vld [vmem:[%s12420_s1 + $0x3f0] sm:$0xf0] }
 0x203   :  { %v7783_v39 = vld [vmem:[%s12420_s1 + $0x8ac] sm:$0xf0]  ;;  %v5949_v35 = vld [vmem:[%s12420_s1 + $0x5f0] sm:$0xf0] }
 0x204   :  { %v6555_v40 = vld [vmem:[%s12420_s1 + $0xa90] sm:$0xf]  ;;  %v6300_v55 = vor.u32 %v7783_v39, %v6299_v37  ;;  %4077 = vmatpush.bf16.msra.mxu3 %v7100_v45  ;;  %v5440_v39 = vor.u32 %v7563_v30, %v5437_v32 }
 0x205   :  { %v7847_v46 = vld [vmem:[%s12420_s1 + $0xaac] sm:$0xf0] }
 0x206   :  { %v6811_v47 = vld [vmem:[%s12420_s1 + $0xc90] sm:$0xf]  ;;  %v6556_v59 = vor.u32 %v7847_v46, %v6555_v40  ;;  %4039 = vmatpush.bf16.msra.mxu0 %v6300_v55  ;;  %v5696_v40 = vor.u32 %v7627_v60, %v5693_v33  ;;  %v7555_v46 = vld [vmem:[%s12420_s1 + $0x194] sm:$0xf] }
 0x207   :  { %v7911_v48 = vld [vmem:[%s12420_s1 + $0xcac] sm:$0xf0]  ;;  %v5309_v60 = vld [vmem:[%s12420_s1 + $0xf0] sm:$0xf0] }
 0x208   :  { %v7067_v51 = vld [vmem:[%s12420_s1 + $0xe90] sm:$0xf]  ;;  %v6812_v61 = vor.u32 %v7911_v48, %v6811_v47  ;;  %4052 = vmatpush.bf16.msra.mxu1 %v6556_v59  ;;  %v5952_v47 = vor.u32 %v7691_v15, %v5949_v35  ;;  %v5405_v48 = vld [vmem:[%s12420_s1 + $0x1b0] sm:$0xf0]  ;;  %v5664_v59 = vor.u32 %v7619_v49, %v5661_v50 }
 0x209   :  { %v7975_v52 = vld [vmem:[%s12420_s1 + $0xeac] sm:$0xf0]  ;;  %v5408_v58 = vor.u32 %v7555_v46, %v5405_v48  ;;  %v7595_v33 = vld [vmem:[%s12420_s1 + $0x2d4] sm:$0xf]  ;;  %v10503_v46 = vpop.f32.mrf.mxu2 }
 0x20a   :  { %v6267_v62 = vld [vmem:[%s12420_s1 + $0x850] sm:$0xf]  ;;  %v7068_v2 = vor.u32 %v7975_v52, %v7067_v51  ;;  %4065 = vmatpush.bf16.msra.mxu2 %v6812_v61  ;;  %v7683_v51 = vld [vmem:[%s12420_s1 + $0x594] sm:$0xf] }
 0x20b   :  { %v7775_v63 = vld [vmem:[%s12420_s1 + $0x86c] sm:$0xf0]  ;;  %v5917_v52 = vld [vmem:[%s12420_s1 + $0x5b0] sm:$0xf0] }
 0x20c   :  { %v6523_v0 = vld [vmem:[%s12420_s1 + $0xa50] sm:$0xf]  ;;  %v6268_v10 = vor.u32 %v7775_v63, %v6267_v62  ;;  %4078 = vmatpush.bf16.msra.mxu3 %v7068_v2  ;;  %v7547_v63 = vld [vmem:[%s12420_s1 + $0x154] sm:$0xf] }
 0x20d   :  { %v7839_v3 = vld [vmem:[%s12420_s1 + $0xa6c] sm:$0xf0]  ;;  %v7611_v2 = vld [vmem:[%s12420_s1 + $0x354] sm:$0xf] }
 0x20e   :  { %v6779_v5 = vld [vmem:[%s12420_s1 + $0xc50] sm:$0xf]  ;;  %v6524_v13 = vor.u32 %v7839_v3, %v6523_v0  ;;  %4040 = vmatpush.bf16.msra.mxu0 %v6268_v10  ;;  %v5920_v0 = vor.u32 %v7683_v51, %v5917_v52  ;;  %v5629_v3 = vld [vmem:[%s12420_s1 + $0x370] sm:$0xf0]  ;;  %v10520_v52 = vpop.f32.mrf.mxu3 }
 0x20f   :  { %v7903_v7 = vld [vmem:[%s12420_s1 + $0xc6c] sm:$0xf0]  ;;  %v5632_v10 = vor.u32 %v7611_v2, %v5629_v3  ;;  %v5821_v15 = vld [vmem:[%s12420_s1 + $0x4f0] sm:$0xf0] }
 0x210   :  { %v7035_v8 = vld [vmem:[%s12420_s1 + $0xe50] sm:$0xf]  ;;  %v6780_v14 = vor.u32 %v7903_v7, %v6779_v5  ;;  %4053 = vmatpush.bf16.msra.mxu1 %v6524_v13  ;;  %v7675_v5 = vld [vmem:[%s12420_s1 + $0x554] sm:$0xf] }
 0x211   :  { %v7967_v9 = vld [vmem:[%s12420_s1 + $0xe6c] sm:$0xf0]  ;;  %v5885_v7 = vld [vmem:[%s12420_s1 + $0x570] sm:$0xf0] }
 0x212   :  { %v6235_v11 = vld [vmem:[%s12420_s1 + $0x810] sm:$0xf]  ;;  %v7036_v24 = vor.u32 %v7967_v9, %v7035_v8  ;;  %4066 = vmatpush.bf16.msra.mxu2 %v6780_v14  ;;  %v5376_v9 = vor.u32 %v7547_v63, %v5373_v1  ;;  %v7539_v13 = vld [vmem:[%s12420_s1 + $0x114] sm:$0xf]  ;;  %v5888_v14 = vor.u32 %v7675_v5, %v5885_v7 }
 0x213   :  { %v7767_v12 = vld [vmem:[%s12420_s1 + $0x82c] sm:$0xf0]  ;;  %v7587_v48 = vld [vmem:[%s12420_s1 + $0x294] sm:$0xf] }
 0x214   :  { %v6491_v16 = vld [vmem:[%s12420_s1 + $0xa10] sm:$0xf]  ;;  %v6236_v31 = vor.u32 %v7767_v12, %v6235_v11  ;;  %4079 = vmatpush.bf16.msra.mxu3 %v7036_v24  ;;  %v7667_v24 = vld [vmem:[%s12420_s1 + $0x514] sm:$0xf] }
 0x215   :  { %v7831_v17 = vld [vmem:[%s12420_s1 + $0xa2c] sm:$0xf0]  ;;  %v5533_v49 = vld [vmem:[%s12420_s1 + $0x2b0] sm:$0xf0] }
 0x216   :  { %v6747_v22 = vld [vmem:[%s12420_s1 + $0xc10] sm:$0xf]  ;;  %v6492_v54 = vor.u32 %v7831_v17, %v6491_v16  ;;  %4041 = vmatpush.bf16.msra.mxu0 %v6236_v31  ;;  %v5341_v16 = vld [vmem:[%s12420_s1 + $0x130] sm:$0xf0] }
 0x217   :  { %v7895_v25 = vld [vmem:[%s12420_s1 + $0xc2c] sm:$0xf0]  ;;  %v7603_v17 = vld [vmem:[%s12420_s1 + $0x314] sm:$0xf]  ;;  %v5344_v28 = vor.u32 %v7539_v13, %v5341_v16 }
 0x218   :  { %v7003_v26 = vld [vmem:[%s12420_s1 + $0xe10] sm:$0xf]  ;;  %v6748_v34 = vor.u32 %v7895_v25, %v6747_v22  ;;  %4054 = vmatpush.bf16.msra.mxu1 %v6492_v54  ;;  %v5597_v22 = vld [vmem:[%s12420_s1 + $0x330] sm:$0xf0] }
 0x219   :  { %v7959_v27 = vld [vmem:[%s12420_s1 + $0xe2c] sm:$0xf0]  ;;  %4042 = vmatmul.bf16.vlgmr.msra.gmra.mxu0 %v8618_v41  ;;  %v5853_v25 = vld [vmem:[%s12420_s1 + $0x530] sm:$0xf0] }
 0x21a   :  { %v7483_v56 = vld [vmem:[%s12420_s1 + $0x11d0] sm:$0xf]  ;;  %v7004_v36 = vor.u32 %v7959_v27, %v7003_v26  ;;  %4067 = vmatpush.bf16.msra.mxu2 %v6748_v34  ;;  %v10468_v27 = vpop.f32.mrf.mxu1  ;;  %v7531_v31 = vld [vmem:[%s12420_s1 + $0xd4] sm:$0xf]  ;;  %v5856_v32 = vor.u32 %v7667_v24, %v5853_v25 }
 0x21b   :  { %v8079_v53 = vld [vmem:[%s12420_s1 + $0x11ec] sm:$0xf0]  ;;  %4055 = vmatmul.bf16.vlgmr.msra.gmra.mxu1 %v8622_v44  ;;  %v5565_v54 = vld [vmem:[%s12420_s1 + $0x2f0] sm:$0xf0] }
 0x21c   :  { %v7484_v37 = vor.u32 %v8079_v53, %v7483_v56  ;;  %v7451_v43 = vld [vmem:[%s12420_s1 + $0x1190] sm:$0xf]  ;;  %4080 = vmatpush.bf16.msra.mxu3 %v7004_v36  ;;  %4099 = vmatpush.bf16.msrb.mxu1 %v5440_v39  ;;  %v5600_v56 = vor.u32 %v7603_v17, %v5597_v22  ;;  %v7659_v34 = vld [vmem:[%s12420_s1 + $0x4d4] sm:$0xf]  ;;  %v5312_v36 = vor.u32 %v7531_v31, %v5309_v60 }
 0x21d   :  { %v8071_v45 = vld [vmem:[%s12420_s1 + $0x11ac] sm:$0xf0]  ;;  %4068 = vmatmul.bf16.vlgmr.msra.gmra.mxu2 %v8610_v38  ;;  %v7651_v50 = vld [vmem:[%s12420_s1 + $0x494] sm:$0xf] }
 0x21e   :  { %4086 = vmatpush.bf16.msrb.mxu0 %v7484_v37  ;;  %v7452_v55 = vor.u32 %v8071_v45, %v7451_v43  ;;  %4112 = vmatpush.bf16.msrb.mxu2 %v5696_v40  ;;  %v7419_v61 = vld [vmem:[%s12420_s1 + $0x1150] sm:$0xf]  ;;  %v5568_v37 = vor.u32 %v7595_v33, %v5565_v54  ;;  %v7523_v43 = vld [vmem:[%s12420_s1 + $0x94] sm:$0xf]  ;;  %v5824_v45 = vor.u32 %v7659_v34, %v5821_v15 }
 0x21f   :  { %v8063_v62 = vld [vmem:[%s12420_s1 + $0x116c] sm:$0xf0]  ;;  %4081 = vmatmul.bf16.vlgmr.msra.gmra.mxu3 %v8620_v42  ;;  %v5789_v51 = vld [vmem:[%s12420_s1 + $0x4b0] sm:$0xf0] }
 0x220   :  { %4125 = vmatpush.bf16.msrb.mxu3 %v5952_v47  ;;  %v7420_v8 = vor.u32 %v8063_v62, %v7419_v61  ;;  %4100 = vmatpush.bf16.msrb.mxu1 %v5408_v58  ;;  %v7387_v11 = vld [vmem:[%s12420_s1 + $0x1110] sm:$0xf]  ;;  %v5277_v47 = vld [vmem:[%s12420_s1 + $0xb0] sm:$0xf0]  ;;  %v5536_v62 = vor.u32 %v7587_v48, %v5533_v49  ;;  %v5792_v2 = vor.u32 %v7651_v50, %v5789_v51 }
 0x221   :  { %v8055_v12 = vld [vmem:[%s12420_s1 + $0x112c] sm:$0xf0]  ;;  %v5280_v61 = vor.u32 %v7523_v43, %v5277_v47  ;;  %v7515_v1 = vld [vmem:[%s12420_s1 + $0x54] sm:$0xf] }
 0x222   :  { %4087 = vmatpush.bf16.msrb.mxu0 %v7452_v55  ;;  %4113 = vmatpush.bf16.msrb.mxu2 %v5664_v59  ;;  %v7388_v26 = vor.u32 %v8055_v12, %v7387_v11  ;;  %v7355_v53 = vld [vmem:[%s12420_s1 + $0x10d0] sm:$0xf]  ;;  %v3837_v55 = vpop.f32.mrf.mxu0  ;;  %v3850_v59 = vpop.f32.mrf.mxu1  ;;  %v5245_v3 = vld [vmem:[%s12420_s1 + $0x70] sm:$0xf0] }
 0x223   :  { %v8047_v30 = vld [vmem:[%s12420_s1 + $0x10ec] sm:$0xf0]  ;;  %v7579_v5 = vld [vmem:[%s12420_s1 + $0x254] sm:$0xf]  ;;  %v5248_v13 = vor.u32 %v7515_v1, %v5245_v3 }
 0x224   :  { %4126 = vmatpush.bf16.msrb.mxu3 %v5920_v0  ;;  %4101 = vmatpush.bf16.msrb.mxu1 %v5376_v9  ;;  %v7356_v35 = vor.u32 %v8047_v30, %v7355_v53  ;;  %v7323_v39 = vld [vmem:[%s12420_s1 + $0x1090] sm:$0xf]  ;;  %v5501_v7 = vld [vmem:[%s12420_s1 + $0x270] sm:$0xf0] }
 0x225   :  { %v8039_v40 = vld [vmem:[%s12420_s1 + $0x10ac] sm:$0xf0]  ;;  %v5757_v9 = vld [vmem:[%s12420_s1 + $0x470] sm:$0xf0] }
 0x226   :  { %4088 = vmatpush.bf16.msrb.mxu0 %v7420_v8  ;;  %4114 = vmatpush.bf16.msrb.mxu2 %v5632_v10  ;;  %v7324_v58 = vor.u32 %v8039_v40, %v7323_v39  ;;  %v7291_v63 = vld [vmem:[%s12420_s1 + $0x1050] sm:$0xf]  ;;  %v7643_v8 = vld [vmem:[%s12420_s1 + $0x454] sm:$0xf] }
 0x227   :  { %v8031_v0 = vld [vmem:[%s12420_s1 + $0x106c] sm:$0xf0]  ;;  %v7507_v16 = vld [vmem:[%s12420_s1 + $0x14] sm:$0xf]  ;;  %v5760_v24 = vor.u32 %v7643_v8, %v5757_v9 }
 0x228   :  { %4127 = vmatpush.bf16.msrb.mxu3 %v5888_v14  ;;  %4102 = vmatpush.bf16.msrb.mxu1 %v5344_v28  ;;  %v7292_v10 = vor.u32 %v8031_v0, %v7291_v63  ;;  %v7259_v11 = vld [vmem:[%s12420_s1 + $0x1010] sm:$0xf]  ;;  %v5504_v14 = vor.u32 %v7579_v5, %v5501_v7  ;;  %v5213_v17 = vld [vmem:[%s12420_s1 + $0x30] sm:$0xf0] }
 0x229   :  { %v8023_v12 = vld [vmem:[%s12420_s1 + $0x102c] sm:$0xf0]  ;;  %v7571_v22 = vld [vmem:[%s12420_s1 + $0x214] sm:$0xf]  ;;  %v5216_v15 = vor.u32 %v7507_v16, %v5213_v17 }
 0x22a   :  { %4089 = vmatpush.bf16.msrb.mxu0 %v7388_v26  ;;  %4115 = vmatpush.bf16.msrb.mxu2 %v5600_v56  ;;  %v5469_v25 = vld [vmem:[%s12420_s1 + $0x230] sm:$0xf0]  ;;  %v3863_v56 = vpop.f32.mrf.mxu2  ;;  %v7260_v60 = vor.u32 %v8023_v12, %v7259_v11 }
 0x22b   :  { %v7635_v26 = vld [vmem:[%s12420_s1 + $0x414] sm:$0xf] }
 0x22c   :  { %4128 = vmatpush.bf16.msrb.mxu3 %v5856_v32  ;;  %4103 = vmatpush.bf16.msrb.mxu1 %v5312_v36  ;;  %v5725_v28 = vld [vmem:[%s12420_s1 + $0x430] sm:$0xf0]  ;;  %v3876_v32 = vpop.f32.mrf.mxu3 }
 0x22d   :  { %v7755_v53 = vld [vmem:[%s12420_s1 + $0x7d4] sm:$0xf]  ;;  %v5728_v39 = vor.u32 %v7635_v26, %v5725_v28 }
 0x22e   :  { %4090 = vmatpush.bf16.msrb.mxu0 %v7356_v35  ;;  %4116 = vmatpush.bf16.msrb.mxu2 %v5568_v37  ;;  %v6205_v30 = vld [vmem:[%s12420_s1 + $0x7f0] sm:$0xf0]  ;;  %v5472_v35 = vor.u32 %v7571_v22, %v5469_v25 }
 0x22f   :  { %v7819_v31 = vld [vmem:[%s12420_s1 + $0x9d4] sm:$0xf]  ;;  %v6208_v40 = vor.u32 %v7755_v53, %v6205_v30 }
 0x230   :  { %4129 = vmatpush.bf16.msrb.mxu3 %v5824_v45  ;;  %4104 = vmatpush.bf16.msrb.mxu1 %v5280_v61  ;;  %v6461_v33 = vld [vmem:[%s12420_s1 + $0x9f0] sm:$0xf0] }
 0x231   :  { %v7883_v54 = vld [vmem:[%s12420_s1 + $0xbd4] sm:$0xf]  ;;  %v6464_v43 = vor.u32 %v7819_v31, %v6461_v33  ;;  %v10670_v31 = vpop.f32.mrf.mxu0 }
 0x232   :  { %4091 = vmatpush.bf16.msrb.mxu0 %v7324_v58  ;;  %4117 = vmatpush.bf16.msrb.mxu2 %v5536_v62  ;;  %v6717_v34 = vld [vmem:[%s12420_s1 + $0xbf0] sm:$0xf0] }
 0x233   :  { %v7947_v36 = vld [vmem:[%s12420_s1 + $0xdd4] sm:$0xf]  ;;  %v6720_v45 = vor.u32 %v7883_v54, %v6717_v34 }
 0x234   :  { %4130 = vmatpush.bf16.msrb.mxu3 %v5792_v2  ;;  %4105 = vmatpush.bf16.msrb.mxu1 %v5248_v13  ;;  %v6973_v37 = vld [vmem:[%s12420_s1 + $0xdf0] sm:$0xf0] }
 0x235   :  { %v7747_v47 = vld [vmem:[%s12420_s1 + $0x794] sm:$0xf]  ;;  %v6976_v50 = vor.u32 %v7947_v36, %v6973_v37 }
 0x236   :  { %4092 = vmatpush.bf16.msrb.mxu0 %v7292_v10  ;;  %4118 = vmatpush.bf16.msrb.mxu2 %v5504_v14  ;;  %v6173_v48 = vld [vmem:[%s12420_s1 + $0x7b0] sm:$0xf0] }
 0x237   :  { %v7811_v49 = vld [vmem:[%s12420_s1 + $0x994] sm:$0xf]  ;;  %v6176_v62 = vor.u32 %v7747_v47, %v6173_v48 }
 0x238   :  { %4131 = vmatpush.bf16.msrb.mxu3 %v5760_v24  ;;  %v6429_v51 = vld [vmem:[%s12420_s1 + $0x9b0] sm:$0xf0]  ;;  %4106 = vmatpush.bf16.msrb.mxu1 %v5216_v15  ;;  %v10681_v15 = vpop.f32.mrf.mxu1 }
 0x239   :  { %v7875_v55 = vld [vmem:[%s12420_s1 + $0xb94] sm:$0xf]  ;;  %v6432_v63 = vor.u32 %v7811_v49, %v6429_v51 }
 0x23a   :  { %4093 = vmatpush.bf16.msrb.mxu0 %v7260_v60  ;;  %v6685_v58 = vld [vmem:[%s12420_s1 + $0xbb0] sm:$0xf0]  ;;  %4119 = vmatpush.bf16.msrb.mxu2 %v5472_v35 }
 0x23b   :  { %v7939_v59 = vld [vmem:[%s12420_s1 + $0xd94] sm:$0xf]  ;;  %v6688_v0 = vor.u32 %v7875_v55, %v6685_v58  ;;  %4107 = vmatmul.bf16.vlgmr.msrb.gmra.mxu1 %v8459_v20  ;;  %v10707_v55 = vpop.f32.mrf.mxu2 }
 0x23c   :  { %v6941_v61 = vld [vmem:[%s12420_s1 + $0xdb0] sm:$0xf0]  ;;  %4132 = vmatpush.bf16.msrb.mxu3 %v5728_v39  ;;  %4151 = vmatpush.bf16.msra.mxu1 %v6464_v43 }
 0x23d   :  { %v7739_v1 = vld [vmem:[%s12420_s1 + $0x754] sm:$0xf]  ;;  %4094 = vmatmul.bf16.vlgmr.msrb.gmra.mxu0 %v8808_v19  ;;  %v6944_v5 = vor.u32 %v7939_v59, %v6941_v61  ;;  %4120 = vmatmul.bf16.vlgmr.msrb.gmra.mxu2 %v8462_v21 }
 0x23e   :  { %4138 = vmatpush.bf16.msra.mxu0 %v6208_v40  ;;  %4164 = vmatpush.bf16.msra.mxu2 %v6720_v45  ;;  %v6141_v2 = vld [vmem:[%s12420_s1 + $0x770] sm:$0xf0] }
 0x23f   :  { %v7803_v3 = vld [vmem:[%s12420_s1 + $0x954] sm:$0xf]  ;;  %4133 = vmatmul.bf16.vlgmr.msrb.gmra.mxu3 %v8427_v4  ;;  %v6144_v12 = vor.u32 %v7739_v1, %v6141_v2 }
 0x240   :  { %4177 = vmatpush.bf16.msra.mxu3 %v6976_v50  ;;  %v6397_v7 = vld [vmem:[%s12420_s1 + $0x970] sm:$0xf0]  ;;  %4152 = vmatpush.bf16.msra.mxu1 %v6432_v63  ;;  %v10718_v63 = vpop.f32.mrf.mxu3 }
 0x241   :  { %v7867_v8 = vld [vmem:[%s12420_s1 + $0xb54] sm:$0xf]  ;;  %v6400_v13 = vor.u32 %v7803_v3, %v6397_v7  ;;  %v3889_v3 = vpop.f32.mrf.mxu0 }
 0x242   :  { %v6653_v9 = vld [vmem:[%s12420_s1 + $0xb70] sm:$0xf0]  ;;  %4139 = vmatpush.bf16.msra.mxu0 %v6176_v62  ;;  %4165 = vmatpush.bf16.msra.mxu2 %v6688_v0 }
 0x243   :  { %v7931_v10 = vld [vmem:[%s12420_s1 + $0xd54] sm:$0xf]  ;;  %v6656_v14 = vor.u32 %v7867_v8, %v6653_v9 }
 0x244   :  { %v6909_v11 = vld [vmem:[%s12420_s1 + $0xd70] sm:$0xf0]  ;;  %4178 = vmatpush.bf16.msra.mxu3 %v6944_v5  ;;  %4153 = vmatpush.bf16.msra.mxu1 %v6400_v13 }
 0x245   :  { %v7731_v16 = vld [vmem:[%s12420_s1 + $0x714] sm:$0xf]  ;;  %v6912_v24 = vor.u32 %v7931_v10, %v6909_v11  ;;  %v3902_v11 = vpop.f32.mrf.mxu1 }
 0x246   :  { %v6109_v17 = vld [vmem:[%s12420_s1 + $0x730] sm:$0xf0]  ;;  %4140 = vmatpush.bf16.msra.mxu0 %v6144_v12  ;;  %4166 = vmatpush.bf16.msra.mxu2 %v6656_v14 }
 0x247   :  { %v7795_v22 = vld [vmem:[%s12420_s1 + $0x914] sm:$0xf]  ;;  %v6112_v30 = vor.u32 %v7731_v16, %v6109_v17 }
 0x248   :  { %v6365_v25 = vld [vmem:[%s12420_s1 + $0x930] sm:$0xf0]  ;;  %4179 = vmatpush.bf16.msra.mxu3 %v6912_v24 }
 0x249   :  { %v7859_v26 = vld [vmem:[%s12420_s1 + $0xb14] sm:$0xf]  ;;  %v6368_v32 = vor.u32 %v7795_v22, %v6365_v25 }
 0x24a   :  { %v6621_v28 = vld [vmem:[%s12420_s1 + $0xb30] sm:$0xf0]  ;;  %4141 = vmatpush.bf16.msra.mxu0 %v6112_v30 }
 0x24b   :  { %v7923_v56 = vld [vmem:[%s12420_s1 + $0xd14] sm:$0xf]  ;;  %v6624_v60 = vor.u32 %v7859_v26, %v6621_v28  ;;  %4154 = vmatpush.bf16.msra.mxu1 %v6368_v32 }
 0x24c   :  { %v6877_v53 = vld [vmem:[%s12420_s1 + $0xd30] sm:$0xf0] }
 0x24d   :  { %v7723_v33 = vld [vmem:[%s12420_s1 + $0x6d4] sm:$0xf]  ;;  %v6880_v35 = vor.u32 %v7923_v56, %v6877_v53  ;;  %4167 = vmatpush.bf16.msra.mxu2 %v6624_v60  ;;  %v3915_v60 = vpop.f32.mrf.mxu2 }
 0x24e   :  { %v6077_v54 = vld [vmem:[%s12420_s1 + $0x6f0] sm:$0xf0] }
 0x24f   :  { %v7787_v34 = vld [vmem:[%s12420_s1 + $0x8d4] sm:$0xf]  ;;  %v6080_v45 = vor.u32 %v7723_v33, %v6077_v54  ;;  %4180 = vmatpush.bf16.msra.mxu3 %v6880_v35 }
 0x250   :  { %v6333_v36 = vld [vmem:[%s12420_s1 + $0x8f0] sm:$0xf0] }
 0x251   :  { %v7851_v37 = vld [vmem:[%s12420_s1 + $0xad4] sm:$0xf]  ;;  %v6336_v47 = vor.u32 %v7787_v34, %v6333_v36  ;;  %4142 = vmatpush.bf16.msra.mxu0 %v6080_v45  ;;  %v3928_v36 = vpop.f32.mrf.mxu3 }
 0x252   :  { %v6589_v39 = vld [vmem:[%s12420_s1 + $0xaf0] sm:$0xf0] }
 0x253   :  { %v7915_v40 = vld [vmem:[%s12420_s1 + $0xcd4] sm:$0xf]  ;;  %v6592_v48 = vor.u32 %v7851_v37, %v6589_v39  ;;  %4155 = vmatpush.bf16.msra.mxu1 %v6336_v47 }
 0x254   :  { %v6845_v43 = vld [vmem:[%s12420_s1 + $0xcf0] sm:$0xf0] }
 0x255   :  { %v7715_v49 = vld [vmem:[%s12420_s1 + $0x694] sm:$0xf]  ;;  %v6848_v58 = vor.u32 %v7915_v40, %v6845_v43  ;;  %4168 = vmatpush.bf16.msra.mxu2 %v6592_v48  ;;  %v3888_v43 = vadd.f32 %v10670_v31, %v10520_v52  ;;  %v5443_v48 = vld [vmem:[%s12420_s1 + $0x1d8] sm:$0xf] }
 0x256   :  { %v6045_v50 = vld [vmem:[%s12420_s1 + $0x6b0] sm:$0xf0]  ;;  %v5699_v52 = vld [vmem:[%s12420_s1 + $0x3d8] sm:$0xf] }
 0x257   :  { %v7779_v51 = vld [vmem:[%s12420_s1 + $0x894] sm:$0xf]  ;;  %v6048_v2 = vor.u32 %v7715_v49, %v6045_v50  ;;  %4181 = vmatpush.bf16.msra.mxu3 %v6848_v58  ;;  %v7568_v49 = vld [vmem:[%s12420_s1 + $0x1f4] sm:$0xf0]  ;;  %v3901_v3 = vadd.f32 %v10681_v15, %v3888_v43 }
 0x258   :  { %v6301_v59 = vld [vmem:[%s12420_s1 + $0x8b0] sm:$0xf0]  ;;  %v7632_v31 = vld [vmem:[%s12420_s1 + $0x3f4] sm:$0xf0] }
 0x259   :  { %v7843_v61 = vld [vmem:[%s12420_s1 + $0xa94] sm:$0xf]  ;;  %v6304_v5 = vor.u32 %v7779_v51, %v6301_v59  ;;  %4143 = vmatpush.bf16.msra.mxu0 %v6048_v2  ;;  %v5667_v15 = vld [vmem:[%s12420_s1 + $0x398] sm:$0xf] }
 0x25a   :  { %v6557_v62 = vld [vmem:[%s12420_s1 + $0xab0] sm:$0xf0]  ;;  %v5603_v43 = vld [vmem:[%s12420_s1 + $0x318] sm:$0xf] }
 0x25b   :  { %v7907_v0 = vld [vmem:[%s12420_s1 + $0xc94] sm:$0xf]  ;;  %v6560_v7 = vor.u32 %v7843_v61, %v6557_v62  ;;  %4156 = vmatpush.bf16.msra.mxu1 %v6304_v5  ;;  %v5444_v62 = vor.u32 %v7568_v49, %v5443_v48  ;;  %v5700_v5 = vor.u32 %v7632_v31, %v5699_v52  ;;  %v3952_v48 = vpop.f32.mrf.mxu1 }
 0x25c   :  { %v6813_v1 = vld [vmem:[%s12420_s1 + $0xcb0] sm:$0xf0] }
 0x25d   :  { %v7707_v8 = vld [vmem:[%s12420_s1 + $0x654] sm:$0xf]  ;;  %v6816_v12 = vor.u32 %v7907_v0, %v6813_v1  ;;  %4169 = vmatpush.bf16.msra.mxu2 %v6560_v7 }
 0x25e   :  { %v6013_v9 = vld [vmem:[%s12420_s1 + $0x670] sm:$0xf0] }
 0x25f   :  { %v7771_v10 = vld [vmem:[%s12420_s1 + $0x854] sm:$0xf]  ;;  %v6016_v24 = vor.u32 %v7707_v8, %v6013_v9  ;;  %4182 = vmatpush.bf16.msra.mxu3 %v6816_v12  ;;  %v5411_v8 = vld [vmem:[%s12420_s1 + $0x198] sm:$0xf] }
 0x260   :  { %v6269_v13 = vld [vmem:[%s12420_s1 + $0x870] sm:$0xf0]  ;;  %v7560_v9 = vld [vmem:[%s12420_s1 + $0x1b4] sm:$0xf0] }
 0x261   :  { %v7835_v14 = vld [vmem:[%s12420_s1 + $0xa54] sm:$0xf]  ;;  %v6272_v28 = vor.u32 %v7771_v10, %v6269_v13  ;;  %4144 = vmatpush.bf16.msra.mxu0 %v6016_v24  ;;  %v7624_v10 = vld [vmem:[%s12420_s1 + $0x3b4] sm:$0xf0]  ;;  %v5412_v13 = vor.u32 %v7560_v9, %v5411_v8 }
 0x262   :  { %v6525_v16 = vld [vmem:[%s12420_s1 + $0xa70] sm:$0xf0]  ;;  %v5668_v24 = vor.u32 %v7624_v10, %v5667_v15 }
 0x263   :  { %v7899_v17 = vld [vmem:[%s12420_s1 + $0xc54] sm:$0xf]  ;;  %v6528_v56 = vor.u32 %v7835_v14, %v6525_v16  ;;  %4157 = vmatpush.bf16.msra.mxu1 %v6272_v28  ;;  %v7552_v28 = vld [vmem:[%s12420_s1 + $0x174] sm:$0xf0] }
 0x264   :  { %v6781_v22 = vld [vmem:[%s12420_s1 + $0xc70] sm:$0xf0] }
 0x265   :  { %v7699_v25 = vld [vmem:[%s12420_s1 + $0x614] sm:$0xf]  ;;  %v6784_v33 = vor.u32 %v7899_v17, %v6781_v22  ;;  %4170 = vmatpush.bf16.msra.mxu2 %v6528_v56  ;;  %v3914_v22 = vadd.f32 %v10707_v55, %v3901_v3  ;;  %v5635_v55 = vld [vmem:[%s12420_s1 + $0x358] sm:$0xf] }
 0x266   :  { %v5981_v26 = vld [vmem:[%s12420_s1 + $0x630] sm:$0xf0]  ;;  %v7616_v56 = vld [vmem:[%s12420_s1 + $0x374] sm:$0xf0] }
 0x267   :  { %v7763_v53 = vld [vmem:[%s12420_s1 + $0x814] sm:$0xf]  ;;  %v5984_v45 = vor.u32 %v7699_v25, %v5981_v26  ;;  %4183 = vmatpush.bf16.msra.mxu3 %v6784_v33  ;;  %v5379_v26 = vld [vmem:[%s12420_s1 + $0x158] sm:$0xf] }
 0x268   :  { %v6237_v30 = vld [vmem:[%s12420_s1 + $0x830] sm:$0xf0] }
 0x269   :  { %v7827_v32 = vld [vmem:[%s12420_s1 + $0xa14] sm:$0xf]  ;;  %v6240_v50 = vor.u32 %v7763_v53, %v6237_v30  ;;  %4145 = vmatpush.bf16.msra.mxu0 %v5984_v45 }
 0x26a   :  { %v6493_v54 = vld [vmem:[%s12420_s1 + $0xa30] sm:$0xf0] }
 0x26b   :  { %v7891_v34 = vld [vmem:[%s12420_s1 + $0xc14] sm:$0xf]  ;;  %v6496_v51 = vor.u32 %v7827_v32, %v6493_v54  ;;  %4158 = vmatpush.bf16.msra.mxu1 %v6240_v50  ;;  %v5380_v32 = vor.u32 %v7552_v28, %v5379_v26  ;;  %v3954_v28 = vpop.f32.mrf.mxu1 }
 0x26c   :  { %v6749_v35 = vld [vmem:[%s12420_s1 + $0xc30] sm:$0xf0]  ;;  %4146 = vmatmul.bf16.vlgmr.msra.gmra.mxu0 %v8432_v6  ;;  %v6691_v28 = vld [vmem:[%s12420_s1 + $0xb98] sm:$0xf] }
 0x26d   :  { %v8011_v37 = vld [vmem:[%s12420_s1 + $0xfd4] sm:$0xf]  ;;  %v6752_v58 = vor.u32 %v7891_v34, %v6749_v35  ;;  %4171 = vmatpush.bf16.msra.mxu2 %v6496_v51  ;;  %v3927_v34 = vadd.f32 %v10718_v63, %v3914_v22  ;;  %v5636_v35 = vor.u32 %v7616_v56, %v5635_v55  ;;  %v7608_v63 = vld [vmem:[%s12420_s1 + $0x334] sm:$0xf0] }
 0x26e   :  { %v7229_v39 = vld [vmem:[%s12420_s1 + $0xff0] sm:$0xf0]  ;;  %4159 = vmatmul.bf16.vlgmr.msra.gmra.mxu1 %v8618_v41  ;;  %v5539_v22 = vld [vmem:[%s12420_s1 + $0x298] sm:$0xf] }
 0x26f   :  { %v8075_v40 = vld [vmem:[%s12420_s1 + $0x11d4] sm:$0xf]  ;;  %v7232_v59 = vor.u32 %v8011_v37, %v7229_v39  ;;  %4184 = vmatpush.bf16.msra.mxu3 %v6752_v58  ;;  %v5347_v37 = vld [vmem:[%s12420_s1 + $0x118] sm:$0xf]  ;;  %v5604_v58 = vor.u32 %v7608_v63, %v5603_v43 }
 0x270   :  { %v7485_v47 = vld [vmem:[%s12420_s1 + $0x11f0] sm:$0xf0]  ;;  %4172 = vmatmul.bf16.vlgmr.msra.gmra.mxu2 %v8622_v44  ;;  %v7544_v39 = vld [vmem:[%s12420_s1 + $0x134] sm:$0xf0] }
 0x271   :  { %v7488_v61 = vor.u32 %v8075_v40, %v7485_v47  ;;  %v8003_v0 = vld [vmem:[%s12420_s1 + $0xf94] sm:$0xf]  ;;  %4190 = vmatpush.bf16.msrb.mxu0 %v7232_v59  ;;  %4216 = vmatpush.bf16.msrb.mxu2 %v5444_v62  ;;  %v3939_v40 = vpop.f32.mrf.mxu0  ;;  %v5348_v50 = vor.u32 %v7544_v39, %v5347_v37  ;;  %v5315_v62 = vld [vmem:[%s12420_s1 + $0xd8] sm:$0xf] }
 0x272   :  { %v7197_v1 = vld [vmem:[%s12420_s1 + $0xfb0] sm:$0xf0]  ;;  %4185 = vmatmul.bf16.vlgmr.msra.gmra.mxu3 %v8610_v38  ;;  %v3940_v45 = vadd.f32 %v3939_v40, %v3927_v34  ;;  %v5251_v34 = vld [vmem:[%s12420_s1 + $0x58] sm:$0xf] }
 0x273   :  { %v8067_v2 = vld [vmem:[%s12420_s1 + $0x1194] sm:$0xf]  ;;  %v7200_v11 = vor.u32 %v8003_v0, %v7197_v1  ;;  %4203 = vmatpush.bf16.msrb.mxu1 %v7488_v61  ;;  %4229 = vmatpush.bf16.msrb.mxu3 %v5700_v5  ;;  %v7536_v0 = vld [vmem:[%s12420_s1 + $0xf4] sm:$0xf0] }
 0x274   :  { %v7453_v7 = vld [vmem:[%s12420_s1 + $0x11b0] sm:$0xf0]  ;;  %v3953_v59 = vadd.f32 %v3952_v48, %v3940_v45  ;;  %v5571_v1 = vld [vmem:[%s12420_s1 + $0x2d8] sm:$0xf] }
 0x275   :  { %v7456_v12 = vor.u32 %v8067_v2, %v7453_v7  ;;  %v7995_v14 = vld [vmem:[%s12420_s1 + $0xf54] sm:$0xf]  ;;  %4191 = vmatpush.bf16.msrb.mxu0 %v7200_v11  ;;  %4217 = vmatpush.bf16.msrb.mxu2 %v5412_v13  ;;  %v7600_v2 = vld [vmem:[%s12420_s1 + $0x2f4] sm:$0xf0]  ;;  %v5316_v7 = vor.u32 %v7536_v0, %v5315_v62  ;;  %v3965_v11 = vpop.f32.mrf.mxu2 }
 0x276   :  { %v7165_v16 = vld [vmem:[%s12420_s1 + $0xf70] sm:$0xf0]  ;;  %v5572_v10 = vor.u32 %v7600_v2, %v5571_v1  ;;  %v5283_v13 = vld [vmem:[%s12420_s1 + $0x98] sm:$0xf] }
 0x277   :  { %v8059_v17 = vld [vmem:[%s12420_s1 + $0x1154] sm:$0xf]  ;;  %v7168_v53 = vor.u32 %v7995_v14, %v7165_v16  ;;  %4204 = vmatpush.bf16.msrb.mxu1 %v7456_v12  ;;  %4230 = vmatpush.bf16.msrb.mxu3 %v5668_v24  ;;  %v7528_v14 = vld [vmem:[%s12420_s1 + $0xb4] sm:$0xf0]  ;;  %v3966_v16 = vadd.f32 %v3965_v11, %v3953_v59 }
 0x278   :  { %v7421_v25 = vld [vmem:[%s12420_s1 + $0x1170] sm:$0xf0]  ;;  %v7592_v24 = vld [vmem:[%s12420_s1 + $0x2b4] sm:$0xf0] }
 0x279   :  { %v7424_v30 = vor.u32 %v8059_v17, %v7421_v25  ;;  %v7987_v60 = vld [vmem:[%s12420_s1 + $0xf14] sm:$0xf]  ;;  %4192 = vmatpush.bf16.msrb.mxu0 %v7168_v53  ;;  %4218 = vmatpush.bf16.msrb.mxu2 %v5380_v32  ;;  %v3978_v17 = vpop.f32.mrf.mxu3  ;;  %v3941_v25 = vpop.f32.mrf.mxu0  ;;  %v5284_v53 = vor.u32 %v7528_v14, %v5283_v13  ;;  %v7584_v37 = vld [vmem:[%s12420_s1 + $0x274] sm:$0xf0] }
 0x27a   :  { %v7133_v33 = vld [vmem:[%s12420_s1 + $0xf30] sm:$0xf0]  ;;  %v10927_v55 = vadd.f32 %v3978_v17, %v3966_v16  ;;  %v5955_v59 = vld [vmem:[%s12420_s1 + $0x5d8] sm:$0xf] }
 0x27b   :  { %v8051_v54 = vld [vmem:[%s12420_s1 + $0x1114] sm:$0xf]  ;;  %v7136_v47 = vor.u32 %v7987_v60, %v7133_v33  ;;  %4205 = vmatpush.bf16.msrb.mxu1 %v7424_v30  ;;  %4231 = vmatpush.bf16.msrb.mxu3 %v5636_v35  ;;  %v5540_v33 = vor.u32 %v7592_v24, %v5539_v22  ;;  %v7520_v35 = vld [vmem:[%s12420_s1 + $0x74] sm:$0xf0] }
 0x27c   :  { %v7389_v36 = vld [vmem:[%s12420_s1 + $0x1130] sm:$0xf0]  ;;  %v5252_v45 = vor.u32 %v7520_v35, %v5251_v34  ;;  %v6211_v62 = vld [vmem:[%s12420_s1 + $0x7d8] sm:$0xf] }
 0x27d   :  { %v7392_v49 = vor.u32 %v8051_v54, %v7389_v36  ;;  %v7979_v51 = vld [vmem:[%s12420_s1 + $0xed4] sm:$0xf]  ;;  %4193 = vmatpush.bf16.msrb.mxu0 %v7136_v47  ;;  %4219 = vmatpush.bf16.msrb.mxu2 %v5348_v50  ;;  %v5507_v36 = vld [vmem:[%s12420_s1 + $0x258] sm:$0xf] }
 0x27e   :  { %v7101_v52 = vld [vmem:[%s12420_s1 + $0xef0] sm:$0xf0]  ;;  %v5508_v50 = vor.u32 %v7584_v37, %v5507_v36  ;;  %v7760_v2 = vld [vmem:[%s12420_s1 + $0x7f4] sm:$0xf0] }
 0x27f   :  { %v8043_v31 = vld [vmem:[%s12420_s1 + $0x10d4] sm:$0xf]  ;;  %v7104_v3 = vor.u32 %v7979_v51, %v7101_v52  ;;  %4206 = vmatpush.bf16.msrb.mxu1 %v7392_v49  ;;  %4232 = vmatpush.bf16.msrb.mxu3 %v5604_v58  ;;  %v5219_v49 = vld [vmem:[%s12420_s1 + $0x18] sm:$0xf]  ;;  %v3967_v58 = vpop.f32.mrf.mxu2 }
 0x280   :  { %v7357_v61 = vld [vmem:[%s12420_s1 + $0x10f0] sm:$0xf0]  ;;  %v7512_v51 = vld [vmem:[%s12420_s1 + $0x34] sm:$0xf0] }
 0x281   :  { %v7360_v5 = vor.u32 %v8043_v31, %v7357_v61  ;;  %v7971_v8 = vld [vmem:[%s12420_s1 + $0xe94] sm:$0xf]  ;;  %4194 = vmatpush.bf16.msrb.mxu0 %v7104_v3  ;;  %4220 = vmatpush.bf16.msrb.mxu2 %v5316_v7  ;;  %v5475_v52 = vld [vmem:[%s12420_s1 + $0x218] sm:$0xf]  ;;  %v3980_v0 = vpop.f32.mrf.mxu3 }
 0x282   :  { %v7069_v9 = vld [vmem:[%s12420_s1 + $0xeb0] sm:$0xf0]  ;;  %v7576_v31 = vld [vmem:[%s12420_s1 + $0x234] sm:$0xf0] }
 0x283   :  { %v8035_v15 = vld [vmem:[%s12420_s1 + $0x1094] sm:$0xf]  ;;  %v7072_v26 = vor.u32 %v7971_v8, %v7069_v9  ;;  %4207 = vmatpush.bf16.msrb.mxu1 %v7360_v5  ;;  %4233 = vmatpush.bf16.msrb.mxu3 %v5572_v10  ;;  %v7696_v61 = vld [vmem:[%s12420_s1 + $0x5f4] sm:$0xf0]  ;;  %v5220_v8 = vor.u32 %v7512_v51, %v5219_v49  ;;  %v5476_v10 = vor.u32 %v7576_v31, %v5475_v52 }
 0x284   :  { %v7325_v12 = vld [vmem:[%s12420_s1 + $0x10b0] sm:$0xf0]  ;;  %v6467_v3 = vld [vmem:[%s12420_s1 + $0x9d8] sm:$0xf]  ;;  %v5956_v11 = vor.u32 %v7696_v61, %v5955_v59  ;;  %v4506_v59 = vmul.f32 %v9667_v18, %v9667_v18 }
 0x285   :  { %v7328_v56 = vor.u32 %v8035_v15, %v7325_v12  ;;  %v7963_v30 = vld [vmem:[%s12420_s1 + $0xe54] sm:$0xf]  ;;  %4195 = vmatpush.bf16.msrb.mxu0 %v7072_v26  ;;  %4221 = vmatpush.bf16.msrb.mxu2 %v5284_v53  ;;  %v7824_v5 = vld [vmem:[%s12420_s1 + $0x9f4] sm:$0xf0]  ;;  %v6212_v12 = vor.u32 %v7760_v2, %v6211_v62  ;;  %v11081_v2 = vpop.f32.mrf.mxu0 }
 0x286   :  { %v7037_v32 = vld [vmem:[%s12420_s1 + $0xe70] sm:$0xf0]  ;;  %v6723_v9 = vld [vmem:[%s12420_s1 + $0xbd8] sm:$0xf]  ;;  %v6468_v13 = vor.u32 %v7824_v5, %v6467_v3 }
 0x287   :  { %v8027_v60 = vld [vmem:[%s12420_s1 + $0x1054] sm:$0xf]  ;;  %v7040_v39 = vor.u32 %v7963_v30, %v7037_v32  ;;  %4208 = vmatpush.bf16.msrb.mxu1 %v7328_v56  ;;  %4234 = vmatpush.bf16.msrb.mxu3 %v5540_v33  ;;  %v7888_v15 = vld [vmem:[%s12420_s1 + $0xbf4] sm:$0xf0] }
 0x288   :  { %v7293_v54 = vld [vmem:[%s12420_s1 + $0x1070] sm:$0xf0]  ;;  %v5923_v14 = vld [vmem:[%s12420_s1 + $0x598] sm:$0xf]  ;;  %v6724_v22 = vor.u32 %v7888_v15, %v6723_v9  ;;  %v11092_v15 = vpop.f32.mrf.mxu1 }
 0x289   :  { %v7955_v40 = vld [vmem:[%s12420_s1 + $0xe14] sm:$0xf]  ;;  %v7296_v63 = vor.u32 %v8027_v60, %v7293_v54  ;;  %4196 = vmatpush.bf16.msrb.mxu0 %v7040_v39  ;;  %4222 = vmatpush.bf16.msrb.mxu2 %v5252_v45  ;;  %v7688_v16 = vld [vmem:[%s12420_s1 + $0x5b4] sm:$0xf0] }
 0x28a   :  { %v7005_v43 = vld [vmem:[%s12420_s1 + $0xe30] sm:$0xf0]  ;;  %v6179_v17 = vld [vmem:[%s12420_s1 + $0x798] sm:$0xf]  ;;  %v5924_v53 = vor.u32 %v7688_v16, %v5923_v14  ;;  %v4514_v14 = vrot.slane %v4506_v59, 4 }
 0x28b   :  { %v8019_v47 = vld [vmem:[%s12420_s1 + $0x1014] sm:$0xf]  ;;  %v7008_v1 = vor.u32 %v7955_v40, %v7005_v43  ;;  %4209 = vmatpush.bf16.msrb.mxu1 %v7296_v63  ;;  %4235 = vmatpush.bf16.msrb.mxu3 %v5508_v50  ;;  %v7752_v24 = vld [vmem:[%s12420_s1 + $0x7b4] sm:$0xf0]  ;;  %v4450_v43 = vrot.slane %v9667_v18, 4 }
 0x28c   :  { %v7261_v48 = vld [vmem:[%s12420_s1 + $0x1030] sm:$0xf0]  ;;  %v6435_v25 = vld [vmem:[%s12420_s1 + $0x998] sm:$0xf]  ;;  %v6180_v30 = vor.u32 %v7752_v24, %v6179_v17 }
 0x28d   :  { %v7264_v7 = vor.u32 %v8019_v47, %v7261_v48  ;;  %4197 = vmatpush.bf16.msrb.mxu0 %v7008_v1  ;;  %v7816_v26 = vld [vmem:[%s12420_s1 + $0x9b4] sm:$0xf0]  ;;  %4223 = vmatpush.bf16.msrb.mxu2 %v5220_v8  ;;  %v4451_v0 = vadd.f32 %v4450_v43, %v9667_v18  ;;  %v3993_v43 = vpop.f32.mrf.mxu0 }
 0x28e   :  { %v7880_v56 = vld [vmem:[%s12420_s1 + $0xbb4] sm:$0xf0]  ;;  %v6436_v32 = vor.u32 %v7816_v26, %v6435_v25  ;;  %v5445_v43 = vld [vmem:[%s12420_s1 + $0x1f8] sm:$0xf0] }
 0x28f   :  { %4210 = vmatpush.bf16.msrb.mxu1 %v7264_v7  ;;  %4236 = vmatpush.bf16.msrb.mxu3 %v5476_v10  ;;  %v5891_v60 = vld [vmem:[%s12420_s1 + $0x558] sm:$0xf]  ;;  %v6692_v34 = vor.u32 %v7880_v56, %v6691_v28 }
 0x290   :  { %v7680_v33 = vld [vmem:[%s12420_s1 + $0x574] sm:$0xf0]  ;;  %4198 = vmatmul.bf16.vlgmr.msrb.gmra.mxu0 %v8620_v42  ;;  %4224 = vmatmul.bf16.vlgmr.msrb.gmra.mxu2 %v8459_v20 }
 0x291   :  { %4242 = vmatpush.bf16.msra.mxu0 %v5956_v11  ;;  %4268 = vmatpush.bf16.msra.mxu2 %v6468_v13  ;;  %v6147_v54 = vld [vmem:[%s12420_s1 + $0x758] sm:$0xf]  ;;  %v5892_v63 = vor.u32 %v7680_v33, %v5891_v60 }
 0x292   :  { %v7744_v35 = vld [vmem:[%s12420_s1 + $0x774] sm:$0xf0]  ;;  %4211 = vmatmul.bf16.vlgmr.msrb.gmra.mxu1 %v8808_v19  ;;  %4237 = vmatmul.bf16.vlgmr.msrb.gmra.mxu3 %v8462_v21 }
 0x293   :  { %4255 = vmatpush.bf16.msra.mxu1 %v6212_v12  ;;  %4281 = vmatpush.bf16.msra.mxu3 %v6724_v22  ;;  %v6403_v36 = vld [vmem:[%s12420_s1 + $0x958] sm:$0xf]  ;;  %v6148_v45 = vor.u32 %v7744_v35, %v6147_v54  ;;  %v4452_v22 = vrot.slane %v4451_v0, 2  ;;  %v4515_v35 = vadd.f32 %v4514_v14, %v4506_v59 }
 0x294   :  { %v7808_v37 = vld [vmem:[%s12420_s1 + $0x974] sm:$0xf0] }
 0x295   :  { %v6659_v39 = vld [vmem:[%s12420_s1 + $0xb58] sm:$0xf]  ;;  %4243 = vmatpush.bf16.msra.mxu0 %v5924_v53  ;;  %4269 = vmatpush.bf16.msra.mxu2 %v6436_v32  ;;  %v6404_v47 = vor.u32 %v7808_v37, %v6403_v36  ;;  %v4516_v59 = vrot.slane %v4515_v35, 2 }
 0x296   :  { %v7872_v40 = vld [vmem:[%s12420_s1 + $0xb74] sm:$0xf0] }
 0x297   :  { %4256 = vmatpush.bf16.msra.mxu1 %v6180_v30  ;;  %v5859_v48 = vld [vmem:[%s12420_s1 + $0x518] sm:$0xf]  ;;  %4282 = vmatpush.bf16.msra.mxu3 %v6692_v34  ;;  %v6660_v51 = vor.u32 %v7872_v40, %v6659_v39  ;;  %v11118_v30 = vpop.f32.mrf.mxu2  ;;  %v11129_v34 = vpop.f32.mrf.mxu3  ;;  %v4453_v39 = vadd.f32 %v4452_v22, %v4451_v0 }
 0x298   :  { %v7672_v49 = vld [vmem:[%s12420_s1 + $0x534] sm:$0xf0] }
 0x299   :  { %v6115_v50 = vld [vmem:[%s12420_s1 + $0x718] sm:$0xf]  ;;  %4244 = vmatpush.bf16.msra.mxu0 %v5892_v63  ;;  %v5860_v1 = vor.u32 %v7672_v49, %v5859_v48  ;;  %4270 = vmatpush.bf16.msra.mxu2 %v6404_v47 }
 0x29a   :  { %v7736_v52 = vld [vmem:[%s12420_s1 + $0x734] sm:$0xf0] }
 0x29b   :  { %v6371_v31 = vld [vmem:[%s12420_s1 + $0x918] sm:$0xf]  ;;  %4257 = vmatpush.bf16.msra.mxu1 %v6148_v45  ;;  %v6116_v3 = vor.u32 %v7736_v52, %v6115_v50  ;;  %4283 = vmatpush.bf16.msra.mxu3 %v6660_v51  ;;  %v4006_v50 = vpop.f32.mrf.mxu1 }
 0x29c   :  { %v7800_v58 = vld [vmem:[%s12420_s1 + $0x934] sm:$0xf0] }
 0x29d   :  { %v6627_v61 = vld [vmem:[%s12420_s1 + $0xb18] sm:$0xf]  ;;  %v6372_v5 = vor.u32 %v7800_v58, %v6371_v31  ;;  %4245 = vmatpush.bf16.msra.mxu0 %v5860_v1  ;;  %v4454_v1 = vrot.slane %v4453_v39, 1 }
 0x29e   :  { %v7864_v62 = vld [vmem:[%s12420_s1 + $0xb34] sm:$0xf0] }
 0x29f   :  { %v5827_v7 = vld [vmem:[%s12420_s1 + $0x4d8] sm:$0xf]  ;;  %v6628_v10 = vor.u32 %v7864_v62, %v6627_v61  ;;  %4258 = vmatpush.bf16.msra.mxu1 %v6116_v3  ;;  %4271 = vmatpush.bf16.msra.mxu2 %v6372_v5  ;;  %v3836_v61 = vadd.f32 %v10460_v23, %v10316_v57  ;;  %v4456_v3 = vrot.slane %v10076_v29, 4  ;;  %v4507_v23 = vmul.f32 %v10076_v29, %v10076_v29 }
 0x2a0   :  { %v7664_v8 = vld [vmem:[%s12420_s1 + $0x4f4] sm:$0xf0] }
 0x2a1   :  { %v6083_v9 = vld [vmem:[%s12420_s1 + $0x6d8] sm:$0xf]  ;;  %v5828_v24 = vor.u32 %v7664_v8, %v5827_v7  ;;  %4284 = vmatpush.bf16.msra.mxu3 %v6628_v10 }
 0x2a2   :  { %v7728_v11 = vld [vmem:[%s12420_s1 + $0x6f4] sm:$0xf0] }
 0x2a3   :  { %v6339_v12 = vld [vmem:[%s12420_s1 + $0x8d8] sm:$0xf]  ;;  %v6084_v25 = vor.u32 %v7728_v11, %v6083_v9  ;;  %4246 = vmatpush.bf16.msra.mxu0 %v5828_v24  ;;  %v4032_v24 = vpop.f32.mrf.mxu3 }
 0x2a4   :  { %v7792_v13 = vld [vmem:[%s12420_s1 + $0x8f4] sm:$0xf0] }
 0x2a5   :  { %v6595_v16 = vld [vmem:[%s12420_s1 + $0xad8] sm:$0xf]  ;;  %v6340_v26 = vor.u32 %v7792_v13, %v6339_v12  ;;  %4259 = vmatpush.bf16.msra.mxu1 %v6084_v25  ;;  %v4019_v13 = vpop.f32.mrf.mxu2  ;;  %v3849_v25 = vadd.f32 %v10468_v27, %v3836_v61 }
 0x2a6   :  { %v7856_v17 = vld [vmem:[%s12420_s1 + $0xaf4] sm:$0xf0] }
 0x2a7   :  { %v5795_v28 = vld [vmem:[%s12420_s1 + $0x498] sm:$0xf]  ;;  %v6596_v32 = vor.u32 %v7856_v17, %v6595_v16  ;;  %4272 = vmatpush.bf16.msra.mxu2 %v6340_v26 }
 0x2a8   :  { %v7656_v56 = vld [vmem:[%s12420_s1 + $0x4b4] sm:$0xf0] }
 0x2a9   :  { %v6051_v53 = vld [vmem:[%s12420_s1 + $0x698] sm:$0xf]  ;;  %v5796_v40 = vor.u32 %v7656_v56, %v5795_v28  ;;  %4285 = vmatpush.bf16.msra.mxu3 %v6596_v32 }
 0x2aa   :  { %v7720_v60 = vld [vmem:[%s12420_s1 + $0x6b4] sm:$0xf0] }
 0x2ab   :  { %v6307_v33 = vld [vmem:[%s12420_s1 + $0x898] sm:$0xf]  ;;  %v6052_v63 = vor.u32 %v7720_v60, %v6051_v53  ;;  %4247 = vmatpush.bf16.msra.mxu0 %v5796_v40  ;;  %v4517_v53 = vadd.f32 %v4516_v59, %v4515_v35  ;;  %v7564_v40 = vld [vmem:[%s12420_s1 + $0x1dc] sm:$0xf] }
 0x2ac   :  { %v7784_v54 = vld [vmem:[%s12420_s1 + $0x8b4] sm:$0xf0] }
 0x2ad   :  { %v6563_v36 = vld [vmem:[%s12420_s1 + $0xa98] sm:$0xf]  ;;  %v6308_v45 = vor.u32 %v7784_v54, %v6307_v33  ;;  %4260 = vmatpush.bf16.msra.mxu1 %v6052_v63  ;;  %v4520_v54 = vrot.slane %v4507_v23, 4  ;;  %v4455_v63 = vadd.f32 %v4454_v1, %v4453_v39  ;;  %v5448_v39 = vor.u32 %v7564_v40, %v5445_v43 }
 0x2ae   :  { %v7848_v37 = vld [vmem:[%s12420_s1 + $0xab4] sm:$0xf0]  ;;  %v4518_v61 = vrot.slane %v4517_v53, 1 }
 0x2af   :  { %v5763_v47 = vld [vmem:[%s12420_s1 + $0x458] sm:$0xf]  ;;  %v6564_v51 = vor.u32 %v7848_v37, %v6563_v36  ;;  %4273 = vmatpush.bf16.msra.mxu2 %v6308_v45  ;;  %v11210_v36 = vadd.f32 %v10503_v46, %v3849_v25  ;;  %v4457_v45 = vadd.f32 %v4456_v3, %v10076_v29  ;;  %v7556_v3 = vld [vmem:[%s12420_s1 + $0x19c] sm:$0xf] }
 0x2b0   :  { %v7648_v48 = vld [vmem:[%s12420_s1 + $0x474] sm:$0xf0] }
 0x2b1   :  { %v6019_v49 = vld [vmem:[%s12420_s1 + $0x658] sm:$0xf]  ;;  %v5764_v5 = vor.u32 %v7648_v48, %v5763_v47  ;;  %4286 = vmatpush.bf16.msra.mxu3 %v6564_v51  ;;  %v4508_v1 = vmul.f32 %v11210_v36, %v11210_v36 }
 0x2b2   :  { %v7712_v52 = vld [vmem:[%s12420_s1 + $0x674] sm:$0xf0] }
 0x2b3   :  { %v6275_v31 = vld [vmem:[%s12420_s1 + $0x858] sm:$0xf]  ;;  %v6020_v8 = vor.u32 %v7712_v52, %v6019_v49  ;;  %4248 = vmatpush.bf16.msra.mxu0 %v5764_v5  ;;  %v5413_v5 = vld [vmem:[%s12420_s1 + $0x1b8] sm:$0xf0] }
 0x2b4   :  { %v7776_v58 = vld [vmem:[%s12420_s1 + $0x874] sm:$0xf0]  ;;  %v5416_v13 = vor.u32 %v7556_v3, %v5413_v5 }
 0x2b5   :  { %v6531_v62 = vld [vmem:[%s12420_s1 + $0xa58] sm:$0xf]  ;;  %v6276_v9 = vor.u32 %v7776_v58, %v6275_v31  ;;  %4261 = vmatpush.bf16.msra.mxu1 %v6020_v8 }
 0x2b6   :  { %v7840_v0 = vld [vmem:[%s12420_s1 + $0xa74] sm:$0xf0] }
 0x2b7   :  { %v5731_v7 = vld [vmem:[%s12420_s1 + $0x418] sm:$0xf]  ;;  %v6532_v14 = vor.u32 %v7840_v0, %v6531_v62  ;;  %4274 = vmatpush.bf16.msra.mxu2 %v6276_v9  ;;  %v4521_v62 = vadd.f32 %v4520_v54, %v4507_v23  ;;  %v4462_v0 = vrot.slane %v11210_v36, 4 }
 0x2b8   :  { %v7640_v57 = vld [vmem:[%s12420_s1 + $0x434] sm:$0xf0] }
 0x2b9   :  { %v5987_v10 = vld [vmem:[%s12420_s1 + $0x618] sm:$0xf]  ;;  %v5732_v32 = vor.u32 %v7640_v57, %v5731_v7  ;;  %4287 = vmatpush.bf16.msra.mxu3 %v6532_v14  ;;  %v11246_v7 = vmul.f32 0.125, %v4455_v63  ;;  %v4458_v57 = vrot.slane %v4457_v45, 2  ;;  %v4522_v24 = vrot.slane %v4521_v62, 2 }
 0x2ba   :  { %v7704_v11 = vld [vmem:[%s12420_s1 + $0x634] sm:$0xf0]  ;;  %v4463_v25 = vadd.f32 %v4462_v0, %v11210_v36 }
 0x2bb   :  { %v6243_v12 = vld [vmem:[%s12420_s1 + $0x818] sm:$0xf]  ;;  %v5988_v35 = vor.u32 %v7704_v11, %v5987_v10  ;;  %4249 = vmatpush.bf16.msra.mxu0 %v5732_v32  ;;  %v11276_v32 = vadd.f32 %v4458_v57, %v4457_v45  ;;  %v11321_v57 = vpop.f32.mrf.mxu1 }
 0x2bc   :  { %v7768_v16 = vld [vmem:[%s12420_s1 + $0x834] sm:$0xf0] }
 0x2bd   :  { %v6499_v17 = vld [vmem:[%s12420_s1 + $0xa18] sm:$0xf]  ;;  %v6244_v37 = vor.u32 %v7768_v16, %v6243_v12  ;;  %4262 = vmatpush.bf16.msra.mxu1 %v5988_v35 }
 0x2be   :  { %v7832_v22 = vld [vmem:[%s12420_s1 + $0xa34] sm:$0xf0]  ;;  %4250 = vmatmul.bf16.vlgmr.msra.gmra.mxu0 %v8427_v4 }
 0x2bf   :  { %v6979_v26 = vld [vmem:[%s12420_s1 + $0xdd8] sm:$0xf]  ;;  %v6500_v47 = vor.u32 %v7832_v22, %v6499_v17  ;;  %4275 = vmatpush.bf16.msra.mxu2 %v6244_v37  ;;  %v4519_v22 = vadd.f32 %v4518_v61, %v4517_v53  ;;  %v4468_v53 = vrot.slane %v10927_v55, 4  ;;  %v11310_v61 = vpop.f32.mrf.mxu0 }
 0x2c0   :  { %v7952_v28 = vld [vmem:[%s12420_s1 + $0xdf4] sm:$0xf0]  ;;  %4263 = vmatmul.bf16.vlgmr.msra.gmra.mxu1 %v8432_v6 }
 0x2c1   :  { %v7235_v56 = vld [vmem:[%s12420_s1 + $0xfd8] sm:$0xf]  ;;  %v6980_v48 = vor.u32 %v7952_v28, %v6979_v26  ;;  %4288 = vmatpush.bf16.msra.mxu3 %v6500_v47  ;;  %v4526_v26 = vrot.slane %v4508_v1, 4  ;;  %v7548_v28 = vld [vmem:[%s12420_s1 + $0x15c] sm:$0xf] }
 0x2c2   :  { %v8016_v60 = vld [vmem:[%s12420_s1 + $0xff4] sm:$0xf0]  ;;  %4276 = vmatmul.bf16.vlgmr.msra.gmra.mxu2 %v8618_v41 }
 0x2c3   :  { %v7491_v27 = vld [vmem:[%s12420_s1 + $0x11d8] sm:$0xf]  ;;  %v7236_v46 = vor.u32 %v8016_v60, %v7235_v56  ;;  %4294 = vmatpush.bf16.msrb.mxu0 %v6980_v48  ;;  %v5381_v56 = vld [vmem:[%s12420_s1 + $0x178] sm:$0xf0]  ;;  %v4509_v60 = vmul.f32 %v10927_v55, %v10927_v55  ;;  %v11300_v48 = vmul.f32 0.125, %v4519_v22 }
 0x2c4   :  { %v8080_v33 = vld [vmem:[%s12420_s1 + $0x11f4] sm:$0xf0]  ;;  %4289 = vmatmul.bf16.vlgmr.msra.gmra.mxu3 %v8622_v44  ;;  %v5384_v43 = vor.u32 %v7548_v28, %v5381_v56 }
 0x2c5   :  { %v7492_v49 = vor.u32 %v8080_v33, %v7491_v27  ;;  %v6947_v50 = vld [vmem:[%s12420_s1 + $0xd98] sm:$0xf]  ;;  %4307 = vmatpush.bf16.msrb.mxu1 %v7236_v46  ;;  %4333 = vmatpush.bf16.msrb.mxu3 %v5448_v39  ;;  %v4523_v46 = vadd.f32 %v4522_v24, %v4521_v62  ;;  %v4460_v39 = vrot.slane %v11276_v32, 1  ;;  %v4005_v24 = vadd.f32 %v11092_v15, %v11081_v2 }
 0x2c6   :  { %v7944_v51 = vld [vmem:[%s12420_s1 + $0xdb4] sm:$0xf0] }
 0x2c7   :  { %v7203_v52 = vld [vmem:[%s12420_s1 + $0xf98] sm:$0xf]  ;;  %v6948_v23 = vor.u32 %v7944_v51, %v6947_v50  ;;  %4320 = vmatpush.bf16.msrb.mxu2 %v7492_v49  ;;  %v4464_v49 = vrot.slane %v4463_v25, 2  ;;  %v4527_v50 = vadd.f32 %v4526_v26, %v4508_v1  ;;  %v7540_v51 = vld [vmem:[%s12420_s1 + $0x11c] sm:$0xf] }
 0x2c8   :  { %v8008_v31 = vld [vmem:[%s12420_s1 + $0xfb4] sm:$0xf0] }
 0x2c9   :  { %v7459_v58 = vld [vmem:[%s12420_s1 + $0x1198] sm:$0xf]  ;;  %v7204_v8 = vor.u32 %v8008_v31, %v7203_v52  ;;  %4295 = vmatpush.bf16.msrb.mxu0 %v6948_v23  ;;  %4334 = vmatpush.bf16.msrb.mxu3 %v5416_v13  ;;  %v5349_v52 = vld [vmem:[%s12420_s1 + $0x138] sm:$0xf0]  ;;  %v4469_v31 = vadd.f32 %v4468_v53, %v10927_v55  ;;  %v4528_v13 = vrot.slane %v4527_v50, 2 }
 0x2ca   :  { %v8072_v59 = vld [vmem:[%s12420_s1 + $0x11b4] sm:$0xf0]  ;;  %v5352_v23 = vor.u32 %v7540_v51, %v5349_v52  ;;  %v4018_v52 = vadd.f32 %v11118_v30, %v4005_v24  ;;  %v4058_v30 = vpop.f32.mrf.mxu1 }
 0x2cb   :  { %v7460_v9 = vor.u32 %v8072_v59, %v7459_v58  ;;  %v6915_v10 = vld [vmem:[%s12420_s1 + $0xd58] sm:$0xf]  ;;  %4308 = vmatpush.bf16.msrb.mxu1 %v7204_v8  ;;  %v4532_v58 = vrot.slane %v4509_v60, 4 }
 0x2cc   :  { %v7936_v11 = vld [vmem:[%s12420_s1 + $0xd74] sm:$0xf0] }
 0x2cd   :  { %v7171_v12 = vld [vmem:[%s12420_s1 + $0xf58] sm:$0xf]  ;;  %v6916_v27 = vor.u32 %v7936_v11, %v6915_v10  ;;  %4321 = vmatpush.bf16.msrb.mxu2 %v7460_v9  ;;  %4335 = vmatpush.bf16.msrb.mxu3 %v5384_v43  ;;  %v4524_v11 = vrot.slane %v4523_v46, 1  ;;  %v4533_v22 = vadd.f32 %v4532_v58, %v4509_v60 }
 0x2ce   :  { %v8000_v14 = vld [vmem:[%s12420_s1 + $0xf74] sm:$0xf0] }
 0x2cf   :  { %v7427_v16 = vld [vmem:[%s12420_s1 + $0x1158] sm:$0xf]  ;;  %v7172_v33 = vor.u32 %v8000_v14, %v7171_v12  ;;  %4296 = vmatpush.bf16.msrb.mxu0 %v6916_v27  ;;  %v11332_v12 = vadd.f32 %v4464_v49, %v4463_v25  ;;  %v7532_v14 = vld [vmem:[%s12420_s1 + $0xdc] sm:$0xf]  ;;  %v11351_v27 = vpop.f32.mrf.mxu2  ;;  %v4534_v51 = vrot.slane %v4533_v22, 2 }
 0x2d0   :  { %v8064_v17 = vld [vmem:[%s12420_s1 + $0x1174] sm:$0xf0] }
 0x2d1   :  { %v7428_v54 = vor.u32 %v8064_v17, %v7427_v16  ;;  %v6883_v35 = vld [vmem:[%s12420_s1 + $0xd18] sm:$0xf]  ;;  %4309 = vmatpush.bf16.msrb.mxu1 %v7172_v33  ;;  %v5317_v16 = vld [vmem:[%s12420_s1 + $0xf8] sm:$0xf0]  ;;  %v4470_v17 = vrot.slane %v4469_v31, 2  ;;  %4336 = vmatpush.bf16.msrb.mxu3 %v5352_v23  ;;  %v4466_v43 = vrot.slane %v11332_v12, 1  ;;  %v4535_v24 = vadd.f32 %v4534_v51, %v4533_v22 }
 0x2d2   :  { %v7928_v37 = vld [vmem:[%s12420_s1 + $0xd34] sm:$0xf0]  ;;  %v5320_v2 = vor.u32 %v7532_v14, %v5317_v16 }
 0x2d3   :  { %v7139_v40 = vld [vmem:[%s12420_s1 + $0xf18] sm:$0xf]  ;;  %v6884_v59 = vor.u32 %v7928_v37, %v6883_v35  ;;  %4322 = vmatpush.bf16.msrb.mxu2 %v7428_v54  ;;  %v11362_v35 = vpop.f32.mrf.mxu3  ;;  %v4461_v37 = vadd.f32 %v4460_v39, %v11276_v32  ;;  %v4471_v49 = vadd.f32 %v4470_v17, %v4469_v31  ;;  %v4045_v32 = vpop.f32.mrf.mxu0 }
 0x2d4   :  { %v7992_v63 = vld [vmem:[%s12420_s1 + $0xf34] sm:$0xf0]  ;;  %v6213_v32 = vld [vmem:[%s12420_s1 + $0x7f8] sm:$0xf0] }
 0x2d5   :  { %v7395_v45 = vld [vmem:[%s12420_s1 + $0x1118] sm:$0xf]  ;;  %v7140_v62 = vor.u32 %v7992_v63, %v7139_v40  ;;  %4297 = vmatpush.bf16.msrb.mxu0 %v6884_v59  ;;  %v4525_v40 = vadd.f32 %v4524_v11, %v4523_v46  ;;  %v11366_v63 = vadd.f32 %v4528_v13, %v4527_v50  ;;  %4337 = vmatpush.bf16.msrb.mxu3 %v5320_v2  ;;  %v4472_v11 = vrot.slane %v4471_v49, 1 }
 0x2d6   :  { %v8056_v47 = vld [vmem:[%s12420_s1 + $0x1134] sm:$0xf0]  ;;  %v4031_v13 = vadd.f32 %v11129_v34, %v4018_v52  ;;  %v5957_v52 = vld [vmem:[%s12420_s1 + $0x5f8] sm:$0xf0] }
 0x2d7   :  { %v7396_v0 = vor.u32 %v8056_v47, %v7395_v45  ;;  %v6851_v1 = vld [vmem:[%s12420_s1 + $0xcd8] sm:$0xf]  ;;  %4310 = vmatpush.bf16.msrb.mxu1 %v7140_v62  ;;  %v7524_v45 = vld [vmem:[%s12420_s1 + $0x9c] sm:$0xf]  ;;  %v11395_v23 = vmul.f32 0.125, %v4525_v40 }
 0x2d8   :  { %v7920_v3 = vld [vmem:[%s12420_s1 + $0xcf4] sm:$0xf0]  ;;  %v5285_v47 = vld [vmem:[%s12420_s1 + $0xb8] sm:$0xf0] }
 0x2d9   :  { %v7107_v5 = vld [vmem:[%s12420_s1 + $0xed8] sm:$0xf]  ;;  %v6852_v26 = vor.u32 %v7920_v3, %v6851_v1  ;;  %4323 = vmatpush.bf16.msrb.mxu2 %v7396_v0  ;;  %v5288_v62 = vor.u32 %v7524_v45, %v5285_v47  ;;  %v7692_v40 = vld [vmem:[%s12420_s1 + $0x5dc] sm:$0xf]  ;;  %v4044_v47 = vadd.f32 %v11310_v61, %v4031_v13 }
 0x2da   :  { %v7984_v8 = vld [vmem:[%s12420_s1 + $0xef4] sm:$0xf0] }
 0x2db   :  { %v7363_v9 = vld [vmem:[%s12420_s1 + $0x10d8] sm:$0xf]  ;;  %v7108_v25 = vor.u32 %v7984_v8, %v7107_v5  ;;  %4298 = vmatpush.bf16.msrb.mxu0 %v6852_v26  ;;  %v11393_v5 = vmul.f32 0.125, %v4461_v37  ;;  %v7516_v8 = vld [vmem:[%s12420_s1 + $0x5c] sm:$0xf]  ;;  %4338 = vmatpush.bf16.msrb.mxu3 %v5288_v62  ;;  %v4057_v13 = vadd.f32 %v11321_v57, %v4044_v47 }
 0x2dc   :  { %v8048_v10 = vld [vmem:[%s12420_s1 + $0x10f4] sm:$0xf0]  ;;  %v7628_v37 = vld [vmem:[%s12420_s1 + $0x3dc] sm:$0xf] }
 0x2dd   :  { %v7364_v28 = vor.u32 %v8048_v10, %v7363_v9  ;;  %v6819_v56 = vld [vmem:[%s12420_s1 + $0xc98] sm:$0xf]  ;;  %4311 = vmatpush.bf16.msrb.mxu1 %v7108_v25  ;;  %v5253_v9 = vld [vmem:[%s12420_s1 + $0x78] sm:$0xf0]  ;;  %v4530_v10 = vrot.slane %v11366_v63, 1  ;;  %v11443_v45 = vmul.f32 %v11393_v5, %v11393_v5 }
 0x2de   :  { %v7912_v53 = vld [vmem:[%s12420_s1 + $0xcb4] sm:$0xf0]  ;;  %v5256_v22 = vor.u32 %v7516_v8, %v5253_v9  ;;  %v7620_v8 = vld [vmem:[%s12420_s1 + $0x39c] sm:$0xf] }
 0x2df   :  { %v7075_v60 = vld [vmem:[%s12420_s1 + $0xe98] sm:$0xf]  ;;  %v6820_v58 = vor.u32 %v7912_v53, %v6819_v56  ;;  %4324 = vmatpush.bf16.msrb.mxu2 %v7364_v28  ;;  %v4071_v53 = vpop.f32.mrf.mxu2  ;;  %v4531_v62 = vadd.f32 %v4530_v10, %v11366_v63  ;;  %v5669_v9 = vld [vmem:[%s12420_s1 + $0x3b8] sm:$0xf0] }
 0x2e0   :  { %v7976_v15 = vld [vmem:[%s12420_s1 + $0xeb4] sm:$0xf0]  ;;  %4339 = vmatpush.bf16.msrb.mxu3 %v5256_v22  ;;  %v5925_v10 = vld [vmem:[%s12420_s1 + $0x5b8] sm:$0xf0] }
 0x2e1   :  { %v7331_v33 = vld [vmem:[%s12420_s1 + $0x1098] sm:$0xf]  ;;  %v7076_v46 = vor.u32 %v7976_v15, %v7075_v60  ;;  %4299 = vmatpush.bf16.msrb.mxu0 %v6820_v58  ;;  %v4467_v60 = vadd.f32 %v4466_v43, %v11332_v12  ;;  %v7508_v15 = vld [vmem:[%s12420_s1 + $0x1c] sm:$0xf]  ;;  %v4570_v43 = vmul.f32 %v11246_v7, %v11246_v7 }
 0x2e2   :  { %v8040_v54 = vld [vmem:[%s12420_s1 + $0x10b4] sm:$0xf0]  ;;  %v5701_v12 = vld [vmem:[%s12420_s1 + $0x3f8] sm:$0xf0] }
 0x2e3   :  { %v7332_v50 = vor.u32 %v8040_v54, %v7331_v33  ;;  %v6787_v39 = vld [vmem:[%s12420_s1 + $0xc58] sm:$0xf]  ;;  %4312 = vmatpush.bf16.msrb.mxu1 %v7076_v46  ;;  %v5221_v33 = vld [vmem:[%s12420_s1 + $0x38] sm:$0xf0]  ;;  %v4084_v54 = vpop.f32.mrf.mxu3  ;;  %v4473_v46 = vadd.f32 %v4472_v11, %v4471_v49  ;;  %v11461_v30 = vmul.f32 0.125, %v4467_v60  ;;  %v5704_v49 = vor.u32 %v7628_v37, %v5701_v12 }
 0x2e4   :  { %v7904_v59 = vld [vmem:[%s12420_s1 + $0xc74] sm:$0xf0]  ;;  %v7756_v58 = vld [vmem:[%s12420_s1 + $0x7dc] sm:$0xf] }
 0x2e5   :  { %v7043_v31 = vld [vmem:[%s12420_s1 + $0xe58] sm:$0xf]  ;;  %v6788_v14 = vor.u32 %v7904_v59, %v6787_v39  ;;  %4325 = vmatpush.bf16.msrb.mxu2 %v7332_v50  ;;  %v4536_v50 = vrot.slane %v4535_v24, 1  ;;  %v7820_v59 = vld [vmem:[%s12420_s1 + $0x9dc] sm:$0xf] }
 0x2e6   :  { %v7968_v0 = vld [vmem:[%s12420_s1 + $0xe74] sm:$0xf0]  ;;  %v7684_v11 = vld [vmem:[%s12420_s1 + $0x59c] sm:$0xf] }
 0x2e7   :  { %v7299_v1 = vld [vmem:[%s12420_s1 + $0x1058] sm:$0xf]  ;;  %v7044_v26 = vor.u32 %v7968_v0, %v7043_v31  ;;  %4300 = vmatpush.bf16.msrb.mxu0 %v6788_v14  ;;  %v6469_v31 = vld [vmem:[%s12420_s1 + $0x9f8] sm:$0xf0]  ;;  %v5224_v0 = vor.u32 %v7508_v15, %v5221_v33  ;;  %v5928_v53 = vor.u32 %v7684_v11, %v5925_v10  ;;  %v4070_v15 = vadd.f32 %v11351_v27, %v4057_v13 }
 0x2e8   :  { %v8032_v3 = vld [vmem:[%s12420_s1 + $0x1074] sm:$0xf0]  ;;  %v6472_v63 = vor.u32 %v7820_v59, %v6469_v31  ;;  %v7748_v14 = vld [vmem:[%s12420_s1 + $0x79c] sm:$0xf] }
 0x2e9   :  { %v6755_v16 = vld [vmem:[%s12420_s1 + $0xc18] sm:$0xf]  ;;  %v7300_v25 = vor.u32 %v8032_v3, %v7299_v1  ;;  %4313 = vmatpush.bf16.msrb.mxu1 %v7044_v26  ;;  %v5960_v1 = vor.u32 %v7692_v40, %v5957_v52  ;;  %v6216_v3 = vor.u32 %v7756_v58, %v6213_v32  ;;  %v11484_v26 = vmul.f32 0.125, %v4473_v46  ;;  %v7812_v57 = vld [vmem:[%s12420_s1 + $0x99c] sm:$0xf]  ;;  %4340 = vmatpush.bf16.msrb.mxu3 %v5224_v0 }
 0x2ea   :  { %v7896_v17 = vld [vmem:[%s12420_s1 + $0xc34] sm:$0xf0]  ;;  %v7612_v22 = vld [vmem:[%s12420_s1 + $0x35c] sm:$0xf]  ;;  %v4083_v59 = vadd.f32 %v11362_v35, %v4070_v15 }
 0x2eb   :  { %v7011_v28 = vld [vmem:[%s12420_s1 + $0xe18] sm:$0xf]  ;;  %v6756_v51 = vor.u32 %v7896_v17, %v6755_v16  ;;  %4326 = vmatpush.bf16.msrb.mxu2 %v7300_v25  ;;  %v6181_v16 = vld [vmem:[%s12420_s1 + $0x7b8] sm:$0xf0]  ;;  %v4578_v17 = vsub.f32 %v11300_v48, %v4570_v43  ;;  %v4537_v25 = vadd.f32 %v4536_v50, %v4535_v24  ;;  %v4572_v48 = vmul.f32 %v11461_v30, %v11461_v30 }
 0x2ec   :  { %v7960_v34 = vld [vmem:[%s12420_s1 + $0xe34] sm:$0xf0]  ;;  %v5672_v24 = vor.u32 %v7620_v8, %v5669_v9  ;;  %v6184_v60 = vor.u32 %v7748_v14, %v6181_v16  ;;  %v5893_v54 = vld [vmem:[%s12420_s1 + $0x578] sm:$0xf0]  ;;  %v4573_v27 = vmul.f32 %v11484_v26, %v11484_v26  ;;  %4341 = vmatmul.bf16.vlgmr.msrb.gmra.mxu3 %v8459_v20 }
 0x2ed   :  { %v7267_v56 = vld [vmem:[%s12420_s1 + $0x1018] sm:$0xf]  ;;  %v7012_v39 = vor.u32 %v7960_v34, %v7011_v28  ;;  %4301 = vmatpush.bf16.msrb.mxu0 %v6756_v51  ;;  %v6437_v28 = vld [vmem:[%s12420_s1 + $0x9b8] sm:$0xf0]  ;;  %v4579_v34 = vsub.f32 %v11395_v23, %v11443_v45  ;;  %4385 = vmatpush.bf16.msra.mxu3 %v6472_v63  ;;  %v4586_v40 = vmax.f32 %v4578_v17, 0.0  ;;  %v4565_v43 = vmul.f32 0.125, %v4537_v25 }
 0x2ee   :  { %v8024_v2 = vld [vmem:[%s12420_s1 + $0x1034] sm:$0xf0]  ;;  %v7676_v23 = vld [vmem:[%s12420_s1 + $0x55c] sm:$0xf]  ;;  %v6440_v33 = vor.u32 %v7812_v57, %v6437_v28  ;;  %v11570_v28 = vpop.f32.mrf.mxu1 }
 0x2ef   :  { %v7268_v61 = vor.u32 %v8024_v2, %v7267_v56  ;;  %4314 = vmatpush.bf16.msrb.mxu1 %v7012_v39  ;;  %v4564_v56 = vmul.f32 0.125, %v4531_v62  ;;  %v5637_v2 = vld [vmem:[%s12420_s1 + $0x378] sm:$0xf0]  ;;  %v4587_v51 = vmax.f32 %v4579_v34, 0.0  ;;  %v5896_v32 = vor.u32 %v7676_v23, %v5893_v54 }
 0x2f0   :  { %4302 = vmatmul.bf16.vlgmr.msrb.gmra.mxu0 %v8610_v38  ;;  %v7740_v37 = vld [vmem:[%s12420_s1 + $0x75c] sm:$0xf]  ;;  %v5640_v58 = vor.u32 %v7612_v22, %v5637_v2 }
 0x2f1   :  { %4327 = vmatpush.bf16.msrb.mxu2 %v7268_v61  ;;  %4346 = vmatpush.bf16.msra.mxu0 %v5704_v49  ;;  %v6149_v12 = vld [vmem:[%s12420_s1 + $0x778] sm:$0xf0]  ;;  %v4580_v52 = vsub.f32 %v4564_v56, %v4572_v48  ;;  %v11546_v49 = vadd.f32 1e-05, %v4586_v40  ;;  %v11554_v9 = vadd.f32 1e-05, %v4587_v51 }
 0x2f2   :  { %4315 = vmatmul.bf16.vlgmr.msrb.gmra.mxu1 %v8620_v42  ;;  %v7804_v45 = vld [vmem:[%s12420_s1 + $0x95c] sm:$0xf]  ;;  %v6152_v46 = vor.u32 %v7740_v37, %v6149_v12  ;;  %4386 = vmatpush.bf16.msra.mxu3 %v6440_v33 }
 0x2f3   :  { %4359 = vmatpush.bf16.msra.mxu1 %v5960_v1  ;;  %v6405_v47 = vld [vmem:[%s12420_s1 + $0x978] sm:$0xf0]  ;;  %v4581_v1 = vsub.f32 %v4565_v43, %v4573_v27  ;;  %v4588_v11 = vmax.f32 %v4580_v52, 0.0  ;;  %8083 = vrsqrt.f32 %v11546_v49  ;;  %vm4616_vm1 = vweird.f32 %v11546_v49 }
 0x2f4   :  { %4328 = vmatmul.bf16.vlgmr.msrb.gmra.mxu2 %v8808_v19  ;;  %v7604_v50 = vld [vmem:[%s12420_s1 + $0x31c] sm:$0xf]  ;;  %v6408_v20 = vor.u32 %v7804_v45, %v6405_v47  ;;  %8085 = vrsqrt.f32 %v11554_v9  ;;  %vm4626_vm3 = vweird.f32 %v11554_v9 }
 0x2f5   :  { %4372 = vmatpush.bf16.msra.mxu2 %v6216_v3  ;;  %4347 = vmatpush.bf16.msra.mxu0 %v5672_v24  ;;  %v5605_v39 = vld [vmem:[%s12420_s1 + $0x338] sm:$0xf0]  ;;  %v4095_v3 = vpop.f32.mrf.mxu0  ;;  %v11591_v37 = vadd.f32 1e-05, %v4588_v11 }
 0x2f6   :  { %v7668_v61 = vld [vmem:[%s12420_s1 + $0x51c] sm:$0xf]  ;;  %v11556_v13 = vadd.f32 %v4095_v3, %v4083_v59  ;;  %v5608_v63 = vor.u32 %v7604_v50, %v5605_v39  ;;  %4387 = vmatpush.bf16.msra.mxu3 %v6408_v20  ;;  %v11610_v50 = vpop.f32.mrf.mxu3 }
 0x2f7   :  { %4360 = vmatpush.bf16.msra.mxu1 %v5928_v53  ;;  %v5861_v31 = vld [vmem:[%s12420_s1 + $0x538] sm:$0xf0]  ;;  %8087 = vrsqrt.f32 %v11591_v37  ;;  %vm4636_vm8 = vweird.f32 %v11591_v37 }
 0x2f8   :  { %v7732_v62 = vld [vmem:[%s12420_s1 + $0x71c] sm:$0xf]  ;;  %v5864_v14 = vor.u32 %v7668_v61, %v5861_v31  ;;  %v4474_v34 = vrot.slane %v11556_v13, 4  ;;  %v4510_v56 = vmul.f32 %v11556_v13, %v11556_v13 }
 0x2f9   :  { %4373 = vmatpush.bf16.msra.mxu2 %v6184_v60  ;;  %v6117_v0 = vld [vmem:[%s12420_s1 + $0x738] sm:$0xf0]  ;;  %4348 = vmatpush.bf16.msra.mxu0 %v5640_v58  ;;  %v4589_v60 = vmax.f32 %v4581_v1, 0.0 }
 0x2fa   :  { %v7796_v35 = vld [vmem:[%s12420_s1 + $0x91c] sm:$0xf]  ;;  %v6120_v16 = vor.u32 %v7732_v62, %v6117_v0  ;;  %v4475_v23 = vadd.f32 %v4474_v34, %v11556_v13  ;;  %v4538_v15 = vrot.slane %v4510_v56, 4 }
 0x2fb   :  { %v6373_v8 = vld [vmem:[%s12420_s1 + $0x938] sm:$0xf0]  ;;  %4361 = vmatpush.bf16.msra.mxu1 %v5896_v32  ;;  %v11612_v39 = vadd.f32 1e-05, %v4589_v60 }
 0x2fc   :  { %v7596_v10 = vld [vmem:[%s12420_s1 + $0x2dc] sm:$0xf]  ;;  %v6376_v48 = vor.u32 %v7796_v35, %v6373_v8  ;;  %v4476_v47 = vrot.slane %v4475_v23, 2  ;;  %v4539_v51 = vadd.f32 %v4538_v15, %v4510_v56 }
 0x2fd   :  { %4374 = vmatpush.bf16.msra.mxu2 %v6152_v46  ;;  %v5573_v17 = vld [vmem:[%s12420_s1 + $0x2f8] sm:$0xf0]  ;;  %4349 = vmatpush.bf16.msra.mxu0 %v5608_v63  ;;  %v11608_v46 = vpop.f32.mrf.mxu2  ;;  %v4097_v20 = vpop.f32.mrf.mxu0  ;;  %8089 = vrsqrt.f32 %v11612_v39  ;;  %vm4646_vm10 = vweird.f32 %v11612_v39 }
 0x2fe   :  { %v7660_v25 = vld [vmem:[%s12420_s1 + $0x4dc] sm:$0xf]  ;;  %v5576_v33 = vor.u32 %v7596_v10, %v5573_v17  ;;  %4388 = vmatpush.bf16.msra.mxu3 %v6376_v48  ;;  %v4477_v31 = vadd.f32 %v4476_v47, %v4475_v23  ;;  %v4540_v62 = vrot.slane %v4539_v51, 2 }
 0x2ff   :  { %v5829_v57 = vld [vmem:[%s12420_s1 + $0x4f8] sm:$0xf0]  ;;  %4362 = vmatpush.bf16.msra.mxu1 %v5864_v14  ;;  %v4110_v14 = vpop.f32.mrf.mxu1 }
 0x300   :  { %v7724_v24 = vld [vmem:[%s12420_s1 + $0x6dc] sm:$0xf]  ;;  %v5832_v12 = vor.u32 %v7660_v25, %v5829_v57  ;;  %v4541_v17 = vadd.f32 %v4540_v62, %v4539_v51 }
 0x301   :  { %v6085_v53 = vld [vmem:[%s12420_s1 + $0x6f8] sm:$0xf0]  ;;  %4375 = vmatpush.bf16.msra.mxu2 %v6120_v16  ;;  %4350 = vmatpush.bf16.msra.mxu0 %v5576_v33  ;;  %v4478_v16 = vrot.slane %v4477_v31, 1 }
 0x302   :  { %v7788_v22 = vld [vmem:[%s12420_s1 + $0x8dc] sm:$0xf]  ;;  %v6088_v40 = vor.u32 %v7724_v24, %v6085_v53  ;;  %v4542_v60 = vrot.slane %v4541_v17, 1 }
 0x303   :  { %v6341_v2 = vld [vmem:[%s12420_s1 + $0x8f8] sm:$0xf0]  ;;  %4363 = vmatpush.bf16.msra.mxu1 %v5832_v12  ;;  %v4479_v53 = vadd.f32 %v4478_v16, %v4477_v31 }
 0x304   :  { %v7588_v54 = vld [vmem:[%s12420_s1 + $0x29c] sm:$0xf]  ;;  %v6344_v52 = vor.u32 %v7788_v22, %v6341_v2 }
 0x305   :  { %v5541_v43 = vld [vmem:[%s12420_s1 + $0x2b8] sm:$0xf0]  ;;  %4376 = vmatpush.bf16.msra.mxu2 %v6088_v40 }
 0x306   :  { %v7652_v27 = vld [vmem:[%s12420_s1 + $0x49c] sm:$0xf]  ;;  %v5544_v0 = vor.u32 %v7588_v54, %v5541_v43  ;;  %4389 = vmatpush.bf16.msra.mxu3 %v6344_v52  ;;  %v11668_v43 = vmul.f32 0.125, %v4479_v53  ;;  %v4123_v52 = vpop.f32.mrf.mxu2 }
 0x307   :  { %v5797_v45 = vld [vmem:[%s12420_s1 + $0x4b8] sm:$0xf0] }
 0x308   :  { %v7716_v58 = vld [vmem:[%s12420_s1 + $0x69c] sm:$0xf]  ;;  %v5800_v35 = vor.u32 %v7652_v27, %v5797_v45  ;;  %4351 = vmatpush.bf16.msra.mxu0 %v5544_v0  ;;  %v4543_v27 = vadd.f32 %v4542_v60, %v4541_v17  ;;  %v4574_v62 = vmul.f32 %v11668_v43, %v11668_v43 }
 0x309   :  { %v6053_v32 = vld [vmem:[%s12420_s1 + $0x6b8] sm:$0xf0] }
 0x30a   :  { %v7780_v61 = vld [vmem:[%s12420_s1 + $0x89c] sm:$0xf]  ;;  %v6056_v8 = vor.u32 %v7716_v58, %v6053_v32  ;;  %4364 = vmatpush.bf16.msra.mxu1 %v5800_v35  ;;  %v4136_v58 = vpop.f32.mrf.mxu3  ;;  %v11676_v32 = vpop.eup %8083  ;;  %v4566_v31 = vmul.f32 0.125, %v4543_v27 }
 0x30b   :  { %v6309_v59 = vld [vmem:[%s12420_s1 + $0x8b8] sm:$0xf0]  ;;  %vm4617_vm0 = vweird.f32 %v11676_v32 }
 0x30c   :  { %v7580_v1 = vld [vmem:[%s12420_s1 + $0x25c] sm:$0xf]  ;;  %v6312_v25 = vor.u32 %v7780_v61, %v6309_v59  ;;  %4377 = vmatpush.bf16.msra.mxu2 %v6056_v8  ;;  %v4582_v14 = vsub.f32 %v4566_v31, %v4574_v62  ;;  %vm11876_vm4 = vmor %vm4616_vm1, %vm4617_vm0 }
 0x30d   :  { %v5509_v3 = vld [vmem:[%s12420_s1 + $0x278] sm:$0xf0] }
 0x30e   :  { %v7644_v11 = vld [vmem:[%s12420_s1 + $0x45c] sm:$0xf]  ;;  %v5512_v22 = vor.u32 %v7580_v1, %v5509_v3  ;;  %4390 = vmatpush.bf16.msra.mxu3 %v6312_v25 }
 0x30f   :  { %v5765_v63 = vld [vmem:[%s12420_s1 + $0x478] sm:$0xf0] }
 0x310   :  { %v7708_v10 = vld [vmem:[%s12420_s1 + $0x65c] sm:$0xf]  ;;  %v5768_v15 = vor.u32 %v7644_v11, %v5765_v63  ;;  %4352 = vmatpush.bf16.msra.mxu0 %v5512_v22  ;;  %v4590_v22 = vmax.f32 %v4582_v14, 0.0 }
 0x311   :  { %v6021_v57 = vld [vmem:[%s12420_s1 + $0x678] sm:$0xf0] }
 0x312   :  { %v7772_v34 = vld [vmem:[%s12420_s1 + $0x85c] sm:$0xf]  ;;  %v6024_v33 = vor.u32 %v7708_v10, %v6021_v57  ;;  %4365 = vmatpush.bf16.msra.mxu1 %v5768_v15  ;;  %v11702_v10 = vpop.eup %8085  ;;  %v4611_v57 = vmul.f32 %v11676_v32, %v11546_v49  ;;  %v11736_v27 = vadd.f32 1e-05, %v4590_v22  ;;  %v4122_v49 = vadd.f32 %v11608_v46, %v11570_v28 }
 0x313   :  { %v6277_v56 = vld [vmem:[%s12420_s1 + $0x878] sm:$0xf0]  ;;  %vm4627_vm2 = vweird.f32 %v11702_v10 }
 0x314   :  { %v7572_v48 = vld [vmem:[%s12420_s1 + $0x21c] sm:$0xf]  ;;  %v6280_v45 = vor.u32 %v7772_v34, %v6277_v56  ;;  %4378 = vmatpush.bf16.msra.mxu2 %v6024_v33  ;;  %v11709_v34 = vpop.eup %8087  ;;  %8091 = vrsqrt.f32 %v11736_v27  ;;  %vm11892_vm6 = vmor %vm4626_vm3, %vm4627_vm2  ;;  %vm4656_vm13 = vweird.f32 %v11736_v27 }
 0x315   :  { %v5477_v24 = vld [vmem:[%s12420_s1 + $0x238] sm:$0xf0]  ;;  %vm4637_vm5 = vweird.f32 %v11709_v34 }
 0x316   :  { %v7636_v2 = vld [vmem:[%s12420_s1 + $0x41c] sm:$0xf]  ;;  %v5480_v0 = vor.u32 %v7572_v48, %v5477_v24  ;;  %4391 = vmatpush.bf16.msra.mxu3 %v6280_v45  ;;  %vm11922_vm9 = vmor %vm4636_vm8, %vm4637_vm5  ;;  %vm4707_vm5 = vcmask 64512  }
 0x317   :  { %v5733_v23 = vld [vmem:[%s12420_s1 + $0x438] sm:$0xf0] }
 0x318   :  { %v7700_v54 = vld [vmem:[%s12420_s1 + $0x61c] sm:$0xf]  ;;  %v5736_v35 = vor.u32 %v7636_v2, %v5733_v23  ;;  %4353 = vmatpush.bf16.msra.mxu0 %v5480_v0 }
 0x319   :  { %v5989_v12 = vld [vmem:[%s12420_s1 + $0x638] sm:$0xf0] }
 0x31a   :  { %v7764_v40 = vld [vmem:[%s12420_s1 + $0x81c] sm:$0xf]  ;;  %v5992_v8 = vor.u32 %v7700_v54, %v5989_v12  ;;  %4366 = vmatpush.bf16.msra.mxu1 %v5736_v35  ;;  %v4621_v12 = vmul.f32 %v11702_v10, %v11554_v9 }
 0x31b   :  { %v6245_v47 = vld [vmem:[%s12420_s1 + $0x838] sm:$0xf0]  ;;  %4354 = vmatmul.bf16.vlgmr.msra.gmra.mxu0 %v8462_v21 }
 0x31c   :  { %v7884_v51 = vld [vmem:[%s12420_s1 + $0xbdc] sm:$0xf]  ;;  %v6248_v16 = vor.u32 %v7764_v40, %v6245_v47  ;;  %4379 = vmatpush.bf16.msra.mxu2 %v5992_v8  ;;  %v11734_v40 = vpop.eup %8089  ;;  %v4612_v47 = vmul.f32 %v11676_v32, %v4611_v57  ;;  %v4622_v35 = vmul.f32 %v11702_v10, %v4621_v12 }
 0x31d   :  { %v6725_v61 = vld [vmem:[%s12420_s1 + $0xbf8] sm:$0xf0]  ;;  %v4641_v8 = vmul.f32 %v11734_v40, %v11612_v39  ;;  %4367 = vmatmul.bf16.vlgmr.msra.gmra.mxu1 %v8427_v4  ;;  %vm4647_vm7 = vweird.f32 %v11734_v40 }
 0x31e   :  { %v7948_v59 = vld [vmem:[%s12420_s1 + $0xddc] sm:$0xf]  ;;  %v6728_v17 = vor.u32 %v7884_v51, %v6725_v61  ;;  %4392 = vmatpush.bf16.msra.mxu3 %v6248_v16  ;;  %v4631_v51 = vmul.f32 %v11709_v34, %v11591_v37  ;;  %v11773_v21 = vmul.f32 0.5, %v4612_v47  ;;  %vm11937_vm11 = vmor %vm4646_vm10, %vm4647_vm7 }
 0x31f   :  { %v6981_v20 = vld [vmem:[%s12420_s1 + $0xdf8] sm:$0xf0]  ;;  %4380 = vmatmul.bf16.vlgmr.msra.gmra.mxu2 %v8432_v6  ;;  %v4642_v22 = vmul.f32 %v11734_v40, %v4641_v8 }
 0x320   :  { %v8012_v1 = vld [vmem:[%s12420_s1 + $0xfdc] sm:$0xf]  ;;  %v6984_v56 = vor.u32 %v7948_v59, %v6981_v20  ;;  %4398 = vmatpush.bf16.msrb.mxu0 %v6728_v17 }
 0x321   :  { %v7237_v3 = vld [vmem:[%s12420_s1 + $0xff8] sm:$0xf0]  ;;  %4393 = vmatmul.bf16.vlgmr.msra.gmra.mxu3 %v8618_v41  ;;  %v4632_v41 = vmul.f32 %v11709_v34, %v4631_v51 }
 0x322   :  { %v8076_v11 = vld [vmem:[%s12420_s1 + $0x11dc] sm:$0xf]  ;;  %v7240_v48 = vor.u32 %v8012_v1, %v7237_v3  ;;  %4411 = vmatpush.bf16.msrb.mxu1 %v6984_v56 }
 0x323   :  { %v7493_v63 = vld [vmem:[%s12420_s1 + $0x11f8] sm:$0xf0] }
 0x324   :  { %v7876_v25 = vld [vmem:[%s12420_s1 + $0xb9c] sm:$0xf]  ;;  %v7496_v2 = vor.u32 %v8076_v11, %v7493_v63  ;;  %4424 = vmatpush.bf16.msrb.mxu2 %v7240_v48 }
 0x325   :  { %v6693_v24 = vld [vmem:[%s12420_s1 + $0xbb8] sm:$0xf0] }
 0x326   :  { %v7940_v53 = vld [vmem:[%s12420_s1 + $0xd9c] sm:$0xf]  ;;  %v6696_v45 = vor.u32 %v7876_v25, %v6693_v24  ;;  %4437 = vmatpush.bf16.msrb.mxu3 %v7496_v2  ;;  %v11801_v2 = vpop.eup %8091 }
 0x327   :  { %v6949_v60 = vld [vmem:[%s12420_s1 + $0xdb8] sm:$0xf0]  ;;  %vm4657_vm12 = vweird.f32 %v11801_v2 }
 0x328   :  { %v8004_v23 = vld [vmem:[%s12420_s1 + $0xf9c] sm:$0xf]  ;;  %v6952_v52 = vor.u32 %v7940_v53, %v6949_v60  ;;  %4399 = vmatpush.bf16.msrb.mxu0 %v6696_v45  ;;  %v4623_v60 = vmul.f32 0.5, %v4622_v35  ;;  %vm4658_vm14 = vmor %vm4656_vm13, %vm4657_vm12 }
 0x329   :  { %v7205_v15 = vld [vmem:[%s12420_s1 + $0xfb8] sm:$0xf0] }
 0x32a   :  { %v8068_v33 = vld [vmem:[%s12420_s1 + $0x119c] sm:$0xf]  ;;  %v7208_v58 = vor.u32 %v8004_v23, %v7205_v15  ;;  %4412 = vmatpush.bf16.msrb.mxu1 %v6952_v52  ;;  %v11803_v15 = vpop.f32.mrf.mxu0 }
 0x32b   :  { %v7461_v54 = vld [vmem:[%s12420_s1 + $0x11b8] sm:$0xf0] }
 0x32c   :  { %v7868_v61 = vld [vmem:[%s12420_s1 + $0xb5c] sm:$0xf]  ;;  %v7464_v31 = vor.u32 %v8068_v33, %v7461_v54  ;;  %4425 = vmatpush.bf16.msrb.mxu2 %v7208_v58  ;;  %v4614_v33 = vsub.f32 1.5, %v11773_v21  ;;  %v4633_v54 = vmul.f32 0.5, %v4632_v41  ;;  %v11815_v58 = vpop.f32.mrf.mxu1 }
 0x32d   :  { %v6661_v59 = vld [vmem:[%s12420_s1 + $0xb78] sm:$0xf0] }
 0x32e   :  { %v7932_v20 = vld [vmem:[%s12420_s1 + $0xd5c] sm:$0xf]  ;;  %v6664_v11 = vor.u32 %v7868_v61, %v6661_v59  ;;  %4438 = vmatpush.bf16.msrb.mxu3 %v7464_v31  ;;  %v4651_v61 = vmul.f32 %v11801_v2, %v11736_v27  ;;  %v4634_v21 = vsub.f32 1.5, %v4633_v54 }
 0x32f   :  { %v6917_v62 = vld [vmem:[%s12420_s1 + $0xd78] sm:$0xf0] }
 0x330   :  { %v7996_v0 = vld [vmem:[%s12420_s1 + $0xf5c] sm:$0xf]  ;;  %v6920_v63 = vor.u32 %v7932_v20, %v6917_v62  ;;  %4400 = vmatpush.bf16.msrb.mxu0 %v6664_v11  ;;  %v4652_v35 = vmul.f32 %v11801_v2, %v4651_v61 }
 0x331   :  { %v7173_v1 = vld [vmem:[%s12420_s1 + $0xf78] sm:$0xf0] }
 0x332   :  { %v8060_v6 = vld [vmem:[%s12420_s1 + $0x115c] sm:$0xf]  ;;  %v7176_v14 = vor.u32 %v7996_v0, %v7173_v1  ;;  %4413 = vmatpush.bf16.msrb.mxu1 %v6920_v63 }
 0x333   :  { %v7429_v3 = vld [vmem:[%s12420_s1 + $0x1178] sm:$0xf0] }
 0x334   :  { %v7860_v16 = vld [vmem:[%s12420_s1 + $0xb1c] sm:$0xf]  ;;  %v7432_v25 = vor.u32 %v8060_v6, %v7429_v3  ;;  %4426 = vmatpush.bf16.msrb.mxu2 %v7176_v14  ;;  %v4624_v6 = vsub.f32 1.5, %v4623_v60  ;;  %v4643_v3 = vmul.f32 0.5, %v4642_v22  ;;  %v4615_v22 = vmul.f32 %v11676_v32, %v4614_v33 }
 0x335   :  { %v6629_v17 = vld [vmem:[%s12420_s1 + $0xb38] sm:$0xf0]  ;;  %v4635_v33 = vmul.f32 %v11709_v34, %v4634_v21 }
 0x336   :  { %v7924_v4 = vld [vmem:[%s12420_s1 + $0xd1c] sm:$0xf]  ;;  %v6632_v23 = vor.u32 %v7860_v16, %v6629_v17  ;;  %4439 = vmatpush.bf16.msrb.mxu3 %v7432_v25  ;;  %v11844_v17 = vpop.f32.mrf.mxu2  ;;  %v4644_v54 = vsub.f32 1.5, %v4643_v3  ;;  %v4595_v3 = vsub.f32 %v10076_v29, %v11393_v5  ;;  %v4135_v5 = vadd.f32 %v11610_v50, %v4122_v49 }
 0x337   :  { %v6885_v57 = vld [vmem:[%s12420_s1 + $0xd38] sm:$0xf0] }
 0x338   :  { %v7988_v56 = vld [vmem:[%s12420_s1 + $0xf1c] sm:$0xf]  ;;  %v6888_v12 = vor.u32 %v7924_v4, %v6885_v57  ;;  %4401 = vmatpush.bf16.msrb.mxu0 %v6632_v23  ;;  %v4653_v4 = vmul.f32 0.5, %v4652_v35  ;;  %v4625_v23 = vmul.f32 %v11702_v10, %v4624_v6  ;;  %v4619_v35 = vsel %vm11876_vm4, %v11676_v32, %v4615_v22 }
 0x339   :  { %v7141_v48 = vld [vmem:[%s12420_s1 + $0xf38] sm:$0xf0]  ;;  %v4645_v29 = vmul.f32 %v11734_v40, %v4644_v54  ;;  %v4639_v32 = vsel %vm11922_vm9, %v11709_v34, %v4635_v33  ;;  %v4148_v54 = vadd.f32 %v11803_v15, %v4135_v5  ;;  %vm5163_vm9 = vcmask 74752  }
 0x33a   :  { %v8052_v24 = vld [vmem:[%s12420_s1 + $0x111c] sm:$0xf]  ;;  %v7144_v45 = vor.u32 %v7988_v56, %v7141_v48  ;;  %4414 = vmatpush.bf16.msrb.mxu1 %v6888_v12 }
 0x33b   :  { %v7397_v53 = vld [vmem:[%s12420_s1 + $0x1138] sm:$0xf0]  ;;  %v4649_v22 = vsel %vm11937_vm11, %v11734_v40, %v4645_v29  ;;  %v4598_v40 = vsub.f32 %v11556_v13, %v11668_v43 }
 0x33c   :  { %v7852_v47 = vld [vmem:[%s12420_s1 + $0xadc] sm:$0xf]  ;;  %v7400_v59 = vor.u32 %v8052_v24, %v7397_v53  ;;  %4427 = vmatpush.bf16.msrb.mxu2 %v7144_v45  ;;  %v11856_v24 = vpop.f32.mrf.mxu3 }
 0x33d   :  { %v6597_v51 = vld [vmem:[%s12420_s1 + $0xaf8] sm:$0xf0] }
 0x33e   :  { %v7916_v52 = vld [vmem:[%s12420_s1 + $0xcdc] sm:$0xf]  ;;  %v6600_v8 = vor.u32 %v7852_v47, %v6597_v51  ;;  %4440 = vmatpush.bf16.msrb.mxu3 %v7400_v59  ;;  %v4149_v51 = vpop.f32.mrf.mxu0 }
 0x33f   :  { %v6853_v20 = vld [vmem:[%s12420_s1 + $0xcf8] sm:$0xf0] }
 0x340   :  { %v7980_v31 = vld [vmem:[%s12420_s1 + $0xedc] sm:$0xf]  ;;  %v6856_v41 = vor.u32 %v7916_v52, %v6853_v20  ;;  %4402 = vmatpush.bf16.msrb.mxu0 %v6600_v8  ;;  %v4654_v20 = vsub.f32 1.5, %v4653_v4 }
 0x341   :  { %v7109_v62 = vld [vmem:[%s12420_s1 + $0xef8] sm:$0xf0] }
 0x342   :  { %v8044_v0 = vld [vmem:[%s12420_s1 + $0x10dc] sm:$0xf]  ;;  %v7112_v63 = vor.u32 %v7980_v31, %v7109_v62  ;;  %4415 = vmatpush.bf16.msrb.mxu1 %v6856_v41  ;;  %v4162_v31 = vpop.f32.mrf.mxu1  ;;  %v4594_v62 = vsub.f32 %v9667_v18, %v11246_v7 }
 0x343   :  { %v7365_v1 = vld [vmem:[%s12420_s1 + $0x10f8] sm:$0xf0] }
 0x344   :  { %v7844_v11 = vld [vmem:[%s12420_s1 + $0xa9c] sm:$0xf]  ;;  %v7368_v25 = vor.u32 %v8044_v0, %v7365_v1  ;;  %4428 = vmatpush.bf16.msrb.mxu2 %v7112_v63  ;;  %v4655_v63 = vmul.f32 %v11801_v2, %v4654_v20 }
 0x345   :  { %v6565_v14 = vld [vmem:[%s12420_s1 + $0xab8] sm:$0xf0] }
 0x346   :  { %v7908_v16 = vld [vmem:[%s12420_s1 + $0xc9c] sm:$0xf]  ;;  %v6568_v12 = vor.u32 %v7844_v11, %v6565_v14  ;;  %4441 = vmatpush.bf16.msrb.mxu3 %v7368_v25  ;;  %v4629_v11 = vsel %vm11892_vm6, %v11702_v10, %v4625_v23  ;;  %v4175_v14 = vpop.f32.mrf.mxu2  ;;  %v4597_v23 = vsub.f32 %v10927_v55, %v11484_v26  ;;  %v4659_v33 = vsel %vm4658_vm14, %v11801_v2, %v4655_v63 }
 0x347   :  { %v6821_v57 = vld [vmem:[%s12420_s1 + $0xcb8] sm:$0xf0]  ;;  %v4161_v26 = vadd.f32 %v11815_v58, %v4148_v54  ;;  %v4694_v51 = vmul.f32 %v4659_v33, %v4598_v40  ;;  %v4199_v58 = vpop.f32.mrf.mxu0 }
 0x348   :  { %v7972_v56 = vld [vmem:[%s12420_s1 + $0xe9c] sm:$0xf]  ;;  %v6824_v28 = vor.u32 %v7908_v16, %v6821_v57  ;;  %4403 = vmatpush.bf16.msrb.mxu0 %v6568_v12  ;;  %v4596_v16 = vsub.f32 %v11210_v36, %v11461_v30  ;;  %v4690_v30 = vmul.f32 %v4619_v35, %v4594_v62  ;;  %v4693_v55 = vmul.f32 %v4649_v22, %v4597_v23 }
 0x349   :  { %v7077_v48 = vld [vmem:[%s12420_s1 + $0xeb8] sm:$0xf0]  ;;  %v4174_v2 = vadd.f32 %v11844_v17, %v4161_v26  ;;  %v4702_v13 = vmax.f32 %v4694_v51, 0.0 }
 0x34a   :  { %v8036_v53 = vld [vmem:[%s12420_s1 + $0x109c] sm:$0xf]  ;;  %v7080_v46 = vor.u32 %v7972_v56, %v7077_v48  ;;  %4416 = vmatpush.bf16.msrb.mxu1 %v6824_v28  ;;  %v4188_v48 = vpop.f32.mrf.mxu3  ;;  %v4692_v12 = vmul.f32 %v4639_v32, %v4596_v16  ;;  %v4698_v15 = vmax.f32 %v4690_v30, 0.0  ;;  %v4212_v59 = vpop.f32.mrf.mxu1 }
 0x34b   :  { %v7333_v60 = vld [vmem:[%s12420_s1 + $0x10b8] sm:$0xf0]  ;;  %v4187_v43 = vadd.f32 %v11856_v24, %v4174_v2 }
 0x34c   :  { %v7836_v45 = vld [vmem:[%s12420_s1 + $0xa5c] sm:$0xf]  ;;  %v7336_v0 = vor.u32 %v8036_v53, %v7333_v60  ;;  %4429 = vmatpush.bf16.msrb.mxu2 %v7080_v46  ;;  %v4691_v60 = vmul.f32 %v4629_v11, %v4595_v3  ;;  %v4700_v46 = vmax.f32 %v4692_v12, 0.0 }
 0x34d   :  { %v6533_v52 = vld [vmem:[%s12420_s1 + $0xa78] sm:$0xf0] }
 0x34e   :  { %v7900_v61 = vld [vmem:[%s12420_s1 + $0xc5c] sm:$0xf]  ;;  %v6536_v37 = vor.u32 %v7836_v45, %v6533_v52  ;;  %4442 = vmatpush.bf16.msrb.mxu3 %v7336_v0  ;;  %v4699_v28 = vmax.f32 %v4691_v60, 0.0  ;;  %v4701_v52 = vmax.f32 %v4693_v55, 0.0 }
 0x34f   :  { %v6789_v1 = vld [vmem:[%s12420_s1 + $0xc78] sm:$0xf0] }
 0x350   :  { %v7964_v9 = vld [vmem:[%s12420_s1 + $0xe5c] sm:$0xf]  ;;  %v6792_v39 = vor.u32 %v7900_v61, %v6789_v1  ;;  %4404 = vmatpush.bf16.msrb.mxu0 %v6536_v37  ;;  %v4200_v61 = vadd.f32 %v4199_v58, %v4187_v43  ;;  %v4225_v1 = vpop.f32.mrf.mxu2 }
 0x351   :  { %v7045_v6 = vld [vmem:[%s12420_s1 + $0xe78] sm:$0xf0] }
 0x352   :  { %v8028_v18 = vld [vmem:[%s12420_s1 + $0x105c] sm:$0xf]  ;;  %v7048_v50 = vor.u32 %v7964_v9, %v7045_v6  ;;  %4417 = vmatpush.bf16.msrb.mxu1 %v6792_v39  ;;  %v4213_v20 = vadd.f32 %v4212_v59, %v4200_v61  ;;  %v4201_v9 = vpop.f32.mrf.mxu0  ;;  %v4214_v3 = vpop.f32.mrf.mxu1 }
 0x353   :  { %v7301_v7 = vld [vmem:[%s12420_s1 + $0x1078] sm:$0xf0] }
 0x354   :  { %v7828_v41 = vld [vmem:[%s12420_s1 + $0xa1c] sm:$0xf]  ;;  %v7304_v4 = vor.u32 %v8028_v18, %v7301_v7  ;;  %4430 = vmatpush.bf16.msrb.mxu2 %v7048_v50  ;;  %v4480_v31 = vrot.slane %v4213_v20, 4  ;;  %v4511_v62 = vmul.f32 %v4213_v20, %v4213_v20 }
 0x355   :  { %v6501_v10 = vld [vmem:[%s12420_s1 + $0xa38] sm:$0xf0] }
 0x356   :  { %v7892_v34 = vld [vmem:[%s12420_s1 + $0xc1c] sm:$0xf]  ;;  %v6504_v49 = vor.u32 %v7828_v41, %v6501_v10  ;;  %4443 = vmatpush.bf16.msrb.mxu3 %v7304_v4  ;;  %v4481_v17 = vadd.f32 %v4480_v31, %v4213_v20  ;;  %v4544_v0 = vrot.slane %v4511_v62, 4 }
 0x357   :  { %v6757_v25 = vld [vmem:[%s12420_s1 + $0xc38] sm:$0xf0] }
 0x358   :  { %v7956_v57 = vld [vmem:[%s12420_s1 + $0xe1c] sm:$0xf]  ;;  %v6760_v45 = vor.u32 %v7892_v34, %v6757_v25  ;;  %4405 = vmatpush.bf16.msrb.mxu0 %v6504_v49  ;;  %v4482_v6 = vrot.slane %v4481_v17, 2  ;;  %v4227_v8 = vpop.f32.mrf.mxu2 }
 0x359   :  { %v7013_v56 = vld [vmem:[%s12420_s1 + $0xe38] sm:$0xf0] }
 0x35a   :  { %v8020_v53 = vld [vmem:[%s12420_s1 + $0x101c] sm:$0xf]  ;;  %v7016_v47 = vor.u32 %v7956_v57, %v7013_v56  ;;  %4418 = vmatpush.bf16.msrb.mxu1 %v6760_v45  ;;  %v4251_v41 = vpop.f32.mrf.mxu0  ;;  %v4264_v10 = vpop.f32.mrf.mxu1 }
 0x35b   :  { %v7269_v36 = vld [vmem:[%s12420_s1 + $0x1038] sm:$0xf0]  ;;  %4406 = vmatmul.bf16.vlgmr.msrb.gmra.mxu0 %v8622_v44  ;;  %v4238_v44 = vpop.f32.mrf.mxu3 }
 0x35c   :  { %v7272_v27 = vor.u32 %v8020_v53, %v7269_v36  ;;  %4431 = vmatpush.bf16.msrb.mxu2 %v7016_v47  ;;  %4726 = vmatpush.msra.mxu0 %v4698_v15  ;;  %v4239_v30 = vadd.f32 %v4238_v44, %v4225_v1 }
 0x35d   :  { %4419 = vmatmul.bf16.vlgmr.msrb.gmra.mxu1 %v8610_v38  ;;  %v4545_v38 = vadd.f32 %v4544_v0, %v4511_v62 }
 0x35e   :  { %4444 = vmatpush.bf16.msrb.mxu3 %v7272_v27  ;;  %4746 = vmatpush.msra.mxu1 %v4699_v28  ;;  %v4252_v12 = vadd.f32 %v4251_v41, %v4239_v30 }
 0x35f   :  { %4432 = vmatmul.bf16.vlgmr.msrb.gmra.mxu2 %v8620_v42  ;;  %4806 = vmatpush.msrb.mxu0 %v4702_v13  ;;  %v4483_v42 = vadd.f32 %v4482_v6, %v4481_v17  ;;  %v4546_v18 = vrot.slane %v4545_v38, 2 }
 0x360   :  { %4766 = vmatpush.msra.mxu2 %v4700_v46  ;;  %v4277_v14 = vpop.f32.mrf.mxu2  ;;  %v4265_v45 = vadd.f32 %v4264_v10, %v4252_v12 }
 0x361   :  { %4445 = vmatmul.bf16.vlgmr.msrb.gmra.mxu3 %v8808_v19  ;;  %v4484_v19 = vrot.slane %v4483_v42, 1  ;;  %v4547_v7 = vadd.f32 %v4546_v18, %v4545_v38 }
 0x362   :  { %4786 = vmatpush.msra.mxu3 %v4701_v52  ;;  %v4253_v57 = vpop.f32.mrf.mxu0  ;;  %v4266_v48 = vpop.f32.mrf.mxu1  ;;  %v4278_v47 = vadd.f32 %v4277_v14, %v4265_v45 }
 0x363   :  { %v4485_v35 = vadd.f32 %v4484_v19, %v4483_v42  ;;  %v4548_v24 = vrot.slane %v4547_v7, 1  ;;  %v4240_v29 = vpop.f32.mrf.mxu3 }
 0x365   :  { %v4503_v5 = vmul.f32 0.125, %v4485_v35  ;;  %v4549_v37 = vadd.f32 %v4548_v24, %v4547_v7 }
 0x367   :  { %v4567_v11 = vmul.f32 0.125, %v4549_v37  ;;  %v4575_v32 = vmul.f32 %v4503_v5, %v4503_v5  ;;  %v4599_v36 = vsub.f32 %v4213_v20, %v4503_v5 }
 0x368   :  { %v4279_v22 = vpop.f32.mrf.mxu2 }
 0x369   :  { %v4583_v21 = vsub.f32 %v4567_v11, %v4575_v32 }
 0x36b   :  { %v4591_v39 = vmax.f32 %v4583_v21, 0.0  ;;  %v4290_v4 = vpop.f32.mrf.mxu3 }
 0x36c   :  { %v4291_v33 = vadd.f32 %v4290_v4, %v4278_v47 }
 0x36d   :  { %v4607_v50 = vadd.f32 1e-05, %v4591_v39  ;;  %v4303_v40 = vpop.f32.mrf.mxu0 }
 0x36e   :  { %v4304_v55 = vadd.f32 %v4303_v40, %v4291_v33 }
 0x36f   :  { %8093 = vrsqrt.f32 %v4607_v50  ;;  %vm4666_vm0 = vweird.f32 %v4607_v50  ;;  %v4316_v27 = vpop.f32.mrf.mxu1 }
 0x370   :  { %v4317_v26 = vadd.f32 %v4316_v27, %v4304_v55 }
 0x373   :  { %v4292_v54 = vpop.f32.mrf.mxu3 }
 0x375   :  { %v8094_v34 = vpop.eup %8093  ;;  %v4305_v46 = vpop.f32.mrf.mxu0 }
 0x376   :  { %v4661_v63 = vmul.f32 %v8094_v34, %v4607_v50  ;;  %vm4667_vm15 = vweird.f32 %v8094_v34 }
 0x377   :  { %vm4668_vm1 = vmor %vm4666_vm0, %vm4667_vm15  ;;  %v4329_v15 = vpop.f32.mrf.mxu2  ;;  %v4318_v52 = vpop.f32.mrf.mxu1 }
 0x378   :  { %v4662_v16 = vmul.f32 %v8094_v34, %v4661_v63  ;;  %v4330_v51 = vadd.f32 %v4329_v15, %v4317_v26 }
 0x37a   :  { %v4663_v25 = vmul.f32 0.5, %v4662_v16  ;;  %v4486_v2 = vrot.slane %v4330_v51, 4  ;;  %v4512_v13 = vmul.f32 %v4330_v51, %v4330_v51 }
 0x37b   :  { %v4342_v28 = vpop.f32.mrf.mxu3 }
 0x37c   :  { %v4664_v56 = vsub.f32 1.5, %v4663_v25  ;;  %v4487_v43 = vadd.f32 %v4486_v2, %v4330_v51  ;;  %v4550_v58 = vrot.slane %v4512_v13, 4 }
 0x37e   :  { %v4665_v53 = vmul.f32 %v8094_v34, %v4664_v56  ;;  %v4488_v61 = vrot.slane %v4487_v43, 2  ;;  %v4551_v59 = vadd.f32 %v4550_v58, %v4512_v13 }
 0x37f   :  { %v4331_v20 = vpop.f32.mrf.mxu2 }
 0x380   :  { %v4669_v60 = vsel %vm4668_vm1, %v8094_v34, %v4665_v53  ;;  %v4489_v31 = vadd.f32 %v4488_v61, %v4487_v43  ;;  %v4552_v62 = vrot.slane %v4551_v59, 2  ;;  %v4918_v20 = vld [vmem:[%s12422_s3 + $0x178] sm:$0xff] }
 0x381   :  { %v4695_v23 = vmul.f32 %v4669_v60, %v4599_v36  ;;  %v11991_v60 = vld [vmem:[%s12421_s2] sm:$0x3] }
 0x382   :  { %v4490_v0 = vrot.slane %v4489_v31, 1  ;;  %v4553_v1 = vadd.f32 %v4552_v62, %v4551_v59  ;;  %7499 = vmatmul.msk.f32.vlgmr.msra.gmra.mxu2 %vm4707_vm5, %v11991_v60  ;;  %7500 = vmatmul.msk.f32.vlgmr.msra.gmra.mxu3 %vm4707_vm5, %v11991_v60  ;;  %v4917_v62 = vld [vmem:[%s12422_s3 + $0x170] sm:$0xff] }
 0x383   :  { %v4703_v49 = vmax.f32 %v4695_v23, 0.0  ;;  %v4344_v17 = vpop.f32.mrf.mxu3  ;;  %7497 = vmatmul.msk.f32.vlgmr.msra.gmra.mxu0 %vm4707_vm5, %v11991_v60  ;;  %7498 = vmatmul.msk.f32.vlgmr.msra.gmra.mxu1 %vm4707_vm5, %v11991_v60 }
 0x384   :  { %v4491_v44 = vadd.f32 %v4490_v0, %v4489_v31  ;;  %v4554_v9 = vrot.slane %v4553_v1, 1  ;;  %v4886_v31 = vld [vmem:[%s12422_s3 + $0x78] sm:$0xff] }
 0x385   :  { %4826 = vmatpush.msrb.mxu1 %v4703_v49  ;;  %5003 = vmatpush.msra.mxu0 %v4886_v31  ;;  %v4950_v31 = vld [vmem:[%s12422_s3 + $0x278] sm:$0xff] }
 0x386   :  { %v4504_v6 = vmul.f32 0.125, %v4491_v44  ;;  %v4555_v38 = vadd.f32 %v4554_v9, %v4553_v1  ;;  %v4885_v1 = vld [vmem:[%s12422_s3 + $0x70] sm:$0xff]  ;;  %v4902_v44 = vld [vmem:[%s12422_s3 + $0xf8] sm:$0xff]  ;;  %v4916_v9 = vld [vmem:[%s12422_s3 + $0x168] sm:$0xff] }
 0x387   :  { %5023 = vmatpush.msra.mxu1 %v4902_v44  ;;  %5004 = vmatpush.msra.mxu0 %v4885_v1  ;;  %v4949_v1 = vld [vmem:[%s12422_s3 + $0x270] sm:$0xff]  ;;  %v4966_v44 = vld [vmem:[%s12422_s3 + $0x2f8] sm:$0xff] }
 0x388   :  { %v4568_v3 = vmul.f32 0.125, %v4555_v38  ;;  %v4576_v42 = vmul.f32 %v4504_v6, %v4504_v6  ;;  %v4600_v63 = vsub.f32 %v4330_v51, %v4504_v6  ;;  %v4884_v38 = vld [vmem:[%s12422_s3 + $0x68] sm:$0xff] }
 0x389   :  { %5005 = vmatpush.msra.mxu0 %v4884_v38  ;;  %v4965_v38 = vld [vmem:[%s12422_s3 + $0x2f0] sm:$0xff] }
 0x38a   :  { %v4584_v18 = vsub.f32 %v4568_v3, %v4576_v42  ;;  %v4901_v3 = vld [vmem:[%s12422_s3 + $0xf0] sm:$0xff]  ;;  %v4915_v42 = vld [vmem:[%s12422_s3 + $0x160] sm:$0xff] }
 0x38b   :  { %7501 = vmatmul.msk.f32.vlgmr.msrb.gmra.mxu0 %vm4707_vm5, %v11991_v60  ;;  %7502 = vmatmul.msk.f32.vlgmr.msrb.gmra.mxu1 %vm4707_vm5, %v11991_v60 }
 0x38c   :  { %v4592_v19 = vmax.f32 %v4584_v18, 0.0  ;;  %5024 = vmatpush.msra.mxu1 %v4901_v3  ;;  %v4931_v3 = vld [vmem:[%s12422_s3 + $0x1e0] sm:$0xff] }
 0x38e   :  { %v4608_v7 = vadd.f32 1e-05, %v4592_v19  ;;  %v4883_v19 = vld [vmem:[%s12422_s3 + $0x60] sm:$0xff] }
 0x38f   :  { %5006 = vmatpush.msra.mxu0 %v4883_v19  ;;  %v4964_v19 = vld [vmem:[%s12422_s3 + $0x2e8] sm:$0xff] }
 0x390   :  { %8095 = vrsqrt.f32 %v4608_v7  ;;  %vm4676_vm3 = vweird.f32 %v4608_v7 }
 0x396   :  { %v8096_v5 = vpop.eup %8095 }
 0x397   :  { %v4671_v11 = vmul.f32 %v8096_v5, %v4608_v7  ;;  %vm4677_vm2 = vweird.f32 %v8096_v5  ;;  %v4900_v7 = vld [vmem:[%s12422_s3 + $0xe8] sm:$0xff] }
 0x398   :  { %v4355_v35 = vpop.f32.mrf.mxu0  ;;  %vm4678_vm4 = vmor %vm4676_vm3, %vm4677_vm2  ;;  %5025 = vmatpush.msra.mxu1 %v4900_v7  ;;  %v4930_v7 = vld [vmem:[%s12422_s3 + $0x1d8] sm:$0xff] }
 0x399   :  { %v4672_v21 = vmul.f32 %v8096_v5, %v4671_v11  ;;  %v4356_v14 = vadd.f32 %v4355_v35, %v4342_v28  ;;  %v4914_v35 = vld [vmem:[%s12422_s3 + $0x158] sm:$0xff] }
 0x39a   :  { %v4368_v24 = vpop.f32.mrf.mxu1  ;;  %v4898_v11 = vld [vmem:[%s12422_s3 + $0xd8] sm:$0xff] }
 0x39b   :  { %v4673_v39 = vmul.f32 0.5, %v4672_v21  ;;  %v4369_v25 = vadd.f32 %v4368_v24, %v4356_v14  ;;  %v4880_v21 = vld [vmem:[%s12422_s3 + $0x48] sm:$0xff]  ;;  %v4878_v14 = vld [vmem:[%s12422_s3 + $0x38] sm:$0xff] }
 0x39d   :  { %v4674_v10 = vsub.f32 1.5, %v4673_v39  ;;  %v4897_v39 = vld [vmem:[%s12422_s3 + $0xd0] sm:$0xff] }
 0x39f   :  { %v4675_v34 = vmul.f32 %v8096_v5, %v4674_v10  ;;  %v4896_v10 = vld [vmem:[%s12422_s3 + $0xc8] sm:$0xff] }
 0x3a0   :  { %v4357_v37 = vpop.f32.mrf.mxu0 }
 0x3a1   :  { %v4679_v16 = vsel %vm4678_vm4, %v8096_v5, %v4675_v34  ;;  %v4913_v5 = vld [vmem:[%s12422_s3 + $0x150] sm:$0xff]  ;;  %v4910_v34 = vld [vmem:[%s12422_s3 + $0x138] sm:$0xff] }
 0x3a2   :  { %v4381_v8 = vpop.f32.mrf.mxu2  ;;  %v4370_v32 = vpop.f32.mrf.mxu1  ;;  %v4696_v4 = vmul.f32 %v4679_v16, %v4600_v63  ;;  %v4881_v37 = vld [vmem:[%s12422_s3 + $0x50] sm:$0xff]  ;;  %v4895_v16 = vld [vmem:[%s12422_s3 + $0xc0] sm:$0xff] }
 0x3a3   :  { %v4382_v56 = vadd.f32 %v4381_v8, %v4369_v25  ;;  %v4882_v8 = vld [vmem:[%s12422_s3 + $0x58] sm:$0xff]  ;;  %v4912_v32 = vld [vmem:[%s12422_s3 + $0x148] sm:$0xff]  ;;  %v4909_v25 = vld [vmem:[%s12422_s3 + $0x130] sm:$0xff] }
 0x3a4   :  { %v4394_v29 = vpop.f32.mrf.mxu3  ;;  %v4704_v57 = vmax.f32 %v4696_v4, 0.0  ;;  %5007 = vmatpush.msra.mxu0 %v4882_v8  ;;  %v4963_v8 = vld [vmem:[%s12422_s3 + $0x2e0] sm:$0xff] }
 0x3a5   :  { %v4395_v48 = vadd.f32 %v4394_v29, %v4382_v56  ;;  %v4899_v29 = vld [vmem:[%s12422_s3 + $0xe0] sm:$0xff]  ;;  %v4894_v56 = vld [vmem:[%s12422_s3 + $0xb8] sm:$0xff] }
 0x3a6   :  { %4846 = vmatpush.msrb.mxu2 %v4704_v57  ;;  %5026 = vmatpush.msra.mxu1 %v4899_v29  ;;  %v4877_v57 = vld [vmem:[%s12422_s3 + $0x30] sm:$0xff] }
 0x3a7   :  { %7503 = vmatmul.msk.f32.vlgmr.msrb.gmra.mxu2 %vm4707_vm5, %v11991_v60  ;;  %5008 = vmatpush.msra.mxu0 %v4881_v37  ;;  %v4929_v29 = vld [vmem:[%s12422_s3 + $0x1d0] sm:$0xff] }
 0x3a8   :  { %5043 = vmatpush.msra.mxu2 %v4918_v20  ;;  %5027 = vmatpush.msra.mxu1 %v4898_v11  ;;  %v4871_v20 = vld [vmem:[%s12422_s3] sm:$0xff]  ;;  %v4945_v37 = vld [vmem:[%s12422_s3 + $0x250] sm:$0xff]  ;;  %v4962_v11 = vld [vmem:[%s12422_s3 + $0x2d8] sm:$0xff] }
 0x3a9   :  { %5009 = vmatpush.msra.mxu0 %v4880_v21  ;;  %v4976_v21 = vld [vmem:[%s12422_s3 + $0x348] sm:$0xff] }
 0x3aa   :  { %v4383_v50 = vpop.f32.mrf.mxu2  ;;  %5044 = vmatpush.msra.mxu2 %v4917_v62  ;;  %5028 = vmatpush.msra.mxu1 %v4897_v39  ;;  %v4981_v62 = vld [vmem:[%s12422_s3 + $0x370] sm:$0xff]  ;;  %v4944_v39 = vld [vmem:[%s12422_s3 + $0x248] sm:$0xff] }
 0x3ab   :  { %v4911_v50 = vld [vmem:[%s12422_s3 + $0x140] sm:$0xff] }
 0x3ac   :  { %v4396_v41 = vpop.f32.mrf.mxu3  ;;  %5045 = vmatpush.msra.mxu2 %v4916_v9  ;;  %5029 = vmatpush.msra.mxu1 %v4896_v10  ;;  %v4980_v9 = vld [vmem:[%s12422_s3 + $0x368] sm:$0xff]  ;;  %v4975_v10 = vld [vmem:[%s12422_s3 + $0x340] sm:$0xff] }
 0x3ad   :  { %v4879_v41 = vld [vmem:[%s12422_s3 + $0x40] sm:$0xff] }
 0x3ae   :  { %5046 = vmatpush.msra.mxu2 %v4915_v42  ;;  %5010 = vmatpush.msra.mxu0 %v4879_v41  ;;  %v4979_v42 = vld [vmem:[%s12422_s3 + $0x360] sm:$0xff] }
 0x3af   :  { %5030 = vmatpush.msra.mxu1 %v4895_v16  ;;  %v4927_v41 = vld [vmem:[%s12422_s3 + $0x1c0] sm:$0xff]  ;;  %v4974_v16 = vld [vmem:[%s12422_s3 + $0x338] sm:$0xff] }
 0x3b0   :  { %5047 = vmatpush.msra.mxu2 %v4914_v35  ;;  %5011 = vmatpush.msra.mxu0 %v4878_v14  ;;  %v4978_v35 = vld [vmem:[%s12422_s3 + $0x358] sm:$0xff] }
 0x3b1   :  { %5031 = vmatpush.msra.mxu1 %v4894_v56  ;;  %v4926_v14 = vld [vmem:[%s12422_s3 + $0x1b8] sm:$0xff]  ;;  %v4973_v56 = vld [vmem:[%s12422_s3 + $0x330] sm:$0xff] }
 0x3b2   :  { %5048 = vmatpush.msra.mxu2 %v4913_v5  ;;  %5012 = vmatpush.msra.mxu0 %v4877_v57  ;;  %v4977_v5 = vld [vmem:[%s12422_s3 + $0x350] sm:$0xff] }
 0x3b3   :  { %v4925_v57 = vld [vmem:[%s12422_s3 + $0x1b0] sm:$0xff] }
 0x3b4   :  { %5049 = vmatpush.msra.mxu2 %v4912_v32  ;;  %v4928_v32 = vld [vmem:[%s12422_s3 + $0x1c8] sm:$0xff] }
 0x3b6   :  { %5050 = vmatpush.msra.mxu2 %v4911_v50  ;;  %v4961_v50 = vld [vmem:[%s12422_s3 + $0x2d0] sm:$0xff] }
 0x3b8   :  { %5051 = vmatpush.msra.mxu2 %v4910_v34  ;;  %v4943_v34 = vld [vmem:[%s12422_s3 + $0x240] sm:$0xff] }
 0x3ba   :  { %5052 = vmatpush.msra.mxu2 %v4909_v25  ;;  %v4959_v25 = vld [vmem:[%s12422_s3 + $0x2c0] sm:$0xff] }
 0x3d8   :  { %v4407_v53 = vpop.f32.mrf.mxu0 }
 0x3d9   :  { %v4408_v30 = vadd.f32 %v4407_v53, %v4395_v48  ;;  %v4908_v53 = vld [vmem:[%s12422_s3 + $0x128] sm:$0xff] }
 0x3da   :  { %v4420_v36 = vpop.f32.mrf.mxu1  ;;  %5053 = vmatpush.msra.mxu2 %v4908_v53  ;;  %v4958_v53 = vld [vmem:[%s12422_s3 + $0x2b8] sm:$0xff] }
 0x3db   :  { %v4421_v22 = vadd.f32 %v4420_v36, %v4408_v30  ;;  %v4876_v36 = vld [vmem:[%s12422_s3 + $0x28] sm:$0xff]  ;;  %v4893_v30 = vld [vmem:[%s12422_s3 + $0xb0] sm:$0xff] }
 0x3dc   :  { %5032 = vmatpush.msra.mxu1 %v4893_v30  ;;  %5013 = vmatpush.msra.mxu0 %v4876_v36  ;;  %v4924_v36 = vld [vmem:[%s12422_s3 + $0x1a8] sm:$0xff] }
 0x3dd   :  { %v4972_v30 = vld [vmem:[%s12422_s3 + $0x328] sm:$0xff] }
 0x3e0   :  { %v4409_v12 = vpop.f32.mrf.mxu0 }
 0x3e2   :  { %v4433_v23 = vpop.f32.mrf.mxu2  ;;  %v4422_v45 = vpop.f32.mrf.mxu1 }
 0x3e3   :  { %v4434_v54 = vadd.f32 %v4433_v23, %v4421_v22  ;;  %v4907_v23 = vld [vmem:[%s12422_s3 + $0x120] sm:$0xff]  ;;  %v4906_v45 = vld [vmem:[%s12422_s3 + $0x118] sm:$0xff] }
 0x3e4   :  { %v4446_v49 = vpop.f32.mrf.mxu3  ;;  %5054 = vmatpush.msra.mxu2 %v4907_v23  ;;  %v4922_v23 = vld [vmem:[%s12422_s3 + $0x198] sm:$0xff] }
 0x3e5   :  { %v12001_v47 = vadd.f32 %v4446_v49, %v4434_v54  ;;  %v4875_v54 = vld [vmem:[%s12422_s3 + $0x20] sm:$0xff]  ;;  %v4892_v49 = vld [vmem:[%s12422_s3 + $0xa8] sm:$0xff] }
 0x3e6   :  { %5033 = vmatpush.msra.mxu1 %v4892_v49  ;;  %5014 = vmatpush.msra.mxu0 %v4875_v54  ;;  %v4921_v54 = vld [vmem:[%s12422_s3 + $0x190] sm:$0xff]  ;;  %v4920_v49 = vld [vmem:[%s12422_s3 + $0x188] sm:$0xff] }
 0x3e7   :  { %v4492_v33 = vrot.slane %v12001_v47, 4  ;;  %v4513_v40 = vmul.f32 %v12001_v47, %v12001_v47  ;;  %5055 = vmatpush.msra.mxu2 %v4906_v45  ;;  %v4998_v45 = vld [vmem:[%s12422_s3 + $0x3f8] sm:$0xff] }
 0x3e9   :  { %v4493_v27 = vadd.f32 %v4492_v33, %v12001_v47  ;;  %v4556_v55 = vrot.slane %v4513_v40, 4  ;;  %v4874_v33 = vld [vmem:[%s12422_s3 + $0x18] sm:$0xff] }
 0x3ea   :  { %v4435_v26 = vpop.f32.mrf.mxu2  ;;  %5015 = vmatpush.msra.mxu0 %v4874_v33  ;;  %v4997_v33 = vld [vmem:[%s12422_s3 + $0x3f0] sm:$0xff] }
 0x3eb   :  { %v4494_v15 = vrot.slane %v4493_v27, 2  ;;  %v4557_v51 = vadd.f32 %v4556_v55, %v4513_v40  ;;  %v4891_v40 = vld [vmem:[%s12422_s3 + $0xa0] sm:$0xff]  ;;  %v4905_v55 = vld [vmem:[%s12422_s3 + $0x110] sm:$0xff] }
 0x3ec   :  { %v4448_v28 = vpop.f32.mrf.mxu3  ;;  %5034 = vmatpush.msra.mxu1 %v4891_v40  ;;  %5056 = vmatpush.msra.mxu2 %v4905_v55  ;;  %v4996_v40 = vld [vmem:[%s12422_s3 + $0x3e8] sm:$0xff]  ;;  %v4994_v55 = vld [vmem:[%s12422_s3 + $0x3d8] sm:$0xff] }
 0x3ed   :  { %v4495_v46 = vadd.f32 %v4494_v15, %v4493_v27  ;;  %v4558_v52 = vrot.slane %v4557_v51, 2  ;;  %v4873_v15 = vld [vmem:[%s12422_s3 + $0x10] sm:$0xff] }
 0x3ee   :  { %5016 = vmatpush.msra.mxu0 %v4873_v15  ;;  %v4992_v15 = vld [vmem:[%s12422_s3 + $0x3c8] sm:$0xff] }
 0x3ef   :  { %v4496_v2 = vrot.slane %v4495_v46, 1  ;;  %v4559_v13 = vadd.f32 %v4558_v52, %v4557_v51  ;;  %v4890_v51 = vld [vmem:[%s12422_s3 + $0x98] sm:$0xff] }
 0x3f0   :  { %5035 = vmatpush.msra.mxu1 %v4890_v51  ;;  %v4991_v51 = vld [vmem:[%s12422_s3 + $0x3c0] sm:$0xff] }
 0x3f1   :  { %v4497_v43 = vadd.f32 %v4496_v2, %v4495_v46  ;;  %v4560_v58 = vrot.slane %v4559_v13, 1  ;;  %v4904_v46 = vld [vmem:[%s12422_s3 + $0x108] sm:$0xff]  ;;  %v4889_v2 = vld [vmem:[%s12422_s3 + $0x90] sm:$0xff] }
 0x3f2   :  { %5036 = vmatpush.msra.mxu1 %v4889_v2  ;;  %5057 = vmatpush.msra.mxu2 %v4904_v46  ;;  %v4940_v46 = vld [vmem:[%s12422_s3 + $0x228] sm:$0xff]  ;;  %v4939_v2 = vld [vmem:[%s12422_s3 + $0x220] sm:$0xff] }
 0x3f3   :  { %v12013_v61 = vmul.f32 0.125, %v4497_v43  ;;  %v4561_v59 = vadd.f32 %v4560_v58, %v4559_v13  ;;  %v4903_v13 = vld [vmem:[%s12422_s3 + $0x100] sm:$0xff]  ;;  %v4982_v58 = vld [vmem:[%s12422_s3 + $0x378] sm:$0xff] }
 0x3f4   :  { %5058 = vmatpush.msra.mxu2 %v4903_v13  ;;  %v4956_v13 = vld [vmem:[%s12422_s3 + $0x2a8] sm:$0xff] }
 0x3f5   :  { %v4569_v17 = vmul.f32 0.125, %v4561_v59  ;;  %v4577_v0 = vmul.f32 %v12013_v61, %v12013_v61  ;;  %v4601_v26 = vsub.f32 %v12001_v47, %v12013_v61  ;;  %v4872_v47 = vld [vmem:[%s12422_s3 + $0x8] sm:$0xff]  ;;  %v4934_v59 = vld [vmem:[%s12422_s3 + $0x1f8] sm:$0xff] }
 0x3f6   :  { %5017 = vmatpush.msra.mxu0 %v4872_v47  ;;  %v4888_v61 = vld [vmem:[%s12422_s3 + $0x88] sm:$0xff]  ;;  %5123 = vmatpush.msrb.mxu2 %v4982_v58  ;;  %v4971_v47 = vld [vmem:[%s12422_s3 + $0x320] sm:$0xff]  ;;  %v4970_v58 = vld [vmem:[%s12422_s3 + $0x318] sm:$0xff] }
 0x3f7   :  { %v4585_v6 = vsub.f32 %v4569_v17, %v4577_v0  ;;  %5037 = vmatpush.msra.mxu1 %v4888_v61  ;;  %v4933_v17 = vld [vmem:[%s12422_s3 + $0x1f0] sm:$0xff]  ;;  %v4887_v0 = vld [vmem:[%s12422_s3 + $0x80] sm:$0xff]  ;;  %v4938_v61 = vld [vmem:[%s12422_s3 + $0x218] sm:$0xff] }
 0x3f8   :  { %5018 = vmatpush.msra.mxu0 %v4871_v20  ;;  %5124 = vmatpush.msrb.mxu2 %v4981_v62  ;;  %v4969_v20 = vld [vmem:[%s12422_s3 + $0x310] sm:$0xff] }
 0x3f9   :  { %v4593_v18 = vmax.f32 %v4585_v6, 0.0  ;;  %5038 = vmatpush.msra.mxu1 %v4887_v0  ;;  %v4948_v6 = vld [vmem:[%s12422_s3 + $0x268] sm:$0xff]  ;;  %v4937_v62 = vld [vmem:[%s12422_s3 + $0x210] sm:$0xff] }
 0x3fa   :  { %5083 = vmatpush.msrb.mxu0 %v4950_v31  ;;  %5125 = vmatpush.msrb.mxu2 %v4980_v9  ;;  %v4988_v31 = vld [vmem:[%s12422_s3 + $0x3a8] sm:$0xff]  ;;  %v4953_v9 = vld [vmem:[%s12422_s3 + $0x290] sm:$0xff] }
 0x3fb   :  { %v12053_v24 = vadd.f32 1e-05, %v4593_v18  ;;  %5103 = vmatpush.msrb.mxu1 %v4966_v44  ;;  %v4947_v18 = vld [vmem:[%s12422_s3 + $0x260] sm:$0xff]  ;;  %v4968_v0 = vld [vmem:[%s12422_s3 + $0x308] sm:$0xff]  ;;  %v4986_v44 = vld [vmem:[%s12422_s3 + $0x398] sm:$0xff] }
 0x3fc   :  { %5084 = vmatpush.msrb.mxu0 %v4949_v1  ;;  %5126 = vmatpush.msrb.mxu2 %v4979_v42  ;;  %v4987_v1 = vld [vmem:[%s12422_s3 + $0x3a0] sm:$0xff] }
 0x3fd   :  { %8097 = vrsqrt.f32 %v12053_v24  ;;  %vm4686_vm7 = vweird.f32 %v12053_v24  ;;  %5104 = vmatpush.msrb.mxu1 %v4965_v38  ;;  %v4985_v38 = vld [vmem:[%s12422_s3 + $0x390] sm:$0xff] }
 0x3fe   :  { %5085 = vmatpush.msrb.mxu0 %v4948_v6  ;;  %5127 = vmatpush.msrb.mxu2 %v4978_v35  ;;  %v4967_v6 = vld [vmem:[%s12422_s3 + $0x300] sm:$0xff] }
 0x3ff   :  { %5105 = vmatpush.msrb.mxu1 %v4964_v19 }
 0x400   :  { %5086 = vmatpush.msrb.mxu0 %v4947_v18  ;;  %5128 = vmatpush.msrb.mxu2 %v4977_v5  ;;  %v4728_v42 = vpop.f32.mrf.mxu0  ;;  %v4748_v18 = vpop.f32.mrf.mxu1  ;;  %v4983_v5 = vld [vmem:[%s12422_s3 + $0x380] sm:$0xff] }
 0x401   :  { %5106 = vmatpush.msrb.mxu1 %v4963_v8  ;;  %5019 = vmatmul.f32.vlgmr.msra.gmra.mxu0 %v4728_v42  ;;  %v4935_v8 = vld [vmem:[%s12422_s3 + $0x200] sm:$0xff] }
 0x402   :  { %5129 = vmatpush.msrb.mxu2 %v4976_v21  ;;  %5039 = vmatmul.f32.vlgmr.msra.gmra.mxu1 %v4748_v18  ;;  %v8082_v21 = vld [vmem:[%s12423_s4] ss:$0 sm:$0xff] }
 0x403   :  { %v8098_v63 = vpop.eup %8097  ;;  %5107 = vmatpush.msrb.mxu1 %v4962_v11  ;;  %v4951_v11 = vld [vmem:[%s12422_s3 + $0x280] sm:$0xff] }
 0x404   :  { %v4681_v4 = vmul.f32 %v8098_v63, %v12053_v24  ;;  %vm4687_vm6 = vweird.f32 %v8098_v63  ;;  %v4946_v24 = vld [vmem:[%s12422_s3 + $0x258] sm:$0xff]  ;;  %5130 = vmatpush.msrb.mxu2 %v4975_v10 }
 0x405   :  { %vm4688_vm8 = vmor %vm4686_vm7, %vm4687_vm6  ;;  %5087 = vmatpush.msrb.mxu0 %v4946_v24  ;;  %5108 = vmatpush.msrb.mxu1 %v4961_v50  ;;  %v4768_v19 = vpop.f32.mrf.mxu2 }
 0x406   :  { %v4682_v48 = vmul.f32 %v8098_v63, %v4681_v4  ;;  %v4942_v4 = vld [vmem:[%s12422_s3 + $0x238] sm:$0xff]  ;;  %5131 = vmatpush.msrb.mxu2 %v4974_v16 }
 0x407   :  { %5088 = vmatpush.msrb.mxu0 %v4945_v37  ;;  %5059 = vmatmul.f32.vlgmr.msra.gmra.mxu2 %v4768_v19 }
 0x408   :  { %v4683_v22 = vmul.f32 0.5, %v4682_v48  ;;  %v4941_v48 = vld [vmem:[%s12422_s3 + $0x230] sm:$0xff]  ;;  %5132 = vmatpush.msrb.mxu2 %v4973_v56  ;;  %v4808_v24 = vpop.f32.mrf.mxu0  ;;  %v4828_v37 = vpop.f32.mrf.mxu1 }
 0x409   :  { %5089 = vmatpush.msrb.mxu0 %v4944_v39 }
 0x40a   :  { %v4684_v12 = vsub.f32 1.5, %v4683_v22  ;;  %v4923_v22 = vld [vmem:[%s12422_s3 + $0x1a0] sm:$0xff]  ;;  %5133 = vmatpush.msrb.mxu2 %v4972_v30 }
 0x40b   :  { %5090 = vmatpush.msrb.mxu0 %v4943_v34 }
 0x40c   :  { %v4685_v27 = vmul.f32 %v8098_v63, %v4684_v12  ;;  %v4919_v12 = vld [vmem:[%s12422_s3 + $0x180] sm:$0xff]  ;;  %5134 = vmatpush.msrb.mxu2 %v4971_v47 }
 0x40d   :  { %5091 = vmatpush.msrb.mxu0 %v4942_v4 }
 0x40e   :  { %v4689_v28 = vsel %vm4688_vm8, %v8098_v63, %v4685_v27  ;;  %v4960_v63 = vld [vmem:[%s12422_s3 + $0x2c8] sm:$0xff]  ;;  %v4995_v27 = vld [vmem:[%s12422_s3 + $0x3e0] sm:$0xff]  ;;  %5135 = vmatpush.msrb.mxu2 %v4970_v58 }
 0x40f   :  { %v4697_v52 = vmul.f32 %v4689_v28, %v4601_v26  ;;  %5109 = vmatpush.msrb.mxu1 %v4960_v63  ;;  %5092 = vmatpush.msrb.mxu0 %v4941_v48  ;;  %v4993_v26 = vld [vmem:[%s12422_s3 + $0x3d0] sm:$0xff]  ;;  %v4990_v28 = vld [vmem:[%s12422_s3 + $0x3b8] sm:$0xff] }
 0x410   :  { %5136 = vmatpush.msrb.mxu2 %v4969_v20 }
 0x411   :  { %v4705_v43 = vmax.f32 %v4697_v52, 0.0  ;;  %5110 = vmatpush.msrb.mxu1 %v4959_v25  ;;  %v4957_v52 = vld [vmem:[%s12422_s3 + $0x2b0] sm:$0xff]  ;;  %5093 = vmatpush.msrb.mxu0 %v4940_v46 }
 0x412   :  { %5137 = vmatpush.msrb.mxu2 %v4968_v0 }
 0x413   :  { %4866 = vmatpush.msrb.mxu3 %v4705_v43  ;;  %5111 = vmatpush.msrb.mxu1 %v4958_v53  ;;  %v4989_v43 = vld [vmem:[%s12422_s3 + $0x3b0] sm:$0xff] }
 0x414   :  { %7504 = vmatmul.msk.f32.vlgmr.msrb.gmra.mxu3 %vm4707_vm5, %v11991_v60  ;;  %v4932_v60 = vld [vmem:[%s12422_s3 + $0x1e8] sm:$0xff]  ;;  %5094 = vmatpush.msrb.mxu0 %v4939_v2 }
 0x415   :  { %5063 = vmatpush.msra.mxu3 %v4934_v59  ;;  %5112 = vmatpush.msrb.mxu1 %v4957_v52  ;;  %v4955_v59 = vld [vmem:[%s12422_s3 + $0x2a0] sm:$0xff] }
 0x416   :  { %5095 = vmatpush.msrb.mxu0 %v4938_v61  ;;  %5138 = vmatpush.msrb.mxu2 %v4967_v6 }
 0x417   :  { %5064 = vmatpush.msra.mxu3 %v4933_v17  ;;  %5113 = vmatpush.msrb.mxu1 %v4956_v13  ;;  %v4954_v17 = vld [vmem:[%s12422_s3 + $0x298] sm:$0xff] }
 0x418   :  { %5096 = vmatpush.msrb.mxu0 %v4937_v62 }
 0x419   :  { %5065 = vmatpush.msra.mxu3 %v4932_v60  ;;  %5114 = vmatpush.msrb.mxu1 %v4955_v59  ;;  %v4936_v60 = vld [vmem:[%s12422_s3 + $0x208] sm:$0xff] }
 0x41a   :  { %5097 = vmatpush.msrb.mxu0 %v4936_v60 }
 0x41b   :  { %5066 = vmatpush.msra.mxu3 %v4931_v3  ;;  %5115 = vmatpush.msrb.mxu1 %v4954_v17  ;;  %v4984_v3 = vld [vmem:[%s12422_s3 + $0x388] sm:$0xff] }
 0x41c   :  { %5098 = vmatpush.msrb.mxu0 %v4935_v8 }
 0x41d   :  { %5067 = vmatpush.msra.mxu3 %v4930_v7  ;;  %5116 = vmatpush.msrb.mxu1 %v4953_v9  ;;  %v4788_v7 = vpop.f32.mrf.mxu3 }
 0x41e   :  { %5099 = vmatmul.f32.vlgmr.msrb.gmra.mxu0 %v4808_v24 }
 0x41f   :  { %5068 = vmatpush.msra.mxu3 %v4929_v29  ;;  %v4952_v29 = vld [vmem:[%s12422_s3 + $0x288] sm:$0xff]  ;;  %s8129_s3 = smov [#allocation2]  }
 0x420   :  { %5117 = vmatpush.msrb.mxu1 %v4952_v29  ;;  %s5182_s4 = sshll.u32 %s8129_s3, 4  ;;  %s5183_s4 = int_to_ptr.vmem [resolvable:$true] %s5182_s4 }
 0x421   :  { %5069 = vmatpush.msra.mxu3 %v4928_v32 }
 0x422   :  { %5118 = vmatpush.msrb.mxu1 %v4951_v11 }
 0x423   :  { %5070 = vmatpush.msra.mxu3 %v4927_v41  ;;  %5119 = vmatmul.f32.vlgmr.msrb.gmra.mxu1 %v4828_v37 }
 0x425   :  { %5071 = vmatpush.msra.mxu3 %v4926_v14 }
 0x427   :  { %5072 = vmatpush.msra.mxu3 %v4925_v57 }
 0x429   :  { %5073 = vmatpush.msra.mxu3 %v4924_v36 }
 0x42a   :  { %v4848_v35 = vpop.f32.mrf.mxu2 }
 0x42b   :  { %5074 = vmatpush.msra.mxu3 %v4923_v22  ;;  %5139 = vmatmul.f32.vlgmr.msrb.gmra.mxu2 %v4848_v35 }
 0x42d   :  { %5075 = vmatpush.msra.mxu3 %v4922_v23 }
 0x42f   :  { %5076 = vmatpush.msra.mxu3 %v4921_v54 }
 0x431   :  { %5077 = vmatpush.msra.mxu3 %v4920_v49 }
 0x433   :  { %5078 = vmatpush.msra.mxu3 %v4919_v12 }
 0x434   :  { %5079 = vmatmul.f32.vlgmr.msra.gmra.mxu3 %v4788_v7 }
 0x435   :  { %5143 = vmatpush.msrb.mxu3 %v4998_v45 }
 0x437   :  { %5144 = vmatpush.msrb.mxu3 %v4997_v33 }
 0x439   :  { %5145 = vmatpush.msrb.mxu3 %v4996_v40 }
 0x43b   :  { %5146 = vmatpush.msrb.mxu3 %v4995_v27 }
 0x43d   :  { %5147 = vmatpush.msrb.mxu3 %v4994_v55 }
 0x43f   :  { %5148 = vmatpush.msrb.mxu3 %v4993_v26 }
 0x441   :  { %5149 = vmatpush.msrb.mxu3 %v4992_v15 }
 0x443   :  { %5150 = vmatpush.msrb.mxu3 %v4991_v51 }
 0x445   :  { %5151 = vmatpush.msrb.mxu3 %v4990_v28 }
 0x447   :  { %5152 = vmatpush.msrb.mxu3 %v4989_v43 }
 0x449   :  { %5153 = vmatpush.msrb.mxu3 %v4988_v31 }
 0x44b   :  { %5154 = vmatpush.msrb.mxu3 %v4987_v1 }
 0x44d   :  { %5155 = vmatpush.msrb.mxu3 %v4986_v44 }
 0x44f   :  { %5156 = vmatpush.msrb.mxu3 %v4985_v38 }
 0x451   :  { %5157 = vmatpush.msrb.mxu3 %v4984_v3 }
 0x453   :  { %5158 = vmatpush.msrb.mxu3 %v4983_v5 }
 0x47e   :  { %v5020_v39 = vpop.f32.mrf.mxu0 }
 0x47f   :  { %v5021_v50 = vadd.f32 %v8082_v21, %v5020_v39  ;;  %v5040_v41 = vpop.f32.mrf.mxu1 }
 0x481   :  { %v5041_v10 = vadd.f32 %v5040_v41, %v5021_v50 }
 0x48a   :  { %v5060_v34 = vpop.f32.mrf.mxu2 }
 0x48b   :  { %v5061_v63 = vadd.f32 %v5060_v34, %v5041_v10 }
 0x497   :  { %v4868_v32 = vpop.f32.mrf.mxu3 }
 0x498   :  { %5159 = vmatmul.f32.vlgmr.msrb.gmra.mxu3 %v4868_v32 }
 0x49b   :  { %v5100_v4 = vpop.f32.mrf.mxu0 }
 0x4a0   :  { %v5120_v57 = vpop.f32.mrf.mxu1 }
 0x4ae   :  { %v5140_v48 = vpop.f32.mrf.mxu2 }
 0x4b7   :  { %v5080_v14 = vpop.f32.mrf.mxu3 }
 0x4b8   :  { %v5081_v16 = vadd.f32 %v5080_v14, %v5061_v63 }
 0x4ba   :  { %v5101_v25 = vadd.f32 %v5100_v4, %v5081_v16 }
 0x4bc   :  { %v5121_v56 = vadd.f32 %v5120_v57, %v5101_v25 }
 0x4be   :  { %v5141_v53 = vadd.f32 %v5140_v48, %v5121_v56 }
 0x51b   :  { %v5160_v36 = vpop.f32.mrf.mxu3 }
 0x51c   :  { %v5161_v30 = vadd.f32 %v5160_v36, %v5141_v53 }
 0x51e   :  { %v5164_v22 = vsel %vm5163_vm9, %v5161_v30, -inf }
 0x51f   :  { %5165 = vmax.xlane.f32.xlu0 %v5164_v22 }
 0x592   :  { %v5166_v23 = vpop.xlane.xlu0 %5165 }
 0x593   :  { %v5167_v54 = vsub.f32 %v5161_v30, %v5166_v23 }
 0x595   :  { %v5168_v49 = vmul.f32 1.442695, %v5167_v54 }
 0x597   :  { %8099 = vpow2.f32 %v5168_v49 }
 0x59d   :  { %v8100_v12 = vpop.eup %8099 }
 0x59e   :  { %v5170_v45 = vsel %vm5163_vm9, %v8100_v12, 0.0 }
 0x59f   :  { %5171 = vadd.xlane.f32.xlu0 %v5170_v45 }
 0x612   :  { %v5172_v33 = vpop.xlane.xlu0 %5171 }
 0x613   :  { %8101 = vlog2.f32 %v5172_v33 }
 0x619   :  { %v8102_v40 = vpop.eup %8101 }
 0x61a   :  { %v5174_v27 = vmul.f32 0.6931472, %v8102_v40 }
 0x61c   :  { %v5175_v55 = vsub.f32 %v5167_v54, %v5174_v27 }
 0x61e   :  { %5176 = vst.msk [vmem:[#allocation2] sm:$0x3] %vm5163_vm9, %v5175_v55 }
 0x61f   :  { %5187 = dma.vmem_to_hbm [thread:$0]  %s5183_s4, 32, %s5185_s15, [#allocation3]  }
 0x620   :  { %8127 = dma.done.wait [#allocation3], 32  }
 0x621   :  { %8128 = vsyncadd [#allocation3], 4294967264 }
 0x622   :  { %5192 = vsyncpa [#allocation3], 1 }

</bundles_post_ra>
